<compile_context>
chip_gen: v7x
topology: tpu7x:2x2x1
jax: 0.10.0
libtpu: 0.0.40
codegen_flags: <defaults>
</compile_context>

<pallas_src>
import functools

import jax
import jax.numpy as jnp
from jax.experimental import pallas as pl
from jax.experimental.pallas import tpu as pltpu


# Polyphase tables for nearest-2x upsample followed by a 3x3 / pad-1 conv.
# For output phase value a (row phase) or b (col phase) and group index k:
#   _PHASE_SHIFT[a][k] : shift of the ORIGINAL (pre-upsample) feature used
#   _PHASE_TAPS[a][k]  : which 3x3-kernel rows/cols are folded onto that shift
_PHASE_SHIFT = ((-1, 0), (0, 1))
_PHASE_TAPS = ((slice(0, 1), slice(1, 3)), (slice(0, 2), slice(2, 3)))


def _inst_norm_relu(x, gamma, beta, inv_hw):
    # Fused single-pass InstanceNorm2d(affine=True, eps=1e-5, biased variance)
    # + ReLU over one flattened (1, H*W) plane.
    s = jnp.sum(x, axis=1, keepdims=True)
    s2 = jnp.sum(x * x, axis=1, keepdims=True)
    mu = s * inv_hw
    var = jnp.maximum(s2 * inv_hw - mu * mu, 0.0)
    scale = gamma * jax.lax.rsqrt(var + 1e-5)
    return jnp.maximum(x * scale + (beta - mu * scale), 0.0)


def _decoding_block_kernel(low_ref, high_ref, cmask_ref,
                           w1_ref, g1_ref, b1_ref,
                           wc_ref, bu_ref,
                           w3_ref, g3_ref, b3_ref,
                           o_ref, *, W):
    # low_ref  : (1, c_low,  HW)   VMEM, phase-major permuted + flattened
    # high_ref : (1, c_high, H*W)  VMEM, row-major flattened (original res)
    # cmask_ref: (2, H*W)          VMEM column-boundary masks for +-1 shifts
    # w*/g*/b* : flat f32 parameters in SMEM (scalar reads)
    # o_ref    : (1, c_out,  HW)   VMEM, phase-major permuted + flattened
    _, c_low, HW = low_ref.shape
    _, c_high, HW4 = high_ref.shape
    _, c_out, _ = o_ref.shape
    inv_hw = 1.0 / float(HW)
    f32 = jnp.float32

    # ---------------- F1: 1x1 conv (no bias) + InstanceNorm + ReLU ----------
    low = low_ref[0]                                     # (c_low, HW)
    f1_planes = []
    for co in range(c_high):
        acc = jnp.zeros((1, HW), f32)
        for ci in range(c_low):
            acc = acc + w1_ref[co * c_low + ci] * low[ci:ci + 1, :]
        f1_planes.append(_inst_norm_relu(acc, g1_ref[co], b1_ref[co], inv_hw))

    # -------- Upsample branch: exact polyphase nearest-2x + 3x3 conv --------
    m_first = cmask_ref[0:1, :]                          # 0 where col == 0
    m_last = cmask_ref[1:2, :]                           # 0 where col == W-1
    zrow = jnp.zeros((1, W), f32)
    zone = jnp.zeros((1, 1), f32)

    def shift_plane(xf, sy, sx):
        # value at flat (i, j) = x[i+sy, j+sx], zero outside the plane.
        if sy == -1:
            xf = jnp.concatenate([zrow, xf[:, :HW4 - W]], axis=1)
        elif sy == 1:
            xf = jnp.concatenate([xf[:, W:], zrow], axis=1)
        if sx == -1:
            xf = jnp.concatenate([zone, xf[:, :HW4 - 1]], axis=1) * m_first
        elif sx == 1:
            xf = jnp.concatenate([xf[:, 1:], zone], axis=1) * m_last
        return xf

    high = high_ref[0]                                   # (c_high, H*W)
    shifted = []                                         # [ci][(sy, sx)]
    for ci in range(c_high):
        xf = high[ci:ci + 1, :]                          # (1, H*W)
        d = {}
        for sy in (-1, 0, 1):
            for sx in (-1, 0, 1):
                d[(sy, sx)] = shift_plane(xf, sy, sx)
        shifted.append(d)

    up_planes = []
    for co in range(c_high):
        phase_chunks = []
        for a in range(2):
            for b in range(2):
                acc = jnp.zeros((1, HW4), f32)
                for ky in range(2):
                    sy = _PHASE_SHIFT[a][ky]
                    for kx in range(2):
                        sx = _PHASE_SHIFT[b][kx]
                        base = ((((a * 2 + b) * 2 + ky) * 2 + kx)
                                * c_high * c_high)
                        for ci in range(c_high):
                            w = wc_ref[base + co * c_high + ci]
                            acc = acc + w * shifted[ci][(sy, sx)]
                phase_chunks.append(acc)
        plane = jnp.concatenate(phase_chunks, axis=1)    # (1, HW) phase-major
        up_planes.append(jnp.maximum(plane + bu_ref[co], 0.0))
    # TODO(synk): nn.Dropout(p=0.5) layers are identity in eval mode; training-
    # mode stochastic dropout is intentionally not modeled.

    # --------------- channel concat (free: planes stay resident) ------------
    cat_planes = f1_planes + up_planes                   # 2*c_high (1, HW)

    # ---------------- F3: 1x1 conv (no bias) + InstanceNorm + ReLU ----------
    out_rows = []
    for co in range(c_out):
        acc = jnp.zeros((1, HW), f32)
        for ci in range(2 * c_high):
            acc = acc + w3_ref[co * (2 * c_high) + ci] * cat_planes[ci]
        out_rows.append(_inst_norm_relu(acc, g3_ref[co], b3_ref[co], inv_hw))

    # Single lane-dense full-block store: (c_out, HW) with HW a multiple of 128.
    o_ref[0] = jnp.concatenate(out_rows, axis=0).astype(o_ref.dtype)


def decoding_block_forward(low_feature, high_feature, params, *, interpret=False):
    """DecodingBlock.forward (eval mode).

    low_feature : (N, c_low,  2H, 2W) f32 NCHW
    high_feature: (N, c_high,  H,  W) f32 NCHW
    returns     : (N, c_out,  2H, 2W) f32 NCHW
    Note: self.F2 (ConvTranspose2d) is never used in DecodingBlock.forward.
    """
    N, c_low, Ho, Wo = low_feature.shape
    Nh, c_high, H, W = high_feature.shape
    assert N == Nh and Ho == 2 * H and Wo == 2 * W
    c_out = params["f3_w"].shape[0]
    HW4 = H * W
    HW = Ho * Wo

    # Phase-major (a, b, i, j) spatial permutation: keeps the in-kernel
    # upsample branch at (H, W) resolution while all F1/F3/InstanceNorm work
    # and the output store are lane-dense (>=128-wide).  Pure layout plumbing.
    low_perm = low_feature.reshape(N, c_low, H, 2, W, 2)
    low_perm = low_perm.transpose(0, 1, 3, 5, 2, 4).reshape(N, c_low, HW)
    high_flat = high_feature.reshape(N, c_high, HW4)

    # Fold the 3x3 taps into per-phase 2x2 shift groups (exact weight sums).
    up_w = params["up_w"].astype(jnp.float32)            # (c_high, c_high, 3, 3)
    blocks = []
    for a in range(2):
        for b in range(2):
            for ky in range(2):
                for kx in range(2):
                    sub = up_w[:, :, _PHASE_TAPS[a][ky], _PHASE_TAPS[b][kx]]
                    blocks.append(jnp.sum(sub, axis=(2, 3)))  # (c_high, c_high)
    wc_flat = jnp.stack(blocks, axis=0).reshape(-1)

    # Column-boundary masks for the +-1 lane shifts on flattened (H*W) planes.
    col = jnp.arange(HW4, dtype=jnp.int32) % W
    cmask = jnp.stack([(col != 0), (col != W - 1)]).astype(jnp.float32)

    w1_flat = params["f1_w"].reshape(-1).astype(jnp.float32)   # (c_high*c_low,)
    w3_flat = params["f3_w"].reshape(-1).astype(jnp.float32)   # (c_out*2*c_high,)

    smem = pl.BlockSpec(memory_space=pltpu.MemorySpace.SMEM)

    out_perm = pl.pallas_call(
        functools.partial(_decoding_block_kernel, W=W),
        out_shape=jax.ShapeDtypeStruct((N, c_out, HW), low_feature.dtype),
        grid_spec=pltpu.PrefetchScalarGridSpec(
            num_scalar_prefetch=0,
            grid=(N,),
            in_specs=[
                pl.BlockSpec((1, c_low, HW), lambda n: (n, 0, 0)),
                pl.BlockSpec((1, c_high, HW4), lambda n: (n, 0, 0)),
                pl.BlockSpec((2, HW4), lambda n: (0, 0)),
                smem, smem, smem,      # w1, gamma1, beta1
                smem, smem,            # folded 3x3 weights, up bias
                smem, smem, smem,      # w3, gamma3, beta3
            ],
            out_specs=pl.BlockSpec((1, c_out, HW), lambda n: (n, 0, 0)),
        ),
        compiler_params=pltpu.CompilerParams(
            dimension_semantics=("parallel",),
            vmem_limit_bytes=32 * 1024 * 1024,
        ),
        interpret=interpret,
    )(low_perm, high_flat, cmask,
      w1_flat, params["f1_gamma"].astype(jnp.float32),
      params["f1_beta"].astype(jnp.float32),
      wc_flat, params["up_b"].astype(jnp.float32),
      w3_flat, params["f3_gamma"].astype(jnp.float32),
      params["f3_beta"].astype(jnp.float32))

    # Un-permute (a, b, i, j) -> (2i+a, 2j+b) and restore NCHW.
    out = out_perm.reshape(N, c_out, 2, 2, H, W)
    return out.transpose(0, 1, 4, 2, 5, 3).reshape(N, c_out, Ho, Wo)


# ----------------------------- pure-JAX reference -----------------------------
def _instance_norm_nchw(x, gamma, beta, eps=1e-5):
    mu = jnp.mean(x, axis=(2, 3), keepdims=True)
    var = jnp.mean((x - mu) ** 2, axis=(2, 3), keepdims=True)
    return ((x - mu) * jax.lax.rsqrt(var + eps)
            * gamma.reshape(1, -1, 1, 1) + beta.reshape(1, -1, 1, 1))


def _reference_forward(low, high, p):
    hi = jax.lax.Precision.HIGHEST
    dn = ("NCHW", "OIHW", "NCHW")
    f1 = jax.lax.conv_general_dilated(low, p["f1_w"], (1, 1), "VALID",
                                      dimension_numbers=dn, precision=hi)
    f1 = jnp.maximum(_instance_norm_nchw(f1, p["f1_gamma"], p["f1_beta"]), 0.0)
    up_in = jnp.repeat(jnp.repeat(high, 2, axis=2), 2, axis=3)
    up = jax.lax.conv_general_dilated(up_in, p["up_w"], (1, 1), ((1, 1), (1, 1)),
                                      dimension_numbers=dn, precision=hi)
    up = jnp.maximum(up + p["up_b"].reshape(1, -1, 1, 1), 0.0)
    cat = jnp.concatenate([f1, up], axis=1)
    f3 = jax.lax.conv_general_dilated(cat, p["f3_w"], (1, 1), "VALID",
                                      dimension_numbers=dn, precision=hi)
    return jnp.maximum(_instance_norm_nchw(f3, p["f3_gamma"], p["f3_beta"]), 0.0)


if __name__ == "__main__":
    key = jax.random.PRNGKey(0)
    ks = jax.random.split(key, 10)

    N, c_low, c_high, c_out = 2, 4, 4, 8
    H = W = 8
    Ho, Wo = 2 * H, 2 * W

    low = jax.random.normal(ks[0], (N, c_low, Ho, Wo), dtype=jnp.float32)
    high = jax.random.normal(ks[1], (N, c_high, H, W), dtype=jnp.float32)

    params = dict(
        f1_w=0.3 * jax.random.normal(ks[2], (c_high, c_low, 1, 1), jnp.float32),
        f1_gamma=1.0 + 0.1 * jax.random.normal(ks[3], (c_high,), jnp.float32),
        f1_beta=0.1 * jax.random.normal(ks[4], (c_high,), jnp.float32),
        up_w=0.2 * jax.random.normal(ks[5], (c_high, c_high, 3, 3), jnp.float32),
        up_b=0.1 * jax.random.normal(ks[6], (c_high,), jnp.float32),
        f3_w=0.2 * jax.random.normal(ks[7], (c_out, 2 * c_high, 1, 1), jnp.float32),
        f3_gamma=1.0 + 0.1 * jax.random.normal(ks[8], (c_out,), jnp.float32),
        f3_beta=0.1 * jax.random.normal(ks[9], (c_out,), jnp.float32),
    )

    out = jax.block_until_ready(decoding_block_forward(low, high, params))
    assert out.shape == (N, c_out, Ho, Wo), out.shape

    ref = jax.block_until_ready(_reference_forward(low, high, params))
    max_err = float(jnp.max(jnp.abs(out - ref)))
    # Upsample branch is exact (polyphase, no MXU rounding); remaining
    # differences are f32 summation-order noise, so the tolerance is tight.
    assert jnp.allclose(out, ref, atol=1e-5, rtol=1e-5), \
        f"mismatch, max|diff|={max_err}"

    print("KERNEL_OK")
</pallas_src>

<mosaic_0001>
module attributes {stable_mosaic.version = 11 : i64} {
  func.func @_decoding_block_kernel(%arg0: i32, %arg1: memref<1x4x256xf32, #tpu.memory_space<vmem>>, %arg2: memref<1x4x64xf32, #tpu.memory_space<vmem>>, %arg3: memref<2x64xf32, #tpu.memory_space<vmem>>, %arg4: memref<16xf32, #tpu.memory_space<smem>>, %arg5: memref<4xf32, #tpu.memory_space<smem>>, %arg6: memref<4xf32, #tpu.memory_space<smem>>, %arg7: memref<256xf32, #tpu.memory_space<smem>>, %arg8: memref<4xf32, #tpu.memory_space<smem>>, %arg9: memref<64xf32, #tpu.memory_space<smem>>, %arg10: memref<8xf32, #tpu.memory_space<smem>>, %arg11: memref<8xf32, #tpu.memory_space<smem>>, %arg12: memref<1x8x256xf32, #tpu.memory_space<vmem>>) attributes {dimension_semantics = [#tpu.dimension_semantics<parallel>], iteration_bounds = array<i64: 2>, scalar_prefetch = 0 : i64, scratch_operands = 0 : i64, tpu.core_type = #tpu.core_type<tc>, window_params = [{transform_indices = @transform_0, window_bounds = array<i64: 1, 4, 256>}, {transform_indices = @transform_1, window_bounds = array<i64: 1, 4, 64>}, {pipeline_mode = #tpu.pipeline_mode<synchronous>, transform_indices = @transform_2, window_bounds = array<i64: 2, 64>}, {transform_indices = @transform_3, window_bounds = array<i64: 16>}, {transform_indices = @transform_4, window_bounds = array<i64: 4>}, {transform_indices = @transform_5, window_bounds = array<i64: 4>}, {transform_indices = @transform_6, window_bounds = array<i64: 256>}, {transform_indices = @transform_7, window_bounds = array<i64: 4>}, {transform_indices = @transform_8, window_bounds = array<i64: 64>}, {transform_indices = @transform_9, window_bounds = array<i64: 8>}, {transform_indices = @transform_10, window_bounds = array<i64: 8>}, {transform_indices = @transform_11, window_bounds = array<i64: 1, 8, 256>}]} {
    %c0 = arith.constant 0 : index
    %c0_0 = arith.constant 0 : index
    %c0_1 = arith.constant 0 : index
    %0 = vector.load %arg1[%c0, %c0_0, %c0_1] : memref<1x4x256xf32, #tpu.memory_space<vmem>>, vector<1x4x256xf32>
    %1 = vector.shape_cast %0 : vector<1x4x256xf32> to vector<4x256xf32>
    %cst = arith.constant 0.000000e+00 : f32
    %2 = vector.broadcast %cst : f32 to vector<1x256xf32>
    %c0_2 = arith.constant 0 : index
    %3 = memref.load %arg4[%c0_2] : memref<16xf32, #tpu.memory_space<smem>>
    %4 = vector.extract_strided_slice %1 {offsets = [0, 0], sizes = [1, 256], strides = [1, 1]} : vector<4x256xf32> to vector<1x256xf32>
    %5 = vector.broadcast %3 : f32 to vector<1x256xf32>
    %6 = arith.mulf %5, %4 : vector<1x256xf32>
    %7 = arith.addf %2, %6 : vector<1x256xf32>
    %c1 = arith.constant 1 : index
    %8 = memref.load %arg4[%c1] : memref<16xf32, #tpu.memory_space<smem>>
    %9 = vector.extract_strided_slice %1 {offsets = [1, 0], sizes = [1, 256], strides = [1, 1]} : vector<4x256xf32> to vector<1x256xf32>
    %10 = vector.broadcast %8 : f32 to vector<1x256xf32>
    %11 = arith.mulf %10, %9 : vector<1x256xf32>
    %12 = arith.addf %7, %11 : vector<1x256xf32>
    %c2 = arith.constant 2 : index
    %13 = memref.load %arg4[%c2] : memref<16xf32, #tpu.memory_space<smem>>
    %14 = vector.extract_strided_slice %1 {offsets = [2, 0], sizes = [1, 256], strides = [1, 1]} : vector<4x256xf32> to vector<1x256xf32>
    %15 = vector.broadcast %13 : f32 to vector<1x256xf32>
    %16 = arith.mulf %15, %14 : vector<1x256xf32>
    %17 = arith.addf %12, %16 : vector<1x256xf32>
    %c3 = arith.constant 3 : index
    %18 = memref.load %arg4[%c3] : memref<16xf32, #tpu.memory_space<smem>>
    %19 = vector.extract_strided_slice %1 {offsets = [3, 0], sizes = [1, 256], strides = [1, 1]} : vector<4x256xf32> to vector<1x256xf32>
    %20 = vector.broadcast %18 : f32 to vector<1x256xf32>
    %21 = arith.mulf %20, %19 : vector<1x256xf32>
    %22 = arith.addf %17, %21 : vector<1x256xf32>
    %c0_3 = arith.constant 0 : index
    %23 = memref.load %arg5[%c0_3] : memref<4xf32, #tpu.memory_space<smem>>
    %c0_4 = arith.constant 0 : index
    %24 = memref.load %arg6[%c0_4] : memref<4xf32, #tpu.memory_space<smem>>
    %cst_5 = arith.constant dense<0.000000e+00> : vector<1xf32>
    %25 = vector.multi_reduction <add>, %22, %cst_5 [1] : vector<1x256xf32> to vector<1xf32>
    %26 = vector.shape_cast %25 : vector<1xf32> to vector<1x1xf32>
    %27 = arith.mulf %22, %22 : vector<1x256xf32>
    %cst_6 = arith.constant dense<0.000000e+00> : vector<1xf32>
    %28 = vector.multi_reduction <add>, %27, %cst_6 [1] : vector<1x256xf32> to vector<1xf32>
    %29 = vector.shape_cast %28 : vector<1xf32> to vector<1x1xf32>
    %cst_7 = arith.constant 3.906250e-03 : f32
    %30 = vector.broadcast %cst_7 : f32 to vector<1x1xf32>
    %31 = arith.mulf %26, %30 : vector<1x1xf32>
    %cst_8 = arith.constant 3.906250e-03 : f32
    %32 = vector.broadcast %cst_8 : f32 to vector<1x1xf32>
    %33 = arith.mulf %29, %32 : vector<1x1xf32>
    %34 = arith.mulf %31, %31 : vector<1x1xf32>
    %35 = arith.subf %33, %34 : vector<1x1xf32>
    %cst_9 = arith.constant 0.000000e+00 : f32
    %36 = vector.broadcast %cst_9 : f32 to vector<1x1xf32>
    %37 = arith.maximumf %35, %36 : vector<1x1xf32>
    %cst_10 = arith.constant 9.99999974E-6 : f32
    %38 = vector.broadcast %cst_10 : f32 to vector<1x1xf32>
    %39 = arith.addf %37, %38 : vector<1x1xf32>
    %40 = math.rsqrt %39 : vector<1x1xf32>
    %41 = vector.broadcast %23 : f32 to vector<1x1xf32>
    %42 = arith.mulf %41, %40 : vector<1x1xf32>
    %43 = vector.broadcast %42 : vector<1x1xf32> to vector<1x256xf32>
    %44 = arith.mulf %22, %43 : vector<1x256xf32>
    %45 = arith.mulf %31, %42 : vector<1x1xf32>
    %46 = vector.broadcast %24 : f32 to vector<1x1xf32>
    %47 = arith.subf %46, %45 : vector<1x1xf32>
    %48 = vector.broadcast %47 : vector<1x1xf32> to vector<1x256xf32>
    %49 = arith.addf %44, %48 : vector<1x256xf32>
    %cst_11 = arith.constant 0.000000e+00 : f32
    %50 = vector.broadcast %cst_11 : f32 to vector<1x256xf32>
    %51 = arith.maximumf %49, %50 : vector<1x256xf32>
    %cst_12 = arith.constant 0.000000e+00 : f32
    %52 = vector.broadcast %cst_12 : f32 to vector<1x256xf32>
    %c4 = arith.constant 4 : index
    %53 = memref.load %arg4[%c4] : memref<16xf32, #tpu.memory_space<smem>>
    %54 = vector.extract_strided_slice %1 {offsets = [0, 0], sizes = [1, 256], strides = [1, 1]} : vector<4x256xf32> to vector<1x256xf32>
    %55 = vector.broadcast %53 : f32 to vector<1x256xf32>
    %56 = arith.mulf %55, %54 : vector<1x256xf32>
    %57 = arith.addf %52, %56 : vector<1x256xf32>
    %c5 = arith.constant 5 : index
    %58 = memref.load %arg4[%c5] : memref<16xf32, #tpu.memory_space<smem>>
    %59 = vector.extract_strided_slice %1 {offsets = [1, 0], sizes = [1, 256], strides = [1, 1]} : vector<4x256xf32> to vector<1x256xf32>
    %60 = vector.broadcast %58 : f32 to vector<1x256xf32>
    %61 = arith.mulf %60, %59 : vector<1x256xf32>
    %62 = arith.addf %57, %61 : vector<1x256xf32>
    %c6 = arith.constant 6 : index
    %63 = memref.load %arg4[%c6] : memref<16xf32, #tpu.memory_space<smem>>
    %64 = vector.extract_strided_slice %1 {offsets = [2, 0], sizes = [1, 256], strides = [1, 1]} : vector<4x256xf32> to vector<1x256xf32>
    %65 = vector.broadcast %63 : f32 to vector<1x256xf32>
    %66 = arith.mulf %65, %64 : vector<1x256xf32>
    %67 = arith.addf %62, %66 : vector<1x256xf32>
    %c7 = arith.constant 7 : index
    %68 = memref.load %arg4[%c7] : memref<16xf32, #tpu.memory_space<smem>>
    %69 = vector.extract_strided_slice %1 {offsets = [3, 0], sizes = [1, 256], strides = [1, 1]} : vector<4x256xf32> to vector<1x256xf32>
    %70 = vector.broadcast %68 : f32 to vector<1x256xf32>
    %71 = arith.mulf %70, %69 : vector<1x256xf32>
    %72 = arith.addf %67, %71 : vector<1x256xf32>
    %c1_13 = arith.constant 1 : index
    %73 = memref.load %arg5[%c1_13] : memref<4xf32, #tpu.memory_space<smem>>
    %c1_14 = arith.constant 1 : index
    %74 = memref.load %arg6[%c1_14] : memref<4xf32, #tpu.memory_space<smem>>
    %cst_15 = arith.constant dense<0.000000e+00> : vector<1xf32>
    %75 = vector.multi_reduction <add>, %72, %cst_15 [1] : vector<1x256xf32> to vector<1xf32>
    %76 = vector.shape_cast %75 : vector<1xf32> to vector<1x1xf32>
    %77 = arith.mulf %72, %72 : vector<1x256xf32>
    %cst_16 = arith.constant dense<0.000000e+00> : vector<1xf32>
    %78 = vector.multi_reduction <add>, %77, %cst_16 [1] : vector<1x256xf32> to vector<1xf32>
    %79 = vector.shape_cast %78 : vector<1xf32> to vector<1x1xf32>
    %cst_17 = arith.constant 3.906250e-03 : f32
    %80 = vector.broadcast %cst_17 : f32 to vector<1x1xf32>
    %81 = arith.mulf %76, %80 : vector<1x1xf32>
    %cst_18 = arith.constant 3.906250e-03 : f32
    %82 = vector.broadcast %cst_18 : f32 to vector<1x1xf32>
    %83 = arith.mulf %79, %82 : vector<1x1xf32>
    %84 = arith.mulf %81, %81 : vector<1x1xf32>
    %85 = arith.subf %83, %84 : vector<1x1xf32>
    %cst_19 = arith.constant 0.000000e+00 : f32
    %86 = vector.broadcast %cst_19 : f32 to vector<1x1xf32>
    %87 = arith.maximumf %85, %86 : vector<1x1xf32>
    %cst_20 = arith.constant 9.99999974E-6 : f32
    %88 = vector.broadcast %cst_20 : f32 to vector<1x1xf32>
    %89 = arith.addf %87, %88 : vector<1x1xf32>
    %90 = math.rsqrt %89 : vector<1x1xf32>
    %91 = vector.broadcast %73 : f32 to vector<1x1xf32>
    %92 = arith.mulf %91, %90 : vector<1x1xf32>
    %93 = vector.broadcast %92 : vector<1x1xf32> to vector<1x256xf32>
    %94 = arith.mulf %72, %93 : vector<1x256xf32>
    %95 = arith.mulf %81, %92 : vector<1x1xf32>
    %96 = vector.broadcast %74 : f32 to vector<1x1xf32>
    %97 = arith.subf %96, %95 : vector<1x1xf32>
    %98 = vector.broadcast %97 : vector<1x1xf32> to vector<1x256xf32>
    %99 = arith.addf %94, %98 : vector<1x256xf32>
    %cst_21 = arith.constant 0.000000e+00 : f32
    %100 = vector.broadcast %cst_21 : f32 to vector<1x256xf32>
    %101 = arith.maximumf %99, %100 : vector<1x256xf32>
    %cst_22 = arith.constant 0.000000e+00 : f32
    %102 = vector.broadcast %cst_22 : f32 to vector<1x256xf32>
    %c8 = arith.constant 8 : index
    %103 = memref.load %arg4[%c8] : memref<16xf32, #tpu.memory_space<smem>>
    %104 = vector.extract_strided_slice %1 {offsets = [0, 0], sizes = [1, 256], strides = [1, 1]} : vector<4x256xf32> to vector<1x256xf32>
    %105 = vector.broadcast %103 : f32 to vector<1x256xf32>
    %106 = arith.mulf %105, %104 : vector<1x256xf32>
    %107 = arith.addf %102, %106 : vector<1x256xf32>
    %c9 = arith.constant 9 : index
    %108 = memref.load %arg4[%c9] : memref<16xf32, #tpu.memory_space<smem>>
    %109 = vector.extract_strided_slice %1 {offsets = [1, 0], sizes = [1, 256], strides = [1, 1]} : vector<4x256xf32> to vector<1x256xf32>
    %110 = vector.broadcast %108 : f32 to vector<1x256xf32>
    %111 = arith.mulf %110, %109 : vector<1x256xf32>
    %112 = arith.addf %107, %111 : vector<1x256xf32>
    %c10 = arith.constant 10 : index
    %113 = memref.load %arg4[%c10] : memref<16xf32, #tpu.memory_space<smem>>
    %114 = vector.extract_strided_slice %1 {offsets = [2, 0], sizes = [1, 256], strides = [1, 1]} : vector<4x256xf32> to vector<1x256xf32>
    %115 = vector.broadcast %113 : f32 to vector<1x256xf32>
    %116 = arith.mulf %115, %114 : vector<1x256xf32>
    %117 = arith.addf %112, %116 : vector<1x256xf32>
    %c11 = arith.constant 11 : index
    %118 = memref.load %arg4[%c11] : memref<16xf32, #tpu.memory_space<smem>>
    %119 = vector.extract_strided_slice %1 {offsets = [3, 0], sizes = [1, 256], strides = [1, 1]} : vector<4x256xf32> to vector<1x256xf32>
    %120 = vector.broadcast %118 : f32 to vector<1x256xf32>
    %121 = arith.mulf %120, %119 : vector<1x256xf32>
    %122 = arith.addf %117, %121 : vector<1x256xf32>
    %c2_23 = arith.constant 2 : index
    %123 = memref.load %arg5[%c2_23] : memref<4xf32, #tpu.memory_space<smem>>
    %c2_24 = arith.constant 2 : index
    %124 = memref.load %arg6[%c2_24] : memref<4xf32, #tpu.memory_space<smem>>
    %cst_25 = arith.constant dense<0.000000e+00> : vector<1xf32>
    %125 = vector.multi_reduction <add>, %122, %cst_25 [1] : vector<1x256xf32> to vector<1xf32>
    %126 = vector.shape_cast %125 : vector<1xf32> to vector<1x1xf32>
    %127 = arith.mulf %122, %122 : vector<1x256xf32>
    %cst_26 = arith.constant dense<0.000000e+00> : vector<1xf32>
    %128 = vector.multi_reduction <add>, %127, %cst_26 [1] : vector<1x256xf32> to vector<1xf32>
    %129 = vector.shape_cast %128 : vector<1xf32> to vector<1x1xf32>
    %cst_27 = arith.constant 3.906250e-03 : f32
    %130 = vector.broadcast %cst_27 : f32 to vector<1x1xf32>
    %131 = arith.mulf %126, %130 : vector<1x1xf32>
    %cst_28 = arith.constant 3.906250e-03 : f32
    %132 = vector.broadcast %cst_28 : f32 to vector<1x1xf32>
    %133 = arith.mulf %129, %132 : vector<1x1xf32>
    %134 = arith.mulf %131, %131 : vector<1x1xf32>
    %135 = arith.subf %133, %134 : vector<1x1xf32>
    %cst_29 = arith.constant 0.000000e+00 : f32
    %136 = vector.broadcast %cst_29 : f32 to vector<1x1xf32>
    %137 = arith.maximumf %135, %136 : vector<1x1xf32>
    %cst_30 = arith.constant 9.99999974E-6 : f32
    %138 = vector.broadcast %cst_30 : f32 to vector<1x1xf32>
    %139 = arith.addf %137, %138 : vector<1x1xf32>
    %140 = math.rsqrt %139 : vector<1x1xf32>
    %141 = vector.broadcast %123 : f32 to vector<1x1xf32>
    %142 = arith.mulf %141, %140 : vector<1x1xf32>
    %143 = vector.broadcast %142 : vector<1x1xf32> to vector<1x256xf32>
    %144 = arith.mulf %122, %143 : vector<1x256xf32>
    %145 = arith.mulf %131, %142 : vector<1x1xf32>
    %146 = vector.broadcast %124 : f32 to vector<1x1xf32>
    %147 = arith.subf %146, %145 : vector<1x1xf32>
    %148 = vector.broadcast %147 : vector<1x1xf32> to vector<1x256xf32>
    %149 = arith.addf %144, %148 : vector<1x256xf32>
    %cst_31 = arith.constant 0.000000e+00 : f32
    %150 = vector.broadcast %cst_31 : f32 to vector<1x256xf32>
    %151 = arith.maximumf %149, %150 : vector<1x256xf32>
    %cst_32 = arith.constant 0.000000e+00 : f32
    %152 = vector.broadcast %cst_32 : f32 to vector<1x256xf32>
    %c12 = arith.constant 12 : index
    %153 = memref.load %arg4[%c12] : memref<16xf32, #tpu.memory_space<smem>>
    %154 = vector.extract_strided_slice %1 {offsets = [0, 0], sizes = [1, 256], strides = [1, 1]} : vector<4x256xf32> to vector<1x256xf32>
    %155 = vector.broadcast %153 : f32 to vector<1x256xf32>
    %156 = arith.mulf %155, %154 : vector<1x256xf32>
    %157 = arith.addf %152, %156 : vector<1x256xf32>
    %c13 = arith.constant 13 : index
    %158 = memref.load %arg4[%c13] : memref<16xf32, #tpu.memory_space<smem>>
    %159 = vector.extract_strided_slice %1 {offsets = [1, 0], sizes = [1, 256], strides = [1, 1]} : vector<4x256xf32> to vector<1x256xf32>
    %160 = vector.broadcast %158 : f32 to vector<1x256xf32>
    %161 = arith.mulf %160, %159 : vector<1x256xf32>
    %162 = arith.addf %157, %161 : vector<1x256xf32>
    %c14 = arith.constant 14 : index
    %163 = memref.load %arg4[%c14] : memref<16xf32, #tpu.memory_space<smem>>
    %164 = vector.extract_strided_slice %1 {offsets = [2, 0], sizes = [1, 256], strides = [1, 1]} : vector<4x256xf32> to vector<1x256xf32>
    %165 = vector.broadcast %163 : f32 to vector<1x256xf32>
    %166 = arith.mulf %165, %164 : vector<1x256xf32>
    %167 = arith.addf %162, %166 : vector<1x256xf32>
    %c15 = arith.constant 15 : index
    %168 = memref.load %arg4[%c15] : memref<16xf32, #tpu.memory_space<smem>>
    %169 = vector.extract_strided_slice %1 {offsets = [3, 0], sizes = [1, 256], strides = [1, 1]} : vector<4x256xf32> to vector<1x256xf32>
    %170 = vector.broadcast %168 : f32 to vector<1x256xf32>
    %171 = arith.mulf %170, %169 : vector<1x256xf32>
    %172 = arith.addf %167, %171 : vector<1x256xf32>
    %c3_33 = arith.constant 3 : index
    %173 = memref.load %arg5[%c3_33] : memref<4xf32, #tpu.memory_space<smem>>
    %c3_34 = arith.constant 3 : index
    %174 = memref.load %arg6[%c3_34] : memref<4xf32, #tpu.memory_space<smem>>
    %cst_35 = arith.constant dense<0.000000e+00> : vector<1xf32>
    %175 = vector.multi_reduction <add>, %172, %cst_35 [1] : vector<1x256xf32> to vector<1xf32>
    %176 = vector.shape_cast %175 : vector<1xf32> to vector<1x1xf32>
    %177 = arith.mulf %172, %172 : vector<1x256xf32>
    %cst_36 = arith.constant dense<0.000000e+00> : vector<1xf32>
    %178 = vector.multi_reduction <add>, %177, %cst_36 [1] : vector<1x256xf32> to vector<1xf32>
    %179 = vector.shape_cast %178 : vector<1xf32> to vector<1x1xf32>
    %cst_37 = arith.constant 3.906250e-03 : f32
    %180 = vector.broadcast %cst_37 : f32 to vector<1x1xf32>
    %181 = arith.mulf %176, %180 : vector<1x1xf32>
    %cst_38 = arith.constant 3.906250e-03 : f32
    %182 = vector.broadcast %cst_38 : f32 to vector<1x1xf32>
    %183 = arith.mulf %179, %182 : vector<1x1xf32>
    %184 = arith.mulf %181, %181 : vector<1x1xf32>
    %185 = arith.subf %183, %184 : vector<1x1xf32>
    %cst_39 = arith.constant 0.000000e+00 : f32
    %186 = vector.broadcast %cst_39 : f32 to vector<1x1xf32>
    %187 = arith.maximumf %185, %186 : vector<1x1xf32>
    %cst_40 = arith.constant 9.99999974E-6 : f32
    %188 = vector.broadcast %cst_40 : f32 to vector<1x1xf32>
    %189 = arith.addf %187, %188 : vector<1x1xf32>
    %190 = math.rsqrt %189 : vector<1x1xf32>
    %191 = vector.broadcast %173 : f32 to vector<1x1xf32>
    %192 = arith.mulf %191, %190 : vector<1x1xf32>
    %193 = vector.broadcast %192 : vector<1x1xf32> to vector<1x256xf32>
    %194 = arith.mulf %172, %193 : vector<1x256xf32>
    %195 = arith.mulf %181, %192 : vector<1x1xf32>
    %196 = vector.broadcast %174 : f32 to vector<1x1xf32>
    %197 = arith.subf %196, %195 : vector<1x1xf32>
    %198 = vector.broadcast %197 : vector<1x1xf32> to vector<1x256xf32>
    %199 = arith.addf %194, %198 : vector<1x256xf32>
    %cst_41 = arith.constant 0.000000e+00 : f32
    %200 = vector.broadcast %cst_41 : f32 to vector<1x256xf32>
    %201 = arith.maximumf %199, %200 : vector<1x256xf32>
    %c0_42 = arith.constant 0 : index
    %c0_43 = arith.constant 0 : index
    %202 = vector.load %arg3[%c0_42, %c0_43] : memref<2x64xf32, #tpu.memory_space<vmem>>, vector<1x64xf32>
    %c1_44 = arith.constant 1 : index
    %c0_45 = arith.constant 0 : index
    %203 = vector.load %arg3[%c1_44, %c0_45] : memref<2x64xf32, #tpu.memory_space<vmem>>, vector<1x64xf32>
    %cst_46 = arith.constant 0.000000e+00 : f32
    %204 = vector.broadcast %cst_46 : f32 to vector<1x8xf32>
    %cst_47 = arith.constant 0.000000e+00 : f32
    %205 = vector.broadcast %cst_47 : f32 to vector<1x1xf32>
    %c0_48 = arith.constant 0 : index
    %c0_49 = arith.constant 0 : index
    %c0_50 = arith.constant 0 : index
    %206 = vector.load %arg2[%c0_48, %c0_49, %c0_50] : memref<1x4x64xf32, #tpu.memory_space<vmem>>, vector<1x4x64xf32>
    %207 = vector.shape_cast %206 : vector<1x4x64xf32> to vector<4x64xf32>
    %208 = vector.extract_strided_slice %207 {offsets = [0, 0], sizes = [1, 64], strides = [1, 1]} : vector<4x64xf32> to vector<1x64xf32>
    %209 = vector.extract_strided_slice %208 {offsets = [0, 0], sizes = [1, 56], strides = [1, 1]} : vector<1x64xf32> to vector<1x56xf32>
    %210 = tpu.concatenate %204, %209 in 1 : vector<1x8xf32>, vector<1x56xf32> -> vector<1x64xf32>
    %211 = vector.extract_strided_slice %210 {offsets = [0, 0], sizes = [1, 63], strides = [1, 1]} : vector<1x64xf32> to vector<1x63xf32>
    %212 = tpu.concatenate %205, %211 in 1 : vector<1x1xf32>, vector<1x63xf32> -> vector<1x64xf32>
    %213 = arith.mulf %212, %202 : vector<1x64xf32>
    %214 = vector.extract_strided_slice %208 {offsets = [0, 0], sizes = [1, 56], strides = [1, 1]} : vector<1x64xf32> to vector<1x56xf32>
    %215 = tpu.concatenate %204, %214 in 1 : vector<1x8xf32>, vector<1x56xf32> -> vector<1x64xf32>
    %216 = vector.extract_strided_slice %208 {offsets = [0, 0], sizes = [1, 56], strides = [1, 1]} : vector<1x64xf32> to vector<1x56xf32>
    %217 = tpu.concatenate %204, %216 in 1 : vector<1x8xf32>, vector<1x56xf32> -> vector<1x64xf32>
    %218 = vector.extract_strided_slice %217 {offsets = [0, 1], sizes = [1, 63], strides = [1, 1]} : vector<1x64xf32> to vector<1x63xf32>
    %219 = tpu.concatenate %218, %205 in 1 : vector<1x63xf32>, vector<1x1xf32> -> vector<1x64xf32>
    %220 = arith.mulf %219, %203 : vector<1x64xf32>
    %221 = vector.extract_strided_slice %208 {offsets = [0, 0], sizes = [1, 63], strides = [1, 1]} : vector<1x64xf32> to vector<1x63xf32>
    %222 = tpu.concatenate %205, %221 in 1 : vector<1x1xf32>, vector<1x63xf32> -> vector<1x64xf32>
    %223 = arith.mulf %222, %202 : vector<1x64xf32>
    %224 = vector.extract_strided_slice %208 {offsets = [0, 1], sizes = [1, 63], strides = [1, 1]} : vector<1x64xf32> to vector<1x63xf32>
    %225 = tpu.concatenate %224, %205 in 1 : vector<1x63xf32>, vector<1x1xf32> -> vector<1x64xf32>
    %226 = arith.mulf %225, %203 : vector<1x64xf32>
    %227 = vector.extract_strided_slice %208 {offsets = [0, 8], sizes = [1, 56], strides = [1, 1]} : vector<1x64xf32> to vector<1x56xf32>
    %228 = tpu.concatenate %227, %204 in 1 : vector<1x56xf32>, vector<1x8xf32> -> vector<1x64xf32>
    %229 = vector.extract_strided_slice %228 {offsets = [0, 0], sizes = [1, 63], strides = [1, 1]} : vector<1x64xf32> to vector<1x63xf32>
    %230 = tpu.concatenate %205, %229 in 1 : vector<1x1xf32>, vector<1x63xf32> -> vector<1x64xf32>
    %231 = arith.mulf %230, %202 : vector<1x64xf32>
    %232 = vector.extract_strided_slice %208 {offsets = [0, 8], sizes = [1, 56], strides = [1, 1]} : vector<1x64xf32> to vector<1x56xf32>
    %233 = tpu.concatenate %232, %204 in 1 : vector<1x56xf32>, vector<1x8xf32> -> vector<1x64xf32>
    %234 = vector.extract_strided_slice %208 {offsets = [0, 8], sizes = [1, 56], strides = [1, 1]} : vector<1x64xf32> to vector<1x56xf32>
    %235 = tpu.concatenate %234, %204 in 1 : vector<1x56xf32>, vector<1x8xf32> -> vector<1x64xf32>
    %236 = vector.extract_strided_slice %235 {offsets = [0, 1], sizes = [1, 63], strides = [1, 1]} : vector<1x64xf32> to vector<1x63xf32>
    %237 = tpu.concatenate %236, %205 in 1 : vector<1x63xf32>, vector<1x1xf32> -> vector<1x64xf32>
    %238 = arith.mulf %237, %203 : vector<1x64xf32>
    %239 = vector.extract_strided_slice %207 {offsets = [1, 0], sizes = [1, 64], strides = [1, 1]} : vector<4x64xf32> to vector<1x64xf32>
    %240 = vector.extract_strided_slice %239 {offsets = [0, 0], sizes = [1, 56], strides = [1, 1]} : vector<1x64xf32> to vector<1x56xf32>
    %241 = tpu.concatenate %204, %240 in 1 : vector<1x8xf32>, vector<1x56xf32> -> vector<1x64xf32>
    %242 = vector.extract_strided_slice %241 {offsets = [0, 0], sizes = [1, 63], strides = [1, 1]} : vector<1x64xf32> to vector<1x63xf32>
    %243 = tpu.concatenate %205, %242 in 1 : vector<1x1xf32>, vector<1x63xf32> -> vector<1x64xf32>
    %244 = arith.mulf %243, %202 : vector<1x64xf32>
    %245 = vector.extract_strided_slice %239 {offsets = [0, 0], sizes = [1, 56], strides = [1, 1]} : vector<1x64xf32> to vector<1x56xf32>
    %246 = tpu.concatenate %204, %245 in 1 : vector<1x8xf32>, vector<1x56xf32> -> vector<1x64xf32>
    %247 = vector.extract_strided_slice %239 {offsets = [0, 0], sizes = [1, 56], strides = [1, 1]} : vector<1x64xf32> to vector<1x56xf32>
    %248 = tpu.concatenate %204, %247 in 1 : vector<1x8xf32>, vector<1x56xf32> -> vector<1x64xf32>
    %249 = vector.extract_strided_slice %248 {offsets = [0, 1], sizes = [1, 63], strides = [1, 1]} : vector<1x64xf32> to vector<1x63xf32>
    %250 = tpu.concatenate %249, %205 in 1 : vector<1x63xf32>, vector<1x1xf32> -> vector<1x64xf32>
    %251 = arith.mulf %250, %203 : vector<1x64xf32>
    %252 = vector.extract_strided_slice %239 {offsets = [0, 0], sizes = [1, 63], strides = [1, 1]} : vector<1x64xf32> to vector<1x63xf32>
    %253 = tpu.concatenate %205, %252 in 1 : vector<1x1xf32>, vector<1x63xf32> -> vector<1x64xf32>
    %254 = arith.mulf %253, %202 : vector<1x64xf32>
    %255 = vector.extract_strided_slice %239 {offsets = [0, 1], sizes = [1, 63], strides = [1, 1]} : vector<1x64xf32> to vector<1x63xf32>
    %256 = tpu.concatenate %255, %205 in 1 : vector<1x63xf32>, vector<1x1xf32> -> vector<1x64xf32>
    %257 = arith.mulf %256, %203 : vector<1x64xf32>
    %258 = vector.extract_strided_slice %239 {offsets = [0, 8], sizes = [1, 56], strides = [1, 1]} : vector<1x64xf32> to vector<1x56xf32>
    %259 = tpu.concatenate %258, %204 in 1 : vector<1x56xf32>, vector<1x8xf32> -> vector<1x64xf32>
    %260 = vector.extract_strided_slice %259 {offsets = [0, 0], sizes = [1, 63], strides = [1, 1]} : vector<1x64xf32> to vector<1x63xf32>
    %261 = tpu.concatenate %205, %260 in 1 : vector<1x1xf32>, vector<1x63xf32> -> vector<1x64xf32>
    %262 = arith.mulf %261, %202 : vector<1x64xf32>
    %263 = vector.extract_strided_slice %239 {offsets = [0, 8], sizes = [1, 56], strides = [1, 1]} : vector<1x64xf32> to vector<1x56xf32>
    %264 = tpu.concatenate %263, %204 in 1 : vector<1x56xf32>, vector<1x8xf32> -> vector<1x64xf32>
    %265 = vector.extract_strided_slice %239 {offsets = [0, 8], sizes = [1, 56], strides = [1, 1]} : vector<1x64xf32> to vector<1x56xf32>
    %266 = tpu.concatenate %265, %204 in 1 : vector<1x56xf32>, vector<1x8xf32> -> vector<1x64xf32>
    %267 = vector.extract_strided_slice %266 {offsets = [0, 1], sizes = [1, 63], strides = [1, 1]} : vector<1x64xf32> to vector<1x63xf32>
    %268 = tpu.concatenate %267, %205 in 1 : vector<1x63xf32>, vector<1x1xf32> -> vector<1x64xf32>
    %269 = arith.mulf %268, %203 : vector<1x64xf32>
    %270 = vector.extract_strided_slice %207 {offsets = [2, 0], sizes = [1, 64], strides = [1, 1]} : vector<4x64xf32> to vector<1x64xf32>
    %271 = vector.extract_strided_slice %270 {offsets = [0, 0], sizes = [1, 56], strides = [1, 1]} : vector<1x64xf32> to vector<1x56xf32>
    %272 = tpu.concatenate %204, %271 in 1 : vector<1x8xf32>, vector<1x56xf32> -> vector<1x64xf32>
    %273 = vector.extract_strided_slice %272 {offsets = [0, 0], sizes = [1, 63], strides = [1, 1]} : vector<1x64xf32> to vector<1x63xf32>
    %274 = tpu.concatenate %205, %273 in 1 : vector<1x1xf32>, vector<1x63xf32> -> vector<1x64xf32>
    %275 = arith.mulf %274, %202 : vector<1x64xf32>
    %276 = vector.extract_strided_slice %270 {offsets = [0, 0], sizes = [1, 56], strides = [1, 1]} : vector<1x64xf32> to vector<1x56xf32>
    %277 = tpu.concatenate %204, %276 in 1 : vector<1x8xf32>, vector<1x56xf32> -> vector<1x64xf32>
    %278 = vector.extract_strided_slice %270 {offsets = [0, 0], sizes = [1, 56], strides = [1, 1]} : vector<1x64xf32> to vector<1x56xf32>
    %279 = tpu.concatenate %204, %278 in 1 : vector<1x8xf32>, vector<1x56xf32> -> vector<1x64xf32>
    %280 = vector.extract_strided_slice %279 {offsets = [0, 1], sizes = [1, 63], strides = [1, 1]} : vector<1x64xf32> to vector<1x63xf32>
    %281 = tpu.concatenate %280, %205 in 1 : vector<1x63xf32>, vector<1x1xf32> -> vector<1x64xf32>
    %282 = arith.mulf %281, %203 : vector<1x64xf32>
    %283 = vector.extract_strided_slice %270 {offsets = [0, 0], sizes = [1, 63], strides = [1, 1]} : vector<1x64xf32> to vector<1x63xf32>
    %284 = tpu.concatenate %205, %283 in 1 : vector<1x1xf32>, vector<1x63xf32> -> vector<1x64xf32>
    %285 = arith.mulf %284, %202 : vector<1x64xf32>
    %286 = vector.extract_strided_slice %270 {offsets = [0, 1], sizes = [1, 63], strides = [1, 1]} : vector<1x64xf32> to vector<1x63xf32>
    %287 = tpu.concatenate %286, %205 in 1 : vector<1x63xf32>, vector<1x1xf32> -> vector<1x64xf32>
    %288 = arith.mulf %287, %203 : vector<1x64xf32>
    %289 = vector.extract_strided_slice %270 {offsets = [0, 8], sizes = [1, 56], strides = [1, 1]} : vector<1x64xf32> to vector<1x56xf32>
    %290 = tpu.concatenate %289, %204 in 1 : vector<1x56xf32>, vector<1x8xf32> -> vector<1x64xf32>
    %291 = vector.extract_strided_slice %290 {offsets = [0, 0], sizes = [1, 63], strides = [1, 1]} : vector<1x64xf32> to vector<1x63xf32>
    %292 = tpu.concatenate %205, %291 in 1 : vector<1x1xf32>, vector<1x63xf32> -> vector<1x64xf32>
    %293 = arith.mulf %292, %202 : vector<1x64xf32>
    %294 = vector.extract_strided_slice %270 {offsets = [0, 8], sizes = [1, 56], strides = [1, 1]} : vector<1x64xf32> to vector<1x56xf32>
    %295 = tpu.concatenate %294, %204 in 1 : vector<1x56xf32>, vector<1x8xf32> -> vector<1x64xf32>
    %296 = vector.extract_strided_slice %270 {offsets = [0, 8], sizes = [1, 56], strides = [1, 1]} : vector<1x64xf32> to vector<1x56xf32>
    %297 = tpu.concatenate %296, %204 in 1 : vector<1x56xf32>, vector<1x8xf32> -> vector<1x64xf32>
    %298 = vector.extract_strided_slice %297 {offsets = [0, 1], sizes = [1, 63], strides = [1, 1]} : vector<1x64xf32> to vector<1x63xf32>
    %299 = tpu.concatenate %298, %205 in 1 : vector<1x63xf32>, vector<1x1xf32> -> vector<1x64xf32>
    %300 = arith.mulf %299, %203 : vector<1x64xf32>
    %301 = vector.extract_strided_slice %207 {offsets = [3, 0], sizes = [1, 64], strides = [1, 1]} : vector<4x64xf32> to vector<1x64xf32>
    %302 = vector.extract_strided_slice %301 {offsets = [0, 0], sizes = [1, 56], strides = [1, 1]} : vector<1x64xf32> to vector<1x56xf32>
    %303 = tpu.concatenate %204, %302 in 1 : vector<1x8xf32>, vector<1x56xf32> -> vector<1x64xf32>
    %304 = vector.extract_strided_slice %303 {offsets = [0, 0], sizes = [1, 63], strides = [1, 1]} : vector<1x64xf32> to vector<1x63xf32>
    %305 = tpu.concatenate %205, %304 in 1 : vector<1x1xf32>, vector<1x63xf32> -> vector<1x64xf32>
    %306 = arith.mulf %305, %202 : vector<1x64xf32>
    %307 = vector.extract_strided_slice %301 {offsets = [0, 0], sizes = [1, 56], strides = [1, 1]} : vector<1x64xf32> to vector<1x56xf32>
    %308 = tpu.concatenate %204, %307 in 1 : vector<1x8xf32>, vector<1x56xf32> -> vector<1x64xf32>
    %309 = vector.extract_strided_slice %301 {offsets = [0, 0], sizes = [1, 56], strides = [1, 1]} : vector<1x64xf32> to vector<1x56xf32>
    %310 = tpu.concatenate %204, %309 in 1 : vector<1x8xf32>, vector<1x56xf32> -> vector<1x64xf32>
    %311 = vector.extract_strided_slice %310 {offsets = [0, 1], sizes = [1, 63], strides = [1, 1]} : vector<1x64xf32> to vector<1x63xf32>
    %312 = tpu.concatenate %311, %205 in 1 : vector<1x63xf32>, vector<1x1xf32> -> vector<1x64xf32>
    %313 = arith.mulf %312, %203 : vector<1x64xf32>
    %314 = vector.extract_strided_slice %301 {offsets = [0, 0], sizes = [1, 63], strides = [1, 1]} : vector<1x64xf32> to vector<1x63xf32>
    %315 = tpu.concatenate %205, %314 in 1 : vector<1x1xf32>, vector<1x63xf32> -> vector<1x64xf32>
    %316 = arith.mulf %315, %202 : vector<1x64xf32>
    %317 = vector.extract_strided_slice %301 {offsets = [0, 1], sizes = [1, 63], strides = [1, 1]} : vector<1x64xf32> to vector<1x63xf32>
    %318 = tpu.concatenate %317, %205 in 1 : vector<1x63xf32>, vector<1x1xf32> -> vector<1x64xf32>
    %319 = arith.mulf %318, %203 : vector<1x64xf32>
    %320 = vector.extract_strided_slice %301 {offsets = [0, 8], sizes = [1, 56], strides = [1, 1]} : vector<1x64xf32> to vector<1x56xf32>
    %321 = tpu.concatenate %320, %204 in 1 : vector<1x56xf32>, vector<1x8xf32> -> vector<1x64xf32>
    %322 = vector.extract_strided_slice %321 {offsets = [0, 0], sizes = [1, 63], strides = [1, 1]} : vector<1x64xf32> to vector<1x63xf32>
    %323 = tpu.concatenate %205, %322 in 1 : vector<1x1xf32>, vector<1x63xf32> -> vector<1x64xf32>
    %324 = arith.mulf %323, %202 : vector<1x64xf32>
    %325 = vector.extract_strided_slice %301 {offsets = [0, 8], sizes = [1, 56], strides = [1, 1]} : vector<1x64xf32> to vector<1x56xf32>
    %326 = tpu.concatenate %325, %204 in 1 : vector<1x56xf32>, vector<1x8xf32> -> vector<1x64xf32>
    %327 = vector.extract_strided_slice %301 {offsets = [0, 8], sizes = [1, 56], strides = [1, 1]} : vector<1x64xf32> to vector<1x56xf32>
    %328 = tpu.concatenate %327, %204 in 1 : vector<1x56xf32>, vector<1x8xf32> -> vector<1x64xf32>
    %329 = vector.extract_strided_slice %328 {offsets = [0, 1], sizes = [1, 63], strides = [1, 1]} : vector<1x64xf32> to vector<1x63xf32>
    %330 = tpu.concatenate %329, %205 in 1 : vector<1x63xf32>, vector<1x1xf32> -> vector<1x64xf32>
    %331 = arith.mulf %330, %203 : vector<1x64xf32>
    %cst_51 = arith.constant 0.000000e+00 : f32
    %332 = vector.broadcast %cst_51 : f32 to vector<1x64xf32>
    %c0_52 = arith.constant 0 : index
    %333 = memref.load %arg7[%c0_52] : memref<256xf32, #tpu.memory_space<smem>>
    %334 = vector.broadcast %333 : f32 to vector<1x64xf32>
    %335 = arith.mulf %334, %213 : vector<1x64xf32>
    %336 = arith.addf %332, %335 : vector<1x64xf32>
    %c1_53 = arith.constant 1 : index
    %337 = memref.load %arg7[%c1_53] : memref<256xf32, #tpu.memory_space<smem>>
    %338 = vector.broadcast %337 : f32 to vector<1x64xf32>
    %339 = arith.mulf %338, %244 : vector<1x64xf32>
    %340 = arith.addf %336, %339 : vector<1x64xf32>
    %c2_54 = arith.constant 2 : index
    %341 = memref.load %arg7[%c2_54] : memref<256xf32, #tpu.memory_space<smem>>
    %342 = vector.broadcast %341 : f32 to vector<1x64xf32>
    %343 = arith.mulf %342, %275 : vector<1x64xf32>
    %344 = arith.addf %340, %343 : vector<1x64xf32>
    %c3_55 = arith.constant 3 : index
    %345 = memref.load %arg7[%c3_55] : memref<256xf32, #tpu.memory_space<smem>>
    %346 = vector.broadcast %345 : f32 to vector<1x64xf32>
    %347 = arith.mulf %346, %306 : vector<1x64xf32>
    %348 = arith.addf %344, %347 : vector<1x64xf32>
    %c16 = arith.constant 16 : index
    %349 = memref.load %arg7[%c16] : memref<256xf32, #tpu.memory_space<smem>>
    %350 = vector.broadcast %349 : f32 to vector<1x64xf32>
    %351 = arith.mulf %350, %215 : vector<1x64xf32>
    %352 = arith.addf %348, %351 : vector<1x64xf32>
    %c17 = arith.constant 17 : index
    %353 = memref.load %arg7[%c17] : memref<256xf32, #tpu.memory_space<smem>>
    %354 = vector.broadcast %353 : f32 to vector<1x64xf32>
    %355 = arith.mulf %354, %246 : vector<1x64xf32>
    %356 = arith.addf %352, %355 : vector<1x64xf32>
    %c18 = arith.constant 18 : index
    %357 = memref.load %arg7[%c18] : memref<256xf32, #tpu.memory_space<smem>>
    %358 = vector.broadcast %357 : f32 to vector<1x64xf32>
    %359 = arith.mulf %358, %277 : vector<1x64xf32>
    %360 = arith.addf %356, %359 : vector<1x64xf32>
    %c19 = arith.constant 19 : index
    %361 = memref.load %arg7[%c19] : memref<256xf32, #tpu.memory_space<smem>>
    %362 = vector.broadcast %361 : f32 to vector<1x64xf32>
    %363 = arith.mulf %362, %308 : vector<1x64xf32>
    %364 = arith.addf %360, %363 : vector<1x64xf32>
    %c32 = arith.constant 32 : index
    %365 = memref.load %arg7[%c32] : memref<256xf32, #tpu.memory_space<smem>>
    %366 = vector.broadcast %365 : f32 to vector<1x64xf32>
    %367 = arith.mulf %366, %223 : vector<1x64xf32>
    %368 = arith.addf %364, %367 : vector<1x64xf32>
    %c33 = arith.constant 33 : index
    %369 = memref.load %arg7[%c33] : memref<256xf32, #tpu.memory_space<smem>>
    %370 = vector.broadcast %369 : f32 to vector<1x64xf32>
    %371 = arith.mulf %370, %254 : vector<1x64xf32>
    %372 = arith.addf %368, %371 : vector<1x64xf32>
    %c34 = arith.constant 34 : index
    %373 = memref.load %arg7[%c34] : memref<256xf32, #tpu.memory_space<smem>>
    %374 = vector.broadcast %373 : f32 to vector<1x64xf32>
    %375 = arith.mulf %374, %285 : vector<1x64xf32>
    %376 = arith.addf %372, %375 : vector<1x64xf32>
    %c35 = arith.constant 35 : index
    %377 = memref.load %arg7[%c35] : memref<256xf32, #tpu.memory_space<smem>>
    %378 = vector.broadcast %377 : f32 to vector<1x64xf32>
    %379 = arith.mulf %378, %316 : vector<1x64xf32>
    %380 = arith.addf %376, %379 : vector<1x64xf32>
    %c48 = arith.constant 48 : index
    %381 = memref.load %arg7[%c48] : memref<256xf32, #tpu.memory_space<smem>>
    %382 = vector.broadcast %381 : f32 to vector<1x64xf32>
    %383 = arith.mulf %382, %208 : vector<1x64xf32>
    %384 = arith.addf %380, %383 : vector<1x64xf32>
    %c49 = arith.constant 49 : index
    %385 = memref.load %arg7[%c49] : memref<256xf32, #tpu.memory_space<smem>>
    %386 = vector.broadcast %385 : f32 to vector<1x64xf32>
    %387 = arith.mulf %386, %239 : vector<1x64xf32>
    %388 = arith.addf %384, %387 : vector<1x64xf32>
    %c50 = arith.constant 50 : index
    %389 = memref.load %arg7[%c50] : memref<256xf32, #tpu.memory_space<smem>>
    %390 = vector.broadcast %389 : f32 to vector<1x64xf32>
    %391 = arith.mulf %390, %270 : vector<1x64xf32>
    %392 = arith.addf %388, %391 : vector<1x64xf32>
    %c51 = arith.constant 51 : index
    %393 = memref.load %arg7[%c51] : memref<256xf32, #tpu.memory_space<smem>>
    %394 = vector.broadcast %393 : f32 to vector<1x64xf32>
    %395 = arith.mulf %394, %301 : vector<1x64xf32>
    %396 = arith.addf %392, %395 : vector<1x64xf32>
    %cst_56 = arith.constant 0.000000e+00 : f32
    %397 = vector.broadcast %cst_56 : f32 to vector<1x64xf32>
    %c64 = arith.constant 64 : index
    %398 = memref.load %arg7[%c64] : memref<256xf32, #tpu.memory_space<smem>>
    %399 = vector.broadcast %398 : f32 to vector<1x64xf32>
    %400 = arith.mulf %399, %215 : vector<1x64xf32>
    %401 = arith.addf %397, %400 : vector<1x64xf32>
    %c65 = arith.constant 65 : index
    %402 = memref.load %arg7[%c65] : memref<256xf32, #tpu.memory_space<smem>>
    %403 = vector.broadcast %402 : f32 to vector<1x64xf32>
    %404 = arith.mulf %403, %246 : vector<1x64xf32>
    %405 = arith.addf %401, %404 : vector<1x64xf32>
    %c66 = arith.constant 66 : index
    %406 = memref.load %arg7[%c66] : memref<256xf32, #tpu.memory_space<smem>>
    %407 = vector.broadcast %406 : f32 to vector<1x64xf32>
    %408 = arith.mulf %407, %277 : vector<1x64xf32>
    %409 = arith.addf %405, %408 : vector<1x64xf32>
    %c67 = arith.constant 67 : index
    %410 = memref.load %arg7[%c67] : memref<256xf32, #tpu.memory_space<smem>>
    %411 = vector.broadcast %410 : f32 to vector<1x64xf32>
    %412 = arith.mulf %411, %308 : vector<1x64xf32>
    %413 = arith.addf %409, %412 : vector<1x64xf32>
    %c80 = arith.constant 80 : index
    %414 = memref.load %arg7[%c80] : memref<256xf32, #tpu.memory_space<smem>>
    %415 = vector.broadcast %414 : f32 to vector<1x64xf32>
    %416 = arith.mulf %415, %220 : vector<1x64xf32>
    %417 = arith.addf %413, %416 : vector<1x64xf32>
    %c81 = arith.constant 81 : index
    %418 = memref.load %arg7[%c81] : memref<256xf32, #tpu.memory_space<smem>>
    %419 = vector.broadcast %418 : f32 to vector<1x64xf32>
    %420 = arith.mulf %419, %251 : vector<1x64xf32>
    %421 = arith.addf %417, %420 : vector<1x64xf32>
    %c82 = arith.constant 82 : index
    %422 = memref.load %arg7[%c82] : memref<256xf32, #tpu.memory_space<smem>>
    %423 = vector.broadcast %422 : f32 to vector<1x64xf32>
    %424 = arith.mulf %423, %282 : vector<1x64xf32>
    %425 = arith.addf %421, %424 : vector<1x64xf32>
    %c83 = arith.constant 83 : index
    %426 = memref.load %arg7[%c83] : memref<256xf32, #tpu.memory_space<smem>>
    %427 = vector.broadcast %426 : f32 to vector<1x64xf32>
    %428 = arith.mulf %427, %313 : vector<1x64xf32>
    %429 = arith.addf %425, %428 : vector<1x64xf32>
    %c96 = arith.constant 96 : index
    %430 = memref.load %arg7[%c96] : memref<256xf32, #tpu.memory_space<smem>>
    %431 = vector.broadcast %430 : f32 to vector<1x64xf32>
    %432 = arith.mulf %431, %208 : vector<1x64xf32>
    %433 = arith.addf %429, %432 : vector<1x64xf32>
    %c97 = arith.constant 97 : index
    %434 = memref.load %arg7[%c97] : memref<256xf32, #tpu.memory_space<smem>>
    %435 = vector.broadcast %434 : f32 to vector<1x64xf32>
    %436 = arith.mulf %435, %239 : vector<1x64xf32>
    %437 = arith.addf %433, %436 : vector<1x64xf32>
    %c98 = arith.constant 98 : index
    %438 = memref.load %arg7[%c98] : memref<256xf32, #tpu.memory_space<smem>>
    %439 = vector.broadcast %438 : f32 to vector<1x64xf32>
    %440 = arith.mulf %439, %270 : vector<1x64xf32>
    %441 = arith.addf %437, %440 : vector<1x64xf32>
    %c99 = arith.constant 99 : index
    %442 = memref.load %arg7[%c99] : memref<256xf32, #tpu.memory_space<smem>>
    %443 = vector.broadcast %442 : f32 to vector<1x64xf32>
    %444 = arith.mulf %443, %301 : vector<1x64xf32>
    %445 = arith.addf %441, %444 : vector<1x64xf32>
    %c112 = arith.constant 112 : index
    %446 = memref.load %arg7[%c112] : memref<256xf32, #tpu.memory_space<smem>>
    %447 = vector.broadcast %446 : f32 to vector<1x64xf32>
    %448 = arith.mulf %447, %226 : vector<1x64xf32>
    %449 = arith.addf %445, %448 : vector<1x64xf32>
    %c113 = arith.constant 113 : index
    %450 = memref.load %arg7[%c113] : memref<256xf32, #tpu.memory_space<smem>>
    %451 = vector.broadcast %450 : f32 to vector<1x64xf32>
    %452 = arith.mulf %451, %257 : vector<1x64xf32>
    %453 = arith.addf %449, %452 : vector<1x64xf32>
    %c114 = arith.constant 114 : index
    %454 = memref.load %arg7[%c114] : memref<256xf32, #tpu.memory_space<smem>>
    %455 = vector.broadcast %454 : f32 to vector<1x64xf32>
    %456 = arith.mulf %455, %288 : vector<1x64xf32>
    %457 = arith.addf %453, %456 : vector<1x64xf32>
    %c115 = arith.constant 115 : index
    %458 = memref.load %arg7[%c115] : memref<256xf32, #tpu.memory_space<smem>>
    %459 = vector.broadcast %458 : f32 to vector<1x64xf32>
    %460 = arith.mulf %459, %319 : vector<1x64xf32>
    %461 = arith.addf %457, %460 : vector<1x64xf32>
    %cst_57 = arith.constant 0.000000e+00 : f32
    %462 = vector.broadcast %cst_57 : f32 to vector<1x64xf32>
    %c128 = arith.constant 128 : index
    %463 = memref.load %arg7[%c128] : memref<256xf32, #tpu.memory_space<smem>>
    %464 = vector.broadcast %463 : f32 to vector<1x64xf32>
    %465 = arith.mulf %464, %223 : vector<1x64xf32>
    %466 = arith.addf %462, %465 : vector<1x64xf32>
    %c129 = arith.constant 129 : index
    %467 = memref.load %arg7[%c129] : memref<256xf32, #tpu.memory_space<smem>>
    %468 = vector.broadcast %467 : f32 to vector<1x64xf32>
    %469 = arith.mulf %468, %254 : vector<1x64xf32>
    %470 = arith.addf %466, %469 : vector<1x64xf32>
    %c130 = arith.constant 130 : index
    %471 = memref.load %arg7[%c130] : memref<256xf32, #tpu.memory_space<smem>>
    %472 = vector.broadcast %471 : f32 to vector<1x64xf32>
    %473 = arith.mulf %472, %285 : vector<1x64xf32>
    %474 = arith.addf %470, %473 : vector<1x64xf32>
    %c131 = arith.constant 131 : index
    %475 = memref.load %arg7[%c131] : memref<256xf32, #tpu.memory_space<smem>>
    %476 = vector.broadcast %475 : f32 to vector<1x64xf32>
    %477 = arith.mulf %476, %316 : vector<1x64xf32>
    %478 = arith.addf %474, %477 : vector<1x64xf32>
    %c144 = arith.constant 144 : index
    %479 = memref.load %arg7[%c144] : memref<256xf32, #tpu.memory_space<smem>>
    %480 = vector.broadcast %479 : f32 to vector<1x64xf32>
    %481 = arith.mulf %480, %208 : vector<1x64xf32>
    %482 = arith.addf %478, %481 : vector<1x64xf32>
    %c145 = arith.constant 145 : index
    %483 = memref.load %arg7[%c145] : memref<256xf32, #tpu.memory_space<smem>>
    %484 = vector.broadcast %483 : f32 to vector<1x64xf32>
    %485 = arith.mulf %484, %239 : vector<1x64xf32>
    %486 = arith.addf %482, %485 : vector<1x64xf32>
    %c146 = arith.constant 146 : index
    %487 = memref.load %arg7[%c146] : memref<256xf32, #tpu.memory_space<smem>>
    %488 = vector.broadcast %487 : f32 to vector<1x64xf32>
    %489 = arith.mulf %488, %270 : vector<1x64xf32>
    %490 = arith.addf %486, %489 : vector<1x64xf32>
    %c147 = arith.constant 147 : index
    %491 = memref.load %arg7[%c147] : memref<256xf32, #tpu.memory_space<smem>>
    %492 = vector.broadcast %491 : f32 to vector<1x64xf32>
    %493 = arith.mulf %492, %301 : vector<1x64xf32>
    %494 = arith.addf %490, %493 : vector<1x64xf32>
    %c160 = arith.constant 160 : index
    %495 = memref.load %arg7[%c160] : memref<256xf32, #tpu.memory_space<smem>>
    %496 = vector.broadcast %495 : f32 to vector<1x64xf32>
    %497 = arith.mulf %496, %231 : vector<1x64xf32>
    %498 = arith.addf %494, %497 : vector<1x64xf32>
    %c161 = arith.constant 161 : index
    %499 = memref.load %arg7[%c161] : memref<256xf32, #tpu.memory_space<smem>>
    %500 = vector.broadcast %499 : f32 to vector<1x64xf32>
    %501 = arith.mulf %500, %262 : vector<1x64xf32>
    %502 = arith.addf %498, %501 : vector<1x64xf32>
    %c162 = arith.constant 162 : index
    %503 = memref.load %arg7[%c162] : memref<256xf32, #tpu.memory_space<smem>>
    %504 = vector.broadcast %503 : f32 to vector<1x64xf32>
    %505 = arith.mulf %504, %293 : vector<1x64xf32>
    %506 = arith.addf %502, %505 : vector<1x64xf32>
    %c163 = arith.constant 163 : index
    %507 = memref.load %arg7[%c163] : memref<256xf32, #tpu.memory_space<smem>>
    %508 = vector.broadcast %507 : f32 to vector<1x64xf32>
    %509 = arith.mulf %508, %324 : vector<1x64xf32>
    %510 = arith.addf %506, %509 : vector<1x64xf32>
    %c176 = arith.constant 176 : index
    %511 = memref.load %arg7[%c176] : memref<256xf32, #tpu.memory_space<smem>>
    %512 = vector.broadcast %511 : f32 to vector<1x64xf32>
    %513 = arith.mulf %512, %233 : vector<1x64xf32>
    %514 = arith.addf %510, %513 : vector<1x64xf32>
    %c177 = arith.constant 177 : index
    %515 = memref.load %arg7[%c177] : memref<256xf32, #tpu.memory_space<smem>>
    %516 = vector.broadcast %515 : f32 to vector<1x64xf32>
    %517 = arith.mulf %516, %264 : vector<1x64xf32>
    %518 = arith.addf %514, %517 : vector<1x64xf32>
    %c178 = arith.constant 178 : index
    %519 = memref.load %arg7[%c178] : memref<256xf32, #tpu.memory_space<smem>>
    %520 = vector.broadcast %519 : f32 to vector<1x64xf32>
    %521 = arith.mulf %520, %295 : vector<1x64xf32>
    %522 = arith.addf %518, %521 : vector<1x64xf32>
    %c179 = arith.constant 179 : index
    %523 = memref.load %arg7[%c179] : memref<256xf32, #tpu.memory_space<smem>>
    %524 = vector.broadcast %523 : f32 to vector<1x64xf32>
    %525 = arith.mulf %524, %326 : vector<1x64xf32>
    %526 = arith.addf %522, %525 : vector<1x64xf32>
    %cst_58 = arith.constant 0.000000e+00 : f32
    %527 = vector.broadcast %cst_58 : f32 to vector<1x64xf32>
    %c192 = arith.constant 192 : index
    %528 = memref.load %arg7[%c192] : memref<256xf32, #tpu.memory_space<smem>>
    %529 = vector.broadcast %528 : f32 to vector<1x64xf32>
    %530 = arith.mulf %529, %208 : vector<1x64xf32>
    %531 = arith.addf %527, %530 : vector<1x64xf32>
    %c193 = arith.constant 193 : index
    %532 = memref.load %arg7[%c193] : memref<256xf32, #tpu.memory_space<smem>>
    %533 = vector.broadcast %532 : f32 to vector<1x64xf32>
    %534 = arith.mulf %533, %239 : vector<1x64xf32>
    %535 = arith.addf %531, %534 : vector<1x64xf32>
    %c194 = arith.constant 194 : index
    %536 = memref.load %arg7[%c194] : memref<256xf32, #tpu.memory_space<smem>>
    %537 = vector.broadcast %536 : f32 to vector<1x64xf32>
    %538 = arith.mulf %537, %270 : vector<1x64xf32>
    %539 = arith.addf %535, %538 : vector<1x64xf32>
    %c195 = arith.constant 195 : index
    %540 = memref.load %arg7[%c195] : memref<256xf32, #tpu.memory_space<smem>>
    %541 = vector.broadcast %540 : f32 to vector<1x64xf32>
    %542 = arith.mulf %541, %301 : vector<1x64xf32>
    %543 = arith.addf %539, %542 : vector<1x64xf32>
    %c208 = arith.constant 208 : index
    %544 = memref.load %arg7[%c208] : memref<256xf32, #tpu.memory_space<smem>>
    %545 = vector.broadcast %544 : f32 to vector<1x64xf32>
    %546 = arith.mulf %545, %226 : vector<1x64xf32>
    %547 = arith.addf %543, %546 : vector<1x64xf32>
    %c209 = arith.constant 209 : index
    %548 = memref.load %arg7[%c209] : memref<256xf32, #tpu.memory_space<smem>>
    %549 = vector.broadcast %548 : f32 to vector<1x64xf32>
    %550 = arith.mulf %549, %257 : vector<1x64xf32>
    %551 = arith.addf %547, %550 : vector<1x64xf32>
    %c210 = arith.constant 210 : index
    %552 = memref.load %arg7[%c210] : memref<256xf32, #tpu.memory_space<smem>>
    %553 = vector.broadcast %552 : f32 to vector<1x64xf32>
    %554 = arith.mulf %553, %288 : vector<1x64xf32>
    %555 = arith.addf %551, %554 : vector<1x64xf32>
    %c211 = arith.constant 211 : index
    %556 = memref.load %arg7[%c211] : memref<256xf32, #tpu.memory_space<smem>>
    %557 = vector.broadcast %556 : f32 to vector<1x64xf32>
    %558 = arith.mulf %557, %319 : vector<1x64xf32>
    %559 = arith.addf %555, %558 : vector<1x64xf32>
    %c224 = arith.constant 224 : index
    %560 = memref.load %arg7[%c224] : memref<256xf32, #tpu.memory_space<smem>>
    %561 = vector.broadcast %560 : f32 to vector<1x64xf32>
    %562 = arith.mulf %561, %233 : vector<1x64xf32>
    %563 = arith.addf %559, %562 : vector<1x64xf32>
    %c225 = arith.constant 225 : index
    %564 = memref.load %arg7[%c225] : memref<256xf32, #tpu.memory_space<smem>>
    %565 = vector.broadcast %564 : f32 to vector<1x64xf32>
    %566 = arith.mulf %565, %264 : vector<1x64xf32>
    %567 = arith.addf %563, %566 : vector<1x64xf32>
    %c226 = arith.constant 226 : index
    %568 = memref.load %arg7[%c226] : memref<256xf32, #tpu.memory_space<smem>>
    %569 = vector.broadcast %568 : f32 to vector<1x64xf32>
    %570 = arith.mulf %569, %295 : vector<1x64xf32>
    %571 = arith.addf %567, %570 : vector<1x64xf32>
    %c227 = arith.constant 227 : index
    %572 = memref.load %arg7[%c227] : memref<256xf32, #tpu.memory_space<smem>>
    %573 = vector.broadcast %572 : f32 to vector<1x64xf32>
    %574 = arith.mulf %573, %326 : vector<1x64xf32>
    %575 = arith.addf %571, %574 : vector<1x64xf32>
    %c240 = arith.constant 240 : index
    %576 = memref.load %arg7[%c240] : memref<256xf32, #tpu.memory_space<smem>>
    %577 = vector.broadcast %576 : f32 to vector<1x64xf32>
    %578 = arith.mulf %577, %238 : vector<1x64xf32>
    %579 = arith.addf %575, %578 : vector<1x64xf32>
    %c241 = arith.constant 241 : index
    %580 = memref.load %arg7[%c241] : memref<256xf32, #tpu.memory_space<smem>>
    %581 = vector.broadcast %580 : f32 to vector<1x64xf32>
    %582 = arith.mulf %581, %269 : vector<1x64xf32>
    %583 = arith.addf %579, %582 : vector<1x64xf32>
    %c242 = arith.constant 242 : index
    %584 = memref.load %arg7[%c242] : memref<256xf32, #tpu.memory_space<smem>>
    %585 = vector.broadcast %584 : f32 to vector<1x64xf32>
    %586 = arith.mulf %585, %300 : vector<1x64xf32>
    %587 = arith.addf %583, %586 : vector<1x64xf32>
    %c243 = arith.constant 243 : index
    %588 = memref.load %arg7[%c243] : memref<256xf32, #tpu.memory_space<smem>>
    %589 = vector.broadcast %588 : f32 to vector<1x64xf32>
    %590 = arith.mulf %589, %331 : vector<1x64xf32>
    %591 = arith.addf %587, %590 : vector<1x64xf32>
    %592 = tpu.concatenate %396, %461, %526, %591 in 1 : vector<1x64xf32>, vector<1x64xf32>, vector<1x64xf32>, vector<1x64xf32> -> vector<1x256xf32>
    %c0_59 = arith.constant 0 : index
    %593 = memref.load %arg8[%c0_59] : memref<4xf32, #tpu.memory_space<smem>>
    %594 = vector.broadcast %593 : f32 to vector<1x256xf32>
    %595 = arith.addf %592, %594 : vector<1x256xf32>
    %cst_60 = arith.constant 0.000000e+00 : f32
    %596 = vector.broadcast %cst_60 : f32 to vector<1x256xf32>
    %597 = arith.maximumf %595, %596 : vector<1x256xf32>
    %cst_61 = arith.constant 0.000000e+00 : f32
    %598 = vector.broadcast %cst_61 : f32 to vector<1x64xf32>
    %c4_62 = arith.constant 4 : index
    %599 = memref.load %arg7[%c4_62] : memref<256xf32, #tpu.memory_space<smem>>
    %600 = vector.broadcast %599 : f32 to vector<1x64xf32>
    %601 = arith.mulf %600, %213 : vector<1x64xf32>
    %602 = arith.addf %598, %601 : vector<1x64xf32>
    %c5_63 = arith.constant 5 : index
    %603 = memref.load %arg7[%c5_63] : memref<256xf32, #tpu.memory_space<smem>>
    %604 = vector.broadcast %603 : f32 to vector<1x64xf32>
    %605 = arith.mulf %604, %244 : vector<1x64xf32>
    %606 = arith.addf %602, %605 : vector<1x64xf32>
    %c6_64 = arith.constant 6 : index
    %607 = memref.load %arg7[%c6_64] : memref<256xf32, #tpu.memory_space<smem>>
    %608 = vector.broadcast %607 : f32 to vector<1x64xf32>
    %609 = arith.mulf %608, %275 : vector<1x64xf32>
    %610 = arith.addf %606, %609 : vector<1x64xf32>
    %c7_65 = arith.constant 7 : index
    %611 = memref.load %arg7[%c7_65] : memref<256xf32, #tpu.memory_space<smem>>
    %612 = vector.broadcast %611 : f32 to vector<1x64xf32>
    %613 = arith.mulf %612, %306 : vector<1x64xf32>
    %614 = arith.addf %610, %613 : vector<1x64xf32>
    %c20 = arith.constant 20 : index
    %615 = memref.load %arg7[%c20] : memref<256xf32, #tpu.memory_space<smem>>
    %616 = vector.broadcast %615 : f32 to vector<1x64xf32>
    %617 = arith.mulf %616, %215 : vector<1x64xf32>
    %618 = arith.addf %614, %617 : vector<1x64xf32>
    %c21 = arith.constant 21 : index
    %619 = memref.load %arg7[%c21] : memref<256xf32, #tpu.memory_space<smem>>
    %620 = vector.broadcast %619 : f32 to vector<1x64xf32>
    %621 = arith.mulf %620, %246 : vector<1x64xf32>
    %622 = arith.addf %618, %621 : vector<1x64xf32>
    %c22 = arith.constant 22 : index
    %623 = memref.load %arg7[%c22] : memref<256xf32, #tpu.memory_space<smem>>
    %624 = vector.broadcast %623 : f32 to vector<1x64xf32>
    %625 = arith.mulf %624, %277 : vector<1x64xf32>
    %626 = arith.addf %622, %625 : vector<1x64xf32>
    %c23 = arith.constant 23 : index
    %627 = memref.load %arg7[%c23] : memref<256xf32, #tpu.memory_space<smem>>
    %628 = vector.broadcast %627 : f32 to vector<1x64xf32>
    %629 = arith.mulf %628, %308 : vector<1x64xf32>
    %630 = arith.addf %626, %629 : vector<1x64xf32>
    %c36 = arith.constant 36 : index
    %631 = memref.load %arg7[%c36] : memref<256xf32, #tpu.memory_space<smem>>
    %632 = vector.broadcast %631 : f32 to vector<1x64xf32>
    %633 = arith.mulf %632, %223 : vector<1x64xf32>
    %634 = arith.addf %630, %633 : vector<1x64xf32>
    %c37 = arith.constant 37 : index
    %635 = memref.load %arg7[%c37] : memref<256xf32, #tpu.memory_space<smem>>
    %636 = vector.broadcast %635 : f32 to vector<1x64xf32>
    %637 = arith.mulf %636, %254 : vector<1x64xf32>
    %638 = arith.addf %634, %637 : vector<1x64xf32>
    %c38 = arith.constant 38 : index
    %639 = memref.load %arg7[%c38] : memref<256xf32, #tpu.memory_space<smem>>
    %640 = vector.broadcast %639 : f32 to vector<1x64xf32>
    %641 = arith.mulf %640, %285 : vector<1x64xf32>
    %642 = arith.addf %638, %641 : vector<1x64xf32>
    %c39 = arith.constant 39 : index
    %643 = memref.load %arg7[%c39] : memref<256xf32, #tpu.memory_space<smem>>
    %644 = vector.broadcast %643 : f32 to vector<1x64xf32>
    %645 = arith.mulf %644, %316 : vector<1x64xf32>
    %646 = arith.addf %642, %645 : vector<1x64xf32>
    %c52 = arith.constant 52 : index
    %647 = memref.load %arg7[%c52] : memref<256xf32, #tpu.memory_space<smem>>
    %648 = vector.broadcast %647 : f32 to vector<1x64xf32>
    %649 = arith.mulf %648, %208 : vector<1x64xf32>
    %650 = arith.addf %646, %649 : vector<1x64xf32>
    %c53 = arith.constant 53 : index
    %651 = memref.load %arg7[%c53] : memref<256xf32, #tpu.memory_space<smem>>
    %652 = vector.broadcast %651 : f32 to vector<1x64xf32>
    %653 = arith.mulf %652, %239 : vector<1x64xf32>
    %654 = arith.addf %650, %653 : vector<1x64xf32>
    %c54 = arith.constant 54 : index
    %655 = memref.load %arg7[%c54] : memref<256xf32, #tpu.memory_space<smem>>
    %656 = vector.broadcast %655 : f32 to vector<1x64xf32>
    %657 = arith.mulf %656, %270 : vector<1x64xf32>
    %658 = arith.addf %654, %657 : vector<1x64xf32>
    %c55 = arith.constant 55 : index
    %659 = memref.load %arg7[%c55] : memref<256xf32, #tpu.memory_space<smem>>
    %660 = vector.broadcast %659 : f32 to vector<1x64xf32>
    %661 = arith.mulf %660, %301 : vector<1x64xf32>
    %662 = arith.addf %658, %661 : vector<1x64xf32>
    %cst_66 = arith.constant 0.000000e+00 : f32
    %663 = vector.broadcast %cst_66 : f32 to vector<1x64xf32>
    %c68 = arith.constant 68 : index
    %664 = memref.load %arg7[%c68] : memref<256xf32, #tpu.memory_space<smem>>
    %665 = vector.broadcast %664 : f32 to vector<1x64xf32>
    %666 = arith.mulf %665, %215 : vector<1x64xf32>
    %667 = arith.addf %663, %666 : vector<1x64xf32>
    %c69 = arith.constant 69 : index
    %668 = memref.load %arg7[%c69] : memref<256xf32, #tpu.memory_space<smem>>
    %669 = vector.broadcast %668 : f32 to vector<1x64xf32>
    %670 = arith.mulf %669, %246 : vector<1x64xf32>
    %671 = arith.addf %667, %670 : vector<1x64xf32>
    %c70 = arith.constant 70 : index
    %672 = memref.load %arg7[%c70] : memref<256xf32, #tpu.memory_space<smem>>
    %673 = vector.broadcast %672 : f32 to vector<1x64xf32>
    %674 = arith.mulf %673, %277 : vector<1x64xf32>
    %675 = arith.addf %671, %674 : vector<1x64xf32>
    %c71 = arith.constant 71 : index
    %676 = memref.load %arg7[%c71] : memref<256xf32, #tpu.memory_space<smem>>
    %677 = vector.broadcast %676 : f32 to vector<1x64xf32>
    %678 = arith.mulf %677, %308 : vector<1x64xf32>
    %679 = arith.addf %675, %678 : vector<1x64xf32>
    %c84 = arith.constant 84 : index
    %680 = memref.load %arg7[%c84] : memref<256xf32, #tpu.memory_space<smem>>
    %681 = vector.broadcast %680 : f32 to vector<1x64xf32>
    %682 = arith.mulf %681, %220 : vector<1x64xf32>
    %683 = arith.addf %679, %682 : vector<1x64xf32>
    %c85 = arith.constant 85 : index
    %684 = memref.load %arg7[%c85] : memref<256xf32, #tpu.memory_space<smem>>
    %685 = vector.broadcast %684 : f32 to vector<1x64xf32>
    %686 = arith.mulf %685, %251 : vector<1x64xf32>
    %687 = arith.addf %683, %686 : vector<1x64xf32>
    %c86 = arith.constant 86 : index
    %688 = memref.load %arg7[%c86] : memref<256xf32, #tpu.memory_space<smem>>
    %689 = vector.broadcast %688 : f32 to vector<1x64xf32>
    %690 = arith.mulf %689, %282 : vector<1x64xf32>
    %691 = arith.addf %687, %690 : vector<1x64xf32>
    %c87 = arith.constant 87 : index
    %692 = memref.load %arg7[%c87] : memref<256xf32, #tpu.memory_space<smem>>
    %693 = vector.broadcast %692 : f32 to vector<1x64xf32>
    %694 = arith.mulf %693, %313 : vector<1x64xf32>
    %695 = arith.addf %691, %694 : vector<1x64xf32>
    %c100 = arith.constant 100 : index
    %696 = memref.load %arg7[%c100] : memref<256xf32, #tpu.memory_space<smem>>
    %697 = vector.broadcast %696 : f32 to vector<1x64xf32>
    %698 = arith.mulf %697, %208 : vector<1x64xf32>
    %699 = arith.addf %695, %698 : vector<1x64xf32>
    %c101 = arith.constant 101 : index
    %700 = memref.load %arg7[%c101] : memref<256xf32, #tpu.memory_space<smem>>
    %701 = vector.broadcast %700 : f32 to vector<1x64xf32>
    %702 = arith.mulf %701, %239 : vector<1x64xf32>
    %703 = arith.addf %699, %702 : vector<1x64xf32>
    %c102 = arith.constant 102 : index
    %704 = memref.load %arg7[%c102] : memref<256xf32, #tpu.memory_space<smem>>
    %705 = vector.broadcast %704 : f32 to vector<1x64xf32>
    %706 = arith.mulf %705, %270 : vector<1x64xf32>
    %707 = arith.addf %703, %706 : vector<1x64xf32>
    %c103 = arith.constant 103 : index
    %708 = memref.load %arg7[%c103] : memref<256xf32, #tpu.memory_space<smem>>
    %709 = vector.broadcast %708 : f32 to vector<1x64xf32>
    %710 = arith.mulf %709, %301 : vector<1x64xf32>
    %711 = arith.addf %707, %710 : vector<1x64xf32>
    %c116 = arith.constant 116 : index
    %712 = memref.load %arg7[%c116] : memref<256xf32, #tpu.memory_space<smem>>
    %713 = vector.broadcast %712 : f32 to vector<1x64xf32>
    %714 = arith.mulf %713, %226 : vector<1x64xf32>
    %715 = arith.addf %711, %714 : vector<1x64xf32>
    %c117 = arith.constant 117 : index
    %716 = memref.load %arg7[%c117] : memref<256xf32, #tpu.memory_space<smem>>
    %717 = vector.broadcast %716 : f32 to vector<1x64xf32>
    %718 = arith.mulf %717, %257 : vector<1x64xf32>
    %719 = arith.addf %715, %718 : vector<1x64xf32>
    %c118 = arith.constant 118 : index
    %720 = memref.load %arg7[%c118] : memref<256xf32, #tpu.memory_space<smem>>
    %721 = vector.broadcast %720 : f32 to vector<1x64xf32>
    %722 = arith.mulf %721, %288 : vector<1x64xf32>
    %723 = arith.addf %719, %722 : vector<1x64xf32>
    %c119 = arith.constant 119 : index
    %724 = memref.load %arg7[%c119] : memref<256xf32, #tpu.memory_space<smem>>
    %725 = vector.broadcast %724 : f32 to vector<1x64xf32>
    %726 = arith.mulf %725, %319 : vector<1x64xf32>
    %727 = arith.addf %723, %726 : vector<1x64xf32>
    %cst_67 = arith.constant 0.000000e+00 : f32
    %728 = vector.broadcast %cst_67 : f32 to vector<1x64xf32>
    %c132 = arith.constant 132 : index
    %729 = memref.load %arg7[%c132] : memref<256xf32, #tpu.memory_space<smem>>
    %730 = vector.broadcast %729 : f32 to vector<1x64xf32>
    %731 = arith.mulf %730, %223 : vector<1x64xf32>
    %732 = arith.addf %728, %731 : vector<1x64xf32>
    %c133 = arith.constant 133 : index
    %733 = memref.load %arg7[%c133] : memref<256xf32, #tpu.memory_space<smem>>
    %734 = vector.broadcast %733 : f32 to vector<1x64xf32>
    %735 = arith.mulf %734, %254 : vector<1x64xf32>
    %736 = arith.addf %732, %735 : vector<1x64xf32>
    %c134 = arith.constant 134 : index
    %737 = memref.load %arg7[%c134] : memref<256xf32, #tpu.memory_space<smem>>
    %738 = vector.broadcast %737 : f32 to vector<1x64xf32>
    %739 = arith.mulf %738, %285 : vector<1x64xf32>
    %740 = arith.addf %736, %739 : vector<1x64xf32>
    %c135 = arith.constant 135 : index
    %741 = memref.load %arg7[%c135] : memref<256xf32, #tpu.memory_space<smem>>
    %742 = vector.broadcast %741 : f32 to vector<1x64xf32>
    %743 = arith.mulf %742, %316 : vector<1x64xf32>
    %744 = arith.addf %740, %743 : vector<1x64xf32>
    %c148 = arith.constant 148 : index
    %745 = memref.load %arg7[%c148] : memref<256xf32, #tpu.memory_space<smem>>
    %746 = vector.broadcast %745 : f32 to vector<1x64xf32>
    %747 = arith.mulf %746, %208 : vector<1x64xf32>
    %748 = arith.addf %744, %747 : vector<1x64xf32>
    %c149 = arith.constant 149 : index
    %749 = memref.load %arg7[%c149] : memref<256xf32, #tpu.memory_space<smem>>
    %750 = vector.broadcast %749 : f32 to vector<1x64xf32>
    %751 = arith.mulf %750, %239 : vector<1x64xf32>
    %752 = arith.addf %748, %751 : vector<1x64xf32>
    %c150 = arith.constant 150 : index
    %753 = memref.load %arg7[%c150] : memref<256xf32, #tpu.memory_space<smem>>
    %754 = vector.broadcast %753 : f32 to vector<1x64xf32>
    %755 = arith.mulf %754, %270 : vector<1x64xf32>
    %756 = arith.addf %752, %755 : vector<1x64xf32>
    %c151 = arith.constant 151 : index
    %757 = memref.load %arg7[%c151] : memref<256xf32, #tpu.memory_space<smem>>
    %758 = vector.broadcast %757 : f32 to vector<1x64xf32>
    %759 = arith.mulf %758, %301 : vector<1x64xf32>
    %760 = arith.addf %756, %759 : vector<1x64xf32>
    %c164 = arith.constant 164 : index
    %761 = memref.load %arg7[%c164] : memref<256xf32, #tpu.memory_space<smem>>
    %762 = vector.broadcast %761 : f32 to vector<1x64xf32>
    %763 = arith.mulf %762, %231 : vector<1x64xf32>
    %764 = arith.addf %760, %763 : vector<1x64xf32>
    %c165 = arith.constant 165 : index
    %765 = memref.load %arg7[%c165] : memref<256xf32, #tpu.memory_space<smem>>
    %766 = vector.broadcast %765 : f32 to vector<1x64xf32>
    %767 = arith.mulf %766, %262 : vector<1x64xf32>
    %768 = arith.addf %764, %767 : vector<1x64xf32>
    %c166 = arith.constant 166 : index
    %769 = memref.load %arg7[%c166] : memref<256xf32, #tpu.memory_space<smem>>
    %770 = vector.broadcast %769 : f32 to vector<1x64xf32>
    %771 = arith.mulf %770, %293 : vector<1x64xf32>
    %772 = arith.addf %768, %771 : vector<1x64xf32>
    %c167 = arith.constant 167 : index
    %773 = memref.load %arg7[%c167] : memref<256xf32, #tpu.memory_space<smem>>
    %774 = vector.broadcast %773 : f32 to vector<1x64xf32>
    %775 = arith.mulf %774, %324 : vector<1x64xf32>
    %776 = arith.addf %772, %775 : vector<1x64xf32>
    %c180 = arith.constant 180 : index
    %777 = memref.load %arg7[%c180] : memref<256xf32, #tpu.memory_space<smem>>
    %778 = vector.broadcast %777 : f32 to vector<1x64xf32>
    %779 = arith.mulf %778, %233 : vector<1x64xf32>
    %780 = arith.addf %776, %779 : vector<1x64xf32>
    %c181 = arith.constant 181 : index
    %781 = memref.load %arg7[%c181] : memref<256xf32, #tpu.memory_space<smem>>
    %782 = vector.broadcast %781 : f32 to vector<1x64xf32>
    %783 = arith.mulf %782, %264 : vector<1x64xf32>
    %784 = arith.addf %780, %783 : vector<1x64xf32>
    %c182 = arith.constant 182 : index
    %785 = memref.load %arg7[%c182] : memref<256xf32, #tpu.memory_space<smem>>
    %786 = vector.broadcast %785 : f32 to vector<1x64xf32>
    %787 = arith.mulf %786, %295 : vector<1x64xf32>
    %788 = arith.addf %784, %787 : vector<1x64xf32>
    %c183 = arith.constant 183 : index
    %789 = memref.load %arg7[%c183] : memref<256xf32, #tpu.memory_space<smem>>
    %790 = vector.broadcast %789 : f32 to vector<1x64xf32>
    %791 = arith.mulf %790, %326 : vector<1x64xf32>
    %792 = arith.addf %788, %791 : vector<1x64xf32>
    %cst_68 = arith.constant 0.000000e+00 : f32
    %793 = vector.broadcast %cst_68 : f32 to vector<1x64xf32>
    %c196 = arith.constant 196 : index
    %794 = memref.load %arg7[%c196] : memref<256xf32, #tpu.memory_space<smem>>
    %795 = vector.broadcast %794 : f32 to vector<1x64xf32>
    %796 = arith.mulf %795, %208 : vector<1x64xf32>
    %797 = arith.addf %793, %796 : vector<1x64xf32>
    %c197 = arith.constant 197 : index
    %798 = memref.load %arg7[%c197] : memref<256xf32, #tpu.memory_space<smem>>
    %799 = vector.broadcast %798 : f32 to vector<1x64xf32>
    %800 = arith.mulf %799, %239 : vector<1x64xf32>
    %801 = arith.addf %797, %800 : vector<1x64xf32>
    %c198 = arith.constant 198 : index
    %802 = memref.load %arg7[%c198] : memref<256xf32, #tpu.memory_space<smem>>
    %803 = vector.broadcast %802 : f32 to vector<1x64xf32>
    %804 = arith.mulf %803, %270 : vector<1x64xf32>
    %805 = arith.addf %801, %804 : vector<1x64xf32>
    %c199 = arith.constant 199 : index
    %806 = memref.load %arg7[%c199] : memref<256xf32, #tpu.memory_space<smem>>
    %807 = vector.broadcast %806 : f32 to vector<1x64xf32>
    %808 = arith.mulf %807, %301 : vector<1x64xf32>
    %809 = arith.addf %805, %808 : vector<1x64xf32>
    %c212 = arith.constant 212 : index
    %810 = memref.load %arg7[%c212] : memref<256xf32, #tpu.memory_space<smem>>
    %811 = vector.broadcast %810 : f32 to vector<1x64xf32>
    %812 = arith.mulf %811, %226 : vector<1x64xf32>
    %813 = arith.addf %809, %812 : vector<1x64xf32>
    %c213 = arith.constant 213 : index
    %814 = memref.load %arg7[%c213] : memref<256xf32, #tpu.memory_space<smem>>
    %815 = vector.broadcast %814 : f32 to vector<1x64xf32>
    %816 = arith.mulf %815, %257 : vector<1x64xf32>
    %817 = arith.addf %813, %816 : vector<1x64xf32>
    %c214 = arith.constant 214 : index
    %818 = memref.load %arg7[%c214] : memref<256xf32, #tpu.memory_space<smem>>
    %819 = vector.broadcast %818 : f32 to vector<1x64xf32>
    %820 = arith.mulf %819, %288 : vector<1x64xf32>
    %821 = arith.addf %817, %820 : vector<1x64xf32>
    %c215 = arith.constant 215 : index
    %822 = memref.load %arg7[%c215] : memref<256xf32, #tpu.memory_space<smem>>
    %823 = vector.broadcast %822 : f32 to vector<1x64xf32>
    %824 = arith.mulf %823, %319 : vector<1x64xf32>
    %825 = arith.addf %821, %824 : vector<1x64xf32>
    %c228 = arith.constant 228 : index
    %826 = memref.load %arg7[%c228] : memref<256xf32, #tpu.memory_space<smem>>
    %827 = vector.broadcast %826 : f32 to vector<1x64xf32>
    %828 = arith.mulf %827, %233 : vector<1x64xf32>
    %829 = arith.addf %825, %828 : vector<1x64xf32>
    %c229 = arith.constant 229 : index
    %830 = memref.load %arg7[%c229] : memref<256xf32, #tpu.memory_space<smem>>
    %831 = vector.broadcast %830 : f32 to vector<1x64xf32>
    %832 = arith.mulf %831, %264 : vector<1x64xf32>
    %833 = arith.addf %829, %832 : vector<1x64xf32>
    %c230 = arith.constant 230 : index
    %834 = memref.load %arg7[%c230] : memref<256xf32, #tpu.memory_space<smem>>
    %835 = vector.broadcast %834 : f32 to vector<1x64xf32>
    %836 = arith.mulf %835, %295 : vector<1x64xf32>
    %837 = arith.addf %833, %836 : vector<1x64xf32>
    %c231 = arith.constant 231 : index
    %838 = memref.load %arg7[%c231] : memref<256xf32, #tpu.memory_space<smem>>
    %839 = vector.broadcast %838 : f32 to vector<1x64xf32>
    %840 = arith.mulf %839, %326 : vector<1x64xf32>
    %841 = arith.addf %837, %840 : vector<1x64xf32>
    %c244 = arith.constant 244 : index
    %842 = memref.load %arg7[%c244] : memref<256xf32, #tpu.memory_space<smem>>
    %843 = vector.broadcast %842 : f32 to vector<1x64xf32>
    %844 = arith.mulf %843, %238 : vector<1x64xf32>
    %845 = arith.addf %841, %844 : vector<1x64xf32>
    %c245 = arith.constant 245 : index
    %846 = memref.load %arg7[%c245] : memref<256xf32, #tpu.memory_space<smem>>
    %847 = vector.broadcast %846 : f32 to vector<1x64xf32>
    %848 = arith.mulf %847, %269 : vector<1x64xf32>
    %849 = arith.addf %845, %848 : vector<1x64xf32>
    %c246 = arith.constant 246 : index
    %850 = memref.load %arg7[%c246] : memref<256xf32, #tpu.memory_space<smem>>
    %851 = vector.broadcast %850 : f32 to vector<1x64xf32>
    %852 = arith.mulf %851, %300 : vector<1x64xf32>
    %853 = arith.addf %849, %852 : vector<1x64xf32>
    %c247 = arith.constant 247 : index
    %854 = memref.load %arg7[%c247] : memref<256xf32, #tpu.memory_space<smem>>
    %855 = vector.broadcast %854 : f32 to vector<1x64xf32>
    %856 = arith.mulf %855, %331 : vector<1x64xf32>
    %857 = arith.addf %853, %856 : vector<1x64xf32>
    %858 = tpu.concatenate %662, %727, %792, %857 in 1 : vector<1x64xf32>, vector<1x64xf32>, vector<1x64xf32>, vector<1x64xf32> -> vector<1x256xf32>
    %c1_69 = arith.constant 1 : index
    %859 = memref.load %arg8[%c1_69] : memref<4xf32, #tpu.memory_space<smem>>
    %860 = vector.broadcast %859 : f32 to vector<1x256xf32>
    %861 = arith.addf %858, %860 : vector<1x256xf32>
    %cst_70 = arith.constant 0.000000e+00 : f32
    %862 = vector.broadcast %cst_70 : f32 to vector<1x256xf32>
    %863 = arith.maximumf %861, %862 : vector<1x256xf32>
    %cst_71 = arith.constant 0.000000e+00 : f32
    %864 = vector.broadcast %cst_71 : f32 to vector<1x64xf32>
    %c8_72 = arith.constant 8 : index
    %865 = memref.load %arg7[%c8_72] : memref<256xf32, #tpu.memory_space<smem>>
    %866 = vector.broadcast %865 : f32 to vector<1x64xf32>
    %867 = arith.mulf %866, %213 : vector<1x64xf32>
    %868 = arith.addf %864, %867 : vector<1x64xf32>
    %c9_73 = arith.constant 9 : index
    %869 = memref.load %arg7[%c9_73] : memref<256xf32, #tpu.memory_space<smem>>
    %870 = vector.broadcast %869 : f32 to vector<1x64xf32>
    %871 = arith.mulf %870, %244 : vector<1x64xf32>
    %872 = arith.addf %868, %871 : vector<1x64xf32>
    %c10_74 = arith.constant 10 : index
    %873 = memref.load %arg7[%c10_74] : memref<256xf32, #tpu.memory_space<smem>>
    %874 = vector.broadcast %873 : f32 to vector<1x64xf32>
    %875 = arith.mulf %874, %275 : vector<1x64xf32>
    %876 = arith.addf %872, %875 : vector<1x64xf32>
    %c11_75 = arith.constant 11 : index
    %877 = memref.load %arg7[%c11_75] : memref<256xf32, #tpu.memory_space<smem>>
    %878 = vector.broadcast %877 : f32 to vector<1x64xf32>
    %879 = arith.mulf %878, %306 : vector<1x64xf32>
    %880 = arith.addf %876, %879 : vector<1x64xf32>
    %c24 = arith.constant 24 : index
    %881 = memref.load %arg7[%c24] : memref<256xf32, #tpu.memory_space<smem>>
    %882 = vector.broadcast %881 : f32 to vector<1x64xf32>
    %883 = arith.mulf %882, %215 : vector<1x64xf32>
    %884 = arith.addf %880, %883 : vector<1x64xf32>
    %c25 = arith.constant 25 : index
    %885 = memref.load %arg7[%c25] : memref<256xf32, #tpu.memory_space<smem>>
    %886 = vector.broadcast %885 : f32 to vector<1x64xf32>
    %887 = arith.mulf %886, %246 : vector<1x64xf32>
    %888 = arith.addf %884, %887 : vector<1x64xf32>
    %c26 = arith.constant 26 : index
    %889 = memref.load %arg7[%c26] : memref<256xf32, #tpu.memory_space<smem>>
    %890 = vector.broadcast %889 : f32 to vector<1x64xf32>
    %891 = arith.mulf %890, %277 : vector<1x64xf32>
    %892 = arith.addf %888, %891 : vector<1x64xf32>
    %c27 = arith.constant 27 : index
    %893 = memref.load %arg7[%c27] : memref<256xf32, #tpu.memory_space<smem>>
    %894 = vector.broadcast %893 : f32 to vector<1x64xf32>
    %895 = arith.mulf %894, %308 : vector<1x64xf32>
    %896 = arith.addf %892, %895 : vector<1x64xf32>
    %c40 = arith.constant 40 : index
    %897 = memref.load %arg7[%c40] : memref<256xf32, #tpu.memory_space<smem>>
    %898 = vector.broadcast %897 : f32 to vector<1x64xf32>
    %899 = arith.mulf %898, %223 : vector<1x64xf32>
    %900 = arith.addf %896, %899 : vector<1x64xf32>
    %c41 = arith.constant 41 : index
    %901 = memref.load %arg7[%c41] : memref<256xf32, #tpu.memory_space<smem>>
    %902 = vector.broadcast %901 : f32 to vector<1x64xf32>
    %903 = arith.mulf %902, %254 : vector<1x64xf32>
    %904 = arith.addf %900, %903 : vector<1x64xf32>
    %c42 = arith.constant 42 : index
    %905 = memref.load %arg7[%c42] : memref<256xf32, #tpu.memory_space<smem>>
    %906 = vector.broadcast %905 : f32 to vector<1x64xf32>
    %907 = arith.mulf %906, %285 : vector<1x64xf32>
    %908 = arith.addf %904, %907 : vector<1x64xf32>
    %c43 = arith.constant 43 : index
    %909 = memref.load %arg7[%c43] : memref<256xf32, #tpu.memory_space<smem>>
    %910 = vector.broadcast %909 : f32 to vector<1x64xf32>
    %911 = arith.mulf %910, %316 : vector<1x64xf32>
    %912 = arith.addf %908, %911 : vector<1x64xf32>
    %c56 = arith.constant 56 : index
    %913 = memref.load %arg7[%c56] : memref<256xf32, #tpu.memory_space<smem>>
    %914 = vector.broadcast %913 : f32 to vector<1x64xf32>
    %915 = arith.mulf %914, %208 : vector<1x64xf32>
    %916 = arith.addf %912, %915 : vector<1x64xf32>
    %c57 = arith.constant 57 : index
    %917 = memref.load %arg7[%c57] : memref<256xf32, #tpu.memory_space<smem>>
    %918 = vector.broadcast %917 : f32 to vector<1x64xf32>
    %919 = arith.mulf %918, %239 : vector<1x64xf32>
    %920 = arith.addf %916, %919 : vector<1x64xf32>
    %c58 = arith.constant 58 : index
    %921 = memref.load %arg7[%c58] : memref<256xf32, #tpu.memory_space<smem>>
    %922 = vector.broadcast %921 : f32 to vector<1x64xf32>
    %923 = arith.mulf %922, %270 : vector<1x64xf32>
    %924 = arith.addf %920, %923 : vector<1x64xf32>
    %c59 = arith.constant 59 : index
    %925 = memref.load %arg7[%c59] : memref<256xf32, #tpu.memory_space<smem>>
    %926 = vector.broadcast %925 : f32 to vector<1x64xf32>
    %927 = arith.mulf %926, %301 : vector<1x64xf32>
    %928 = arith.addf %924, %927 : vector<1x64xf32>
    %cst_76 = arith.constant 0.000000e+00 : f32
    %929 = vector.broadcast %cst_76 : f32 to vector<1x64xf32>
    %c72 = arith.constant 72 : index
    %930 = memref.load %arg7[%c72] : memref<256xf32, #tpu.memory_space<smem>>
    %931 = vector.broadcast %930 : f32 to vector<1x64xf32>
    %932 = arith.mulf %931, %215 : vector<1x64xf32>
    %933 = arith.addf %929, %932 : vector<1x64xf32>
    %c73 = arith.constant 73 : index
    %934 = memref.load %arg7[%c73] : memref<256xf32, #tpu.memory_space<smem>>
    %935 = vector.broadcast %934 : f32 to vector<1x64xf32>
    %936 = arith.mulf %935, %246 : vector<1x64xf32>
    %937 = arith.addf %933, %936 : vector<1x64xf32>
    %c74 = arith.constant 74 : index
    %938 = memref.load %arg7[%c74] : memref<256xf32, #tpu.memory_space<smem>>
    %939 = vector.broadcast %938 : f32 to vector<1x64xf32>
    %940 = arith.mulf %939, %277 : vector<1x64xf32>
    %941 = arith.addf %937, %940 : vector<1x64xf32>
    %c75 = arith.constant 75 : index
    %942 = memref.load %arg7[%c75] : memref<256xf32, #tpu.memory_space<smem>>
    %943 = vector.broadcast %942 : f32 to vector<1x64xf32>
    %944 = arith.mulf %943, %308 : vector<1x64xf32>
    %945 = arith.addf %941, %944 : vector<1x64xf32>
    %c88 = arith.constant 88 : index
    %946 = memref.load %arg7[%c88] : memref<256xf32, #tpu.memory_space<smem>>
    %947 = vector.broadcast %946 : f32 to vector<1x64xf32>
    %948 = arith.mulf %947, %220 : vector<1x64xf32>
    %949 = arith.addf %945, %948 : vector<1x64xf32>
    %c89 = arith.constant 89 : index
    %950 = memref.load %arg7[%c89] : memref<256xf32, #tpu.memory_space<smem>>
    %951 = vector.broadcast %950 : f32 to vector<1x64xf32>
    %952 = arith.mulf %951, %251 : vector<1x64xf32>
    %953 = arith.addf %949, %952 : vector<1x64xf32>
    %c90 = arith.constant 90 : index
    %954 = memref.load %arg7[%c90] : memref<256xf32, #tpu.memory_space<smem>>
    %955 = vector.broadcast %954 : f32 to vector<1x64xf32>
    %956 = arith.mulf %955, %282 : vector<1x64xf32>
    %957 = arith.addf %953, %956 : vector<1x64xf32>
    %c91 = arith.constant 91 : index
    %958 = memref.load %arg7[%c91] : memref<256xf32, #tpu.memory_space<smem>>
    %959 = vector.broadcast %958 : f32 to vector<1x64xf32>
    %960 = arith.mulf %959, %313 : vector<1x64xf32>
    %961 = arith.addf %957, %960 : vector<1x64xf32>
    %c104 = arith.constant 104 : index
    %962 = memref.load %arg7[%c104] : memref<256xf32, #tpu.memory_space<smem>>
    %963 = vector.broadcast %962 : f32 to vector<1x64xf32>
    %964 = arith.mulf %963, %208 : vector<1x64xf32>
    %965 = arith.addf %961, %964 : vector<1x64xf32>
    %c105 = arith.constant 105 : index
    %966 = memref.load %arg7[%c105] : memref<256xf32, #tpu.memory_space<smem>>
    %967 = vector.broadcast %966 : f32 to vector<1x64xf32>
    %968 = arith.mulf %967, %239 : vector<1x64xf32>
    %969 = arith.addf %965, %968 : vector<1x64xf32>
    %c106 = arith.constant 106 : index
    %970 = memref.load %arg7[%c106] : memref<256xf32, #tpu.memory_space<smem>>
    %971 = vector.broadcast %970 : f32 to vector<1x64xf32>
    %972 = arith.mulf %971, %270 : vector<1x64xf32>
    %973 = arith.addf %969, %972 : vector<1x64xf32>
    %c107 = arith.constant 107 : index
    %974 = memref.load %arg7[%c107] : memref<256xf32, #tpu.memory_space<smem>>
    %975 = vector.broadcast %974 : f32 to vector<1x64xf32>
    %976 = arith.mulf %975, %301 : vector<1x64xf32>
    %977 = arith.addf %973, %976 : vector<1x64xf32>
    %c120 = arith.constant 120 : index
    %978 = memref.load %arg7[%c120] : memref<256xf32, #tpu.memory_space<smem>>
    %979 = vector.broadcast %978 : f32 to vector<1x64xf32>
    %980 = arith.mulf %979, %226 : vector<1x64xf32>
    %981 = arith.addf %977, %980 : vector<1x64xf32>
    %c121 = arith.constant 121 : index
    %982 = memref.load %arg7[%c121] : memref<256xf32, #tpu.memory_space<smem>>
    %983 = vector.broadcast %982 : f32 to vector<1x64xf32>
    %984 = arith.mulf %983, %257 : vector<1x64xf32>
    %985 = arith.addf %981, %984 : vector<1x64xf32>
    %c122 = arith.constant 122 : index
    %986 = memref.load %arg7[%c122] : memref<256xf32, #tpu.memory_space<smem>>
    %987 = vector.broadcast %986 : f32 to vector<1x64xf32>
    %988 = arith.mulf %987, %288 : vector<1x64xf32>
    %989 = arith.addf %985, %988 : vector<1x64xf32>
    %c123 = arith.constant 123 : index
    %990 = memref.load %arg7[%c123] : memref<256xf32, #tpu.memory_space<smem>>
    %991 = vector.broadcast %990 : f32 to vector<1x64xf32>
    %992 = arith.mulf %991, %319 : vector<1x64xf32>
    %993 = arith.addf %989, %992 : vector<1x64xf32>
    %cst_77 = arith.constant 0.000000e+00 : f32
    %994 = vector.broadcast %cst_77 : f32 to vector<1x64xf32>
    %c136 = arith.constant 136 : index
    %995 = memref.load %arg7[%c136] : memref<256xf32, #tpu.memory_space<smem>>
    %996 = vector.broadcast %995 : f32 to vector<1x64xf32>
    %997 = arith.mulf %996, %223 : vector<1x64xf32>
    %998 = arith.addf %994, %997 : vector<1x64xf32>
    %c137 = arith.constant 137 : index
    %999 = memref.load %arg7[%c137] : memref<256xf32, #tpu.memory_space<smem>>
    %1000 = vector.broadcast %999 : f32 to vector<1x64xf32>
    %1001 = arith.mulf %1000, %254 : vector<1x64xf32>
    %1002 = arith.addf %998, %1001 : vector<1x64xf32>
    %c138 = arith.constant 138 : index
    %1003 = memref.load %arg7[%c138] : memref<256xf32, #tpu.memory_space<smem>>
    %1004 = vector.broadcast %1003 : f32 to vector<1x64xf32>
    %1005 = arith.mulf %1004, %285 : vector<1x64xf32>
    %1006 = arith.addf %1002, %1005 : vector<1x64xf32>
    %c139 = arith.constant 139 : index
    %1007 = memref.load %arg7[%c139] : memref<256xf32, #tpu.memory_space<smem>>
    %1008 = vector.broadcast %1007 : f32 to vector<1x64xf32>
    %1009 = arith.mulf %1008, %316 : vector<1x64xf32>
    %1010 = arith.addf %1006, %1009 : vector<1x64xf32>
    %c152 = arith.constant 152 : index
    %1011 = memref.load %arg7[%c152] : memref<256xf32, #tpu.memory_space<smem>>
    %1012 = vector.broadcast %1011 : f32 to vector<1x64xf32>
    %1013 = arith.mulf %1012, %208 : vector<1x64xf32>
    %1014 = arith.addf %1010, %1013 : vector<1x64xf32>
    %c153 = arith.constant 153 : index
    %1015 = memref.load %arg7[%c153] : memref<256xf32, #tpu.memory_space<smem>>
    %1016 = vector.broadcast %1015 : f32 to vector<1x64xf32>
    %1017 = arith.mulf %1016, %239 : vector<1x64xf32>
    %1018 = arith.addf %1014, %1017 : vector<1x64xf32>
    %c154 = arith.constant 154 : index
    %1019 = memref.load %arg7[%c154] : memref<256xf32, #tpu.memory_space<smem>>
    %1020 = vector.broadcast %1019 : f32 to vector<1x64xf32>
    %1021 = arith.mulf %1020, %270 : vector<1x64xf32>
    %1022 = arith.addf %1018, %1021 : vector<1x64xf32>
    %c155 = arith.constant 155 : index
    %1023 = memref.load %arg7[%c155] : memref<256xf32, #tpu.memory_space<smem>>
    %1024 = vector.broadcast %1023 : f32 to vector<1x64xf32>
    %1025 = arith.mulf %1024, %301 : vector<1x64xf32>
    %1026 = arith.addf %1022, %1025 : vector<1x64xf32>
    %c168 = arith.constant 168 : index
    %1027 = memref.load %arg7[%c168] : memref<256xf32, #tpu.memory_space<smem>>
    %1028 = vector.broadcast %1027 : f32 to vector<1x64xf32>
    %1029 = arith.mulf %1028, %231 : vector<1x64xf32>
    %1030 = arith.addf %1026, %1029 : vector<1x64xf32>
    %c169 = arith.constant 169 : index
    %1031 = memref.load %arg7[%c169] : memref<256xf32, #tpu.memory_space<smem>>
    %1032 = vector.broadcast %1031 : f32 to vector<1x64xf32>
    %1033 = arith.mulf %1032, %262 : vector<1x64xf32>
    %1034 = arith.addf %1030, %1033 : vector<1x64xf32>
    %c170 = arith.constant 170 : index
    %1035 = memref.load %arg7[%c170] : memref<256xf32, #tpu.memory_space<smem>>
    %1036 = vector.broadcast %1035 : f32 to vector<1x64xf32>
    %1037 = arith.mulf %1036, %293 : vector<1x64xf32>
    %1038 = arith.addf %1034, %1037 : vector<1x64xf32>
    %c171 = arith.constant 171 : index
    %1039 = memref.load %arg7[%c171] : memref<256xf32, #tpu.memory_space<smem>>
    %1040 = vector.broadcast %1039 : f32 to vector<1x64xf32>
    %1041 = arith.mulf %1040, %324 : vector<1x64xf32>
    %1042 = arith.addf %1038, %1041 : vector<1x64xf32>
    %c184 = arith.constant 184 : index
    %1043 = memref.load %arg7[%c184] : memref<256xf32, #tpu.memory_space<smem>>
    %1044 = vector.broadcast %1043 : f32 to vector<1x64xf32>
    %1045 = arith.mulf %1044, %233 : vector<1x64xf32>
    %1046 = arith.addf %1042, %1045 : vector<1x64xf32>
    %c185 = arith.constant 185 : index
    %1047 = memref.load %arg7[%c185] : memref<256xf32, #tpu.memory_space<smem>>
    %1048 = vector.broadcast %1047 : f32 to vector<1x64xf32>
    %1049 = arith.mulf %1048, %264 : vector<1x64xf32>
    %1050 = arith.addf %1046, %1049 : vector<1x64xf32>
    %c186 = arith.constant 186 : index
    %1051 = memref.load %arg7[%c186] : memref<256xf32, #tpu.memory_space<smem>>
    %1052 = vector.broadcast %1051 : f32 to vector<1x64xf32>
    %1053 = arith.mulf %1052, %295 : vector<1x64xf32>
    %1054 = arith.addf %1050, %1053 : vector<1x64xf32>
    %c187 = arith.constant 187 : index
    %1055 = memref.load %arg7[%c187] : memref<256xf32, #tpu.memory_space<smem>>
    %1056 = vector.broadcast %1055 : f32 to vector<1x64xf32>
    %1057 = arith.mulf %1056, %326 : vector<1x64xf32>
    %1058 = arith.addf %1054, %1057 : vector<1x64xf32>
    %cst_78 = arith.constant 0.000000e+00 : f32
    %1059 = vector.broadcast %cst_78 : f32 to vector<1x64xf32>
    %c200 = arith.constant 200 : index
    %1060 = memref.load %arg7[%c200] : memref<256xf32, #tpu.memory_space<smem>>
    %1061 = vector.broadcast %1060 : f32 to vector<1x64xf32>
    %1062 = arith.mulf %1061, %208 : vector<1x64xf32>
    %1063 = arith.addf %1059, %1062 : vector<1x64xf32>
    %c201 = arith.constant 201 : index
    %1064 = memref.load %arg7[%c201] : memref<256xf32, #tpu.memory_space<smem>>
    %1065 = vector.broadcast %1064 : f32 to vector<1x64xf32>
    %1066 = arith.mulf %1065, %239 : vector<1x64xf32>
    %1067 = arith.addf %1063, %1066 : vector<1x64xf32>
    %c202 = arith.constant 202 : index
    %1068 = memref.load %arg7[%c202] : memref<256xf32, #tpu.memory_space<smem>>
    %1069 = vector.broadcast %1068 : f32 to vector<1x64xf32>
    %1070 = arith.mulf %1069, %270 : vector<1x64xf32>
    %1071 = arith.addf %1067, %1070 : vector<1x64xf32>
    %c203 = arith.constant 203 : index
    %1072 = memref.load %arg7[%c203] : memref<256xf32, #tpu.memory_space<smem>>
    %1073 = vector.broadcast %1072 : f32 to vector<1x64xf32>
    %1074 = arith.mulf %1073, %301 : vector<1x64xf32>
    %1075 = arith.addf %1071, %1074 : vector<1x64xf32>
    %c216 = arith.constant 216 : index
    %1076 = memref.load %arg7[%c216] : memref<256xf32, #tpu.memory_space<smem>>
    %1077 = vector.broadcast %1076 : f32 to vector<1x64xf32>
    %1078 = arith.mulf %1077, %226 : vector<1x64xf32>
    %1079 = arith.addf %1075, %1078 : vector<1x64xf32>
    %c217 = arith.constant 217 : index
    %1080 = memref.load %arg7[%c217] : memref<256xf32, #tpu.memory_space<smem>>
    %1081 = vector.broadcast %1080 : f32 to vector<1x64xf32>
    %1082 = arith.mulf %1081, %257 : vector<1x64xf32>
    %1083 = arith.addf %1079, %1082 : vector<1x64xf32>
    %c218 = arith.constant 218 : index
    %1084 = memref.load %arg7[%c218] : memref<256xf32, #tpu.memory_space<smem>>
    %1085 = vector.broadcast %1084 : f32 to vector<1x64xf32>
    %1086 = arith.mulf %1085, %288 : vector<1x64xf32>
    %1087 = arith.addf %1083, %1086 : vector<1x64xf32>
    %c219 = arith.constant 219 : index
    %1088 = memref.load %arg7[%c219] : memref<256xf32, #tpu.memory_space<smem>>
    %1089 = vector.broadcast %1088 : f32 to vector<1x64xf32>
    %1090 = arith.mulf %1089, %319 : vector<1x64xf32>
    %1091 = arith.addf %1087, %1090 : vector<1x64xf32>
    %c232 = arith.constant 232 : index
    %1092 = memref.load %arg7[%c232] : memref<256xf32, #tpu.memory_space<smem>>
    %1093 = vector.broadcast %1092 : f32 to vector<1x64xf32>
    %1094 = arith.mulf %1093, %233 : vector<1x64xf32>
    %1095 = arith.addf %1091, %1094 : vector<1x64xf32>
    %c233 = arith.constant 233 : index
    %1096 = memref.load %arg7[%c233] : memref<256xf32, #tpu.memory_space<smem>>
    %1097 = vector.broadcast %1096 : f32 to vector<1x64xf32>
    %1098 = arith.mulf %1097, %264 : vector<1x64xf32>
    %1099 = arith.addf %1095, %1098 : vector<1x64xf32>
    %c234 = arith.constant 234 : index
    %1100 = memref.load %arg7[%c234] : memref<256xf32, #tpu.memory_space<smem>>
    %1101 = vector.broadcast %1100 : f32 to vector<1x64xf32>
    %1102 = arith.mulf %1101, %295 : vector<1x64xf32>
    %1103 = arith.addf %1099, %1102 : vector<1x64xf32>
    %c235 = arith.constant 235 : index
    %1104 = memref.load %arg7[%c235] : memref<256xf32, #tpu.memory_space<smem>>
    %1105 = vector.broadcast %1104 : f32 to vector<1x64xf32>
    %1106 = arith.mulf %1105, %326 : vector<1x64xf32>
    %1107 = arith.addf %1103, %1106 : vector<1x64xf32>
    %c248 = arith.constant 248 : index
    %1108 = memref.load %arg7[%c248] : memref<256xf32, #tpu.memory_space<smem>>
    %1109 = vector.broadcast %1108 : f32 to vector<1x64xf32>
    %1110 = arith.mulf %1109, %238 : vector<1x64xf32>
    %1111 = arith.addf %1107, %1110 : vector<1x64xf32>
    %c249 = arith.constant 249 : index
    %1112 = memref.load %arg7[%c249] : memref<256xf32, #tpu.memory_space<smem>>
    %1113 = vector.broadcast %1112 : f32 to vector<1x64xf32>
    %1114 = arith.mulf %1113, %269 : vector<1x64xf32>
    %1115 = arith.addf %1111, %1114 : vector<1x64xf32>
    %c250 = arith.constant 250 : index
    %1116 = memref.load %arg7[%c250] : memref<256xf32, #tpu.memory_space<smem>>
    %1117 = vector.broadcast %1116 : f32 to vector<1x64xf32>
    %1118 = arith.mulf %1117, %300 : vector<1x64xf32>
    %1119 = arith.addf %1115, %1118 : vector<1x64xf32>
    %c251 = arith.constant 251 : index
    %1120 = memref.load %arg7[%c251] : memref<256xf32, #tpu.memory_space<smem>>
    %1121 = vector.broadcast %1120 : f32 to vector<1x64xf32>
    %1122 = arith.mulf %1121, %331 : vector<1x64xf32>
    %1123 = arith.addf %1119, %1122 : vector<1x64xf32>
    %1124 = tpu.concatenate %928, %993, %1058, %1123 in 1 : vector<1x64xf32>, vector<1x64xf32>, vector<1x64xf32>, vector<1x64xf32> -> vector<1x256xf32>
    %c2_79 = arith.constant 2 : index
    %1125 = memref.load %arg8[%c2_79] : memref<4xf32, #tpu.memory_space<smem>>
    %1126 = vector.broadcast %1125 : f32 to vector<1x256xf32>
    %1127 = arith.addf %1124, %1126 : vector<1x256xf32>
    %cst_80 = arith.constant 0.000000e+00 : f32
    %1128 = vector.broadcast %cst_80 : f32 to vector<1x256xf32>
    %1129 = arith.maximumf %1127, %1128 : vector<1x256xf32>
    %cst_81 = arith.constant 0.000000e+00 : f32
    %1130 = vector.broadcast %cst_81 : f32 to vector<1x64xf32>
    %c12_82 = arith.constant 12 : index
    %1131 = memref.load %arg7[%c12_82] : memref<256xf32, #tpu.memory_space<smem>>
    %1132 = vector.broadcast %1131 : f32 to vector<1x64xf32>
    %1133 = arith.mulf %1132, %213 : vector<1x64xf32>
    %1134 = arith.addf %1130, %1133 : vector<1x64xf32>
    %c13_83 = arith.constant 13 : index
    %1135 = memref.load %arg7[%c13_83] : memref<256xf32, #tpu.memory_space<smem>>
    %1136 = vector.broadcast %1135 : f32 to vector<1x64xf32>
    %1137 = arith.mulf %1136, %244 : vector<1x64xf32>
    %1138 = arith.addf %1134, %1137 : vector<1x64xf32>
    %c14_84 = arith.constant 14 : index
    %1139 = memref.load %arg7[%c14_84] : memref<256xf32, #tpu.memory_space<smem>>
    %1140 = vector.broadcast %1139 : f32 to vector<1x64xf32>
    %1141 = arith.mulf %1140, %275 : vector<1x64xf32>
    %1142 = arith.addf %1138, %1141 : vector<1x64xf32>
    %c15_85 = arith.constant 15 : index
    %1143 = memref.load %arg7[%c15_85] : memref<256xf32, #tpu.memory_space<smem>>
    %1144 = vector.broadcast %1143 : f32 to vector<1x64xf32>
    %1145 = arith.mulf %1144, %306 : vector<1x64xf32>
    %1146 = arith.addf %1142, %1145 : vector<1x64xf32>
    %c28 = arith.constant 28 : index
    %1147 = memref.load %arg7[%c28] : memref<256xf32, #tpu.memory_space<smem>>
    %1148 = vector.broadcast %1147 : f32 to vector<1x64xf32>
    %1149 = arith.mulf %1148, %215 : vector<1x64xf32>
    %1150 = arith.addf %1146, %1149 : vector<1x64xf32>
    %c29 = arith.constant 29 : index
    %1151 = memref.load %arg7[%c29] : memref<256xf32, #tpu.memory_space<smem>>
    %1152 = vector.broadcast %1151 : f32 to vector<1x64xf32>
    %1153 = arith.mulf %1152, %246 : vector<1x64xf32>
    %1154 = arith.addf %1150, %1153 : vector<1x64xf32>
    %c30 = arith.constant 30 : index
    %1155 = memref.load %arg7[%c30] : memref<256xf32, #tpu.memory_space<smem>>
    %1156 = vector.broadcast %1155 : f32 to vector<1x64xf32>
    %1157 = arith.mulf %1156, %277 : vector<1x64xf32>
    %1158 = arith.addf %1154, %1157 : vector<1x64xf32>
    %c31 = arith.constant 31 : index
    %1159 = memref.load %arg7[%c31] : memref<256xf32, #tpu.memory_space<smem>>
    %1160 = vector.broadcast %1159 : f32 to vector<1x64xf32>
    %1161 = arith.mulf %1160, %308 : vector<1x64xf32>
    %1162 = arith.addf %1158, %1161 : vector<1x64xf32>
    %c44 = arith.constant 44 : index
    %1163 = memref.load %arg7[%c44] : memref<256xf32, #tpu.memory_space<smem>>
    %1164 = vector.broadcast %1163 : f32 to vector<1x64xf32>
    %1165 = arith.mulf %1164, %223 : vector<1x64xf32>
    %1166 = arith.addf %1162, %1165 : vector<1x64xf32>
    %c45 = arith.constant 45 : index
    %1167 = memref.load %arg7[%c45] : memref<256xf32, #tpu.memory_space<smem>>
    %1168 = vector.broadcast %1167 : f32 to vector<1x64xf32>
    %1169 = arith.mulf %1168, %254 : vector<1x64xf32>
    %1170 = arith.addf %1166, %1169 : vector<1x64xf32>
    %c46 = arith.constant 46 : index
    %1171 = memref.load %arg7[%c46] : memref<256xf32, #tpu.memory_space<smem>>
    %1172 = vector.broadcast %1171 : f32 to vector<1x64xf32>
    %1173 = arith.mulf %1172, %285 : vector<1x64xf32>
    %1174 = arith.addf %1170, %1173 : vector<1x64xf32>
    %c47 = arith.constant 47 : index
    %1175 = memref.load %arg7[%c47] : memref<256xf32, #tpu.memory_space<smem>>
    %1176 = vector.broadcast %1175 : f32 to vector<1x64xf32>
    %1177 = arith.mulf %1176, %316 : vector<1x64xf32>
    %1178 = arith.addf %1174, %1177 : vector<1x64xf32>
    %c60 = arith.constant 60 : index
    %1179 = memref.load %arg7[%c60] : memref<256xf32, #tpu.memory_space<smem>>
    %1180 = vector.broadcast %1179 : f32 to vector<1x64xf32>
    %1181 = arith.mulf %1180, %208 : vector<1x64xf32>
    %1182 = arith.addf %1178, %1181 : vector<1x64xf32>
    %c61 = arith.constant 61 : index
    %1183 = memref.load %arg7[%c61] : memref<256xf32, #tpu.memory_space<smem>>
    %1184 = vector.broadcast %1183 : f32 to vector<1x64xf32>
    %1185 = arith.mulf %1184, %239 : vector<1x64xf32>
    %1186 = arith.addf %1182, %1185 : vector<1x64xf32>
    %c62 = arith.constant 62 : index
    %1187 = memref.load %arg7[%c62] : memref<256xf32, #tpu.memory_space<smem>>
    %1188 = vector.broadcast %1187 : f32 to vector<1x64xf32>
    %1189 = arith.mulf %1188, %270 : vector<1x64xf32>
    %1190 = arith.addf %1186, %1189 : vector<1x64xf32>
    %c63 = arith.constant 63 : index
    %1191 = memref.load %arg7[%c63] : memref<256xf32, #tpu.memory_space<smem>>
    %1192 = vector.broadcast %1191 : f32 to vector<1x64xf32>
    %1193 = arith.mulf %1192, %301 : vector<1x64xf32>
    %1194 = arith.addf %1190, %1193 : vector<1x64xf32>
    %cst_86 = arith.constant 0.000000e+00 : f32
    %1195 = vector.broadcast %cst_86 : f32 to vector<1x64xf32>
    %c76 = arith.constant 76 : index
    %1196 = memref.load %arg7[%c76] : memref<256xf32, #tpu.memory_space<smem>>
    %1197 = vector.broadcast %1196 : f32 to vector<1x64xf32>
    %1198 = arith.mulf %1197, %215 : vector<1x64xf32>
    %1199 = arith.addf %1195, %1198 : vector<1x64xf32>
    %c77 = arith.constant 77 : index
    %1200 = memref.load %arg7[%c77] : memref<256xf32, #tpu.memory_space<smem>>
    %1201 = vector.broadcast %1200 : f32 to vector<1x64xf32>
    %1202 = arith.mulf %1201, %246 : vector<1x64xf32>
    %1203 = arith.addf %1199, %1202 : vector<1x64xf32>
    %c78 = arith.constant 78 : index
    %1204 = memref.load %arg7[%c78] : memref<256xf32, #tpu.memory_space<smem>>
    %1205 = vector.broadcast %1204 : f32 to vector<1x64xf32>
    %1206 = arith.mulf %1205, %277 : vector<1x64xf32>
    %1207 = arith.addf %1203, %1206 : vector<1x64xf32>
    %c79 = arith.constant 79 : index
    %1208 = memref.load %arg7[%c79] : memref<256xf32, #tpu.memory_space<smem>>
    %1209 = vector.broadcast %1208 : f32 to vector<1x64xf32>
    %1210 = arith.mulf %1209, %308 : vector<1x64xf32>
    %1211 = arith.addf %1207, %1210 : vector<1x64xf32>
    %c92 = arith.constant 92 : index
    %1212 = memref.load %arg7[%c92] : memref<256xf32, #tpu.memory_space<smem>>
    %1213 = vector.broadcast %1212 : f32 to vector<1x64xf32>
    %1214 = arith.mulf %1213, %220 : vector<1x64xf32>
    %1215 = arith.addf %1211, %1214 : vector<1x64xf32>
    %c93 = arith.constant 93 : index
    %1216 = memref.load %arg7[%c93] : memref<256xf32, #tpu.memory_space<smem>>
    %1217 = vector.broadcast %1216 : f32 to vector<1x64xf32>
    %1218 = arith.mulf %1217, %251 : vector<1x64xf32>
    %1219 = arith.addf %1215, %1218 : vector<1x64xf32>
    %c94 = arith.constant 94 : index
    %1220 = memref.load %arg7[%c94] : memref<256xf32, #tpu.memory_space<smem>>
    %1221 = vector.broadcast %1220 : f32 to vector<1x64xf32>
    %1222 = arith.mulf %1221, %282 : vector<1x64xf32>
    %1223 = arith.addf %1219, %1222 : vector<1x64xf32>
    %c95 = arith.constant 95 : index
    %1224 = memref.load %arg7[%c95] : memref<256xf32, #tpu.memory_space<smem>>
    %1225 = vector.broadcast %1224 : f32 to vector<1x64xf32>
    %1226 = arith.mulf %1225, %313 : vector<1x64xf32>
    %1227 = arith.addf %1223, %1226 : vector<1x64xf32>
    %c108 = arith.constant 108 : index
    %1228 = memref.load %arg7[%c108] : memref<256xf32, #tpu.memory_space<smem>>
    %1229 = vector.broadcast %1228 : f32 to vector<1x64xf32>
    %1230 = arith.mulf %1229, %208 : vector<1x64xf32>
    %1231 = arith.addf %1227, %1230 : vector<1x64xf32>
    %c109 = arith.constant 109 : index
    %1232 = memref.load %arg7[%c109] : memref<256xf32, #tpu.memory_space<smem>>
    %1233 = vector.broadcast %1232 : f32 to vector<1x64xf32>
    %1234 = arith.mulf %1233, %239 : vector<1x64xf32>
    %1235 = arith.addf %1231, %1234 : vector<1x64xf32>
    %c110 = arith.constant 110 : index
    %1236 = memref.load %arg7[%c110] : memref<256xf32, #tpu.memory_space<smem>>
    %1237 = vector.broadcast %1236 : f32 to vector<1x64xf32>
    %1238 = arith.mulf %1237, %270 : vector<1x64xf32>
    %1239 = arith.addf %1235, %1238 : vector<1x64xf32>
    %c111 = arith.constant 111 : index
    %1240 = memref.load %arg7[%c111] : memref<256xf32, #tpu.memory_space<smem>>
    %1241 = vector.broadcast %1240 : f32 to vector<1x64xf32>
    %1242 = arith.mulf %1241, %301 : vector<1x64xf32>
    %1243 = arith.addf %1239, %1242 : vector<1x64xf32>
    %c124 = arith.constant 124 : index
    %1244 = memref.load %arg7[%c124] : memref<256xf32, #tpu.memory_space<smem>>
    %1245 = vector.broadcast %1244 : f32 to vector<1x64xf32>
    %1246 = arith.mulf %1245, %226 : vector<1x64xf32>
    %1247 = arith.addf %1243, %1246 : vector<1x64xf32>
    %c125 = arith.constant 125 : index
    %1248 = memref.load %arg7[%c125] : memref<256xf32, #tpu.memory_space<smem>>
    %1249 = vector.broadcast %1248 : f32 to vector<1x64xf32>
    %1250 = arith.mulf %1249, %257 : vector<1x64xf32>
    %1251 = arith.addf %1247, %1250 : vector<1x64xf32>
    %c126 = arith.constant 126 : index
    %1252 = memref.load %arg7[%c126] : memref<256xf32, #tpu.memory_space<smem>>
    %1253 = vector.broadcast %1252 : f32 to vector<1x64xf32>
    %1254 = arith.mulf %1253, %288 : vector<1x64xf32>
    %1255 = arith.addf %1251, %1254 : vector<1x64xf32>
    %c127 = arith.constant 127 : index
    %1256 = memref.load %arg7[%c127] : memref<256xf32, #tpu.memory_space<smem>>
    %1257 = vector.broadcast %1256 : f32 to vector<1x64xf32>
    %1258 = arith.mulf %1257, %319 : vector<1x64xf32>
    %1259 = arith.addf %1255, %1258 : vector<1x64xf32>
    %cst_87 = arith.constant 0.000000e+00 : f32
    %1260 = vector.broadcast %cst_87 : f32 to vector<1x64xf32>
    %c140 = arith.constant 140 : index
    %1261 = memref.load %arg7[%c140] : memref<256xf32, #tpu.memory_space<smem>>
    %1262 = vector.broadcast %1261 : f32 to vector<1x64xf32>
    %1263 = arith.mulf %1262, %223 : vector<1x64xf32>
    %1264 = arith.addf %1260, %1263 : vector<1x64xf32>
    %c141 = arith.constant 141 : index
    %1265 = memref.load %arg7[%c141] : memref<256xf32, #tpu.memory_space<smem>>
    %1266 = vector.broadcast %1265 : f32 to vector<1x64xf32>
    %1267 = arith.mulf %1266, %254 : vector<1x64xf32>
    %1268 = arith.addf %1264, %1267 : vector<1x64xf32>
    %c142 = arith.constant 142 : index
    %1269 = memref.load %arg7[%c142] : memref<256xf32, #tpu.memory_space<smem>>
    %1270 = vector.broadcast %1269 : f32 to vector<1x64xf32>
    %1271 = arith.mulf %1270, %285 : vector<1x64xf32>
    %1272 = arith.addf %1268, %1271 : vector<1x64xf32>
    %c143 = arith.constant 143 : index
    %1273 = memref.load %arg7[%c143] : memref<256xf32, #tpu.memory_space<smem>>
    %1274 = vector.broadcast %1273 : f32 to vector<1x64xf32>
    %1275 = arith.mulf %1274, %316 : vector<1x64xf32>
    %1276 = arith.addf %1272, %1275 : vector<1x64xf32>
    %c156 = arith.constant 156 : index
    %1277 = memref.load %arg7[%c156] : memref<256xf32, #tpu.memory_space<smem>>
    %1278 = vector.broadcast %1277 : f32 to vector<1x64xf32>
    %1279 = arith.mulf %1278, %208 : vector<1x64xf32>
    %1280 = arith.addf %1276, %1279 : vector<1x64xf32>
    %c157 = arith.constant 157 : index
    %1281 = memref.load %arg7[%c157] : memref<256xf32, #tpu.memory_space<smem>>
    %1282 = vector.broadcast %1281 : f32 to vector<1x64xf32>
    %1283 = arith.mulf %1282, %239 : vector<1x64xf32>
    %1284 = arith.addf %1280, %1283 : vector<1x64xf32>
    %c158 = arith.constant 158 : index
    %1285 = memref.load %arg7[%c158] : memref<256xf32, #tpu.memory_space<smem>>
    %1286 = vector.broadcast %1285 : f32 to vector<1x64xf32>
    %1287 = arith.mulf %1286, %270 : vector<1x64xf32>
    %1288 = arith.addf %1284, %1287 : vector<1x64xf32>
    %c159 = arith.constant 159 : index
    %1289 = memref.load %arg7[%c159] : memref<256xf32, #tpu.memory_space<smem>>
    %1290 = vector.broadcast %1289 : f32 to vector<1x64xf32>
    %1291 = arith.mulf %1290, %301 : vector<1x64xf32>
    %1292 = arith.addf %1288, %1291 : vector<1x64xf32>
    %c172 = arith.constant 172 : index
    %1293 = memref.load %arg7[%c172] : memref<256xf32, #tpu.memory_space<smem>>
    %1294 = vector.broadcast %1293 : f32 to vector<1x64xf32>
    %1295 = arith.mulf %1294, %231 : vector<1x64xf32>
    %1296 = arith.addf %1292, %1295 : vector<1x64xf32>
    %c173 = arith.constant 173 : index
    %1297 = memref.load %arg7[%c173] : memref<256xf32, #tpu.memory_space<smem>>
    %1298 = vector.broadcast %1297 : f32 to vector<1x64xf32>
    %1299 = arith.mulf %1298, %262 : vector<1x64xf32>
    %1300 = arith.addf %1296, %1299 : vector<1x64xf32>
    %c174 = arith.constant 174 : index
    %1301 = memref.load %arg7[%c174] : memref<256xf32, #tpu.memory_space<smem>>
    %1302 = vector.broadcast %1301 : f32 to vector<1x64xf32>
    %1303 = arith.mulf %1302, %293 : vector<1x64xf32>
    %1304 = arith.addf %1300, %1303 : vector<1x64xf32>
    %c175 = arith.constant 175 : index
    %1305 = memref.load %arg7[%c175] : memref<256xf32, #tpu.memory_space<smem>>
    %1306 = vector.broadcast %1305 : f32 to vector<1x64xf32>
    %1307 = arith.mulf %1306, %324 : vector<1x64xf32>
    %1308 = arith.addf %1304, %1307 : vector<1x64xf32>
    %c188 = arith.constant 188 : index
    %1309 = memref.load %arg7[%c188] : memref<256xf32, #tpu.memory_space<smem>>
    %1310 = vector.broadcast %1309 : f32 to vector<1x64xf32>
    %1311 = arith.mulf %1310, %233 : vector<1x64xf32>
    %1312 = arith.addf %1308, %1311 : vector<1x64xf32>
    %c189 = arith.constant 189 : index
    %1313 = memref.load %arg7[%c189] : memref<256xf32, #tpu.memory_space<smem>>
    %1314 = vector.broadcast %1313 : f32 to vector<1x64xf32>
    %1315 = arith.mulf %1314, %264 : vector<1x64xf32>
    %1316 = arith.addf %1312, %1315 : vector<1x64xf32>
    %c190 = arith.constant 190 : index
    %1317 = memref.load %arg7[%c190] : memref<256xf32, #tpu.memory_space<smem>>
    %1318 = vector.broadcast %1317 : f32 to vector<1x64xf32>
    %1319 = arith.mulf %1318, %295 : vector<1x64xf32>
    %1320 = arith.addf %1316, %1319 : vector<1x64xf32>
    %c191 = arith.constant 191 : index
    %1321 = memref.load %arg7[%c191] : memref<256xf32, #tpu.memory_space<smem>>
    %1322 = vector.broadcast %1321 : f32 to vector<1x64xf32>
    %1323 = arith.mulf %1322, %326 : vector<1x64xf32>
    %1324 = arith.addf %1320, %1323 : vector<1x64xf32>
    %cst_88 = arith.constant 0.000000e+00 : f32
    %1325 = vector.broadcast %cst_88 : f32 to vector<1x64xf32>
    %c204 = arith.constant 204 : index
    %1326 = memref.load %arg7[%c204] : memref<256xf32, #tpu.memory_space<smem>>
    %1327 = vector.broadcast %1326 : f32 to vector<1x64xf32>
    %1328 = arith.mulf %1327, %208 : vector<1x64xf32>
    %1329 = arith.addf %1325, %1328 : vector<1x64xf32>
    %c205 = arith.constant 205 : index
    %1330 = memref.load %arg7[%c205] : memref<256xf32, #tpu.memory_space<smem>>
    %1331 = vector.broadcast %1330 : f32 to vector<1x64xf32>
    %1332 = arith.mulf %1331, %239 : vector<1x64xf32>
    %1333 = arith.addf %1329, %1332 : vector<1x64xf32>
    %c206 = arith.constant 206 : index
    %1334 = memref.load %arg7[%c206] : memref<256xf32, #tpu.memory_space<smem>>
    %1335 = vector.broadcast %1334 : f32 to vector<1x64xf32>
    %1336 = arith.mulf %1335, %270 : vector<1x64xf32>
    %1337 = arith.addf %1333, %1336 : vector<1x64xf32>
    %c207 = arith.constant 207 : index
    %1338 = memref.load %arg7[%c207] : memref<256xf32, #tpu.memory_space<smem>>
    %1339 = vector.broadcast %1338 : f32 to vector<1x64xf32>
    %1340 = arith.mulf %1339, %301 : vector<1x64xf32>
    %1341 = arith.addf %1337, %1340 : vector<1x64xf32>
    %c220 = arith.constant 220 : index
    %1342 = memref.load %arg7[%c220] : memref<256xf32, #tpu.memory_space<smem>>
    %1343 = vector.broadcast %1342 : f32 to vector<1x64xf32>
    %1344 = arith.mulf %1343, %226 : vector<1x64xf32>
    %1345 = arith.addf %1341, %1344 : vector<1x64xf32>
    %c221 = arith.constant 221 : index
    %1346 = memref.load %arg7[%c221] : memref<256xf32, #tpu.memory_space<smem>>
    %1347 = vector.broadcast %1346 : f32 to vector<1x64xf32>
    %1348 = arith.mulf %1347, %257 : vector<1x64xf32>
    %1349 = arith.addf %1345, %1348 : vector<1x64xf32>
    %c222 = arith.constant 222 : index
    %1350 = memref.load %arg7[%c222] : memref<256xf32, #tpu.memory_space<smem>>
    %1351 = vector.broadcast %1350 : f32 to vector<1x64xf32>
    %1352 = arith.mulf %1351, %288 : vector<1x64xf32>
    %1353 = arith.addf %1349, %1352 : vector<1x64xf32>
    %c223 = arith.constant 223 : index
    %1354 = memref.load %arg7[%c223] : memref<256xf32, #tpu.memory_space<smem>>
    %1355 = vector.broadcast %1354 : f32 to vector<1x64xf32>
    %1356 = arith.mulf %1355, %319 : vector<1x64xf32>
    %1357 = arith.addf %1353, %1356 : vector<1x64xf32>
    %c236 = arith.constant 236 : index
    %1358 = memref.load %arg7[%c236] : memref<256xf32, #tpu.memory_space<smem>>
    %1359 = vector.broadcast %1358 : f32 to vector<1x64xf32>
    %1360 = arith.mulf %1359, %233 : vector<1x64xf32>
    %1361 = arith.addf %1357, %1360 : vector<1x64xf32>
    %c237 = arith.constant 237 : index
    %1362 = memref.load %arg7[%c237] : memref<256xf32, #tpu.memory_space<smem>>
    %1363 = vector.broadcast %1362 : f32 to vector<1x64xf32>
    %1364 = arith.mulf %1363, %264 : vector<1x64xf32>
    %1365 = arith.addf %1361, %1364 : vector<1x64xf32>
    %c238 = arith.constant 238 : index
    %1366 = memref.load %arg7[%c238] : memref<256xf32, #tpu.memory_space<smem>>
    %1367 = vector.broadcast %1366 : f32 to vector<1x64xf32>
    %1368 = arith.mulf %1367, %295 : vector<1x64xf32>
    %1369 = arith.addf %1365, %1368 : vector<1x64xf32>
    %c239 = arith.constant 239 : index
    %1370 = memref.load %arg7[%c239] : memref<256xf32, #tpu.memory_space<smem>>
    %1371 = vector.broadcast %1370 : f32 to vector<1x64xf32>
    %1372 = arith.mulf %1371, %326 : vector<1x64xf32>
    %1373 = arith.addf %1369, %1372 : vector<1x64xf32>
    %c252 = arith.constant 252 : index
    %1374 = memref.load %arg7[%c252] : memref<256xf32, #tpu.memory_space<smem>>
    %1375 = vector.broadcast %1374 : f32 to vector<1x64xf32>
    %1376 = arith.mulf %1375, %238 : vector<1x64xf32>
    %1377 = arith.addf %1373, %1376 : vector<1x64xf32>
    %c253 = arith.constant 253 : index
    %1378 = memref.load %arg7[%c253] : memref<256xf32, #tpu.memory_space<smem>>
    %1379 = vector.broadcast %1378 : f32 to vector<1x64xf32>
    %1380 = arith.mulf %1379, %269 : vector<1x64xf32>
    %1381 = arith.addf %1377, %1380 : vector<1x64xf32>
    %c254 = arith.constant 254 : index
    %1382 = memref.load %arg7[%c254] : memref<256xf32, #tpu.memory_space<smem>>
    %1383 = vector.broadcast %1382 : f32 to vector<1x64xf32>
    %1384 = arith.mulf %1383, %300 : vector<1x64xf32>
    %1385 = arith.addf %1381, %1384 : vector<1x64xf32>
    %c255 = arith.constant 255 : index
    %1386 = memref.load %arg7[%c255] : memref<256xf32, #tpu.memory_space<smem>>
    %1387 = vector.broadcast %1386 : f32 to vector<1x64xf32>
    %1388 = arith.mulf %1387, %331 : vector<1x64xf32>
    %1389 = arith.addf %1385, %1388 : vector<1x64xf32>
    %1390 = tpu.concatenate %1194, %1259, %1324, %1389 in 1 : vector<1x64xf32>, vector<1x64xf32>, vector<1x64xf32>, vector<1x64xf32> -> vector<1x256xf32>
    %c3_89 = arith.constant 3 : index
    %1391 = memref.load %arg8[%c3_89] : memref<4xf32, #tpu.memory_space<smem>>
    %1392 = vector.broadcast %1391 : f32 to vector<1x256xf32>
    %1393 = arith.addf %1390, %1392 : vector<1x256xf32>
    %cst_90 = arith.constant 0.000000e+00 : f32
    %1394 = vector.broadcast %cst_90 : f32 to vector<1x256xf32>
    %1395 = arith.maximumf %1393, %1394 : vector<1x256xf32>
    %cst_91 = arith.constant 0.000000e+00 : f32
    %1396 = vector.broadcast %cst_91 : f32 to vector<1x256xf32>
    %c0_92 = arith.constant 0 : index
    %1397 = memref.load %arg9[%c0_92] : memref<64xf32, #tpu.memory_space<smem>>
    %1398 = vector.broadcast %1397 : f32 to vector<1x256xf32>
    %1399 = arith.mulf %1398, %51 : vector<1x256xf32>
    %1400 = arith.addf %1396, %1399 : vector<1x256xf32>
    %c1_93 = arith.constant 1 : index
    %1401 = memref.load %arg9[%c1_93] : memref<64xf32, #tpu.memory_space<smem>>
    %1402 = vector.broadcast %1401 : f32 to vector<1x256xf32>
    %1403 = arith.mulf %1402, %101 : vector<1x256xf32>
    %1404 = arith.addf %1400, %1403 : vector<1x256xf32>
    %c2_94 = arith.constant 2 : index
    %1405 = memref.load %arg9[%c2_94] : memref<64xf32, #tpu.memory_space<smem>>
    %1406 = vector.broadcast %1405 : f32 to vector<1x256xf32>
    %1407 = arith.mulf %1406, %151 : vector<1x256xf32>
    %1408 = arith.addf %1404, %1407 : vector<1x256xf32>
    %c3_95 = arith.constant 3 : index
    %1409 = memref.load %arg9[%c3_95] : memref<64xf32, #tpu.memory_space<smem>>
    %1410 = vector.broadcast %1409 : f32 to vector<1x256xf32>
    %1411 = arith.mulf %1410, %201 : vector<1x256xf32>
    %1412 = arith.addf %1408, %1411 : vector<1x256xf32>
    %c4_96 = arith.constant 4 : index
    %1413 = memref.load %arg9[%c4_96] : memref<64xf32, #tpu.memory_space<smem>>
    %1414 = vector.broadcast %1413 : f32 to vector<1x256xf32>
    %1415 = arith.mulf %1414, %597 : vector<1x256xf32>
    %1416 = arith.addf %1412, %1415 : vector<1x256xf32>
    %c5_97 = arith.constant 5 : index
    %1417 = memref.load %arg9[%c5_97] : memref<64xf32, #tpu.memory_space<smem>>
    %1418 = vector.broadcast %1417 : f32 to vector<1x256xf32>
    %1419 = arith.mulf %1418, %863 : vector<1x256xf32>
    %1420 = arith.addf %1416, %1419 : vector<1x256xf32>
    %c6_98 = arith.constant 6 : index
    %1421 = memref.load %arg9[%c6_98] : memref<64xf32, #tpu.memory_space<smem>>
    %1422 = vector.broadcast %1421 : f32 to vector<1x256xf32>
    %1423 = arith.mulf %1422, %1129 : vector<1x256xf32>
    %1424 = arith.addf %1420, %1423 : vector<1x256xf32>
    %c7_99 = arith.constant 7 : index
    %1425 = memref.load %arg9[%c7_99] : memref<64xf32, #tpu.memory_space<smem>>
    %1426 = vector.broadcast %1425 : f32 to vector<1x256xf32>
    %1427 = arith.mulf %1426, %1395 : vector<1x256xf32>
    %1428 = arith.addf %1424, %1427 : vector<1x256xf32>
    %c0_100 = arith.constant 0 : index
    %1429 = memref.load %arg10[%c0_100] : memref<8xf32, #tpu.memory_space<smem>>
    %c0_101 = arith.constant 0 : index
    %1430 = memref.load %arg11[%c0_101] : memref<8xf32, #tpu.memory_space<smem>>
    %cst_102 = arith.constant dense<0.000000e+00> : vector<1xf32>
    %1431 = vector.multi_reduction <add>, %1428, %cst_102 [1] : vector<1x256xf32> to vector<1xf32>
    %1432 = vector.shape_cast %1431 : vector<1xf32> to vector<1x1xf32>
    %1433 = arith.mulf %1428, %1428 : vector<1x256xf32>
    %cst_103 = arith.constant dense<0.000000e+00> : vector<1xf32>
    %1434 = vector.multi_reduction <add>, %1433, %cst_103 [1] : vector<1x256xf32> to vector<1xf32>
    %1435 = vector.shape_cast %1434 : vector<1xf32> to vector<1x1xf32>
    %cst_104 = arith.constant 3.906250e-03 : f32
    %1436 = vector.broadcast %cst_104 : f32 to vector<1x1xf32>
    %1437 = arith.mulf %1432, %1436 : vector<1x1xf32>
    %cst_105 = arith.constant 3.906250e-03 : f32
    %1438 = vector.broadcast %cst_105 : f32 to vector<1x1xf32>
    %1439 = arith.mulf %1435, %1438 : vector<1x1xf32>
    %1440 = arith.mulf %1437, %1437 : vector<1x1xf32>
    %1441 = arith.subf %1439, %1440 : vector<1x1xf32>
    %cst_106 = arith.constant 0.000000e+00 : f32
    %1442 = vector.broadcast %cst_106 : f32 to vector<1x1xf32>
    %1443 = arith.maximumf %1441, %1442 : vector<1x1xf32>
    %cst_107 = arith.constant 9.99999974E-6 : f32
    %1444 = vector.broadcast %cst_107 : f32 to vector<1x1xf32>
    %1445 = arith.addf %1443, %1444 : vector<1x1xf32>
    %1446 = math.rsqrt %1445 : vector<1x1xf32>
    %1447 = vector.broadcast %1429 : f32 to vector<1x1xf32>
    %1448 = arith.mulf %1447, %1446 : vector<1x1xf32>
    %1449 = vector.broadcast %1448 : vector<1x1xf32> to vector<1x256xf32>
    %1450 = arith.mulf %1428, %1449 : vector<1x256xf32>
    %1451 = arith.mulf %1437, %1448 : vector<1x1xf32>
    %1452 = vector.broadcast %1430 : f32 to vector<1x1xf32>
    %1453 = arith.subf %1452, %1451 : vector<1x1xf32>
    %1454 = vector.broadcast %1453 : vector<1x1xf32> to vector<1x256xf32>
    %1455 = arith.addf %1450, %1454 : vector<1x256xf32>
    %cst_108 = arith.constant 0.000000e+00 : f32
    %1456 = vector.broadcast %cst_108 : f32 to vector<1x256xf32>
    %1457 = arith.maximumf %1455, %1456 : vector<1x256xf32>
    %cst_109 = arith.constant 0.000000e+00 : f32
    %1458 = vector.broadcast %cst_109 : f32 to vector<1x256xf32>
    %c8_110 = arith.constant 8 : index
    %1459 = memref.load %arg9[%c8_110] : memref<64xf32, #tpu.memory_space<smem>>
    %1460 = vector.broadcast %1459 : f32 to vector<1x256xf32>
    %1461 = arith.mulf %1460, %51 : vector<1x256xf32>
    %1462 = arith.addf %1458, %1461 : vector<1x256xf32>
    %c9_111 = arith.constant 9 : index
    %1463 = memref.load %arg9[%c9_111] : memref<64xf32, #tpu.memory_space<smem>>
    %1464 = vector.broadcast %1463 : f32 to vector<1x256xf32>
    %1465 = arith.mulf %1464, %101 : vector<1x256xf32>
    %1466 = arith.addf %1462, %1465 : vector<1x256xf32>
    %c10_112 = arith.constant 10 : index
    %1467 = memref.load %arg9[%c10_112] : memref<64xf32, #tpu.memory_space<smem>>
    %1468 = vector.broadcast %1467 : f32 to vector<1x256xf32>
    %1469 = arith.mulf %1468, %151 : vector<1x256xf32>
    %1470 = arith.addf %1466, %1469 : vector<1x256xf32>
    %c11_113 = arith.constant 11 : index
    %1471 = memref.load %arg9[%c11_113] : memref<64xf32, #tpu.memory_space<smem>>
    %1472 = vector.broadcast %1471 : f32 to vector<1x256xf32>
    %1473 = arith.mulf %1472, %201 : vector<1x256xf32>
    %1474 = arith.addf %1470, %1473 : vector<1x256xf32>
    %c12_114 = arith.constant 12 : index
    %1475 = memref.load %arg9[%c12_114] : memref<64xf32, #tpu.memory_space<smem>>
    %1476 = vector.broadcast %1475 : f32 to vector<1x256xf32>
    %1477 = arith.mulf %1476, %597 : vector<1x256xf32>
    %1478 = arith.addf %1474, %1477 : vector<1x256xf32>
    %c13_115 = arith.constant 13 : index
    %1479 = memref.load %arg9[%c13_115] : memref<64xf32, #tpu.memory_space<smem>>
    %1480 = vector.broadcast %1479 : f32 to vector<1x256xf32>
    %1481 = arith.mulf %1480, %863 : vector<1x256xf32>
    %1482 = arith.addf %1478, %1481 : vector<1x256xf32>
    %c14_116 = arith.constant 14 : index
    %1483 = memref.load %arg9[%c14_116] : memref<64xf32, #tpu.memory_space<smem>>
    %1484 = vector.broadcast %1483 : f32 to vector<1x256xf32>
    %1485 = arith.mulf %1484, %1129 : vector<1x256xf32>
    %1486 = arith.addf %1482, %1485 : vector<1x256xf32>
    %c15_117 = arith.constant 15 : index
    %1487 = memref.load %arg9[%c15_117] : memref<64xf32, #tpu.memory_space<smem>>
    %1488 = vector.broadcast %1487 : f32 to vector<1x256xf32>
    %1489 = arith.mulf %1488, %1395 : vector<1x256xf32>
    %1490 = arith.addf %1486, %1489 : vector<1x256xf32>
    %c1_118 = arith.constant 1 : index
    %1491 = memref.load %arg10[%c1_118] : memref<8xf32, #tpu.memory_space<smem>>
    %c1_119 = arith.constant 1 : index
    %1492 = memref.load %arg11[%c1_119] : memref<8xf32, #tpu.memory_space<smem>>
    %cst_120 = arith.constant dense<0.000000e+00> : vector<1xf32>
    %1493 = vector.multi_reduction <add>, %1490, %cst_120 [1] : vector<1x256xf32> to vector<1xf32>
    %1494 = vector.shape_cast %1493 : vector<1xf32> to vector<1x1xf32>
    %1495 = arith.mulf %1490, %1490 : vector<1x256xf32>
    %cst_121 = arith.constant dense<0.000000e+00> : vector<1xf32>
    %1496 = vector.multi_reduction <add>, %1495, %cst_121 [1] : vector<1x256xf32> to vector<1xf32>
    %1497 = vector.shape_cast %1496 : vector<1xf32> to vector<1x1xf32>
    %cst_122 = arith.constant 3.906250e-03 : f32
    %1498 = vector.broadcast %cst_122 : f32 to vector<1x1xf32>
    %1499 = arith.mulf %1494, %1498 : vector<1x1xf32>
    %cst_123 = arith.constant 3.906250e-03 : f32
    %1500 = vector.broadcast %cst_123 : f32 to vector<1x1xf32>
    %1501 = arith.mulf %1497, %1500 : vector<1x1xf32>
    %1502 = arith.mulf %1499, %1499 : vector<1x1xf32>
    %1503 = arith.subf %1501, %1502 : vector<1x1xf32>
    %cst_124 = arith.constant 0.000000e+00 : f32
    %1504 = vector.broadcast %cst_124 : f32 to vector<1x1xf32>
    %1505 = arith.maximumf %1503, %1504 : vector<1x1xf32>
    %cst_125 = arith.constant 9.99999974E-6 : f32
    %1506 = vector.broadcast %cst_125 : f32 to vector<1x1xf32>
    %1507 = arith.addf %1505, %1506 : vector<1x1xf32>
    %1508 = math.rsqrt %1507 : vector<1x1xf32>
    %1509 = vector.broadcast %1491 : f32 to vector<1x1xf32>
    %1510 = arith.mulf %1509, %1508 : vector<1x1xf32>
    %1511 = vector.broadcast %1510 : vector<1x1xf32> to vector<1x256xf32>
    %1512 = arith.mulf %1490, %1511 : vector<1x256xf32>
    %1513 = arith.mulf %1499, %1510 : vector<1x1xf32>
    %1514 = vector.broadcast %1492 : f32 to vector<1x1xf32>
    %1515 = arith.subf %1514, %1513 : vector<1x1xf32>
    %1516 = vector.broadcast %1515 : vector<1x1xf32> to vector<1x256xf32>
    %1517 = arith.addf %1512, %1516 : vector<1x256xf32>
    %cst_126 = arith.constant 0.000000e+00 : f32
    %1518 = vector.broadcast %cst_126 : f32 to vector<1x256xf32>
    %1519 = arith.maximumf %1517, %1518 : vector<1x256xf32>
    %cst_127 = arith.constant 0.000000e+00 : f32
    %1520 = vector.broadcast %cst_127 : f32 to vector<1x256xf32>
    %c16_128 = arith.constant 16 : index
    %1521 = memref.load %arg9[%c16_128] : memref<64xf32, #tpu.memory_space<smem>>
    %1522 = vector.broadcast %1521 : f32 to vector<1x256xf32>
    %1523 = arith.mulf %1522, %51 : vector<1x256xf32>
    %1524 = arith.addf %1520, %1523 : vector<1x256xf32>
    %c17_129 = arith.constant 17 : index
    %1525 = memref.load %arg9[%c17_129] : memref<64xf32, #tpu.memory_space<smem>>
    %1526 = vector.broadcast %1525 : f32 to vector<1x256xf32>
    %1527 = arith.mulf %1526, %101 : vector<1x256xf32>
    %1528 = arith.addf %1524, %1527 : vector<1x256xf32>
    %c18_130 = arith.constant 18 : index
    %1529 = memref.load %arg9[%c18_130] : memref<64xf32, #tpu.memory_space<smem>>
    %1530 = vector.broadcast %1529 : f32 to vector<1x256xf32>
    %1531 = arith.mulf %1530, %151 : vector<1x256xf32>
    %1532 = arith.addf %1528, %1531 : vector<1x256xf32>
    %c19_131 = arith.constant 19 : index
    %1533 = memref.load %arg9[%c19_131] : memref<64xf32, #tpu.memory_space<smem>>
    %1534 = vector.broadcast %1533 : f32 to vector<1x256xf32>
    %1535 = arith.mulf %1534, %201 : vector<1x256xf32>
    %1536 = arith.addf %1532, %1535 : vector<1x256xf32>
    %c20_132 = arith.constant 20 : index
    %1537 = memref.load %arg9[%c20_132] : memref<64xf32, #tpu.memory_space<smem>>
    %1538 = vector.broadcast %1537 : f32 to vector<1x256xf32>
    %1539 = arith.mulf %1538, %597 : vector<1x256xf32>
    %1540 = arith.addf %1536, %1539 : vector<1x256xf32>
    %c21_133 = arith.constant 21 : index
    %1541 = memref.load %arg9[%c21_133] : memref<64xf32, #tpu.memory_space<smem>>
    %1542 = vector.broadcast %1541 : f32 to vector<1x256xf32>
    %1543 = arith.mulf %1542, %863 : vector<1x256xf32>
    %1544 = arith.addf %1540, %1543 : vector<1x256xf32>
    %c22_134 = arith.constant 22 : index
    %1545 = memref.load %arg9[%c22_134] : memref<64xf32, #tpu.memory_space<smem>>
    %1546 = vector.broadcast %1545 : f32 to vector<1x256xf32>
    %1547 = arith.mulf %1546, %1129 : vector<1x256xf32>
    %1548 = arith.addf %1544, %1547 : vector<1x256xf32>
    %c23_135 = arith.constant 23 : index
    %1549 = memref.load %arg9[%c23_135] : memref<64xf32, #tpu.memory_space<smem>>
    %1550 = vector.broadcast %1549 : f32 to vector<1x256xf32>
    %1551 = arith.mulf %1550, %1395 : vector<1x256xf32>
    %1552 = arith.addf %1548, %1551 : vector<1x256xf32>
    %c2_136 = arith.constant 2 : index
    %1553 = memref.load %arg10[%c2_136] : memref<8xf32, #tpu.memory_space<smem>>
    %c2_137 = arith.constant 2 : index
    %1554 = memref.load %arg11[%c2_137] : memref<8xf32, #tpu.memory_space<smem>>
    %cst_138 = arith.constant dense<0.000000e+00> : vector<1xf32>
    %1555 = vector.multi_reduction <add>, %1552, %cst_138 [1] : vector<1x256xf32> to vector<1xf32>
    %1556 = vector.shape_cast %1555 : vector<1xf32> to vector<1x1xf32>
    %1557 = arith.mulf %1552, %1552 : vector<1x256xf32>
    %cst_139 = arith.constant dense<0.000000e+00> : vector<1xf32>
    %1558 = vector.multi_reduction <add>, %1557, %cst_139 [1] : vector<1x256xf32> to vector<1xf32>
    %1559 = vector.shape_cast %1558 : vector<1xf32> to vector<1x1xf32>
    %cst_140 = arith.constant 3.906250e-03 : f32
    %1560 = vector.broadcast %cst_140 : f32 to vector<1x1xf32>
    %1561 = arith.mulf %1556, %1560 : vector<1x1xf32>
    %cst_141 = arith.constant 3.906250e-03 : f32
    %1562 = vector.broadcast %cst_141 : f32 to vector<1x1xf32>
    %1563 = arith.mulf %1559, %1562 : vector<1x1xf32>
    %1564 = arith.mulf %1561, %1561 : vector<1x1xf32>
    %1565 = arith.subf %1563, %1564 : vector<1x1xf32>
    %cst_142 = arith.constant 0.000000e+00 : f32
    %1566 = vector.broadcast %cst_142 : f32 to vector<1x1xf32>
    %1567 = arith.maximumf %1565, %1566 : vector<1x1xf32>
    %cst_143 = arith.constant 9.99999974E-6 : f32
    %1568 = vector.broadcast %cst_143 : f32 to vector<1x1xf32>
    %1569 = arith.addf %1567, %1568 : vector<1x1xf32>
    %1570 = math.rsqrt %1569 : vector<1x1xf32>
    %1571 = vector.broadcast %1553 : f32 to vector<1x1xf32>
    %1572 = arith.mulf %1571, %1570 : vector<1x1xf32>
    %1573 = vector.broadcast %1572 : vector<1x1xf32> to vector<1x256xf32>
    %1574 = arith.mulf %1552, %1573 : vector<1x256xf32>
    %1575 = arith.mulf %1561, %1572 : vector<1x1xf32>
    %1576 = vector.broadcast %1554 : f32 to vector<1x1xf32>
    %1577 = arith.subf %1576, %1575 : vector<1x1xf32>
    %1578 = vector.broadcast %1577 : vector<1x1xf32> to vector<1x256xf32>
    %1579 = arith.addf %1574, %1578 : vector<1x256xf32>
    %cst_144 = arith.constant 0.000000e+00 : f32
    %1580 = vector.broadcast %cst_144 : f32 to vector<1x256xf32>
    %1581 = arith.maximumf %1579, %1580 : vector<1x256xf32>
    %cst_145 = arith.constant 0.000000e+00 : f32
    %1582 = vector.broadcast %cst_145 : f32 to vector<1x256xf32>
    %c24_146 = arith.constant 24 : index
    %1583 = memref.load %arg9[%c24_146] : memref<64xf32, #tpu.memory_space<smem>>
    %1584 = vector.broadcast %1583 : f32 to vector<1x256xf32>
    %1585 = arith.mulf %1584, %51 : vector<1x256xf32>
    %1586 = arith.addf %1582, %1585 : vector<1x256xf32>
    %c25_147 = arith.constant 25 : index
    %1587 = memref.load %arg9[%c25_147] : memref<64xf32, #tpu.memory_space<smem>>
    %1588 = vector.broadcast %1587 : f32 to vector<1x256xf32>
    %1589 = arith.mulf %1588, %101 : vector<1x256xf32>
    %1590 = arith.addf %1586, %1589 : vector<1x256xf32>
    %c26_148 = arith.constant 26 : index
    %1591 = memref.load %arg9[%c26_148] : memref<64xf32, #tpu.memory_space<smem>>
    %1592 = vector.broadcast %1591 : f32 to vector<1x256xf32>
    %1593 = arith.mulf %1592, %151 : vector<1x256xf32>
    %1594 = arith.addf %1590, %1593 : vector<1x256xf32>
    %c27_149 = arith.constant 27 : index
    %1595 = memref.load %arg9[%c27_149] : memref<64xf32, #tpu.memory_space<smem>>
    %1596 = vector.broadcast %1595 : f32 to vector<1x256xf32>
    %1597 = arith.mulf %1596, %201 : vector<1x256xf32>
    %1598 = arith.addf %1594, %1597 : vector<1x256xf32>
    %c28_150 = arith.constant 28 : index
    %1599 = memref.load %arg9[%c28_150] : memref<64xf32, #tpu.memory_space<smem>>
    %1600 = vector.broadcast %1599 : f32 to vector<1x256xf32>
    %1601 = arith.mulf %1600, %597 : vector<1x256xf32>
    %1602 = arith.addf %1598, %1601 : vector<1x256xf32>
    %c29_151 = arith.constant 29 : index
    %1603 = memref.load %arg9[%c29_151] : memref<64xf32, #tpu.memory_space<smem>>
    %1604 = vector.broadcast %1603 : f32 to vector<1x256xf32>
    %1605 = arith.mulf %1604, %863 : vector<1x256xf32>
    %1606 = arith.addf %1602, %1605 : vector<1x256xf32>
    %c30_152 = arith.constant 30 : index
    %1607 = memref.load %arg9[%c30_152] : memref<64xf32, #tpu.memory_space<smem>>
    %1608 = vector.broadcast %1607 : f32 to vector<1x256xf32>
    %1609 = arith.mulf %1608, %1129 : vector<1x256xf32>
    %1610 = arith.addf %1606, %1609 : vector<1x256xf32>
    %c31_153 = arith.constant 31 : index
    %1611 = memref.load %arg9[%c31_153] : memref<64xf32, #tpu.memory_space<smem>>
    %1612 = vector.broadcast %1611 : f32 to vector<1x256xf32>
    %1613 = arith.mulf %1612, %1395 : vector<1x256xf32>
    %1614 = arith.addf %1610, %1613 : vector<1x256xf32>
    %c3_154 = arith.constant 3 : index
    %1615 = memref.load %arg10[%c3_154] : memref<8xf32, #tpu.memory_space<smem>>
    %c3_155 = arith.constant 3 : index
    %1616 = memref.load %arg11[%c3_155] : memref<8xf32, #tpu.memory_space<smem>>
    %cst_156 = arith.constant dense<0.000000e+00> : vector<1xf32>
    %1617 = vector.multi_reduction <add>, %1614, %cst_156 [1] : vector<1x256xf32> to vector<1xf32>
    %1618 = vector.shape_cast %1617 : vector<1xf32> to vector<1x1xf32>
    %1619 = arith.mulf %1614, %1614 : vector<1x256xf32>
    %cst_157 = arith.constant dense<0.000000e+00> : vector<1xf32>
    %1620 = vector.multi_reduction <add>, %1619, %cst_157 [1] : vector<1x256xf32> to vector<1xf32>
    %1621 = vector.shape_cast %1620 : vector<1xf32> to vector<1x1xf32>
    %cst_158 = arith.constant 3.906250e-03 : f32
    %1622 = vector.broadcast %cst_158 : f32 to vector<1x1xf32>
    %1623 = arith.mulf %1618, %1622 : vector<1x1xf32>
    %cst_159 = arith.constant 3.906250e-03 : f32
    %1624 = vector.broadcast %cst_159 : f32 to vector<1x1xf32>
    %1625 = arith.mulf %1621, %1624 : vector<1x1xf32>
    %1626 = arith.mulf %1623, %1623 : vector<1x1xf32>
    %1627 = arith.subf %1625, %1626 : vector<1x1xf32>
    %cst_160 = arith.constant 0.000000e+00 : f32
    %1628 = vector.broadcast %cst_160 : f32 to vector<1x1xf32>
    %1629 = arith.maximumf %1627, %1628 : vector<1x1xf32>
    %cst_161 = arith.constant 9.99999974E-6 : f32
    %1630 = vector.broadcast %cst_161 : f32 to vector<1x1xf32>
    %1631 = arith.addf %1629, %1630 : vector<1x1xf32>
    %1632 = math.rsqrt %1631 : vector<1x1xf32>
    %1633 = vector.broadcast %1615 : f32 to vector<1x1xf32>
    %1634 = arith.mulf %1633, %1632 : vector<1x1xf32>
    %1635 = vector.broadcast %1634 : vector<1x1xf32> to vector<1x256xf32>
    %1636 = arith.mulf %1614, %1635 : vector<1x256xf32>
    %1637 = arith.mulf %1623, %1634 : vector<1x1xf32>
    %1638 = vector.broadcast %1616 : f32 to vector<1x1xf32>
    %1639 = arith.subf %1638, %1637 : vector<1x1xf32>
    %1640 = vector.broadcast %1639 : vector<1x1xf32> to vector<1x256xf32>
    %1641 = arith.addf %1636, %1640 : vector<1x256xf32>
    %cst_162 = arith.constant 0.000000e+00 : f32
    %1642 = vector.broadcast %cst_162 : f32 to vector<1x256xf32>
    %1643 = arith.maximumf %1641, %1642 : vector<1x256xf32>
    %cst_163 = arith.constant 0.000000e+00 : f32
    %1644 = vector.broadcast %cst_163 : f32 to vector<1x256xf32>
    %c32_164 = arith.constant 32 : index
    %1645 = memref.load %arg9[%c32_164] : memref<64xf32, #tpu.memory_space<smem>>
    %1646 = vector.broadcast %1645 : f32 to vector<1x256xf32>
    %1647 = arith.mulf %1646, %51 : vector<1x256xf32>
    %1648 = arith.addf %1644, %1647 : vector<1x256xf32>
    %c33_165 = arith.constant 33 : index
    %1649 = memref.load %arg9[%c33_165] : memref<64xf32, #tpu.memory_space<smem>>
    %1650 = vector.broadcast %1649 : f32 to vector<1x256xf32>
    %1651 = arith.mulf %1650, %101 : vector<1x256xf32>
    %1652 = arith.addf %1648, %1651 : vector<1x256xf32>
    %c34_166 = arith.constant 34 : index
    %1653 = memref.load %arg9[%c34_166] : memref<64xf32, #tpu.memory_space<smem>>
    %1654 = vector.broadcast %1653 : f32 to vector<1x256xf32>
    %1655 = arith.mulf %1654, %151 : vector<1x256xf32>
    %1656 = arith.addf %1652, %1655 : vector<1x256xf32>
    %c35_167 = arith.constant 35 : index
    %1657 = memref.load %arg9[%c35_167] : memref<64xf32, #tpu.memory_space<smem>>
    %1658 = vector.broadcast %1657 : f32 to vector<1x256xf32>
    %1659 = arith.mulf %1658, %201 : vector<1x256xf32>
    %1660 = arith.addf %1656, %1659 : vector<1x256xf32>
    %c36_168 = arith.constant 36 : index
    %1661 = memref.load %arg9[%c36_168] : memref<64xf32, #tpu.memory_space<smem>>
    %1662 = vector.broadcast %1661 : f32 to vector<1x256xf32>
    %1663 = arith.mulf %1662, %597 : vector<1x256xf32>
    %1664 = arith.addf %1660, %1663 : vector<1x256xf32>
    %c37_169 = arith.constant 37 : index
    %1665 = memref.load %arg9[%c37_169] : memref<64xf32, #tpu.memory_space<smem>>
    %1666 = vector.broadcast %1665 : f32 to vector<1x256xf32>
    %1667 = arith.mulf %1666, %863 : vector<1x256xf32>
    %1668 = arith.addf %1664, %1667 : vector<1x256xf32>
    %c38_170 = arith.constant 38 : index
    %1669 = memref.load %arg9[%c38_170] : memref<64xf32, #tpu.memory_space<smem>>
    %1670 = vector.broadcast %1669 : f32 to vector<1x256xf32>
    %1671 = arith.mulf %1670, %1129 : vector<1x256xf32>
    %1672 = arith.addf %1668, %1671 : vector<1x256xf32>
    %c39_171 = arith.constant 39 : index
    %1673 = memref.load %arg9[%c39_171] : memref<64xf32, #tpu.memory_space<smem>>
    %1674 = vector.broadcast %1673 : f32 to vector<1x256xf32>
    %1675 = arith.mulf %1674, %1395 : vector<1x256xf32>
    %1676 = arith.addf %1672, %1675 : vector<1x256xf32>
    %c4_172 = arith.constant 4 : index
    %1677 = memref.load %arg10[%c4_172] : memref<8xf32, #tpu.memory_space<smem>>
    %c4_173 = arith.constant 4 : index
    %1678 = memref.load %arg11[%c4_173] : memref<8xf32, #tpu.memory_space<smem>>
    %cst_174 = arith.constant dense<0.000000e+00> : vector<1xf32>
    %1679 = vector.multi_reduction <add>, %1676, %cst_174 [1] : vector<1x256xf32> to vector<1xf32>
    %1680 = vector.shape_cast %1679 : vector<1xf32> to vector<1x1xf32>
    %1681 = arith.mulf %1676, %1676 : vector<1x256xf32>
    %cst_175 = arith.constant dense<0.000000e+00> : vector<1xf32>
    %1682 = vector.multi_reduction <add>, %1681, %cst_175 [1] : vector<1x256xf32> to vector<1xf32>
    %1683 = vector.shape_cast %1682 : vector<1xf32> to vector<1x1xf32>
    %cst_176 = arith.constant 3.906250e-03 : f32
    %1684 = vector.broadcast %cst_176 : f32 to vector<1x1xf32>
    %1685 = arith.mulf %1680, %1684 : vector<1x1xf32>
    %cst_177 = arith.constant 3.906250e-03 : f32
    %1686 = vector.broadcast %cst_177 : f32 to vector<1x1xf32>
    %1687 = arith.mulf %1683, %1686 : vector<1x1xf32>
    %1688 = arith.mulf %1685, %1685 : vector<1x1xf32>
    %1689 = arith.subf %1687, %1688 : vector<1x1xf32>
    %cst_178 = arith.constant 0.000000e+00 : f32
    %1690 = vector.broadcast %cst_178 : f32 to vector<1x1xf32>
    %1691 = arith.maximumf %1689, %1690 : vector<1x1xf32>
    %cst_179 = arith.constant 9.99999974E-6 : f32
    %1692 = vector.broadcast %cst_179 : f32 to vector<1x1xf32>
    %1693 = arith.addf %1691, %1692 : vector<1x1xf32>
    %1694 = math.rsqrt %1693 : vector<1x1xf32>
    %1695 = vector.broadcast %1677 : f32 to vector<1x1xf32>
    %1696 = arith.mulf %1695, %1694 : vector<1x1xf32>
    %1697 = vector.broadcast %1696 : vector<1x1xf32> to vector<1x256xf32>
    %1698 = arith.mulf %1676, %1697 : vector<1x256xf32>
    %1699 = arith.mulf %1685, %1696 : vector<1x1xf32>
    %1700 = vector.broadcast %1678 : f32 to vector<1x1xf32>
    %1701 = arith.subf %1700, %1699 : vector<1x1xf32>
    %1702 = vector.broadcast %1701 : vector<1x1xf32> to vector<1x256xf32>
    %1703 = arith.addf %1698, %1702 : vector<1x256xf32>
    %cst_180 = arith.constant 0.000000e+00 : f32
    %1704 = vector.broadcast %cst_180 : f32 to vector<1x256xf32>
    %1705 = arith.maximumf %1703, %1704 : vector<1x256xf32>
    %cst_181 = arith.constant 0.000000e+00 : f32
    %1706 = vector.broadcast %cst_181 : f32 to vector<1x256xf32>
    %c40_182 = arith.constant 40 : index
    %1707 = memref.load %arg9[%c40_182] : memref<64xf32, #tpu.memory_space<smem>>
    %1708 = vector.broadcast %1707 : f32 to vector<1x256xf32>
    %1709 = arith.mulf %1708, %51 : vector<1x256xf32>
    %1710 = arith.addf %1706, %1709 : vector<1x256xf32>
    %c41_183 = arith.constant 41 : index
    %1711 = memref.load %arg9[%c41_183] : memref<64xf32, #tpu.memory_space<smem>>
    %1712 = vector.broadcast %1711 : f32 to vector<1x256xf32>
    %1713 = arith.mulf %1712, %101 : vector<1x256xf32>
    %1714 = arith.addf %1710, %1713 : vector<1x256xf32>
    %c42_184 = arith.constant 42 : index
    %1715 = memref.load %arg9[%c42_184] : memref<64xf32, #tpu.memory_space<smem>>
    %1716 = vector.broadcast %1715 : f32 to vector<1x256xf32>
    %1717 = arith.mulf %1716, %151 : vector<1x256xf32>
    %1718 = arith.addf %1714, %1717 : vector<1x256xf32>
    %c43_185 = arith.constant 43 : index
    %1719 = memref.load %arg9[%c43_185] : memref<64xf32, #tpu.memory_space<smem>>
    %1720 = vector.broadcast %1719 : f32 to vector<1x256xf32>
    %1721 = arith.mulf %1720, %201 : vector<1x256xf32>
    %1722 = arith.addf %1718, %1721 : vector<1x256xf32>
    %c44_186 = arith.constant 44 : index
    %1723 = memref.load %arg9[%c44_186] : memref<64xf32, #tpu.memory_space<smem>>
    %1724 = vector.broadcast %1723 : f32 to vector<1x256xf32>
    %1725 = arith.mulf %1724, %597 : vector<1x256xf32>
    %1726 = arith.addf %1722, %1725 : vector<1x256xf32>
    %c45_187 = arith.constant 45 : index
    %1727 = memref.load %arg9[%c45_187] : memref<64xf32, #tpu.memory_space<smem>>
    %1728 = vector.broadcast %1727 : f32 to vector<1x256xf32>
    %1729 = arith.mulf %1728, %863 : vector<1x256xf32>
    %1730 = arith.addf %1726, %1729 : vector<1x256xf32>
    %c46_188 = arith.constant 46 : index
    %1731 = memref.load %arg9[%c46_188] : memref<64xf32, #tpu.memory_space<smem>>
    %1732 = vector.broadcast %1731 : f32 to vector<1x256xf32>
    %1733 = arith.mulf %1732, %1129 : vector<1x256xf32>
    %1734 = arith.addf %1730, %1733 : vector<1x256xf32>
    %c47_189 = arith.constant 47 : index
    %1735 = memref.load %arg9[%c47_189] : memref<64xf32, #tpu.memory_space<smem>>
    %1736 = vector.broadcast %1735 : f32 to vector<1x256xf32>
    %1737 = arith.mulf %1736, %1395 : vector<1x256xf32>
    %1738 = arith.addf %1734, %1737 : vector<1x256xf32>
    %c5_190 = arith.constant 5 : index
    %1739 = memref.load %arg10[%c5_190] : memref<8xf32, #tpu.memory_space<smem>>
    %c5_191 = arith.constant 5 : index
    %1740 = memref.load %arg11[%c5_191] : memref<8xf32, #tpu.memory_space<smem>>
    %cst_192 = arith.constant dense<0.000000e+00> : vector<1xf32>
    %1741 = vector.multi_reduction <add>, %1738, %cst_192 [1] : vector<1x256xf32> to vector<1xf32>
    %1742 = vector.shape_cast %1741 : vector<1xf32> to vector<1x1xf32>
    %1743 = arith.mulf %1738, %1738 : vector<1x256xf32>
    %cst_193 = arith.constant dense<0.000000e+00> : vector<1xf32>
    %1744 = vector.multi_reduction <add>, %1743, %cst_193 [1] : vector<1x256xf32> to vector<1xf32>
    %1745 = vector.shape_cast %1744 : vector<1xf32> to vector<1x1xf32>
    %cst_194 = arith.constant 3.906250e-03 : f32
    %1746 = vector.broadcast %cst_194 : f32 to vector<1x1xf32>
    %1747 = arith.mulf %1742, %1746 : vector<1x1xf32>
    %cst_195 = arith.constant 3.906250e-03 : f32
    %1748 = vector.broadcast %cst_195 : f32 to vector<1x1xf32>
    %1749 = arith.mulf %1745, %1748 : vector<1x1xf32>
    %1750 = arith.mulf %1747, %1747 : vector<1x1xf32>
    %1751 = arith.subf %1749, %1750 : vector<1x1xf32>
    %cst_196 = arith.constant 0.000000e+00 : f32
    %1752 = vector.broadcast %cst_196 : f32 to vector<1x1xf32>
    %1753 = arith.maximumf %1751, %1752 : vector<1x1xf32>
    %cst_197 = arith.constant 9.99999974E-6 : f32
    %1754 = vector.broadcast %cst_197 : f32 to vector<1x1xf32>
    %1755 = arith.addf %1753, %1754 : vector<1x1xf32>
    %1756 = math.rsqrt %1755 : vector<1x1xf32>
    %1757 = vector.broadcast %1739 : f32 to vector<1x1xf32>
    %1758 = arith.mulf %1757, %1756 : vector<1x1xf32>
    %1759 = vector.broadcast %1758 : vector<1x1xf32> to vector<1x256xf32>
    %1760 = arith.mulf %1738, %1759 : vector<1x256xf32>
    %1761 = arith.mulf %1747, %1758 : vector<1x1xf32>
    %1762 = vector.broadcast %1740 : f32 to vector<1x1xf32>
    %1763 = arith.subf %1762, %1761 : vector<1x1xf32>
    %1764 = vector.broadcast %1763 : vector<1x1xf32> to vector<1x256xf32>
    %1765 = arith.addf %1760, %1764 : vector<1x256xf32>
    %cst_198 = arith.constant 0.000000e+00 : f32
    %1766 = vector.broadcast %cst_198 : f32 to vector<1x256xf32>
    %1767 = arith.maximumf %1765, %1766 : vector<1x256xf32>
    %cst_199 = arith.constant 0.000000e+00 : f32
    %1768 = vector.broadcast %cst_199 : f32 to vector<1x256xf32>
    %c48_200 = arith.constant 48 : index
    %1769 = memref.load %arg9[%c48_200] : memref<64xf32, #tpu.memory_space<smem>>
    %1770 = vector.broadcast %1769 : f32 to vector<1x256xf32>
    %1771 = arith.mulf %1770, %51 : vector<1x256xf32>
    %1772 = arith.addf %1768, %1771 : vector<1x256xf32>
    %c49_201 = arith.constant 49 : index
    %1773 = memref.load %arg9[%c49_201] : memref<64xf32, #tpu.memory_space<smem>>
    %1774 = vector.broadcast %1773 : f32 to vector<1x256xf32>
    %1775 = arith.mulf %1774, %101 : vector<1x256xf32>
    %1776 = arith.addf %1772, %1775 : vector<1x256xf32>
    %c50_202 = arith.constant 50 : index
    %1777 = memref.load %arg9[%c50_202] : memref<64xf32, #tpu.memory_space<smem>>
    %1778 = vector.broadcast %1777 : f32 to vector<1x256xf32>
    %1779 = arith.mulf %1778, %151 : vector<1x256xf32>
    %1780 = arith.addf %1776, %1779 : vector<1x256xf32>
    %c51_203 = arith.constant 51 : index
    %1781 = memref.load %arg9[%c51_203] : memref<64xf32, #tpu.memory_space<smem>>
    %1782 = vector.broadcast %1781 : f32 to vector<1x256xf32>
    %1783 = arith.mulf %1782, %201 : vector<1x256xf32>
    %1784 = arith.addf %1780, %1783 : vector<1x256xf32>
    %c52_204 = arith.constant 52 : index
    %1785 = memref.load %arg9[%c52_204] : memref<64xf32, #tpu.memory_space<smem>>
    %1786 = vector.broadcast %1785 : f32 to vector<1x256xf32>
    %1787 = arith.mulf %1786, %597 : vector<1x256xf32>
    %1788 = arith.addf %1784, %1787 : vector<1x256xf32>
    %c53_205 = arith.constant 53 : index
    %1789 = memref.load %arg9[%c53_205] : memref<64xf32, #tpu.memory_space<smem>>
    %1790 = vector.broadcast %1789 : f32 to vector<1x256xf32>
    %1791 = arith.mulf %1790, %863 : vector<1x256xf32>
    %1792 = arith.addf %1788, %1791 : vector<1x256xf32>
    %c54_206 = arith.constant 54 : index
    %1793 = memref.load %arg9[%c54_206] : memref<64xf32, #tpu.memory_space<smem>>
    %1794 = vector.broadcast %1793 : f32 to vector<1x256xf32>
    %1795 = arith.mulf %1794, %1129 : vector<1x256xf32>
    %1796 = arith.addf %1792, %1795 : vector<1x256xf32>
    %c55_207 = arith.constant 55 : index
    %1797 = memref.load %arg9[%c55_207] : memref<64xf32, #tpu.memory_space<smem>>
    %1798 = vector.broadcast %1797 : f32 to vector<1x256xf32>
    %1799 = arith.mulf %1798, %1395 : vector<1x256xf32>
    %1800 = arith.addf %1796, %1799 : vector<1x256xf32>
    %c6_208 = arith.constant 6 : index
    %1801 = memref.load %arg10[%c6_208] : memref<8xf32, #tpu.memory_space<smem>>
    %c6_209 = arith.constant 6 : index
    %1802 = memref.load %arg11[%c6_209] : memref<8xf32, #tpu.memory_space<smem>>
    %cst_210 = arith.constant dense<0.000000e+00> : vector<1xf32>
    %1803 = vector.multi_reduction <add>, %1800, %cst_210 [1] : vector<1x256xf32> to vector<1xf32>
    %1804 = vector.shape_cast %1803 : vector<1xf32> to vector<1x1xf32>
    %1805 = arith.mulf %1800, %1800 : vector<1x256xf32>
    %cst_211 = arith.constant dense<0.000000e+00> : vector<1xf32>
    %1806 = vector.multi_reduction <add>, %1805, %cst_211 [1] : vector<1x256xf32> to vector<1xf32>
    %1807 = vector.shape_cast %1806 : vector<1xf32> to vector<1x1xf32>
    %cst_212 = arith.constant 3.906250e-03 : f32
    %1808 = vector.broadcast %cst_212 : f32 to vector<1x1xf32>
    %1809 = arith.mulf %1804, %1808 : vector<1x1xf32>
    %cst_213 = arith.constant 3.906250e-03 : f32
    %1810 = vector.broadcast %cst_213 : f32 to vector<1x1xf32>
    %1811 = arith.mulf %1807, %1810 : vector<1x1xf32>
    %1812 = arith.mulf %1809, %1809 : vector<1x1xf32>
    %1813 = arith.subf %1811, %1812 : vector<1x1xf32>
    %cst_214 = arith.constant 0.000000e+00 : f32
    %1814 = vector.broadcast %cst_214 : f32 to vector<1x1xf32>
    %1815 = arith.maximumf %1813, %1814 : vector<1x1xf32>
    %cst_215 = arith.constant 9.99999974E-6 : f32
    %1816 = vector.broadcast %cst_215 : f32 to vector<1x1xf32>
    %1817 = arith.addf %1815, %1816 : vector<1x1xf32>
    %1818 = math.rsqrt %1817 : vector<1x1xf32>
    %1819 = vector.broadcast %1801 : f32 to vector<1x1xf32>
    %1820 = arith.mulf %1819, %1818 : vector<1x1xf32>
    %1821 = vector.broadcast %1820 : vector<1x1xf32> to vector<1x256xf32>
    %1822 = arith.mulf %1800, %1821 : vector<1x256xf32>
    %1823 = arith.mulf %1809, %1820 : vector<1x1xf32>
    %1824 = vector.broadcast %1802 : f32 to vector<1x1xf32>
    %1825 = arith.subf %1824, %1823 : vector<1x1xf32>
    %1826 = vector.broadcast %1825 : vector<1x1xf32> to vector<1x256xf32>
    %1827 = arith.addf %1822, %1826 : vector<1x256xf32>
    %cst_216 = arith.constant 0.000000e+00 : f32
    %1828 = vector.broadcast %cst_216 : f32 to vector<1x256xf32>
    %1829 = arith.maximumf %1827, %1828 : vector<1x256xf32>
    %cst_217 = arith.constant 0.000000e+00 : f32
    %1830 = vector.broadcast %cst_217 : f32 to vector<1x256xf32>
    %c56_218 = arith.constant 56 : index
    %1831 = memref.load %arg9[%c56_218] : memref<64xf32, #tpu.memory_space<smem>>
    %1832 = vector.broadcast %1831 : f32 to vector<1x256xf32>
    %1833 = arith.mulf %1832, %51 : vector<1x256xf32>
    %1834 = arith.addf %1830, %1833 : vector<1x256xf32>
    %c57_219 = arith.constant 57 : index
    %1835 = memref.load %arg9[%c57_219] : memref<64xf32, #tpu.memory_space<smem>>
    %1836 = vector.broadcast %1835 : f32 to vector<1x256xf32>
    %1837 = arith.mulf %1836, %101 : vector<1x256xf32>
    %1838 = arith.addf %1834, %1837 : vector<1x256xf32>
    %c58_220 = arith.constant 58 : index
    %1839 = memref.load %arg9[%c58_220] : memref<64xf32, #tpu.memory_space<smem>>
    %1840 = vector.broadcast %1839 : f32 to vector<1x256xf32>
    %1841 = arith.mulf %1840, %151 : vector<1x256xf32>
    %1842 = arith.addf %1838, %1841 : vector<1x256xf32>
    %c59_221 = arith.constant 59 : index
    %1843 = memref.load %arg9[%c59_221] : memref<64xf32, #tpu.memory_space<smem>>
    %1844 = vector.broadcast %1843 : f32 to vector<1x256xf32>
    %1845 = arith.mulf %1844, %201 : vector<1x256xf32>
    %1846 = arith.addf %1842, %1845 : vector<1x256xf32>
    %c60_222 = arith.constant 60 : index
    %1847 = memref.load %arg9[%c60_222] : memref<64xf32, #tpu.memory_space<smem>>
    %1848 = vector.broadcast %1847 : f32 to vector<1x256xf32>
    %1849 = arith.mulf %1848, %597 : vector<1x256xf32>
    %1850 = arith.addf %1846, %1849 : vector<1x256xf32>
    %c61_223 = arith.constant 61 : index
    %1851 = memref.load %arg9[%c61_223] : memref<64xf32, #tpu.memory_space<smem>>
    %1852 = vector.broadcast %1851 : f32 to vector<1x256xf32>
    %1853 = arith.mulf %1852, %863 : vector<1x256xf32>
    %1854 = arith.addf %1850, %1853 : vector<1x256xf32>
    %c62_224 = arith.constant 62 : index
    %1855 = memref.load %arg9[%c62_224] : memref<64xf32, #tpu.memory_space<smem>>
    %1856 = vector.broadcast %1855 : f32 to vector<1x256xf32>
    %1857 = arith.mulf %1856, %1129 : vector<1x256xf32>
    %1858 = arith.addf %1854, %1857 : vector<1x256xf32>
    %c63_225 = arith.constant 63 : index
    %1859 = memref.load %arg9[%c63_225] : memref<64xf32, #tpu.memory_space<smem>>
    %1860 = vector.broadcast %1859 : f32 to vector<1x256xf32>
    %1861 = arith.mulf %1860, %1395 : vector<1x256xf32>
    %1862 = arith.addf %1858, %1861 : vector<1x256xf32>
    %c7_226 = arith.constant 7 : index
    %1863 = memref.load %arg10[%c7_226] : memref<8xf32, #tpu.memory_space<smem>>
    %c7_227 = arith.constant 7 : index
    %1864 = memref.load %arg11[%c7_227] : memref<8xf32, #tpu.memory_space<smem>>
    %cst_228 = arith.constant dense<0.000000e+00> : vector<1xf32>
    %1865 = vector.multi_reduction <add>, %1862, %cst_228 [1] : vector<1x256xf32> to vector<1xf32>
    %1866 = vector.shape_cast %1865 : vector<1xf32> to vector<1x1xf32>
    %1867 = arith.mulf %1862, %1862 : vector<1x256xf32>
    %cst_229 = arith.constant dense<0.000000e+00> : vector<1xf32>
    %1868 = vector.multi_reduction <add>, %1867, %cst_229 [1] : vector<1x256xf32> to vector<1xf32>
    %1869 = vector.shape_cast %1868 : vector<1xf32> to vector<1x1xf32>
    %cst_230 = arith.constant 3.906250e-03 : f32
    %1870 = vector.broadcast %cst_230 : f32 to vector<1x1xf32>
    %1871 = arith.mulf %1866, %1870 : vector<1x1xf32>
    %cst_231 = arith.constant 3.906250e-03 : f32
    %1872 = vector.broadcast %cst_231 : f32 to vector<1x1xf32>
    %1873 = arith.mulf %1869, %1872 : vector<1x1xf32>
    %1874 = arith.mulf %1871, %1871 : vector<1x1xf32>
    %1875 = arith.subf %1873, %1874 : vector<1x1xf32>
    %cst_232 = arith.constant 0.000000e+00 : f32
    %1876 = vector.broadcast %cst_232 : f32 to vector<1x1xf32>
    %1877 = arith.maximumf %1875, %1876 : vector<1x1xf32>
    %cst_233 = arith.constant 9.99999974E-6 : f32
    %1878 = vector.broadcast %cst_233 : f32 to vector<1x1xf32>
    %1879 = arith.addf %1877, %1878 : vector<1x1xf32>
    %1880 = math.rsqrt %1879 : vector<1x1xf32>
    %1881 = vector.broadcast %1863 : f32 to vector<1x1xf32>
    %1882 = arith.mulf %1881, %1880 : vector<1x1xf32>
    %1883 = vector.broadcast %1882 : vector<1x1xf32> to vector<1x256xf32>
    %1884 = arith.mulf %1862, %1883 : vector<1x256xf32>
    %1885 = arith.mulf %1871, %1882 : vector<1x1xf32>
    %1886 = vector.broadcast %1864 : f32 to vector<1x1xf32>
    %1887 = arith.subf %1886, %1885 : vector<1x1xf32>
    %1888 = vector.broadcast %1887 : vector<1x1xf32> to vector<1x256xf32>
    %1889 = arith.addf %1884, %1888 : vector<1x256xf32>
    %cst_234 = arith.constant 0.000000e+00 : f32
    %1890 = vector.broadcast %cst_234 : f32 to vector<1x256xf32>
    %1891 = arith.maximumf %1889, %1890 : vector<1x256xf32>
    %1892 = tpu.concatenate %1457, %1519, %1581, %1643, %1705, %1767, %1829, %1891 in 0 : vector<1x256xf32>, vector<1x256xf32>, vector<1x256xf32>, vector<1x256xf32>, vector<1x256xf32>, vector<1x256xf32>, vector<1x256xf32>, vector<1x256xf32> -> vector<8x256xf32>
    %c0_235 = arith.constant 0 : index
    %c0_236 = arith.constant 0 : index
    %c0_237 = arith.constant 0 : index
    %1893 = vector.load %arg12[%c0_235, %c0_236, %c0_237] : memref<1x8x256xf32, #tpu.memory_space<vmem>>, vector<1x8x256xf32>
    %1894 = vector.shape_cast %1893 : vector<1x8x256xf32> to vector<8x256xf32>
    %1895 = vector.shape_cast %1892 : vector<8x256xf32> to vector<1x8x256xf32>
    tpu.vector_store %arg12[%c0_235, %c0_236, %c0_237], %1895 {strides = array<i32>} : memref<1x8x256xf32, #tpu.memory_space<vmem>>, vector<1x8x256xf32>,
    return
  }
  func.func @transform_0(%arg0: i32) -> (i32, i32, i32) {
    %c0_i32 = arith.constant 0 : i32
    %c0_i32_0 = arith.constant 0 : i32
    %c0_i32_1 = arith.constant 0 : i32
    return %arg0, %c0_i32, %c0_i32_0 : i32, i32, i32
  }
  func.func @transform_1(%arg0: i32) -> (i32, i32, i32) {
    %c0_i32 = arith.constant 0 : i32
    %c0_i32_0 = arith.constant 0 : i32
    %c0_i32_1 = arith.constant 0 : i32
    return %arg0, %c0_i32, %c0_i32_0 : i32, i32, i32
  }
  func.func @transform_2(%arg0: i32) -> (i32, i32) {
    %c0_i32 = arith.constant 0 : i32
    %c0_i32_0 = arith.constant 0 : i32
    %c0_i32_1 = arith.constant 0 : i32
    return %c0_i32, %c0_i32_0 : i32, i32
  }
  func.func @transform_3(%arg0: i32) -> i32 {
    %c0_i32 = arith.constant 0 : i32
    %c0_i32_0 = arith.constant 0 : i32
    return %c0_i32 : i32
  }
  func.func @transform_4(%arg0: i32) -> i32 {
    %c0_i32 = arith.constant 0 : i32
    %c0_i32_0 = arith.constant 0 : i32
    return %c0_i32 : i32
  }
  func.func @transform_5(%arg0: i32) -> i32 {
    %c0_i32 = arith.constant 0 : i32
    %c0_i32_0 = arith.constant 0 : i32
    return %c0_i32 : i32
  }
  func.func @transform_6(%arg0: i32) -> i32 {
    %c0_i32 = arith.constant 0 : i32
    %c0_i32_0 = arith.constant 0 : i32
    return %c0_i32 : i32
  }
  func.func @transform_7(%arg0: i32) -> i32 {
    %c0_i32 = arith.constant 0 : i32
    %c0_i32_0 = arith.constant 0 : i32
    return %c0_i32 : i32
  }
  func.func @transform_8(%arg0: i32) -> i32 {
    %c0_i32 = arith.constant 0 : i32
    %c0_i32_0 = arith.constant 0 : i32
    return %c0_i32 : i32
  }
  func.func @transform_9(%arg0: i32) -> i32 {
    %c0_i32 = arith.constant 0 : i32
    %c0_i32_0 = arith.constant 0 : i32
    return %c0_i32 : i32
  }
  func.func @transform_10(%arg0: i32) -> i32 {
    %c0_i32 = arith.constant 0 : i32
    %c0_i32_0 = arith.constant 0 : i32
    return %c0_i32 : i32
  }
  func.func @transform_11(%arg0: i32) -> (i32, i32, i32) {
    %c0_i32 = arith.constant 0 : i32
    %c0_i32_0 = arith.constant 0 : i32
    %c0_i32_1 = arith.constant 0 : i32
    return %arg0, %c0_i32, %c0_i32_0 : i32, i32, i32
  }
}

</mosaic_0001>

<bundles_post_ra>
// kernel: tpu_custom_call.1
= control target key start
LH: loop header
LB: loop body
LE: loop exit
PB: predicated region body
PF: predicated region fallthrough
CT: control target
= control target key end

     0   :  { %s8054_s0 = inlined_call_operand.hbm [shape: f32[2,4,256], index: 0, kind: input, shape index: {}]   ;;  %s8055_s1 = inlined_call_operand.hbm [shape: f32[2,4,64], index: 1, kind: input, shape index: {}]   ;;  %s8056_s2 = inlined_call_operand.vmem [shape: f32[2,64], index: 2, kind: input, shape index: {}]   ;;  %s8057_s3 = inlined_call_operand.vmem [shape: f32[16], index: 3, kind: input, shape index: {}]   ;;  %s8058_s4 = inlined_call_operand.vmem [shape: f32[4], index: 4, kind: input, shape index: {}]   ;;  %s8059_s5 = inlined_call_operand.vmem [shape: f32[4], index: 5, kind: input, shape index: {}]   ;;  %s8060_s6 = inlined_call_operand.vmem [shape: f32[256], index: 6, kind: input, shape index: {}]   ;;  %s8061_s7 = inlined_call_operand.vmem [shape: f32[4], index: 7, kind: input, shape index: {}]   ;;  %s8062_s8 = inlined_call_operand.vmem [shape: f32[64], index: 8, kind: input, shape index: {}]   ;;  %s8063_s9 = inlined_call_operand.vmem [shape: f32[8], index: 9, kind: input, shape index: {}]   ;;  %s8064_s10 = inlined_call_operand.vmem [shape: f32[8], index: 10, kind: input, shape index: {}]   ;;  %s8065_s11 = inlined_call_operand.hbm [shape: f32[2,8,256], index: 11, kind: output, shape index: {}]  }
   0x1   :  { %8366 = sst [smem:[#allocation196_spill]] %s8054_s0 }
   0x2   :  { %8367 = sst [smem:[#allocation197_spill]] %s8055_s1 }
   0x3   :  { %8368 = sst [smem:[#allocation198_spill]] %s8056_s2 }
   0x4   :  { %8369 = sst [smem:[#allocation199_spill]] %s8057_s3 }
   0x5   :  { %8370 = sst [smem:[#allocation200_spill]] %s8058_s4 }
   0x6   :  { %8371 = sst [smem:[#allocation201_spill]] %s8059_s5 }
   0x7   :  { %8372 = sst [smem:[#allocation202_spill]] %s8060_s6 }
   0x8   :  { %8373 = sst [smem:[#allocation203_spill]] %s8061_s7 }
   0x9   :  { %8374 = sst [smem:[#allocation204_spill]] %s8062_s8 }
   0xa   :  { %8375 = sst [smem:[#allocation205_spill]] %s8063_s9 }
   0xb   :  { %8376 = sst [smem:[#allocation206_spill]] %s8064_s10 }
   0xc   :  { %8377 = sst [smem:[#allocation207_spill]] %s8065_s11 }
   0xd   :  { %16 = vsyncpa [#allocation3], 0 }
   0xe   :  { %18 = vsyncpa [#allocation3 + $0x1], 0 }
   0xf   :  { %19 = vsyncpa [#allocation7], 0 }
  0x10   :  { %21 = vsyncpa [#allocation7 + $0x1], 0 }
  0x11   :  { %22 = vsyncpa [#allocation5], 0 }
  0x12   :  { %23 = vsyncpa [#allocation10], 0 }
  0x13   :  { %24 = vsyncpa [#allocation13], 0 }
  0x14   :  { %25 = vsyncpa [#allocation16], 0 }
  0x15   :  { %26 = vsyncpa [#allocation19], 0 }
  0x16   :  { %27 = vsyncpa [#allocation4], 0 }
  0x17   :  { %29 = vsyncpa [#allocation4 + $0x1], 0  ;;  %s4657_s17 = smov 0   ;;  %s4659_s18 = smov 0  }
  0x18   :  { %s4661_s19 = smov 0   ;;  %s4663_s20 = smov 0  }
  0x19 LB: > { %8378 = sst [smem:[#allocation29_spill]] %s4566_s17  ;;  %s8382_s4 = sld [smem:[#allocation200_spill]]  ;;  %s4578_s20 = sphi %s4663_s20, %s9326_s20   ;;  %s4574_s19 = sphi %s4661_s19, %s9329_s19   ;;  %s4570_s18 = sphi %s4659_s18, %s9328_s18   ;;  %s4566_s17 = sphi %s4657_s17, %s9327_s17  }
  0x1a   : > { %8379 = sst [smem:[#allocation30_spill]] %s4570_s18  ;;  %s4681_s24 = sadd.s32 4294967295, %s4578_s20  }
  0x1b   : > { %8380 = sst [smem:[#allocation31_spill]] %s4574_s19  ;;  %p3741_p0 = scmp.ge.s32.totalorder %s4578_s20, 1 }
  0x1c   : > { %8381 = sst [smem:[#allocation32_spill]] %s4578_s20  ;;  %p8066_p1 = scmp.eq.s32.totalorder %s4681_s24, 0 }
  0x1d   : > { %8383 = sst [smem:[#allocation33_spill]] %s4681_s24  ;;  %p307_p2 = scmp.lt.s32.totalorder %s4578_s20, 3 }
  0x1e   : > { %s8385_s6 = sld [smem:[#allocation202_spill]]  ;;  %s8386_s8 = sld [smem:[#allocation204_spill]] }
  0x1f   : > { %s334_s23 = sshll.u32 %s8382_s4, 4  ;;  %p4686_p3 = pnand %p3741_p0, %p307_p2  ;;  %s335_s23 = int_to_ptr.vmem [resolvable:$true] %s334_s23 }
  0x20   : > { %s8388_s3 = sld [smem:[#allocation199_spill]]  ;;  %s4308_s21 = scalar_lea.vmem %s335_s23, 16 }
  0x21   : > { %s8384_s25 = scalar_select %p4686_p3, 1, 0 }
  0x22   : > { %p4181_p5 = pneg %p4686_p3  ;;  %p4309_p7 = scmp.ne.s32.totalorder %s335_s23, %s4308_s21 }
  0x23   : > { %p4316_p11 = scmp.lt.s32.totalorder %s335_s23, %s335_s23  ;;  %p4317_p12 = scmp.lt.s32.totalorder %s4308_s21, %s4308_s21 }
  0x24   : > { %s356_s28 = sshll.u32 %s8385_s6, 4  ;;  %s378_s12 = sshll.u32 %s8386_s8, 4  ;;  %s357_s28 = int_to_ptr.vmem [resolvable:$true] %s356_s28  ;;  %s4705_s12 = int_to_ptr.vmem [resolvable:$true] %s378_s12 }
  0x25   : > { %p4701_p6 = pnand %p4181_p5, %p8066_p1  ;;  %p4318_p13 = por %p4317_p12, %p4316_p11 }
  0x26   : > { %s323_s16 = sshll.u32 %s8388_s3, 4  ;;  %s4710_s16 = int_to_ptr.vmem [resolvable:$true] %s323_s16 }
  0x27   : > { %p4714_p8 = pneg %p4701_p6 }
  0x29   : > { %p4311_p9 = pnand %p4714_p8, %p4309_p7 }
  0x2b   : > { %p4312_p10 = pneg %p4311_p9 }
  0x2d   : > { %p4319_p0 = pnand %p4318_p13, %p4312_p10 }
  0x2f   : > { %4322 = shalt.err (!%p4319_p0)
}
  0x30   : > { %s4580_s26 = smov [#allocation9]   ;;  %s4323_s27 = scalar_lea.vmem %s357_s28, 32 }
  0x31   : > { %4187 = dma.vmem_to_smem (!%p4701_p6), %s335_s23, 16, %s4580_s26, [#allocation10]  }
  0x32   : > { %p4324_p2 = scmp.ne.s32.totalorder %s357_s28, %s4323_s27  ;;  %p4331_p1 = scmp.lt.s32.totalorder %s357_s28, %s357_s28 }
  0x33   : > { %p4332_p3 = scmp.lt.s32.totalorder %s4323_s27, %s4323_s27 }
  0x34   : > { %p4326_p5 = pnand %p4324_p2, %p4714_p8 }
  0x35   : > { %p4333_p7 = por %p4332_p3, %p4331_p1 }
  0x36   : > { %p4327_p4 = pneg %p4326_p5 }
  0x38   : > { %p4334_p9 = pnand %p4333_p7, %p4327_p4 }
  0x3a   : > { %4337 = shalt.err (!%p4334_p9)
}
  0x3b   : > { %s4581_s29 = smov [#allocation12]   ;;  %s4338_s30 = scalar_lea.vmem %s4705_s12, 16 }
  0x3c   : > { %4193 = dma.vmem_to_smem (!%p4701_p6), %s357_s28, 32, %s4581_s29, [#allocation13]  }
  0x3d   : > { %p4339_p10 = scmp.ne.s32.totalorder %s4705_s12, %s4338_s30  ;;  %p4346_p13 = scmp.lt.s32.totalorder %s4705_s12, %s4705_s12 }
  0x3e   : > { %p4347_p0 = scmp.lt.s32.totalorder %s4338_s30, %s4338_s30 }
  0x3f   : > { %p4341_p11 = pnand %p4339_p10, %p4714_p8 }
  0x40   : > { %p4348_p2 = por %p4347_p0, %p4346_p13 }
  0x41   : > { %p4342_p12 = pneg %p4341_p11 }
  0x43   : > { %p4349_p1 = pnand %p4348_p2, %p4342_p12 }
  0x45   : > { %4352 = shalt.err (!%p4349_p1)
}
  0x46   : > { %s4582_s23 = smov [#allocation15]   ;;  %s4353_s28 = scalar_lea.vmem %s4710_s16, 16 }
  0x47   : > { %4199 = dma.vmem_to_smem (!%p4701_p6), %s4705_s12, 16, %s4582_s23, [#allocation16]  }
  0x48   : > { %p4354_p3 = scmp.ne.s32.totalorder %s4710_s16, %s4353_s28  ;;  %p4361_p7 = scmp.lt.s32.totalorder %s4710_s16, %s4710_s16 }
  0x49   : > { %p4362_p9 = scmp.lt.s32.totalorder %s4353_s28, %s4353_s28 }
  0x4a   : > { %p4356_p4 = pnand %p4354_p3, %p4714_p8 }
  0x4b   : > { %p4363_p10 = por %p4362_p9, %p4361_p7 }
  0x4c   : > { %p4357_p5 = pneg %p4356_p4 }
  0x4e   : > { %p4364_p11 = pnand %p4363_p10, %p4357_p5 }
  0x50   : > { %4367 = shalt.err (!%p4364_p11)
}
  0x51   : > { %s4583_s14 = smov [#allocation8]   ;;  %s8390_s5 = sld [smem:[#allocation201_spill]] }
  0x52   : > { %4184 = dma.vmem_to_smem (!%p4701_p6), %s4710_s16, 16, %s4583_s14, [#allocation5]  }
  0x53   : > { %s8391_s7 = sld [smem:[#allocation203_spill]] }
  0x57   : > { %s345_s12 = sshll.u32 %s8390_s5, 4  ;;  %s346_s12 = int_to_ptr.vmem [resolvable:$true] %s345_s12 }
  0x58   : > { %s4368_s30 = scalar_lea.vmem %s346_s12, 16  ;;  %p4376_p2 = scmp.lt.s32.totalorder %s346_s12, %s346_s12 }
  0x59   : > { %s367_s29 = sshll.u32 %s8391_s7, 4  ;;  %p4369_p12 = scmp.ne.s32.totalorder %s346_s12, %s4368_s30  ;;  %s368_s29 = int_to_ptr.vmem [resolvable:$true] %s367_s29 }
  0x5a   : > { %p4377_p1 = scmp.lt.s32.totalorder %s4368_s30, %s4368_s30 }
  0x5b   : > { %p4371_p13 = pnand %p4369_p12, %p4714_p8 }
  0x5c   : > { %p4378_p3 = por %p4377_p1, %p4376_p2 }
  0x5d   : > { %p4372_p0 = pneg %p4371_p13 }
  0x5f   : > { %p4379_p4 = pnand %p4378_p3, %p4372_p0 }
  0x61   : > { %4382 = shalt.err (!%p4379_p4)
}
  0x62   : > { %s4584_s16 = smov [#allocation11]   ;;  %s4383_s23 = scalar_lea.vmem %s368_s29, 16 }
  0x63   : > { %4190 = dma.vmem_to_smem (!%p4701_p6), %s346_s12, 16, %s4584_s16, [#allocation10]  }
  0x64   : > { %p4384_p5 = scmp.ne.s32.totalorder %s368_s29, %s4383_s23  ;;  %p4391_p10 = scmp.lt.s32.totalorder %s368_s29, %s368_s29 }
  0x65   : > { %p4392_p11 = scmp.lt.s32.totalorder %s4383_s23, %s4383_s23 }
  0x66   : > { %p4386_p7 = pnand %p4384_p5, %p4714_p8 }
  0x67   : > { %p4393_p12 = por %p4392_p11, %p4391_p10 }
  0x68   : > { %p4387_p9 = pneg %p4386_p7 }
  0x6a   : > { %p4394_p13 = pnand %p4393_p12, %p4387_p9 }
  0x6c   : > { %4397 = shalt.err (!%p4394_p13)
}
  0x6d   : > { %s4585_s28 = smov [#allocation14]   ;;  %s8392_s9 = sld [smem:[#allocation205_spill]] }
  0x6e   : > { %4196 = dma.vmem_to_smem (!%p4701_p6), %s368_s29, 16, %s4585_s28, [#allocation13]  }
  0x6f   : > { %s8393_s10 = sld [smem:[#allocation206_spill]] }
  0x73   : > { %s389_s21 = sshll.u32 %s8392_s9, 4  ;;  %s390_s21 = int_to_ptr.vmem [resolvable:$true] %s389_s21 }
  0x74   : > { %s4398_s30 = scalar_lea.vmem %s390_s21, 16  ;;  %p4406_p3 = scmp.lt.s32.totalorder %s390_s21, %s390_s21 }
  0x75   : > { %s400_s27 = sshll.u32 %s8393_s10, 4  ;;  %p4399_p0 = scmp.ne.s32.totalorder %s390_s21, %s4398_s30  ;;  %s401_s27 = int_to_ptr.vmem [resolvable:$true] %s400_s27 }
  0x76   : > { %p4407_p4 = scmp.lt.s32.totalorder %s4398_s30, %s4398_s30 }
  0x77   : > { %p4401_p2 = pnand %p4399_p0, %p4714_p8 }
  0x78   : > { %p4408_p5 = por %p4407_p4, %p4406_p3 }
  0x79   : > { %p4402_p1 = pneg %p4401_p2 }
  0x7b   : > { %p4409_p7 = pnand %p4408_p5, %p4402_p1 }
  0x7d   : > { %4412 = shalt.err (!%p4409_p7)
}
  0x7e   : > { %s4586_s29 = smov [#allocation17]   ;;  %s4413_s16 = scalar_lea.vmem %s401_s27, 16 }
  0x7f   : > { %4202 = dma.vmem_to_smem (!%p4701_p6), %s390_s21, 16, %s4586_s29, [#allocation16]  }
  0x80   : > { %p4414_p9 = scmp.ne.s32.totalorder %s401_s27, %s4413_s16  ;;  %p4421_p12 = scmp.lt.s32.totalorder %s401_s27, %s401_s27 }
  0x81   : > { %p4422_p13 = scmp.lt.s32.totalorder %s4413_s16, %s4413_s16 }
  0x82   : > { %p4416_p10 = pnand %p4414_p9, %p4714_p8 }
  0x83   : > { %p4423_p0 = por %p4422_p13, %p4421_p12 }
  0x84   : > { %p4417_p11 = pneg %p4416_p10 }
  0x86   : > { %p4424_p2 = pnand %p4423_p0, %p4417_p11 }
  0x88   : > { %4427 = shalt.err (!%p4424_p2)
}
  0x89   : > { %s4587_s23 = smov [#allocation18]   ;;  %s3740_s22 = sadd.s32 4294967294, %s4578_s20  }
  0x8a   : > { %4205 = dma.vmem_to_smem (!%p4701_p6), %s401_s27, 16, %s4587_s23, [#allocation19]  }
  0x8b   : > { %s4774_s28 = sadd.s32 1, %s4578_s20   ;;  %s42_s14 = sadd.s32 1, %s4574_s19 }
  0x8c   : > { %8394 = sst [smem:[#allocation34_spill]] %s4774_s28  ;;  %s39_s13 = ssub.s32 %s4578_s20, %s4774_s28 }
  0x8d   : > { %p40_p8 = scmp.eq.s32.totalorder %s39_s13, 0  ;;  %p49_p1 = scmp.ne.s32.totalorder %s4574_s19, %s4570_s18 }
  0x8e   : > { %p50_p3 = scmp.eq.s32.totalorder %s4578_s20, 0  ;;  %p55_p4 = scmp.ne.s32.totalorder %s4570_s18, %s4566_s17 }
  0x8f   : > { %s4785_s15 = scalar_select %p40_p8, %s4574_s19, %s42_s14  }
  0x90   : > { %p4787_p5 = por %p50_p3, %p49_p1  ;;  %p8397_p7 = scmp.eq.s32.totalorder %s4681_s24, 0 }
  0x91   : > { %8395 = sst [smem:[#allocation35_spill]] %s4785_s15  ;;  %p294_p9 = scmp.eq.s32.totalorder %s4681_s24, 1 }
  0x92   : > { %p4793_p6 = por %p8397_p7, %p55_p4  ;;  %p300_p10 = scmp.eq.s32.totalorder %s3740_s22, 1 }
  0x93   : > { %p4225_p11 = scmp.lt.s32.totalorder %s4578_s20, 2  ;;  %s4800_s26 = sand.u32 1, %s4574_s19  }
  0x94   : > { %s8398_s12 = scalar_select %p4793_p6, 1, 0 }
  0x95   : > { %p4802_p12 = por %p294_p9, %p49_p1  ;;  %p4806_p13 = por %p300_p10, %p55_p4 }
  0x96   : > { %s3751_s29 = sshll.u32 %s4800_s26, 3  ;;  %s4141_s16 = sshll.u32 %s4578_s20, 7 }
  0x97   : > { %s8399_s27 = scalar_select %p4802_p12, 1, 0 }
  0x98   : > { %s8401_s30 = scalar_select %p4806_p13, 1, 0 }
  0x99   : > { %8400 = sst [smem:[#allocation36_spill]] %s8399_s27  ;;  %s8403_s0 = sld [smem:[#allocation196_spill]] }
  0x9a   : > { %8402 = sst [smem:[#allocation37_spill]] %s8401_s30  ;;  %s415_s14 = scalar_lea.vmem [#allocation2], %s3751_s29 }
  0x9b   : > { %s423_s3 = sshll.u32 %s415_s14, 4  ;;  %p4821_p0 = pnand %p4225_p11, %p4787_p5  ;;  %s4817_s3 = int_to_ptr.vmem [resolvable:$true] %s423_s3 }
  0x9c   : > { %s412_s6 = scalar_lea.sflag [#allocation3], %s4800_s26 }
  0x9d   : > { %p4430_p8 = pneg %p4821_p0 }
  0x9f   : > { %s4815_s22 = scalar_lea.hbm %s8403_s0, %s4141_s16  ;;  %s4433_s21 = scalar_lea.hbm %s8403_s0, 256 }
  0xa0   : > { %s4428_s23 = scalar_lea.hbm %s4815_s22, 128  ;;  %p4434_p4 = scmp.lt.u32.totalorder %s4815_s22, %s8403_s0 }
  0xa1   : > { %p4429_p2 = scmp.ne.s32.totalorder %s4815_s22, %s4428_s23  ;;  %p4435_p5 = scmp.lt.u32.totalorder %s4433_s21, %s4428_s23 }
  0xa2   : > { %p4437_p9 = scmp.lt.u32.totalorder %s4428_s23, %s4815_s22 }
  0xa3   : > { %p4431_p1 = pnand %p4430_p8, %p4429_p2  ;;  %p4436_p7 = por %p4435_p5, %p4434_p4 }
  0xa5   : > { %p4432_p3 = pneg %p4431_p1  ;;  %p4438_p10 = por %p4437_p9, %p4436_p7 }
  0xa7   : > { %p4439_p11 = pnand %p4438_p10, %p4432_p3 }
  0xa9   : > { %4442 = shalt.err (!%p4439_p11)
}
  0xaa   : > { %s4443_s5 = scalar_lea.vmem %s4817_s3, 128  ;;  %s4588_s29 = smov [#allocation2]  }
  0xab   : > { %p4444_p2 = scmp.ne.s32.totalorder %s4817_s3, %s4443_s5  ;;  %s4448_s16 = sshll.u32 %s4588_s29, 4  ;;  %s4449_s16 = int_to_ptr.vmem [resolvable:$false] %s4448_s16 }
  0xac   : > { %s4450_s13 = scalar_lea.vmem %s4449_s16, 256  ;;  %p4451_p12 = scmp.lt.s32.totalorder %s4817_s3, %s4449_s16 }
  0xad   : > { %p4446_p1 = pnand %p4444_p2, %p4430_p8  ;;  %p4452_p4 = scmp.lt.s32.totalorder %s4450_s13, %s4443_s5 }
  0xaf   : > { %p4447_p13 = pneg %p4446_p1  ;;  %p4453_p5 = por %p4452_p4, %p4451_p12 }
  0xb1   : > { %p4454_p7 = pnand %p4453_p5, %p4447_p13 }
  0xb3   : > { %4457 = shalt.err (!%p4454_p7)
}
  0xb4   : > { %4209 = dma.hbm_to_vmem [thread:$0]  (!%p4821_p0), %s4815_s22, 128, %s4817_s3, %s412_s6  }
  0xb5   : > { %s3755_s23 = sshll.u32 %s4578_s20, 6  ;;  %s8405_s21 = sshll.u32 %s4800_s26, 2 }
  0xb6   : > { %s434_s14 = scalar_lea.vmem [#allocation6], %s8405_s21  ;;  %s8406_s1 = sld [smem:[#allocation197_spill]] }
  0xb7   : > { %s441_s29 = sshll.u32 %s434_s14, 4  ;;  %s431_s16 = scalar_lea.sflag [#allocation7], %s4800_s26  ;;  %s442_s29 = int_to_ptr.vmem [resolvable:$true] %s441_s29 }
  0xbc   : > { %s4858_s5 = scalar_lea.hbm %s8406_s1, %s3755_s23  ;;  %s4463_s22 = scalar_lea.hbm %s8406_s1, 128 }
  0xbd   : > { %s4458_s13 = scalar_lea.hbm %s4858_s5, 64  ;;  %p4464_p9 = scmp.lt.u32.totalorder %s4858_s5, %s8406_s1 }
  0xbe   : > { %p4459_p12 = scmp.ne.s32.totalorder %s4858_s5, %s4458_s13  ;;  %p4465_p10 = scmp.lt.u32.totalorder %s4463_s22, %s4458_s13 }
  0xbf   : > { %p4467_p2 = scmp.lt.u32.totalorder %s4458_s13, %s4858_s5 }
  0xc0   : > { %p4461_p13 = pnand %p4459_p12, %p4430_p8  ;;  %p4466_p11 = por %p4465_p10, %p4464_p9 }
  0xc2   : > { %p4462_p3 = pneg %p4461_p13  ;;  %p4468_p1 = por %p4467_p2, %p4466_p11 }
  0xc4   : > { %p4469_p4 = pnand %p4468_p1, %p4462_p3 }
  0xc6   : > { %4472 = shalt.err (!%p4469_p4)
}
  0xc7   : > { %s4473_s7 = scalar_lea.vmem %s442_s29, 64  ;;  %s4589_s26 = smov [#allocation6]  }
  0xc8   : > { %p4474_p5 = scmp.ne.s32.totalorder %s442_s29, %s4473_s7  ;;  %s4478_s23 = sshll.u32 %s4589_s26, 4  ;;  %s4479_s23 = int_to_ptr.vmem [resolvable:$false] %s4478_s23 }
  0xc9   : > { %s4480_s14 = scalar_lea.vmem %s4479_s23, 128  ;;  %p4481_p13 = scmp.lt.s32.totalorder %s442_s29, %s4479_s23 }
  0xca   : > { %p4476_p7 = pnand %p4474_p5, %p4430_p8  ;;  %p4482_p6 = scmp.lt.s32.totalorder %s4480_s14, %s4473_s7 }
  0xcc   : > { %p4477_p12 = pneg %p4476_p7  ;;  %p4483_p9 = por %p4482_p6, %p4481_p13 }
  0xce   : > { %p4484_p10 = pnand %p4483_p9, %p4477_p12 }
  0xd0   : > { %4487 = shalt.err (!%p4484_p10)
}
  0xd1   : > { %4212 = dma.hbm_to_vmem [thread:$0]  (!%p4821_p0), %s4858_s5, 64, %s442_s29, %s431_s16  }
  0xd2   : > { %p8407_p3 = scmp.ne.s32.totalorder %s8384_s25, 0 }
  0xd4   : > { %450 = sbr.rel (%p8407_p3) target bundleno = 939 (0x3ab), region = 64 }
  0xdb   : > { %s4883_s13 = sand.u32 1, %s4570_s18   ;;  %p8409_p6 = scmp.ne.s32.totalorder %s8398_s12, 0 }
  0xdc   : > { %8408 = sst [smem:[#allocation38_spill]] %s4883_s13  ;;  %s3757_s3 = sshll.u32 %s4883_s13, 3 }
  0xdd   : > { %s453_s6 = scalar_lea.sflag [#allocation3], %s4883_s13  ;;  %s4887_s22 = scalar_lea.vmem [#allocation2], %s3757_s3 }
  0xde   : > { %4533 = dma.done.wait (%p8409_p6), %s453_s6, 128  }
  0xdf   : > { %4535 = vsyncadd (%p8409_p6), %s453_s6, 4294967168  ;;  %s3758_s4 = sshll.u32 %s4883_s13, 2  ;;  %s462_s25 = scalar_lea.sflag [#allocation7], %s4883_s13 }
  0xe0   : > { %s4895_s29 = scalar_lea.vmem [#allocation6], %s3758_s4 }
  0xe1   : > { %8410 = sst [smem:[#allocation39_spill]] %s4895_s29 }
  0xe2   : > { %4537 = dma.done.wait (%p8409_p6), %s462_s25, 64  }
  0xe3   : > { %4539 = vsyncadd (%p8409_p6), %s462_s25, 4294967232  ;;  %p8411_p0 = scmp.eq.s32.totalorder %s4681_s24, 0 }
  0xe5   : > { %4541 = dma.done.wait (%p8411_p0), [#allocation5], 16   ;;  %p8412_p8 = pmov %p8411_p0 }
  0xe6   : > { %p8413_p11 = pmov %p8411_p0 }
  0xe7   : > { %4543 = vsyncadd (%p8412_p8), [#allocation5], 4294967280 }
  0xe8   : > { %4545 = dma.done.wait (%p8413_p11), [#allocation10], 32   ;;  %p8414_p2 = pmov %p8411_p0 }
  0xe9   : > { %p8415_p1 = pmov %p8411_p0 }
  0xea   : > { %4547 = vsyncadd (%p8414_p2), [#allocation10], 4294967264 }
  0xeb   : > { %4549 = dma.done.wait (%p8415_p1), [#allocation13], 48   ;;  %p8416_p4 = pmov %p8411_p0 }
  0xec   : > { %p8417_p5 = pmov %p8411_p0 }
  0xed   : > { %4551 = vsyncadd (%p8416_p4), [#allocation13], 4294967248 }
  0xee   : > { %4553 = dma.done.wait (%p8417_p5), [#allocation16], 32   ;;  %p8418_p7 = pmov %p8411_p0 }
  0xef   : > { %p8419_p12 = pmov %p8411_p0 }
  0xf0   : > { %4555 = vsyncadd (%p8418_p7), [#allocation16], 4294967264 }
  0xf1   : > { %4557 = dma.done.wait (%p8419_p12), [#allocation19], 16   ;;  %p8420_p13 = pmov %p8411_p0 }
  0xf3   : > { %4559 = vsyncadd (%p8420_p13), [#allocation19], 4294967280 }
  0xf4   : > { %502 = sfence }
  0xf5   : > { %v4922_v0 = vld [vmem:[%s4895_s29] sm:$0xf]  ;;  %s4590_s12 = smov 8   ;;  %s3775_s5 = sld [smem:[#allocation8 + $0x5]]  ;;  %v4937_v4 = vld [vmem:[%s4887_s22] sm:$0xff]  ;;  %v574_v25 = vlaneseq  ;;  %vm584_vm0 = vcmask 1040384  }
  0xf6   : > { %932 = vrot.lane.b32.xlu0 %v4922_v0, %s4590_s12  ;;  %v8133_v1 = vrot.slane %v4922_v0, 2  ;;  %v8134_v2 = vrot.slane %v4922_v0, 1  ;;  %v8132_v3 = vrot.slane %v4922_v0, 3  ;;  %s3774_s16 = sld [smem:[#allocation8 + $0x4]]  ;;  %s3777_s21 = sld [smem:[#allocation8 + $0x6]]  ;;  %vm935_vm1 = vcmask 64512  }
  0xf7   : > { %s3768_s0 = sld [smem:[#allocation8 + $0x1]]  ;;  %s3770_s7 = sld [smem:[#allocation8 + $0x2]]  ;;  %v4963_v36 = vshrl.u32 %v574_v25, 7  ;;  %vm963_vm2 = vcmask 457728   ;;  %vm947_vm3 = vcmask 515072   ;;  %vm941_vm4 = vcmask 7168  }
  0xf8   : > { %1009 = vrot.lane.b32.xlu1 %v8133_v1, %s4590_s12  ;;  %s543_s26 = sld [smem:[#allocation8]]  ;;  %s3784_s23 = sld [smem:[#allocation8 + $0x9]]  ;;  %vm1415_vm5 = vcmask 523264   ;;  %vm3533_vm6 = vcmask 1041408   ;;  %vm3536_vm7 = vcmask 1042432   ;;  %vm3539_vm8 = vcmask 1043456  }
  0xf9   : > { %s4934_s14 = sld [smem:[#allocation8 + $0x7]]  ;;  %s4939_s3 = sld [smem:[#allocation8 + $0x3]]  ;;  %v4967_v44 = vsub.s32 0, %v4963_v36  ;;  %v4970_v45 = vsub.s32 4, %v4963_v36  ;;  %vm3542_vm9 = vcmask 1044480   ;;  %vm3545_vm10 = vcmask 1045504  }
  0xfa   : > { %977 = vrot.lane.b32.xlu0 %v8134_v2, %s4590_s12  ;;  %s4591_s6 = smov 120   ;;  %s4942_s4 = sld [smem:[#allocation8 + $0x8]]  ;;  %vm3548_vm11 = vcmask 1046528  }
  0xfb   : > { %v645_v5 = vstv %s3775_s5  ;;  %s4944_s25 = sld [smem:[#allocation8 + $0xa]]  ;;  %s8070_s22 = smov 127   ;;  %8421 = vst [vmem:[#allocation40_spill] sm:$0xff] %v4967_v44  ;;  %8422 = vst [vmem:[#allocation41_spill] sm:$0xff] %v4970_v45 }
  0xfc   : > { %1040 = vrot.lane.b32.xlu1 %v8132_v3, %s4590_s12  ;;  %v641_v7 = vstv %s3774_s16  ;;  %v646_v8 = vmul.f32 %v645_v5, %v4937_v4  ;;  %v653_v9 = vstv %s3777_s21  ;;  %s3788_s12 = sld [smem:[#allocation8 + $0xb]]  ;;  %s3793_s5 = sld [smem:[#allocation8 + $0xd]] }
  0xfd   : > { %v548_v6 = vstv %s3768_s0  ;;  %v556_v11 = vstv %s3770_s7  ;;  %v642_v14 = vmul.f32 %v641_v7, %v4937_v4  ;;  %v654_v16 = vmul.f32 %v653_v9, %v4937_v4  ;;  %s3792_s16 = sld [smem:[#allocation8 + $0xc]]  ;;  %s3795_s21 = sld [smem:[#allocation8 + $0xe]] }
  0xfe   : > { %960 = vrot.lane.b32.xlu0 %v4922_v0, %s4591_s6  ;;  %v549_v10 = vmul.f32 %v548_v6, %v4937_v4  ;;  %v544_v12 = vstv %s543_s26  ;;  %v741_v13 = vstv %s3784_s23  ;;  %v3776_v15 = vrot.slane %v646_v8, 9  ;;  %s3797_s0 = sld [smem:[#allocation8 + $0xf]]  ;;  %s5014_s7 = sld [smem:[#allocation12 + $0x40]] }
  0xff   : > { %v661_v17 = vstv %s4934_s14  ;;  %v557_v18 = vmul.f32 %v556_v11, %v4937_v4  ;;  %v545_v19 = vmul.f32 %v544_v12, %v4937_v4  ;;  %v564_v21 = vstv %s4939_s3  ;;  %s5016_s26 = sld [smem:[#allocation12 + $0x41]]  ;;  %s5018_s23 = sld [smem:[#allocation12 + $0x42]] }
 0x100   : > { %v3769_v20 = vrot.slane %v549_v10, 9  ;;  %v742_v22 = vmul.f32 %v741_v13, %v4937_v4  ;;  %v737_v23 = vstv %s4942_s4  ;;  %v662_v26 = vmul.f32 %v661_v17, %v4937_v4  ;;  %s5021_s14 = sld [smem:[#allocation12 + $0x43]]  ;;  %s5023_s3 = sld [smem:[#allocation12 + $0x44]] }
 0x101   : > { %v749_v24 = vstv %s4944_s25  ;;  %v651_v27 = vadd.f32 %v3776_v15, %v642_v14  ;;  %v3778_v28 = vrot.slane %v654_v16, 10  ;;  %v3771_v29 = vrot.slane %v557_v18, 10  ;;  %s5025_s6 = sld [smem:[#allocation12 + $0x45]]  ;;  %s5027_s4 = sld [smem:[#allocation12 + $0x46]] }
 0x102   : > { %955 = vrot.lane.b32.xlu0 %v4922_v0, %s8070_s22  ;;  %v565_v30 = vmul.f32 %v564_v21, %v4937_v4  ;;  %v554_v31 = vadd.f32 %v3769_v20, %v545_v19  ;;  %v738_v32 = vmul.f32 %v737_v23, %v4937_v4  ;;  %v3785_v33 = vrot.slane %v742_v22, 9  ;;  %s5029_s25 = sld [smem:[#allocation12 + $0x47]]  ;;  %s5035_s22 = sld [smem:[#allocation12 + $0x4a]] }
 0x103   : > { %v750_v34 = vmul.f32 %v749_v24, %v4937_v4  ;;  %v757_v35 = vstv %s3788_s12  ;;  %v659_v37 = vadd.f32 %v3778_v28, %v651_v27  ;;  %v3780_v38 = vrot.slane %v662_v26, 11  ;;  %s5031_s12 = sld [smem:[#allocation12 + $0x48]]  ;;  %s5039_s1 = sld [smem:[#allocation12 + $0x4b]] }
 0x104   : > { %v3773_v39 = vrot.slane %v565_v30, 11  ;;  %v562_v40 = vadd.f32 %v3771_v29, %v554_v31  ;;  %v747_v41 = vadd.f32 %v3785_v33, %v738_v32  ;;  %v758_v43 = vmul.f32 %v757_v35, %v4937_v4  ;;  %8423 = sst [smem:[#allocation42_spill]] %s5014_s7  ;;  %s5045_s8 = sld [smem:[#allocation12 + $0x4e]] }
 0x105   : > { %v3787_v42 = vrot.slane %v750_v34, 10  ;;  %v4972_v46 = vadd.f32 %v3780_v38, %v659_v37  ;;  %v837_v25 = vstv %s3793_s5  ;;  %8424 = sst [smem:[#allocation43_spill]] %s5016_s26  ;;  %v833_v27 = vstv %s3792_s16  ;;  %s5033_s5 = sld [smem:[#allocation12 + $0x49]] }
 0x106   : > { %v4974_v47 = vadd.f32 %v3773_v39, %v562_v40  ;;  %v3789_v49 = vrot.slane %v758_v43, 11  ;;  %8425 = sst [smem:[#allocation44_spill]] %s5018_s23  ;;  %v838_v26 = vmul.f32 %v837_v25, %v4937_v4  ;;  %v845_v28 = vstv %s3795_s21  ;;  %s5041_s16 = sld [smem:[#allocation12 + $0x4c]] }
 0x107   : > { %v755_v48 = vadd.f32 %v3787_v42, %v747_v41  ;;  %v674_v50 = vrot.slane %v4972_v46, %v4967_v44  ;;  %v678_v51 = vrot.slane %v4972_v46, %v4970_v45  ;;  %v686_v52 = vmul.f32 %v4972_v46, %v4972_v46  ;;  %8426 = sst [smem:[#allocation45_spill]] %s5021_s14  ;;  %s5043_s21 = sld [smem:[#allocation12 + $0x4d]] }
 0x108   : > { %v577_v53 = vrot.slane %v4974_v47, %v4967_v44  ;;  %v581_v54 = vrot.slane %v4974_v47, %v4970_v45  ;;  %v590_v56 = vmul.f32 %v4974_v47, %v4974_v47  ;;  %8427 = sst [smem:[#allocation46_spill]] %s5023_s3  ;;  %v834_v29 = vmul.f32 %v833_v27, %v4937_v4  ;;  %s5049_s10 = sld [smem:[#allocation12 + $0xc0]] }
 0x109   : > { %v4986_v55 = vadd.f32 %v3789_v49, %v755_v48  ;;  %v681_v57 = vsel %vm584_vm0, %v674_v50, 0.0  ;;  %v682_v58 = vsel %vm584_vm0, %v678_v51, 0.0  ;;  %v691_v59 = vrot.slane %v686_v52, %v4967_v44  ;;  %8428 = sst [smem:[#allocation47_spill]] %s5025_s6  ;;  %s5047_s9 = sld [smem:[#allocation12 + $0x4f]] }
 0x10a   : > { %v585_v60 = vsel %vm584_vm0, %v577_v53, 0.0  ;;  %v586_v61 = vsel %vm584_vm0, %v581_v54, 0.0  ;;  %v695_v62 = vrot.slane %v686_v52, %v4970_v45  ;;  %v595_v5 = vrot.slane %v590_v56, %v4967_v44  ;;  %8429 = sst [smem:[#allocation48_spill]] %s5027_s4  ;;  %s5053_s19 = sld [smem:[#allocation12 + $0xc2]] }
 0x10b   : > { %v782_v63 = vmul.f32 %v4986_v55, %v4986_v55  ;;  %v599_v6 = vrot.slane %v590_v56, %v4970_v45  ;;  %v683_v7 = vadd.f32 %v682_v58, %v681_v57  ;;  %v587_v8 = vadd.f32 %v586_v61, %v585_v60  ;;  %8430 = sst [smem:[#allocation49_spill]] %s5029_s25  ;;  %s5051_s15 = sld [smem:[#allocation12 + $0xc1]] }
 0x10c   : > { %v698_v9 = vsel %vm584_vm0, %v691_v59, 0.0  ;;  %v699_v10 = vsel %vm584_vm0, %v695_v62, 0.0  ;;  %v602_v13 = vsel %vm584_vm0, %v595_v5, 0.0  ;;  %v770_v15 = vrot.slane %v4986_v55, %v4967_v44  ;;  %8431 = sst [smem:[#allocation50_spill]] %s5031_s12  ;;  %s5058_s28 = sld [smem:[#allocation12 + $0xd0]] }
 0x10d   : > { %v787_v11 = vrot.slane %v782_v63, %v4967_v44  ;;  %v791_v12 = vrot.slane %v782_v63, %v4970_v45  ;;  %v603_v14 = vsel %vm584_vm0, %v599_v6, 0.0  ;;  %v774_v16 = vrot.slane %v4986_v55, %v4970_v45  ;;  %8432 = sst [smem:[#allocation51_spill]] %s5033_s5  ;;  %s5056_s18 = sld [smem:[#allocation12 + $0xc3]] }
 0x10e   : > { %v700_v17 = vadd.f32 %v699_v10, %v698_v9  ;;  %v604_v18 = vadd.f32 %v603_v14, %v602_v13  ;;  %v777_v21 = vsel %vm584_vm0, %v770_v15, 0.0  ;;  %8433 = sst [smem:[#allocation52_spill]] %s5035_s22  ;;  %v3794_v30 = vrot.slane %v838_v26, 9  ;;  %s5062_s20 = sld [smem:[#allocation12 + $0xd2]] }
 0x10f   : > { %v794_v19 = vsel %vm584_vm0, %v787_v11, 0.0  ;;  %v795_v20 = vsel %vm584_vm0, %v791_v12, 0.0  ;;  %v778_v22 = vsel %vm584_vm0, %v774_v16, 0.0  ;;  %v846_v31 = vmul.f32 %v845_v28, %v4937_v4  ;;  %8434 = sst [smem:[#allocation53_spill]] %s5039_s1  ;;  %s5064_s30 = sld [smem:[#allocation12 + $0xd3]] }
 0x110   : > { %v796_v23 = vadd.f32 %v795_v20, %v794_v19  ;;  %v779_v24 = vadd.f32 %v778_v22, %v777_v21  ;;  %8435 = sst [smem:[#allocation54_spill]] %s5041_s16  ;;  %v853_v32 = vstv %s3797_s0  ;;  %v843_v33 = vadd.f32 %v3794_v30, %v834_v29  ;;  %s5060_s0 = sld [smem:[#allocation12 + $0xd1]] }
 0x111   : > { %8436 = sst [smem:[#allocation55_spill]] %s5043_s21  ;;  %v3796_v34 = vrot.slane %v846_v31, 10  ;;  %v854_v35 = vmul.f32 %v853_v32, %v4937_v4  ;;  %s5068_s11 = sld [smem:[#allocation12 + $0xe1]]  ;;  %v1144_v48 = vstv %s5014_s7  ;;  %v1148_v49 = vstv %s5016_s26 }
 0x112   : > { %8437 = sst [smem:[#allocation56_spill]] %s5045_s8  ;;  %s5066_s17 = sld [smem:[#allocation12 + $0xe0]]  ;;  %v1152_v50 = vstv %s5018_s23  ;;  %v1156_v53 = vstv %s5021_s14  ;;  %v1312_v54 = vstv %s5051_s15  ;;  %v1498_v58 = vstv %s5023_s3 }
 0x113   : > { %8438 = sst [smem:[#allocation57_spill]] %s5047_s9  ;;  %v851_v37 = vadd.f32 %v3796_v34, %v843_v33  ;;  %v3798_v38 = vrot.slane %v854_v35, 11  ;;  %s5072_s24 = sld [smem:[#allocation12 + $0xe3]]  ;;  %v1319_v59 = vstv %s5053_s19  ;;  %v1502_v60 = vstv %s5025_s6 }
 0x114   : > { %8439 = sst [smem:[#allocation58_spill]] %s5058_s28  ;;  %s5070_s27 = sld [smem:[#allocation12 + $0xe2]]  ;;  %v1506_v61 = vstv %s5027_s4  ;;  %v1510_v62 = vstv %s5029_s25  ;;  %v1326_v63 = vstv %s5056_s18  ;;  %v1851_v5 = vstv %s5031_s12 }
 0x115   : > { %8441 = sst [smem:[#allocation60_spill]] %s5062_s20  ;;  %s5074_s13 = sld [smem:[#allocation12 + $0xc4]]  ;;  %v5088_v4 = vadd.f32 %v3798_v38, %v851_v37  ;;  %v1855_v6 = vstv %s5033_s5  ;;  %v1308_v11 = vstv %s5049_s10  ;;  %v5169_v12 = vmul.f32 %v1319_v59, %v4922_v0 }
 0x116   : > { %8440 = sst [smem:[#allocation59_spill]] %s5060_s0  ;;  %s5076_s29 = sld [smem:[#allocation12 + $0xc5]]  ;;  %v1863_v15 = vstv %s5039_s1  ;;  %v5179_v16 = vmul.f32 %v1326_v63, %v4922_v0  ;;  %v2212_v19 = vstv %s5045_s8  ;;  %v2216_v21 = vstv %s5047_s9 }
 0x117   : > { %8442 = sst [smem:[#allocation61_spill]] %s5064_s30  ;;  %s5080_s0 = sld [smem:[#allocation12 + $0xc7]]  ;;  %8453 = vst [vmem:[#allocation72_spill] sm:$0xff] %v5088_v4  ;;  %v878_v40 = vmul.f32 %v5088_v4, %v5088_v4  ;;  %v866_v51 = vrot.slane %v5088_v4, %v4967_v44  ;;  %v870_v52 = vrot.slane %v5088_v4, %v4970_v45  ;;  %v1309_v22 = vmul.f32 %v1308_v11, %v4922_v0 }
 0x118   : > { %8443 = sst [smem:[#allocation62_spill]] %s5066_s17  ;;  %s5078_s28 = sld [smem:[#allocation12 + $0xc6]]  ;;  %v1322_v27 = vrot.slane %v5169_v12, 2  ;;  %v1329_v29 = vrot.slane %v5179_v16, 3 }
 0x119   : > { %8444 = sst [smem:[#allocation63_spill]] %s5068_s11  ;;  %s5082_s20 = sld [smem:[#allocation12 + $0xd4]]  ;;  %v883_v56 = vrot.slane %v878_v40, %v4967_v44  ;;  %v887_v57 = vrot.slane %v878_v40, %v4970_v45  ;;  %v873_v9 = vsel %vm584_vm0, %v866_v51, 0.0  ;;  %v874_v10 = vsel %vm584_vm0, %v870_v52, 0.0 }
 0x11a   : > { %8445 = sst [smem:[#allocation64_spill]] %s5070_s27  ;;  %s5084_s30 = sld [smem:[#allocation12 + $0xd5]]  ;;  %v5200_v25 = vadd.f32 %v874_v10, %v873_v9 }
 0x11b   : > { %8446 = sst [smem:[#allocation65_spill]] %s5072_s24  ;;  %s5086_s17 = sld [smem:[#allocation12 + $0xd6]]  ;;  %v890_v13 = vsel %vm584_vm0, %v883_v56, 0.0  ;;  %v891_v14 = vsel %vm584_vm0, %v887_v57, 0.0 }
 0x11c   : > { %8447 = sst [smem:[#allocation66_spill]] %s5074_s13  ;;  %s5090_s27 = sld [smem:[#allocation12 + $0xd7]]  ;;  %v1666_v20 = vstv %s5076_s29  ;;  %v5202_v26 = vadd.f32 %v891_v14, %v890_v13 }
 0x11d   : > { %8449 = sst [smem:[#allocation68_spill]] %s5080_s0  ;;  %s5092_s11 = sld [smem:[#allocation12 + $0xe4]]  ;;  %v1667_v32 = vmul.f32 %v1666_v20, %v4922_v0 }
 0x11e   : > { %8448 = sst [smem:[#allocation67_spill]] %s5078_s28  ;;  %s5094_s24 = sld [smem:[#allocation12 + $0xe5]] }
 0x11f   : > { %8450 = sst [smem:[#allocation69_spill]] %s5082_s20  ;;  %s5107_s20 = sld [smem:[#allocation12 + $0xc9]]  ;;  %v1669_v10 = vrot.slane %v1667_v32, 1 }
 0x120   : > { %588 = vadd.xlane.f32.xlu1 %v587_v8  ;;  %8451 = sst [smem:[#allocation70_spill]] %s5084_s30  ;;  %s5096_s13 = sld [smem:[#allocation12 + $0xe6]]  ;;  %v1313_v8 = vmul.f32 %v1312_v54, %v4922_v0 }
 0x121   : > { %684 = vadd.xlane.f32.xlu0 %v683_v7  ;;  %8452 = sst [smem:[#allocation71_spill]] %s5086_s17  ;;  %s8458_s2 = sld [smem:[#allocation198_spill]]  ;;  %v1859_v7 = vstv %s5035_s22 }
 0x122   : > { %8454 = sst [smem:[#allocation73_spill]] %s5090_s27  ;;  %s5103_s30 = sld [smem:[#allocation12 + $0xe7]] }
 0x123   : > { %8455 = sst [smem:[#allocation74_spill]] %s5092_s11  ;;  %s5105_s17 = sld [smem:[#allocation12 + $0xc8]] }
 0x124   : > { %701 = vadd.xlane.f32.xlu1 %v700_v17  ;;  %8456 = sst [smem:[#allocation75_spill]] %s5094_s24  ;;  %s5109_s27 = sld [smem:[#allocation12 + $0xca]]  ;;  %v2204_v17 = vstv %s5041_s16 }
 0x125   : > { %605 = vadd.xlane.f32.xlu0 %v604_v18  ;;  %s5115_s24 = sld [smem:[#allocation12 + $0xd8]]  ;;  %s5119_s28 = sld [smem:[#allocation12 + $0xd9]]  ;;  %v2208_v18 = vstv %s5043_s21 }
 0x126   : > { %8457 = sst [smem:[#allocation76_spill]] %s5096_s13  ;;  %s5113_s13 = sld [smem:[#allocation12 + $0xcb]] }
 0x127   : > { %v5101_v39 = vld [vmem:[%s8458_s2 + $0x1] sm:$0x1]  ;;  %s5121_s0 = sld [smem:[#allocation12 + $0xda]]  ;;  %s5127_s2 = sld [smem:[#allocation12 + $0xdb]] }
 0x128   : > { %797 = vadd.xlane.f32.xlu1 %v796_v23  ;;  %8459 = sst [smem:[#allocation77_spill]] %s5103_s30  ;;  %v8192_v41 = vrot.slane %v5101_v39, 7  ;;  %v8197_v42 = vrot.slane %v5101_v39, 6  ;;  %v8198_v43 = vrot.slane %v5101_v39, 5  ;;  %s5137_s7 = sld [smem:[#allocation12 + $0xe9]]  ;;  %v1315_v23 = vrot.slane %v1313_v8, 1 }
 0x129   : > { %780 = vadd.xlane.f32.xlu0 %v779_v24  ;;  %s5139_s23 = sld [smem:[#allocation12 + $0xea]]  ;;  %s5145_s26 = sld [smem:[#allocation12 + $0xeb]]  ;;  %v2019_v24 = vstv %s5107_s20  ;;  %v2015_v52 = vstv %s5105_s17 }
 0x12a   : > { %s5153_s15 = sld [smem:[#allocation12 + $0xcd]]  ;;  %s5155_s14 = sld [smem:[#allocation12 + $0xce]]  ;;  %v2020_v37 = vmul.f32 %v2019_v24, %v4922_v0  ;;  %v1317_v40 = vadd.f32 %v1315_v23, %v1309_v22  ;;  %v2026_v54 = vstv %s5109_s27  ;;  %v2016_v14 = vmul.f32 %v2015_v52, %v4922_v0 }
 0x12b   : > { %8460 = sst [smem:[#allocation78_spill]] %s5115_s24  ;;  %s5129_s24 = sld [smem:[#allocation12 + $0xe8]]  ;;  %v2027_v22 = vmul.f32 %v2026_v54, %v4922_v0 }
 0x12c   : > { %8461 = sst [smem:[#allocation79_spill]] %s5119_s28  ;;  %s5163_s3 = sld [smem:[#allocation12 + $0xdc]]  ;;  %v2022_v20 = vrot.slane %v2020_v37, 1  ;;  %v1324_v24 = vadd.f32 %v1322_v27, %v1317_v40 }
 0x12d   : > { %8462 = sst [smem:[#allocation80_spill]] %s5121_s0  ;;  %s5161_s19 = sld [smem:[#allocation12 + $0xcf]]  ;;  %v2029_v2 = vrot.slane %v2027_v22, 2 }
 0x12e   : > { %8463 = sst [smem:[#allocation81_spill]] %s5127_s2  ;;  %s5171_s18 = sld [smem:[#allocation12 + $0xdd]]  ;;  %v2024_v1 = vadd.f32 %v2022_v20, %v2016_v14 }
 0x12f   : > { %8465 = sst [smem:[#allocation83_spill]] %s5137_s7  ;;  %s5173_s25 = sld [smem:[#allocation12 + $0xde]] }
 0x130   : > { %8466 = sst [smem:[#allocation84_spill]] %s5139_s23  ;;  %s5181_s22 = sld [smem:[#allocation12 + $0xdf]]  ;;  %v2372_v12 = vstv %s5153_s15 }
 0x131   : > { %8464 = sst [smem:[#allocation82_spill]] %s5129_s24  ;;  %s5147_s24 = sld [smem:[#allocation12 + $0xcc]]  ;;  %v2373_v54 = vmul.f32 %v2372_v12, %v4922_v0 }
 0x132   : > { %8467 = sst [smem:[#allocation85_spill]] %s5145_s26  ;;  %s5183_s10 = sld [smem:[#allocation12 + $0xec]] }
 0x133   : > { %8468 = sst [smem:[#allocation86_spill]] %s5163_s3  ;;  %s8473_s4 = sld [smem:[#allocation58_spill]]  ;;  %v2386_v57 = vstv %s5161_s19  ;;  %v2375_v22 = vrot.slane %v2373_v54, 1 }
 0x134   : > { %8469 = sst [smem:[#allocation87_spill]] %s5171_s18  ;;  %s5189_s5 = sld [smem:[#allocation12 + $0xed]] }
 0x135   : > { %8470 = sst [smem:[#allocation88_spill]] %s5173_s25  ;;  %s8475_s6 = sld [smem:[#allocation59_spill]] }
 0x136   : > { %8471 = sst [smem:[#allocation89_spill]] %s5181_s22  ;;  %s5191_s12 = sld [smem:[#allocation12 + $0xee]] }
 0x137   : > { %s8477_s25 = sld [smem:[#allocation60_spill]]  ;;  %s8478_s1 = sld [smem:[#allocation61_spill]]  ;;  %v2368_v3 = vstv %s5147_s24 }
 0x138   : > { %8472 = sst [smem:[#allocation90_spill]] %s5183_s10  ;;  %s5196_s22 = sld [smem:[#allocation12 + $0xef]]  ;;  %v2369_v20 = vmul.f32 %v2368_v3, %v4922_v0 }
 0x139   : > { %s8480_s10 = sld [smem:[#allocation66_spill]]  ;;  %s5198_s18 = sld [smem:[#allocation12 + $0x10]]  ;;  %v1333_v28 = vstv %s8473_s4 }
 0x13a   : > { %8474 = sst [smem:[#allocation91_spill]] %s5189_s5  ;;  %s8482_s21 = sld [smem:[#allocation67_spill]] }
 0x13b   : > { %s5206_s29 = sld [smem:[#allocation12 + $0x11]]  ;;  %s5208_s9 = sld [smem:[#allocation12 + $0x14]]  ;;  %v1337_v30 = vstv %s8475_s6 }
 0x13c   : > { %8476 = sst [smem:[#allocation92_spill]] %s5191_s12  ;;  %s5214_s20 = sld [smem:[#allocation12 + $0x12]] }
 0x13d   : > { %v1344_v31 = vstv %s8477_s25  ;;  %v1351_v33 = vstv %s8478_s1  ;;  %s5229_s25 = sld [smem:[#allocation12 + $0x19]]  ;;  %s8498_s1 = smov 127  }
 0x13e   : > { %8479 = sst [smem:[#allocation93_spill]] %s5196_s22  ;;  %s5224_s22 = sld [smem:[#allocation12 + $0x18]] }
 0x13f   : > { %8481 = sst [smem:[#allocation66_spill]] %s5198_s18  ;;  %s5216_s18 = sld [smem:[#allocation12 + $0x15]]  ;;  %v1662_v34 = vstv %s8480_s10 }
 0x140   : > { %v1673_v35 = vstv %s8482_s21  ;;  %s5239_s21 = sld [smem:[#allocation12 + $0x1c]]  ;;  %s5241_s10 = sld [smem:[#allocation12 + $0x1d]]  ;;  %v1663_v9 = vmul.f32 %v1662_v34, %v4922_v0 }
 0x141   : > { %8483 = sst [smem:[#allocation67_spill]] %s5206_s29  ;;  %s8490_s29 = sld [smem:[#allocation68_spill]]  ;;  %v1674_v11 = vmul.f32 %v1673_v35, %v4922_v0  ;;  %v2033_v35 = vstv %s5113_s13 }
 0x142   : > { %8484 = sst [smem:[#allocation94_spill]] %s5208_s9  ;;  %s5250_s27 = sld [smem:[#allocation12 + $0x13]]  ;;  %v1671_v40 = vadd.f32 %v1669_v10, %v1663_v9  ;;  %v2034_v13 = vmul.f32 %v2033_v35, %v4922_v0  ;;  %v5298_v10 = vadd.f32 %v1329_v29, %v1324_v24  ;;  %v2387_v35 = vmul.f32 %v2386_v57, %v4922_v0 }
 0x143   : > { %8486 = sst [smem:[#allocation95_spill]] %s5214_s20  ;;  %s5222_s9 = sld [smem:[#allocation12 + $0x16]]  ;;  %v1095_v59 = vstv %s5214_s20 }
 0x144   : > { %8492 = sst [smem:[#allocation97_spill]] %s5224_s22  ;;  %s8499_s17 = sld [smem:[#allocation69_spill]] }
 0x145   : > { %8488 = sst [smem:[#allocation96_spill]] %s5216_s18  ;;  %s5231_s18 = sld [smem:[#allocation12 + $0x1a]] }
 0x146   : > { %8493 = sst [smem:[#allocation98_spill]] %s5229_s25  ;;  %s5252_s4 = sld [smem:[#allocation12 + $0x17]] }
 0x147   : > { %v1680_v63 = vstv %s8490_s29  ;;  %8496 = sst [smem:[#allocation100_spill]] %s5239_s21  ;;  %s8501_s29 = sld [smem:[#allocation70_spill]] }
 0x148   : > { %8497 = sst [smem:[#allocation101_spill]] %s5241_s10  ;;  %s8503_s16 = sld [smem:[#allocation71_spill]]  ;;  %v5262_v32 = vmul.f32 %v1680_v63, %v4922_v0  ;;  %v1676_v63 = vrot.slane %v1674_v11, 2 }
 0x149   : > { %8491 = sst [smem:[#allocation68_spill]] %s5222_s9  ;;  %s5257_s8 = sld [smem:[#allocation12 + $0xb0]] }
 0x14a   : > { %8500 = sst [smem:[#allocation102_spill]] %s5250_s27  ;;  %s5259_s10 = sld [smem:[#allocation12 + $0xb1]]  ;;  %v1687_v34 = vstv %s8499_s17  ;;  %v1678_v29 = vadd.f32 %v1676_v63, %v1671_v40  ;;  %v1683_v3 = vrot.slane %v5262_v32, 3 }
 0x14b   : > { %8495 = sst [smem:[#allocation99_spill]] %s5231_s18  ;;  %s5268_s6 = sld [smem:[#allocation12 + $0xb2]] }
 0x14c   : > { %8502 = sst [smem:[#allocation103_spill]] %s5252_s4  ;;  %s5266_s15 = sld [smem:[#allocation12 + $0x1b]]  ;;  %v5352_v57 = vadd.f32 %v1683_v3, %v1678_v29  ;;  %v2389_v29 = vrot.slane %v2387_v35, 3  ;;  %v1794_v3 = vstv %s5224_s22 }
 0x14d   : > { %s5284_s13 = sld [smem:[#allocation12 + $0xb4]]  ;;  %s5314_s17 = sld [smem:[#allocation12 + $0xba]] }
 0x14e   : > { %v1698_v52 = vstv %s8503_s16  ;;  %s5286_s16 = sld [smem:[#allocation12 + $0xb5]]  ;;  %s5323_s11 = sld [smem:[#allocation12 + $0xbb]] }
 0x14f   : > { %8504 = sst [smem:[#allocation104_spill]] %s5257_s8  ;;  %s5278_s8 = sld [smem:[#allocation12 + $0xb3]] }
 0x150   : > { %8505 = sst [smem:[#allocation105_spill]] %s5259_s10  ;;  %s5276_s10 = sld [smem:[#allocation12 + $0x1e]] }
 0x151   : > { %8507 = sst [smem:[#allocation107_spill]] %s5268_s6  ;;  %s5339_s24 = sld [smem:[#allocation12 + $0xbf]] }
 0x152   : > { %8506 = sst [smem:[#allocation106_spill]] %s5266_s15  ;;  %s5346_s28 = sld [smem:[#allocation12 + $0x71]] }
 0x153   : > { %8511 = sst [smem:[#allocation110_spill]] %s5284_s13  ;;  %s5305_s13 = sld [smem:[#allocation12 + $0xb9]] }
 0x154   : > { %8512 = sst [smem:[#allocation111_spill]] %s5286_s16  ;;  %s5303_s16 = sld [smem:[#allocation12 + $0xb8]] }
 0x155   : > { %8509 = sst [smem:[#allocation109_spill]] %s5278_s8  ;;  %s5294_s8 = sld [smem:[#allocation12 + $0xb7]] }
 0x156   : > { %8508 = sst [smem:[#allocation108_spill]] %s5276_s10  ;;  %s5348_s2 = sld [smem:[#allocation12 + $0x72]] }
 0x157   : > { %8521 = sst [smem:[#allocation117_spill]] %s5314_s17  ;;  %s5359_s19 = sld [smem:[#allocation12 + $0x74]] }
 0x158   : > { %8523 = sst [smem:[#allocation118_spill]] %s5323_s11  ;;  %s5329_s17 = sld [smem:[#allocation12 + $0xbd]] }
 0x159   : > { %8518 = sst [smem:[#allocation115_spill]] %s5305_s13  ;;  %s5325_s13 = sld [smem:[#allocation12 + $0xbc]] }
 0x15a   : > { %8517 = sst [smem:[#allocation114_spill]] %s5303_s16  ;;  %s5331_s16 = sld [smem:[#allocation12 + $0xbe]] }
 0x15b   : > { %8514 = sst [smem:[#allocation113_spill]] %s5294_s8  ;;  %s8519_s8 = sld [smem:[#allocation78_spill]] }
 0x15c   : > { %8528 = sst [smem:[#allocation123_spill]] %s5339_s24  ;;  %s5373_s26 = sld [smem:[#allocation12 + $0x77]] }
 0x15d   : > { %8531 = sst [smem:[#allocation124_spill]] %s5346_s28  ;;  %s5357_s24 = sld [smem:[#allocation12 + $0x73]] }
 0x15e   : > { %8525 = sst [smem:[#allocation120_spill]] %s5329_s17  ;;  %s5366_s28 = sld [smem:[#allocation12 + $0x75]] }
 0x15f   : > { %8524 = sst [smem:[#allocation119_spill]] %s5325_s13  ;;  %s8541_s23 = sld [smem:[#allocation94_spill]] }
 0x160   : > { %8526 = sst [smem:[#allocation121_spill]] %s5331_s16  ;;  %s5375_s7 = sld [smem:[#allocation12 + $0x78]] }
 0x161   : > { %8533 = sst [smem:[#allocation125_spill]] %s5348_s2  ;;  %s8537_s2 = sld [smem:[#allocation66_spill]] }
 0x162   : > { %8535 = sst [smem:[#allocation126_spill]] %s5359_s19  ;;  %s5377_s30 = sld [smem:[#allocation9]] }
 0x163   : > { %8540 = sst [smem:[#allocation128_spill]] %s5373_s26  ;;  %s5385_s0 = sld [smem:[#allocation12 + $0x7a]] }
 0x164   : > { %s5391_s16 = sld [smem:[#allocation12 + $0x7b]]  ;;  %s5393_s5 = sld [smem:[#allocation12 + $0x7c]] }
 0x165   : > { %s5399_s12 = sld [smem:[#allocation12 + $0x7d]]  ;;  %s5401_s20 = sld [smem:[#allocation12 + $0x7e]] }
 0x166   : > { %8542 = sst [smem:[#allocation129_spill]] %s5375_s7  ;;  %s5410_s9 = sld [smem:[#allocation12 + $0x7f]] }
 0x167   : > { %v1087_v35 = vstv %s8537_s2  ;;  %s5417_s22 = sld [smem:[#allocation9 + $0x2]]  ;;  %s5431_s10 = sld [smem:[#allocation12 + $0x54]] }
 0x168   : > { %v933_v38 = vpop.permute.xlu0 %932  ;;  %8544 = sst [smem:[#allocation130_spill]] %s5377_s30  ;;  %s8574_s27 = sld [smem:[#allocation124_spill]] }
 0x169   : > { %v5234_v56 = vsel %vm935_vm1, 0.0, %v933_v38  ;;  %v1691_v38 = vstv %s8501_s29  ;;  %s5292_s29 = sld [smem:[#allocation12 + $0xb6]]  ;;  %8547 = sst [smem:[#allocation133_spill]] %s5385_s0 }
 0x16a   : > { %944 = vrot.lane.b32.xlu1 %v5234_v56, %s8498_s1  ;;  %v5245_v8 = vpop.permute.xlu1 %1009  ;;  %8548 = sst [smem:[#allocation134_spill]] %s5391_s16  ;;  %s5423_s16 = sld [smem:[#allocation11 + $0x2]]  ;;  %v1145_v63 = vmul.f32 %v1144_v48, %v5234_v56  ;;  %v2205_v48 = vmul.f32 %v2204_v17, %v5234_v56  ;;  %v5524_v32 = vmul.f32 %v1087_v35, %v5234_v56  ;;  %v5544_v35 = vmul.f32 %v1794_v3, %v5234_v56 }
 0x16b   : > { %8549 = sst [smem:[#allocation135_spill]] %s5393_s5  ;;  %s5415_s5 = sld [smem:[#allocation11 + $0x1]] }
 0x16c   : > { %v978_v23 = vpop.permute.xlu0 %977  ;;  %8552 = sst [smem:[#allocation136_spill]] %s5399_s12  ;;  %s5440_s2 = sld [smem:[#allocation12 + $0x51]]  ;;  %8613 = vst [vmem:[#allocation148_spill] sm:$0xff] %v5524_v32  ;;  %8616 = vst [vmem:[#allocation150_spill] sm:$0xff] %v5544_v35 }
 0x16d   : > { %v5271_v37 = vsel %vm935_vm1, 0.0, %v978_v23  ;;  %v2379_v23 = vstv %s5155_s14  ;;  %s5337_s14 = sld [smem:[#allocation12 + $0x70]]  ;;  %8554 = sst [smem:[#allocation137_spill]] %s5401_s20 }
 0x16e   : > { %987 = vrot.lane.b32.xlu1 %v5271_v37, %s8498_s1  ;;  %v1041_v27 = vpop.permute.xlu1 %1040  ;;  %v2380_v16 = vmul.f32 %v2379_v23, %v4922_v0  ;;  %v2036_v23 = vrot.slane %v2034_v13, 3  ;;  %v2377_v13 = vadd.f32 %v2375_v22, %v2369_v20  ;;  %8559 = sst [smem:[#allocation139_spill]] %s5410_s9  ;;  %s5425_s9 = sld [smem:[#allocation12 + $0x50]]  ;;  %v1503_v22 = vmul.f32 %v1502_v60, %v5271_v37 }
 0x16f   : > { %v5289_v12 = vsel %vm935_vm1, 0.0, %v1041_v27  ;;  %8513 = sst [smem:[#allocation112_spill]] %s5292_s29  ;;  %s5312_s29 = sld [smem:[#allocation12 + $0x1f]]  ;;  %v2031_v27 = vadd.f32 %v2029_v2, %v2024_v1  ;;  %v5343_v1 = vsel %vm935_vm1, 0.0, %v5245_v8  ;;  %v4593_v2 = vmov 839922192  }
 0x170   : > { %v961_v9 = vpop.permute.xlu0 %960  ;;  %v2382_v54 = vrot.slane %v2380_v16, 2  ;;  %v618_v16 = vunpack.c.l.s4 %v4593_v2  ;;  %8563 = sst [smem:[#allocation141_spill]] %s5417_s22  ;;  %s5448_s20 = sld [smem:[#allocation12 + $0x59]]  ;;  %v1860_v3 = vmul.f32 %v1859_v7, %v5343_v1  ;;  %v2213_v11 = vmul.f32 %v2212_v19, %v5343_v1 }
 0x171   : > { %v5308_v14 = vsel %vm963_vm2, %v961_v9, 0.0  ;;  %v2040_v9 = vstv %s8519_s8  ;;  %v5361_v20 = vadd.f32 %v2036_v23, %v2031_v27  ;;  %s5381_s8 = sld [smem:[#allocation12 + $0x79]]  ;;  %8561 = sst [smem:[#allocation140_spill]] %s5415_s5 }
 0x172   : > { %971 = vrot.lane.b32.xlu0 %v5308_v14, %s8498_s1  ;;  %1050 = vrot.lane.b32.xlu1 %v5289_v12, %s8498_s1  ;;  %v2384_v27 = vadd.f32 %v2382_v54, %v2377_v13  ;;  %v1441_v54 = vstv %s8541_s23  ;;  %s5406_s23 = sld [smem:[#allocation9 + $0x1]]  ;;  %8567 = sst [smem:[#allocation142_spill]] %s5423_s16  ;;  %v619_v2 = vunpack.c.0.s8 %v618_v16 }
 0x173   : > { %8527 = sst [smem:[#allocation122_spill]] %s5337_s14  ;;  %s5368_s14 = sld [smem:[#allocation12 + $0x76]] }
 0x174   : > { %v5408_v24 = vadd.f32 %v2389_v29, %v2384_v27  ;;  %8568 = sst [smem:[#allocation143_spill]] %s5425_s9  ;;  %s8569_s17 = sld [smem:[#allocation122_spill]]  ;;  %v956_v13 = vpop.permute.xlu0 %955  ;;  %v5461_v51 = vsub.s32 %v619_v2, %v4963_v36  ;;  %v1149_v2 = vmul.f32 %v1148_v49, %v5271_v37 }
 0x175   : > { %8520 = sst [smem:[#allocation116_spill]] %s5312_s29  ;;  %s5433_s29 = sld [smem:[#allocation12 + $0x58]]  ;;  %v958_v23 = vsel %vm947_vm3, %v956_v13, 0.0  ;;  %v1852_v13 = vmul.f32 %v1851_v5, %v5234_v56 }
 0x176   : > { %1019 = vrot.lane.b32.xlu0 %v5343_v1, %s8498_s1  ;;  %s8575_s16 = sld [smem:[#allocation125_spill]]  ;;  %s5438_s9 = sld [smem:[#allocation12 + $0x5c]]  ;;  %8587 = vst [vmem:[#allocation146_spill] sm:$0xff] %v5461_v51  ;;  %v5489_v36 = vmul.f32 %v958_v23, %v5101_v39  ;;  %v5493_v29 = vmul.f32 %v8192_v41, %v958_v23  ;;  %v1499_v41 = vmul.f32 %v1498_v58, %v5234_v56 }
 0x177   : > { %8545 = sst [smem:[#allocation131_spill]] %s5381_s8  ;;  %s5446_s4 = sld [smem:[#allocation12 + $0x55]]  ;;  %v5529_v58 = vmul.f32 %v1441_v54, %v5234_v56  ;;  %v5533_v5 = vmul.f32 %v8197_v42, %v958_v23  ;;  %v1153_v54 = vmul.f32 %v1152_v50, %v5343_v1  ;;  %v1856_v42 = vmul.f32 %v1855_v6, %v5271_v37 }
 0x178   : > { %8556 = sst [smem:[#allocation138_spill]] %s5406_s23  ;;  %s5454_s23 = sld [smem:[#allocation12 + $0x5d]]  ;;  %v1334_v49 = vmul.f32 %v1333_v28, %v5489_v36  ;;  %v1338_v17 = vmul.f32 %v1337_v30, %v5493_v29  ;;  %v2209_v28 = vmul.f32 %v2208_v18, %v5271_v37  ;;  %v1507_v30 = vmul.f32 %v1506_v61, %v5343_v1 }
 0x179   : > { %8539 = sst [smem:[#allocation127_spill]] %s5368_s14  ;;  %s5383_s14 = sld [smem:[#allocation11]]  ;;  %8614 = vst [vmem:[#allocation149_spill] sm:$0xff] %v5529_v58  ;;  %v1150_v60 = vadd.f32 %v1149_v2, %v1145_v63  ;;  %v5579_v61 = vmul.f32 %v1095_v59, %v5343_v1  ;;  %v5583_v7 = vmul.f32 %v8198_v43, %v958_v23  ;;  %v1345_v63 = vmul.f32 %v1344_v31, %v5533_v5 }
 0x17a   : > { %8577 = sst [smem:[#allocation125_spill]] %s5440_s2  ;;  %s8578_s3 = sld [smem:[#allocation127_spill]]  ;;  %v1335_v18 = vadd.f32 %v1334_v49, %v5298_v10  ;;  %v1340_v19 = vrot.slane %v1338_v17, 1  ;;  %v1504_v2 = vadd.f32 %v1503_v22, %v1499_v41  ;;  %v1857_v27 = vadd.f32 %v1856_v42, %v1852_v13 }
 0x17b   : > { %8573 = sst [smem:[#allocation122_spill]] %s5433_s29  ;;  %s5484_s25 = sld [smem:[#allocation12 + $0x56]]  ;;  %8622 = vst [vmem:[#allocation151_spill] sm:$0xff] %v5579_v61  ;;  %v2210_v59 = vadd.f32 %v2209_v28, %v2205_v48  ;;  %v1157_v23 = vmul.f32 %v1156_v53, %v5289_v12  ;;  %v1688_v43 = vmul.f32 %v1687_v34, %v5489_v36  ;;  %v1692_v16 = vmul.f32 %v1691_v38, %v5493_v29 }
 0x17c   : > { %8576 = sst [smem:[#allocation124_spill]] %s5438_s9  ;;  %s5475_s6 = sld [smem:[#allocation12 + $0x52]]  ;;  %v1154_v49 = vadd.f32 %v1153_v54, %v1150_v60  ;;  %v1511_v41 = vmul.f32 %v1510_v62, %v5289_v12  ;;  %v1864_v42 = vmul.f32 %v1863_v15, %v5289_v12  ;;  %v1342_v31 = vadd.f32 %v1340_v19, %v1335_v18 }
 0x17d   : > { %8579 = sst [smem:[#allocation127_spill]] %s5446_s4  ;;  %s5486_s13 = sld [smem:[#allocation12 + $0x5a]]  ;;  %v1347_v62 = vrot.slane %v1345_v63, 2  ;;  %v1352_v15 = vmul.f32 %v1351_v33, %v5583_v7  ;;  %v1508_v34 = vadd.f32 %v1507_v30, %v1504_v2  ;;  %v1861_v38 = vadd.f32 %v1860_v3, %v1857_v27 }
 0x17e   : > { %8580 = sst [smem:[#allocation144_spill]] %s5448_s20  ;;  %s5501_s8 = sld [smem:[#allocation12 + $0x5e]]  ;;  %v2214_v22 = vadd.f32 %v2213_v11, %v2210_v59  ;;  %v2217_v13 = vmul.f32 %v2216_v21, %v5289_v12  ;;  %v1689_v48 = vadd.f32 %v1688_v43, %v5352_v57  ;;  %v1694_v17 = vrot.slane %v1692_v16, 1 }
 0x17f   : > { %8546 = sst [smem:[#allocation132_spill]] %s5383_s14  ;;  %s5513_s29 = sld [smem:[#allocation12 + $0x53]]  ;;  %v1699_v33 = vmul.f32 %v1698_v52, %v5533_v5  ;;  %v5633_v54 = vadd.f32 %v1157_v23, %v1154_v49  ;;  %v1349_v43 = vadd.f32 %v1347_v62, %v1342_v31  ;;  %v1354_v21 = vrot.slane %v1352_v15, 3 }
 0x180   : > { %8582 = sst [smem:[#allocation145_spill]] %s5454_s23  ;;  %s5568_s22 = sld [smem:[#allocation12 + $0x57]]  ;;  %v5644_v57 = vadd.f32 %v1511_v41, %v1508_v34  ;;  %v5646_v52 = vadd.f32 %v1864_v42, %v1861_v38  ;;  %v2041_v16 = vmul.f32 %v2040_v9, %v5489_v36  ;;  %v5654_v18 = vadd.f32 %v2217_v13, %v2214_v22 }
 0x181   : > { %8595 = sst [smem:[#allocation42_spill]] %s5484_s25  ;;  %s5572_s12 = sld [smem:[#allocation12 + $0x60]]  ;;  %v1696_v19 = vadd.f32 %v1694_v17, %v1689_v48  ;;  %v1701_v63 = vrot.slane %v1699_v33, 2  ;;  %v1356_v34 = vadd.f32 %v1354_v21, %v1349_v43 }
 0x182   : > { %8591 = sst [smem:[#allocation147_spill]] %s5475_s6  ;;  %s5574_s5 = sld [smem:[#allocation12 + $0x61]]  ;;  %v2042_v22 = vadd.f32 %v2041_v16, %v5361_v20 }
 0x183   : > { %8597 = sst [smem:[#allocation46_spill]] %s5486_s13  ;;  %s5585_s4 = sld [smem:[#allocation12 + $0x64]] }
 0x184   : > { %8606 = sst [smem:[#allocation50_spill]] %s5501_s8  ;;  %s5587_s18 = sld [smem:[#allocation12 + $0x65]] }
 0x185   : > { %8612 = sst [smem:[#allocation43_spill]] %s5513_s29  ;;  %s5611_s14 = sld [smem:[#allocation12 + $0x68]] }
 0x186   : > { %8618 = sst [smem:[#allocation54_spill]] %s5568_s22  ;;  %s5615_s1 = sld [smem:[#allocation12 + $0x69]] }
 0x187   : > { %s5617_s11 = sld [smem:[#allocation12 + $0x6d]]  ;;  %s5624_s30 = sld [smem:[#allocation12 + $0x5b]] }
 0x188   : > { %s8630_s26 = sld [smem:[#allocation79_spill]]  ;;  %s8631_s9 = sld [smem:[#allocation73_spill]]  ;;  %v1180_v28 = vstv %s5574_s5 }
 0x189   : > { %s8632_s2 = sld [smem:[#allocation39_spill]]  ;;  %v1530_v27 = vstv %s5585_s4  ;;  %s5640_s0 = sld [smem:[#allocation12 + $0x5f]] }
 0x18a   : > { %v1534_v30 = vstv %s5587_s18  ;;  %s5642_s21 = sld [smem:[#allocation12 + $0x6c]]  ;;  %s8637_s5 = sld [smem:[#allocation62_spill]] }
 0x18b   : > { %s8638_s4 = sld [smem:[#allocation63_spill]]  ;;  %v1883_v31 = vstv %s5611_s14  ;;  %s8642_s15 = sld [smem:[#allocation64_spill]] }
 0x18c   : > { %v1887_v62 = vstv %s5615_s1  ;;  %s5677_s18 = sld [smem:[#allocation12 + $0xf0]]  ;;  %s8644_s14 = sld [smem:[#allocation81_spill]] }
 0x18d   : > { %8628 = sst [smem:[#allocation66_spill]] %s5624_s30  ;;  %v2240_v15 = vstv %s5617_s11  ;;  %s8645_s19 = sld [smem:[#allocation86_spill]] }
 0x18e   : > { %v8634_v3 = vstv %s8630_s26  ;;  %v8636_v2 = vstv %s8631_s9  ;;  %s8646_s1 = sld [smem:[#allocation87_spill]]  ;;  %s5700_s11 = sld [smem:[#allocation12 + $0xf1]] }
 0x18f   : > { %8633 = sst [smem:[#allocation94_spill]] %s5640_s0  ;;  %v2045_v60 = vmul.f32 %v8634_v3, %v5493_v29  ;;  %v1706_v59 = vmul.f32 %v8636_v2, %v5583_v7  ;;  %v5660_v23 = vld [vmem:[%s8632_s2] sm:$0xf]  ;;  %s5702_s7 = sld [smem:[#allocation12 + $0xf2]] }
 0x190   : > { %v5666_v9 = vmul.f32 %v5660_v23, %v1180_v28  ;;  %v5669_v41 = vmul.f32 %v5660_v23, %v1530_v27  ;;  %v5672_v42 = vmul.f32 %v5660_v23, %v1534_v30  ;;  %v8641_v33 = vstv %s8637_s5  ;;  %s8649_s26 = sld [smem:[#allocation65_spill]]  ;;  %s5707_s9 = sld [smem:[#allocation12 + $0xf3]] }
 0x191   : > { %v2047_v13 = vrot.slane %v2045_v60, 1  ;;  %v8643_v28 = vstv %s8638_s4  ;;  %v1703_v30 = vadd.f32 %v1701_v63, %v1696_v19  ;;  %v1708_v43 = vrot.slane %v1706_v59, 3  ;;  %s5712_s5 = sld [smem:[#allocation12 + $0xf4]]  ;;  %s8654_s4 = sld [smem:[#allocation75_spill]] }
 0x192   : > { %8639 = sst [smem:[#allocation58_spill]] %s5677_s18  ;;  %v1363_v27 = vmul.f32 %v8643_v28, %v5308_v14  ;;  %v5692_v3 = vmul.f32 %v5660_v23, %v1883_v31  ;;  %v5695_v20 = vmul.f32 %v5660_v23, %v1887_v62  ;;  %v5698_v16 = vmul.f32 %v5660_v23, %v2240_v15  ;;  %s8656_s2 = sld [smem:[#allocation76_spill]] }
 0x193   : > { %v2236_v63 = vstv %s5642_s21  ;;  %v8651_v59 = vstv %s8642_s15  ;;  %v2049_v62 = vadd.f32 %v2047_v13, %v2042_v22  ;;  %v1710_v60 = vadd.f32 %v1708_v43, %v1703_v30  ;;  %s5731_s21 = sld [smem:[#allocation12 + $0xf5]]  ;;  %s8661_s15 = sld [smem:[#allocation88_spill]] }
 0x194   : > { %8647 = sst [smem:[#allocation59_spill]] %s5700_s11  ;;  %v1370_v31 = vmul.f32 %v8651_v59, %v5308_v14  ;;  %v1365_v28 = vrot.slane %v1363_v27, 1  ;;  %v8658_v21 = vstv %s8646_s1  ;;  %v5725_v19 = vmul.f32 %v5660_v23, %v2236_v63  ;;  %s5742_s1 = sld [smem:[#allocation12 + $0xf7]] }
 0x195   : > { %876 = vadd.xlane.f32.xlu0 %v5200_v25  ;;  %8648 = sst [smem:[#allocation97_spill]] %s5702_s7  ;;  %v2398_v6 = vmul.f32 %v8658_v21, %v5493_v29  ;;  %s8201_s8 = smov 1  }
 0x196   : > { %893 = vadd.xlane.f32.xlu1 %v5202_v26  ;;  %v1176_v26 = vstv %s5572_s12  ;;  %s8635_s12 = sld [smem:[#allocation80_spill]]  ;;  %8650 = sst [smem:[#allocation44_spill]] %s5707_s9  ;;  %v8659_v13 = vstv %s8649_s26  ;;  %v1372_v63 = vrot.slane %v1370_v31, 2 }
 0x197   : > { %v5663_v49 = vmul.f32 %v5660_v23, %v1176_v26  ;;  %v1359_v26 = vmul.f32 %v8641_v33, %v5308_v14  ;;  %8653 = sst [smem:[#allocation47_spill]] %s5712_s5  ;;  %v8663_v21 = vstv %s8654_s4  ;;  %s8668_s26 = sld [smem:[#allocation83_spill]]  ;;  %v2400_v59 = vrot.slane %v2398_v6, 1 }
 0x198   : > { %s8670_s4 = sld [smem:[#allocation84_spill]]  ;;  %s8674_s13 = sld [smem:[#allocation89_spill]] }
 0x199   : > { %v1360_v2 = vadd.f32 %v1359_v26, %v1356_v34  ;;  %v8657_v34 = vstv %s8645_s19  ;;  %8660 = sst [smem:[#allocation51_spill]] %s5731_s21  ;;  %s8665_s19 = sld [smem:[#allocation77_spill]]  ;;  %v8671_v31 = vstv %s8661_s15 }
 0x19a   : > { %v2394_v26 = vmul.f32 %v8657_v34, %v5489_v36  ;;  %v1717_v34 = vmul.f32 %v8663_v21, %v5308_v14  ;;  %8666 = sst [smem:[#allocation48_spill]] %s5742_s1  ;;  %v2405_v38 = vmul.f32 %v8671_v31, %v5533_v5  ;;  %s5768_s15 = sld [smem:[#allocation12 + $0xfa]] }
 0x19b   : > { %v1367_v27 = vadd.f32 %v1365_v28, %v1360_v2  ;;  %s8678_s25 = sld [smem:[#allocation85_spill]]  ;;  %s8681_s9 = smov 1  }
 0x19c   : > { %v8640_v48 = vstv %s8635_s12  ;;  %s8652_s12 = sld [smem:[#allocation74_spill]]  ;;  %v2395_v21 = vadd.f32 %v2394_v26, %v5408_v24  ;;  %s8687_s5 = sld [smem:[#allocation91_spill]] }
 0x19d   : > { %v2052_v17 = vmul.f32 %v8640_v48, %v5533_v5  ;;  %v8655_v48 = vstv %s8644_s14  ;;  %s5740_s14 = sld [smem:[#allocation12 + $0xf6]]  ;;  %v1374_v50 = vadd.f32 %v1372_v63, %v1367_v27  ;;  %v8675_v24 = vstv %s8668_s26  ;;  %s5785_s26 = sld [smem:[#allocation12 + $0x62]] }
 0x19e   : > { %v2059_v33 = vmul.f32 %v8655_v48, %v5583_v7  ;;  %v2070_v6 = vmul.f32 %v8675_v24, %v5308_v14  ;;  %v8679_v31 = vstv %s8670_s4  ;;  %v2407_v63 = vrot.slane %v2405_v38, 2  ;;  %s5797_s4 = sld [smem:[#allocation12 + $0xfc]]  ;;  %s5805_s21 = sld [smem:[#allocation12 + $0x63]] }
 0x19f   : > { %v2054_v15 = vrot.slane %v2052_v17, 2  ;;  %v1377_v17 = vmul.f32 %v8659_v13, %v5308_v14  ;;  %v8667_v13 = vstv %s8656_s2  ;;  %s5762_s2 = sld [smem:[#allocation12 + $0xf9]]  ;;  %s5811_s6 = sld [smem:[#allocation12 + $0xfe]] }
 0x1a0   : > { %v1724_v22 = vmul.f32 %v8667_v13, %v5308_v14  ;;  %v2061_v28 = vrot.slane %v2059_v33, 3  ;;  %8677 = sst [smem:[#allocation95_spill]] %s5768_s15  ;;  %s8692_s1 = sld [smem:[#allocation90_spill]] }
 0x1a1   : > { %v2056_v2 = vadd.f32 %v2054_v15, %v2049_v62  ;;  %v1379_v13 = vrot.slane %v1377_v17, 3  ;;  %v8672_v15 = vstv %s8665_s19  ;;  %s5776_s19 = sld [smem:[#allocation12 + $0xfb]]  ;;  %v8684_v30 = vstv %s8678_s25  ;;  %s8689_s25 = sld [smem:[#allocation93_spill]] }
 0x1a2   : > { %v8662_v43 = vstv %s8652_s12  ;;  %s5747_s12 = sld [smem:[#allocation12 + $0xf8]]  ;;  %v5760_v33 = vmul.f32 %v8672_v15, %v5308_v14  ;;  %v1726_v26 = vrot.slane %v1724_v22, 2  ;;  %v5774_v15 = vmul.f32 %v8679_v31, %v5308_v14  ;;  %s8798_s15 = sld [smem:[#allocation113_spill]] }
 0x1a3   : > { %v1713_v48 = vmul.f32 %v8662_v43, %v5308_v14  ;;  %8664 = sst [smem:[#allocation55_spill]] %s5740_s14  ;;  %v8682_v22 = vstv %s8674_s13  ;;  %v5795_v62 = vmul.f32 %v8684_v30, %v5308_v14  ;;  %v5799_v38 = vadd.f32 %v1379_v13, %v1374_v50  ;;  %s5803_s13 = sld [smem:[#allocation12 + $0xfd]] }
 0x1a4   : > { %8685 = sst [smem:[#allocation45_spill]] %s5797_s4  ;;  %v8691_v50 = vrot.slane %v4922_v0, 1  ;;  %v8693_v24 = vstv %s8687_s5  ;;  %v1194_v44 = vstv %s5805_s21  ;;  %s6132_s4 = sld [smem:[#allocation15 + $0x19]] }
 0x1a5   : > { %v1714_v43 = vadd.f32 %v1713_v48, %v1710_v60  ;;  %8673 = sst [smem:[#allocation56_spill]] %s5762_s2  ;;  %v1719_v60 = vrot.slane %v1717_v34, 1  ;;  %v2063_v48 = vadd.f32 %v2061_v28, %v2056_v2  ;;  %v2402_v34 = vadd.f32 %v2400_v59, %v2395_v21  ;;  %s5840_s2 = sld [smem:[#allocation12 + $0xff]] }
 0x1a6   : > { %v2412_v2 = vmul.f32 %v8682_v22, %v5583_v7  ;;  %v1733_v28 = vrot.slane %v5760_v33, 3  ;;  %8690 = sst [smem:[#allocation70_spill]] %s5811_s6  ;;  %v2423_v21 = vmul.f32 %v8693_v24, %v5308_v14  ;;  %s5846_s5 = sld [smem:[#allocation12 + $0x66]] }
 0x1a7   : > { %950 = vrot.lane.b32.xlu1 %v5660_v23, %s8201_s8  ;;  %s8676_s8 = sld [smem:[#allocation82_spill]]  ;;  %8680 = sst [smem:[#allocation60_spill]] %s5776_s19  ;;  %v1721_v27 = vadd.f32 %v1719_v60, %v1714_v43  ;;  %v2072_v60 = vrot.slane %v2070_v6, 1 }
 0x1a8   : > { %8669 = sst [smem:[#allocation52_spill]] %s5747_s12  ;;  %s5891_s21 = sld [smem:[#allocation12 + $0x6e]] }
 0x1a9   : > { %8686 = sst [smem:[#allocation69_spill]] %s5803_s13  ;;  %v1728_v6 = vadd.f32 %v1726_v26, %v1721_v27  ;;  %s8757_s6 = sld [smem:[#allocation106_spill]] }
 0x1aa   : > { %s8763_s13 = sld [smem:[#allocation108_spill]]  ;;  %s8794_s19 = sld [smem:[#allocation112_spill]] }
 0x1ab   : > { %938 = vrot.lane.b32.xlu0 %v5234_v56, %s8681_s9  ;;  %982 = vrot.lane.b32.xlu1 %v5271_v37, %s8681_s9  ;;  %8696 = sst [smem:[#allocation49_spill]] %s5840_s2  ;;  %v5853_v25 = vadd.f32 %v1733_v28, %v1728_v6  ;;  %s8755_s2 = sld [smem:[#allocation99_spill]] }
 0x1ac   : > { %s6144_s12 = sld [smem:[#allocation15 + $0x21]]  ;;  %s6180_s14 = sld [smem:[#allocation15 + $0x28]] }
 0x1ad   : > { %v8683_v31 = vstv %s8676_s8  ;;  %v589_v59 = vpop.xlane.xlu1 %588  ;;  %s8688_s8 = sld [smem:[#allocation92_spill]]  ;;  %s6192_s0 = sld [smem:[#allocation15 + $0x2a]] }
 0x1ae   : > { %v2066_v17 = vmul.f32 %v8683_v31, %v5308_v14  ;;  %v685_v33 = vpop.xlane.xlu0 %684  ;;  %v5807_v22 = vmul.f32 0.00390625, %v589_v59  ;;  %v2079_v31 = vrot.slane %v5774_v15, 2  ;;  %v2409_v59 = vadd.f32 %v2407_v63, %v2402_v34  ;;  %s8822_s30 = sld [smem:[#allocation123_spill]]  ;;  %s8828_s22 = sld [smem:[#allocation104_spill]] }
 0x1af   : > { %992 = vrot.lane.b32.xlu0 %v8691_v50, %s8681_s9  ;;  %1014 = vrot.lane.b32.xlu1 %v5343_v1, %s8681_s9  ;;  %v5818_v13 = vmul.f32 0.00390625, %v685_v33  ;;  %v8695_v63 = vstv %s8689_s25  ;;  %v8697_v15 = vstv %s8692_s1  ;;  %v8698_v34 = vrot.slane %v4922_v0, 2  ;;  %s5863_s1 = sld [smem:[#allocation12 + $0x6a]]  ;;  %s5865_s25 = sld [smem:[#allocation12 + $0x6b]] }
 0x1b0   : > { %v2067_v30 = vadd.f32 %v2066_v17, %v2063_v48  ;;  %v2414_v17 = vrot.slane %v2412_v2, 3  ;;  %v2086_v48 = vrot.slane %v5795_v62, 3  ;;  %v609_v26 = vmul.f32 %v5807_v22, %v5807_v22  ;;  %s6210_s29 = sld [smem:[#allocation15 + $0x31]]  ;;  %s8829_s7 = sld [smem:[#allocation110_spill]] }
 0x1b1   : > { %v705_v50 = vmul.f32 %v5818_v13, %v5818_v13  ;;  %v702_v27 = vpop.xlane.xlu1 %701  ;;  %v5838_v62 = vmul.f32 %v8695_v63, %v5308_v14  ;;  %v2419_v40 = vmul.f32 %v8697_v15, %v5308_v14  ;;  %v2425_v15 = vrot.slane %v2423_v21, 1  ;;  %s6227_s11 = sld [smem:[#allocation15 + $0x38]]  ;;  %s6243_s18 = sld [smem:[#allocation15 + $0x3a]] }
 0x1b2   : > { %v606_v2 = vpop.xlane.xlu0 %605  ;;  %v704_v24 = vmul.f32 0.00390625, %v702_v27  ;;  %v2416_v27 = vadd.f32 %v2414_v17, %v2409_v59  ;;  %v8699_v17 = vrot.slane %v4922_v0, 3  ;;  %v8701_v0 = vstv %s8575_s16  ;;  %s5909_s16 = sld [smem:[#allocation12 + $0x6f]]  ;;  %8817 = sst [smem:[#allocation63_spill]] %s6180_s14 }
 0x1b3   : > { %v8694_v43 = vstv %s8688_s8  ;;  %1024 = vrot.lane.b32.xlu0 %v8698_v34, %s8681_s9  ;;  %1045 = vrot.lane.b32.xlu1 %v5289_v12, %s8681_s9  ;;  %v608_v63 = vmul.f32 0.00390625, %v606_v2  ;;  %s5856_s8 = sld [smem:[#allocation12 + $0x67]]  ;;  %s6245_s23 = sld [smem:[#allocation12]] }
 0x1b4   : > { %v5828_v11 = vmul.f32 %v8694_v43, %v5308_v14  ;;  %v2074_v43 = vadd.f32 %v2072_v60, %v2067_v30  ;;  %v1187_v60 = vstv %s5785_s26  ;;  %v706_v30 = vsub.f32 %v704_v24, %v705_v50  ;;  %s8710_s26 = sld [smem:[#allocation133_spill]]  ;;  %8799 = sst [smem:[#allocation79_spill]] %s6144_s12 }
 0x1b5   : > { %v610_v53 = vsub.f32 %v608_v63, %v609_v26  ;;  %v798_v10 = vpop.xlane.xlu1 %797  ;;  %v8700_v63 = vstv %s8574_s27  ;;  %s8708_s27 = sld [smem:[#allocation128_spill]]  ;;  %s6247_s20 = sld [smem:[#allocation12 + $0x4]] }
 0x1b6   : > { %v2432_v33 = vrot.slane %v5828_v11, 2  ;;  %v707_v28 = vmax.f32 %v706_v30, 0.0  ;;  %v781_v6 = vpop.xlane.xlu0 %780  ;;  %v2081_v59 = vadd.f32 %v2079_v31, %v2074_v43  ;;  %v5869_v11 = vmul.f32 %v5660_v23, %v1187_v60  ;;  %s8867_s12 = sld [smem:[#allocation122_spill]]  ;;  %s6513_s14 = sld [smem:[#allocation12 + $0x86]] }
 0x1b7   : > { %1055 = vrot.lane.b32.xlu0 %v8699_v17, %s8681_s9  ;;  %966 = vrot.lane.b32.xlu1 %v5308_v14, %s8681_s9  ;;  %v611_v50 = vmax.f32 %v610_v53, 0.0  ;;  %v5876_v26 = vmul.f32 0.00390625, %v781_v6  ;;  %v800_v2 = vmul.f32 0.00390625, %v798_v10  ;;  %v2420_v31 = vadd.f32 %v2419_v40, %v2416_v27  ;;  %8836 = sst [smem:[#allocation81_spill]] %s6227_s11  ;;  %s6555_s11 = sld [smem:[#allocation12 + $0x9a]] }
 0x1b8   : > { %v708_v24 = vadd.f32 1e-05, %v707_v28  ;;  %v5879_v43 = vmul.f32 %v5660_v23, %v1194_v44  ;;  %v5884_v60 = vmul.f32 %v8700_v63, %v5493_v29  ;;  %v5889_v30 = vmul.f32 %v8701_v0, %v5533_v5  ;;  %8843 = sst [smem:[#allocation87_spill]] %s6243_s18  ;;  %s8878_s18 = sld [smem:[#allocation145_spill]] }
 0x1b9   : > { %v612_v53 = vadd.f32 1e-05, %v611_v50  ;;  %v801_v10 = vmul.f32 %v5876_v26, %v5876_v26  ;;  %v8702_v27 = vstv %s8569_s17  ;;  %v5901_v28 = vadd.f32 %v2086_v48, %v2081_v59  ;;  %s8707_s17 = sld [smem:[#allocation126_spill]]  ;;  %8844 = sst [smem:[#allocation65_spill]] %s6245_s23 }
 0x1ba   : > { %v5899_v44 = vmul.f32 %v8702_v27, %v5489_v36  ;;  %4281 = vrsqrt.f32 %v708_v24  ;;  %v8703_v6 = vstv %s5357_s24  ;;  %v1541_v63 = vstv %s5846_s5  ;;  %s8709_s24 = sld [smem:[#allocation131_spill]]  ;;  %s8711_s5 = sld [smem:[#allocation134_spill]] }
 0x1bb   : > { %v5906_v17 = vmul.f32 %v8703_v6, %v5583_v7  ;;  %v8705_v50 = vrot.slane %v5308_v14, 1  ;;  %v8706_v0 = vrot.slane %v5308_v14, 2  ;;  %4283 = vrsqrt.f32 %v612_v53  ;;  %8845 = sst [smem:[#allocation74_spill]] %s6247_s20  ;;  %s6546_s20 = sld [smem:[#allocation12 + $0x88]] }
 0x1bc   : > { %v802_v48 = vsub.f32 %v800_v2, %v801_v10  ;;  %v2427_v59 = vadd.f32 %v2425_v15, %v2420_v31  ;;  %v1548_v24 = vstv %s5856_s8  ;;  %v1894_v53 = vstv %s5863_s1  ;;  %s8717_s8 = sld [smem:[#allocation129_spill]]  ;;  %s8728_s1 = sld [smem:[#allocation135_spill]] }
 0x1bd   : > { %8704 = vst [vmem:[#allocation152_spill] sm:$0xff] %v5906_v17  ;;  %1002 = vrot.lane.b32.xlu0 %v8705_v50, %s8681_s9  ;;  %1033 = vrot.lane.b32.xlu1 %v8706_v0, %s8681_s9  ;;  %v5923_v0 = vmul.f32 %v5660_v23, %v1541_v63  ;;  %v1901_v2 = vstv %s5865_s25  ;;  %v5929_v31 = vmul.f32 %v5660_v23, %v1548_v24  ;;  %v8712_v10 = vstv %s5366_s28  ;;  %s8725_s28 = sld [smem:[#allocation138_spill]]  ;;  %s8730_s25 = sld [smem:[#allocation137_spill]] }
 0x1be   : > { %v803_v21 = vmax.f32 %v802_v48, 0.0  ;;  %v5934_v40 = vmul.f32 %v8712_v10, %v5493_v29  ;;  %v8713_v50 = vstv %s8578_s3  ;;  %v8715_v63 = vrot.slane %v5308_v14, 3  ;;  %s8720_s3 = sld [smem:[#allocation136_spill]]  ;;  %s6548_s23 = sld [smem:[#allocation12 + $0x89]] }
 0x1bf   : > { %v5939_v48 = vmul.f32 %v8713_v50, %v5533_v5  ;;  %v2434_v27 = vadd.f32 %v2432_v33, %v2427_v59  ;;  %v8716_v15 = vstv %s8707_s17  ;;  %v8718_v45 = vstv %s8708_s27  ;;  %s8737_s17 = sld [smem:[#allocation102_spill]]  ;;  %s8741_s27 = sld [smem:[#allocation140_spill]] }
 0x1c0   : > { %v804_v6 = vadd.f32 1e-05, %v803_v21  ;;  %v5947_v24 = vmul.f32 %v8716_v15, %v5489_v36  ;;  %v5952_v10 = vmul.f32 %v8718_v45, %v5583_v7  ;;  %v5955_v50 = vmul.f32 %v5660_v23, %v1894_v53 }
 0x1c1   : > { %8714 = vst [vmem:[#allocation153_spill] sm:$0xff] %v5939_v48  ;;  %1064 = vrot.lane.b32.xlu0 %v8715_v63, %s8681_s9  ;;  %v5958_v8 = vmul.f32 %v5660_v23, %v1901_v2  ;;  %v8721_v63 = vstv %s8709_s24  ;;  %v2247_v33 = vstv %s5891_s21  ;;  %v8722_v15 = vstv %s8710_s26  ;;  %s8727_s9 = sld [smem:[#allocation130_spill]]  ;;  %s8731_s21 = sld [smem:[#allocation139_spill]] }
 0x1c2   : > { %8719 = vst [vmem:[#allocation154_spill] sm:$0xff] %v5952_v10  ;;  %v5963_v21 = vmul.f32 %v8721_v63, %v5493_v29  ;;  %4285 = vrsqrt.f32 %v804_v6  ;;  %v5970_v34 = vmul.f32 %v8722_v15, %v5533_v5  ;;  %v8724_v45 = vstv %s8711_s5  ;;  %s8745_s24 = sld [smem:[#allocation96_spill]]  ;;  %s6026_s26 = sld [smem:[#allocation15 + $0x9]] }
 0x1c3   : > { %v5975_v53 = vmul.f32 %v8724_v45, %v5583_v7  ;;  %v2254_v61 = vstv %s5909_s16  ;;  %v8729_v59 = vstv %s8717_s8  ;;  %v5988_v45 = vmul.f32 %v5660_v23, %v2247_v33  ;;  %s8736_s16 = sld [smem:[#allocation67_spill]]  ;;  %s6032_s8 = sld [smem:[#allocation15 + $0x8]] }
 0x1c4   : > { %8723 = vst [vmem:[#allocation155_spill] sm:$0xff] %v5970_v34  ;;  %v5985_v15 = vmul.f32 %v8729_v59, %v5489_v36  ;;  %v8732_v2 = vstv %s8720_s3  ;;  %v4282_v4 = vpop.eup %4281  ;;  %v8734_v63 = vrot.slane %v5838_v62, 3  ;;  %v8735_v48 = vstv %s8725_s28  ;;  %s8746_s5 = sld [smem:[#allocation132_spill]]  ;;  %s6034_s3 = sld [smem:[#allocation15]] }
 0x1c5   : > { %8726 = vst [vmem:[#allocation156_spill] sm:$0xff] %v5975_v53  ;;  %v5993_v35 = vmul.f32 %v8732_v2, %v5493_v29  ;;  %v4284_v10 = vpop.eup %4283  ;;  %v711_v17 = vmul.f32 %v4282_v4, %v8735_v48  ;;  %v6007_v2 = vmul.f32 %v5660_v23, %v2254_v61  ;;  %v8740_v59 = vstv %s8730_s25  ;;  %s8747_s28 = sld [smem:[#allocation68_spill]]  ;;  %8959 = sst [smem:[#allocation67_spill]] %s6513_s14 }
 0x1c6   : > { %v5997_v58 = vadd.f32 %v8734_v63, %v2434_v27  ;;  %v8739_v63 = vstv %s8728_s1  ;;  %v6019_v32 = vmul.f32 %v8740_v59, %v5533_v5  ;;  %s8750_s1 = sld [smem:[#allocation98_spill]]  ;;  %s8754_s25 = sld [smem:[#allocation141_spill]] }
 0x1c7   : > { %8733 = vst [vmem:[#allocation157_spill] sm:$0xff] %v5993_v35  ;;  %v8738_v62 = vstv %s8727_s9  ;;  %v6014_v6 = vmul.f32 %v8739_v63, %v5489_v36  ;;  %v8743_v4 = vstv %s8731_s21  ;;  %v719_v61 = vrot.slane %v711_v17, %v5461_v51  ;;  %s8748_s9 = sld [smem:[#allocation103_spill]]  ;;  %s6048_s21 = sld [smem:[#allocation15 + $0x1]] }
 0x1c8   : > { %v615_v27 = vmul.f32 %v4284_v10, %v8738_v62  ;;  %8742 = vst [vmem:[#allocation158_spill] sm:$0xff] %v6019_v32  ;;  %v6024_v48 = vmul.f32 %v8743_v4, %v5583_v7  ;;  %v722_v23 = vmul.f32 %v711_v17, %v5818_v13  ;;  %v8752_v13 = vstv %s8737_s17  ;;  %s8762_s17 = sld [smem:[#allocation101_spill]]  ;;  %8967 = sst [smem:[#allocation96_spill]] %s6546_s20 }
 0x1c9   : > { %v8749_v59 = vstv %s8736_s16  ;;  %v6046_v17 = vmul.f32 %v8752_v13, %v5289_v12  ;;  %v721_v63 = vmul.f32 %v719_v61, %v4972_v46  ;;  %v8756_v4 = vstv %s8741_s27  ;;  %s8761_s16 = sld [smem:[#allocation100_spill]]  ;;  %s8775_s27 = sld [smem:[#allocation105_spill]] }
 0x1ca   : > { %8744 = vst [vmem:[#allocation159_spill] sm:$0xff] %v6024_v48  ;;  %v623_v5 = vrot.slane %v615_v27, %v5461_v51  ;;  %v626_v7 = vmul.f32 %v615_v27, %v5807_v22  ;;  %v6041_v62 = vmul.f32 %v8749_v59, %v5271_v37  ;;  %v724_v29 = vsub.f32 %v8756_v4, %v722_v23  ;;  %8968 = sst [smem:[#allocation132_spill]] %s6548_s23  ;;  %s6658_s14 = sld [smem:[#allocation12 + $0xab]] }
 0x1cb   : > { %8753 = vst [vmem:[#allocation161_spill] sm:$0xff] %v6046_v17  ;;  %v8758_v27 = vstv %s8745_s24  ;;  %v8760_v33 = vstv %s8746_s5  ;;  %v8764_v4 = vstv %s8747_s28  ;;  %v8771_v36 = vstv %s8755_s2  ;;  %s6093_s24 = sld [smem:[#allocation15 + $0xa]]  ;;  %s8783_s2 = sld [smem:[#allocation142_spill]] }
 0x1cc   : > { %8751 = vst [vmem:[#allocation160_spill] sm:$0xff] %v6041_v62  ;;  %v6057_v10 = vmul.f32 %v8758_v27, %v5271_v37  ;;  %v625_v59 = vmul.f32 %v623_v5, %v4974_v47  ;;  %v628_v13 = vsub.f32 %v8760_v33, %v626_v7  ;;  %v4286_v61 = vpop.eup %4285  ;;  %v732_v23 = vrot.slane %v724_v29, %v5461_v51  ;;  %s6095_s5 = sld [smem:[#allocation15 + $0x2]]  ;;  %s6114_s28 = sld [smem:[#allocation15 + $0x11]] }
 0x1cd   : > { %v6068_v22 = vmul.f32 %v8764_v4, %v5343_v1  ;;  %v8766_v27 = vstv %s8748_s9  ;;  %v8768_v47 = vstv %s8750_s1  ;;  %v8770_v7 = vstv %s8754_s25  ;;  %s6119_s9 = sld [smem:[#allocation15 + $0x12]]  ;;  %s8786_s1 = sld [smem:[#allocation116_spill]] }
 0x1ce   : > { %8759 = vst [vmem:[#allocation162_spill] sm:$0xff] %v6057_v10  ;;  %v6073_v17 = vmul.f32 %v8766_v27, %v5289_v12  ;;  %v6078_v33 = vmul.f32 %v8768_v47, %v5271_v37  ;;  %v636_v5 = vrot.slane %v628_v13, %v5461_v51  ;;  %v807_v46 = vmul.f32 %v4286_v61, %v8770_v7  ;;  %s6121_s25 = sld [smem:[#allocation15 + $0x18]]  ;;  %s6716_s23 = sld [smem:[#allocation12 + $0x32]] }
 0x1cf   : > { %8765 = vst [vmem:[#allocation163_spill] sm:$0xff] %v6068_v22  ;;  %v6086_v29 = vmul.f32 %v8771_v36, %v5343_v1  ;;  %v8773_v4 = vstv %s8757_s6  ;;  %v734_v27 = vadd.f32 %v732_v23, %v721_v63  ;;  %v8776_v13 = vstv %s8761_s16  ;;  %s6112_s6 = sld [smem:[#allocation15 + $0x10]]  ;;  %s8791_s16 = sld [smem:[#allocation109_spill]] }
 0x1d0   : > { %8767 = vst [vmem:[#allocation164_spill] sm:$0xff] %v6073_v17  ;;  %8769 = vst [vmem:[#allocation165_spill] sm:$0xff] %v6078_v33  ;;  %v6091_v22 = vmul.f32 %v8773_v4, %v5289_v12  ;;  %v6100_v47 = vmul.f32 %v8776_v13, %v5234_v56  ;;  %v8778_v61 = vstv %s8762_s17  ;;  %v8780_v7 = vstv %s8763_s13  ;;  %s8788_s13 = sld [smem:[#allocation107_spill]]  ;;  %s8793_s17 = sld [smem:[#allocation111_spill]] }
 0x1d1   : > { %8772 = vst [vmem:[#allocation166_spill] sm:$0xff] %v6086_v29  ;;  %v6105_v36 = vmul.f32 %v8778_v61, %v5271_v37  ;;  %v6110_v4 = vmul.f32 %v8780_v7, %v5343_v1  ;;  %v815_v63 = vrot.slane %v807_v46, %v5461_v51  ;;  %v818_v56 = vmul.f32 %v807_v46, %v5876_v26  ;;  %8993 = sst [smem:[#allocation105_spill]] %s6658_s14  ;;  %s6753_s20 = sld [smem:[#allocation12 + $0x23]] }
 0x1d2   : > { %8774 = vst [vmem:[#allocation167_spill] sm:$0xff] %v6091_v22  ;;  %8777 = vst [vmem:[#allocation168_spill] sm:$0xff] %v6100_v47  ;;  %8784 = sst [smem:[#allocation61_spill]] %s6114_s28  ;;  %v638_v22 = vadd.f32 %v636_v5, %v625_v59  ;;  %v2608_v23 = vstv %s6026_s26  ;;  %v6123_v37 = vmax.f32 %v734_v27, 0.0  ;;  %v8790_v1 = vstv %s8775_s27  ;;  %s6134_s26 = sld [smem:[#allocation15 + $0x1a]] }
 0x1d3   : > { %8779 = vst [vmem:[#allocation169_spill] sm:$0xff] %v6105_v36  ;;  %8781 = vst [vmem:[#allocation170_spill] sm:$0xff] %v6110_v4  ;;  %8785 = sst [smem:[#allocation57_spill]] %s6119_s9  ;;  %v6128_v13 = vmul.f32 %v8790_v1, %v5308_v14  ;;  %v2604_v61 = vstv %s6032_s8  ;;  %v2484_v59 = vstv %s6034_s3  ;;  %v817_v46 = vmul.f32 %v815_v63, %v4986_v55  ;;  %s6142_s27 = sld [smem:[#allocation15 + $0x20]] }
 0x1d4   : > { %8787 = sst [smem:[#allocation71_spill]] %s6121_s25  ;;  %8789 = vst [vmem:[#allocation171_spill] sm:$0xff] %v6123_v37  ;;  %v6136_v26 = vmax.f32 %v638_v22, 0.0  ;;  %v8797_v5 = vstv %s8783_s2  ;;  %v2488_v7 = vstv %s6048_s21  ;;  %s6146_s8 = sld [smem:[#allocation9 + $0x3]]  ;;  %v8802_v1 = vstv %s8786_s1 }
 0x1d5   : > { %8782 = sst [smem:[#allocation53_spill]] %s6112_s6  ;;  %8792 = vst [vmem:[#allocation172_spill] sm:$0xff] %v6128_v13  ;;  %v820_v27 = vsub.f32 %v8797_v5, %v818_v56  ;;  %s6148_s3 = sld [smem:[#allocation11 + $0x3]]  ;;  %v6153_v4 = vmul.f32 %v8802_v1, %v5289_v12  ;;  %v8806_v55 = vstv %s8791_s16  ;;  %v2609_v56 = vmul.f32 %v2608_v23, %v6123_v37 }
 0x1d6   : > { %8796 = vst [vmem:[#allocation173_spill] sm:$0xff] %v6136_v26  ;;  %v8804_v22 = vstv %s8788_s13  ;;  %s8807_s21 = sld [smem:[#allocation115_spill]]  ;;  %v6163_v63 = vmul.f32 %v8806_v55, %v5308_v14  ;;  %s8809_s2 = sld [smem:[#allocation117_spill]]  ;;  %v8810_v36 = vstv %s8793_s17  ;;  %v8812_v12 = vstv %s8794_s19 }
 0x1d7   : > { %8803 = vst [vmem:[#allocation174_spill] sm:$0xff] %v6153_v4  ;;  %v6158_v17 = vmul.f32 %v8804_v22, %v5308_v14  ;;  %v828_v5 = vrot.slane %v820_v27, %v5461_v51  ;;  %v6170_v29 = vmul.f32 %v8810_v36, %v5308_v14  ;;  %v6175_v1 = vmul.f32 %v8812_v12, %v5308_v14  ;;  %s8814_s1 = sld [smem:[#allocation118_spill]]  ;;  %s6178_s13 = sld [smem:[#allocation15 + $0x22]] }
 0x1d8   : > { %8795 = sst [smem:[#allocation78_spill]] %s6134_s26  ;;  %8808 = vst [vmem:[#allocation176_spill] sm:$0xff] %v6163_v63  ;;  %v2605_v22 = vmul.f32 %v2604_v61, %v6136_v26  ;;  %s8816_s16 = sld [smem:[#allocation120_spill]]  ;;  %v8818_v27 = vstv %s8798_s15  ;;  %v2485_v36 = vmul.f32 %v2484_v59, %v6136_v26  ;;  %v2489_v4 = vmul.f32 %v2488_v7, %v6123_v37 }
 0x1d9   : > { %8805 = vst [vmem:[#allocation175_spill] sm:$0xff] %v6158_v17  ;;  %8811 = vst [vmem:[#allocation177_spill] sm:$0xff] %v6170_v29  ;;  %v6186_v55 = vmul.f32 %v8818_v27, %v5308_v14  ;;  %s6190_s19 = sld [smem:[#allocation15 + $0x29]]  ;;  %v6194_v61 = vadd.f32 %v828_v5, %v817_v46  ;;  %s6208_s15 = sld [smem:[#allocation15 + $0x30]]  ;;  %v8840_v17 = vstv %s8822_s30 }
 0x1da   : > { %8800 = sst [smem:[#allocation73_spill]] %s6146_s8  ;;  %8813 = vst [vmem:[#allocation178_spill] sm:$0xff] %v6175_v1  ;;  %v6206_v13 = vadd.f32 %v2609_v56, %v2605_v22  ;;  %s6261_s30 = sld [smem:[#allocation12 + $0x8]] }
 0x1db   : > { %8801 = sst [smem:[#allocation80_spill]] %s6148_s3  ;;  %8819 = vst [vmem:[#allocation179_spill] sm:$0xff] %v6186_v55  ;;  %s8821_s17 = sld [smem:[#allocation121_spill]] }
 0x1dc   : > { %v8823_v12 = vstv %s8807_s21  ;;  %v8825_v23 = vstv %s8809_s2  ;;  %8827 = vst [vmem:[#allocation182_spill] sm:$0xff] %v6206_v13  ;;  %s6225_s21 = sld [smem:[#allocation15 + $0x32]]  ;;  %s6295_s8 = sld [smem:[#allocation12 + $0x6]] }
 0x1dd   : > { %8815 = sst [smem:[#allocation62_spill]] %s6178_s13  ;;  %v6199_v51 = vmul.f32 %v8823_v12, %v5308_v14  ;;  %v6204_v27 = vmul.f32 %v8825_v23, %v5308_v14  ;;  %v8830_v46 = vstv %s8814_s1  ;;  %v6223_v23 = vadd.f32 %v2489_v4, %v2485_v36  ;;  %s8835_s2 = sld [smem:[#allocation114_spill]] }
 0x1de   : > { %v6216_v7 = vmul.f32 %v8830_v46, %v5308_v14  ;;  %v8832_v5 = vstv %s8816_s16  ;;  %s8838_s1 = sld [smem:[#allocation119_spill]]  ;;  %s6241_s16 = sld [smem:[#allocation15 + $0x39]]  ;;  %v8846_v4 = vstv %s8828_s22 }
 0x1df   : > { %8820 = sst [smem:[#allocation64_spill]] %s6190_s19  ;;  %8824 = vst [vmem:[#allocation180_spill] sm:$0xff] %v6199_v51  ;;  %8826 = vst [vmem:[#allocation181_spill] sm:$0xff] %v6204_v27  ;;  %v6221_v12 = vmul.f32 %v8832_v5, %v5308_v14  ;;  %v6239_v5 = vmul.f32 %v8840_v17, %v5308_v14  ;;  %v6252_v36 = vmul.f32 %v8846_v4, %v5308_v14  ;;  %s6293_s3 = sld [smem:[#allocation12 + $0x2]]  ;;  %v945_v27 = vpop.permute.xlu1 %944 }
 0x1e0   : > { %8831 = vst [vmem:[#allocation183_spill] sm:$0xff] %v6216_v7  ;;  %8834 = vst [vmem:[#allocation185_spill] sm:$0xff] %v6223_v23  ;;  %8850 = sst [smem:[#allocation75_spill]] %s6261_s30  ;;  %s6279_s22 = sld [smem:[#allocation12 + $0x1]]  ;;  %v948_v22 = vsel %vm947_vm3, %v945_v27, 0.0 }
 0x1e1   : > { %8833 = vst [vmem:[#allocation184_spill] sm:$0xff] %v6221_v12  ;;  %v8837_v59 = vstv %s8821_s17  ;;  %8841 = vst [vmem:[#allocation187_spill] sm:$0xff] %v6239_v5  ;;  %s6263_s17 = sld [smem:[#allocation12 + $0xc]]  ;;  %s8864_s28 = sld [smem:[#allocation143_spill]]  ;;  %v8873_v12 = vstv %s5431_s10 }
 0x1e2   : > { %v6234_v46 = vmul.f32 %v8837_v59, %v5308_v14  ;;  %8847 = vst [vmem:[#allocation188_spill] sm:$0xff] %v6252_v36  ;;  %v8848_v59 = vstv %s8829_s7  ;;  %s6281_s7 = sld [smem:[#allocation12 + $0x5]]  ;;  %8861 = sst [smem:[#allocation82_spill]] %s6295_s8 }
 0x1e3   : > { %v6257_v56 = vmul.f32 %v8848_v59, %v5308_v14  ;;  %v8852_v63 = vstv %s8835_s2  ;;  %s6285_s2 = sld [smem:[#allocation12 + $0x9]]  ;;  %s8865_s6 = sld [smem:[#allocation198_spill]]  ;;  %v988_v51 = vpop.permute.xlu1 %987 }
 0x1e4   : > { %8839 = vst [vmem:[#allocation186_spill] sm:$0xff] %v6234_v46  ;;  %8842 = sst [smem:[#allocation86_spill]] %s6241_s16  ;;  %v6268_v29 = vmul.f32 %v8852_v63, %v5308_v14  ;;  %v8854_v59 = vstv %s8838_s1  ;;  %s6287_s1 = sld [smem:[#allocation12 + $0xd]]  ;;  %v990_v27 = vsel %vm947_vm3, %v988_v51, 0.0  ;;  %v972_v4 = vpop.permute.xlu0 %971 }
 0x1e5   : > { %8849 = vst [vmem:[#allocation189_spill] sm:$0xff] %v6257_v56  ;;  %v6275_v17 = vmul.f32 %v8854_v59, %v5308_v14  ;;  %8860 = sst [smem:[#allocation89_spill]] %s6293_s3  ;;  %s6316_s26 = sld [smem:[#allocation12 + $0x3]]  ;;  %v974_v51 = vsel %vm947_vm3, %v972_v4, 0.0  ;;  %v8893_v4 = vrot.slane %v5101_v39, 6 }
 0x1e6   : > { %8853 = vst [vmem:[#allocation190_spill] sm:$0xff] %v6268_v29  ;;  %8856 = sst [smem:[#allocation88_spill]] %s6279_s22  ;;  %s6321_s13 = sld [smem:[#allocation12 + $0x7]]  ;;  %v8875_v29 = vstv %s8867_s12 }
 0x1e7   : > { %8851 = sst [smem:[#allocation76_spill]] %s6263_s17  ;;  %8855 = vst [vmem:[#allocation191_spill] sm:$0xff] %v6275_v17  ;;  %s8874_s25 = sld [smem:[#allocation125_spill]]  ;;  %v1051_v33 = vpop.permute.xlu1 %1050 }
 0x1e8   : > { %8857 = sst [smem:[#allocation77_spill]] %s6281_s7  ;;  %s8871_s9 = sld [smem:[#allocation124_spill]] }
 0x1e9   : > { %8858 = sst [smem:[#allocation83_spill]] %s6285_s2  ;;  %s6303_s2 = sld [smem:[#allocation12 + $0xe]]  ;;  %v4306_v5 = vld [vmem:[%s8865_s6 + $0x1] sm:$0x1] }
 0x1ea   : > { %8859 = sst [smem:[#allocation84_spill]] %s6287_s1  ;;  %s6301_s1 = sld [smem:[#allocation12 + $0xa]]  ;;  %v949_v59 = vmul.f32 %v4306_v5, %v948_v22  ;;  %v8872_v22 = vstv %s8864_s28  ;;  %v991_v36 = vmul.f32 %v4306_v5, %v990_v27 }
 0x1eb   : > { %8866 = sst [smem:[#allocation92_spill]] %s6316_s26  ;;  %s8876_s6 = sld [smem:[#allocation127_spill]] }
 0x1ec   : > { %8868 = sst [smem:[#allocation93_spill]] %s6321_s13  ;;  %v1161_v46 = vmul.f32 %v8872_v22, %v949_v59  ;;  %v1515_v55 = vmul.f32 %v8873_v12, %v949_v59  ;;  %v1868_v14 = vmul.f32 %v8875_v29, %v949_v59  ;;  %s8877_s28 = sld [smem:[#allocation144_spill]] }
 0x1ed   : > { %v8880_v62 = vstv %s8874_s25  ;;  %s8884_s10 = sld [smem:[#allocation58_spill]]  ;;  %s8885_s12 = sld [smem:[#allocation59_spill]] }
 0x1ee   : > { %v8879_v12 = vstv %s8871_s9  ;;  %v1162_v17 = vadd.f32 %v1161_v46, %v5633_v54  ;;  %v1516_v63 = vadd.f32 %v1515_v55, %v5644_v57  ;;  %v1165_v7 = vmul.f32 %v8880_v62, %v991_v36  ;;  %s8886_s9 = sld [smem:[#allocation97_spill]]  ;;  %s8887_s25 = sld [smem:[#allocation43_spill]] }
 0x1ef   : > { %8863 = sst [smem:[#allocation91_spill]] %s6303_s2  ;;  %v2221_v47 = vmul.f32 %v8879_v12, %v949_v59  ;;  %v8883_v59 = vstv %s8878_s18  ;;  %v1869_v12 = vadd.f32 %v1868_v14, %v5646_v52  ;;  %v1053_v54 = vsel %vm947_vm3, %v1051_v33, 0.0  ;;  %s8890_s18 = sld [smem:[#allocation94_spill]] }
 0x1f0   : > { %8862 = sst [smem:[#allocation85_spill]] %s6301_s1  ;;  %v2225_v27 = vmul.f32 %v8883_v59, %v991_v36  ;;  %v1166_v46 = vadd.f32 %v1165_v7, %v1162_v17  ;;  %v8891_v52 = vrot.slane %v5101_v39, 7  ;;  %s8892_s2 = sld [smem:[#allocation147_spill]]  ;;  %v8897_v17 = vrot.slane %v5101_v39, 5 }
 0x1f1   : > { %v8881_v23 = vstv %s8876_s6  ;;  %v2222_v55 = vadd.f32 %v2221_v47, %v5654_v18  ;;  %s8888_s6 = sld [smem:[#allocation54_spill]]  ;;  %s8894_s17 = sld [smem:[#allocation42_spill]]  ;;  %v6372_v18 = vmul.f32 %v8893_v4, %v974_v51  ;;  %v1020_v47 = vpop.permute.xlu0 %1019  ;;  %v1054_v14 = vmul.f32 %v4306_v5, %v1053_v54 }
 0x1f2   : > { %v1519_v22 = vmul.f32 %v8881_v23, %v991_v36  ;;  %v8882_v56 = vstv %s8877_s28  ;;  %s8889_s28 = sld [smem:[#allocation66_spill]]  ;;  %v6368_v33 = vmul.f32 %v8891_v52, %v974_v51  ;;  %s8895_s26 = sld [smem:[#allocation46_spill]] }
 0x1f3   : > { %v1872_v37 = vmul.f32 %v8882_v56, %v991_v36  ;;  %v6364_v36 = vmul.f32 %v4306_v5, %v974_v51  ;;  %s8896_s1 = sld [smem:[#allocation50_spill]]  ;;  %v2226_v7 = vadd.f32 %v2225_v27, %v2222_v55  ;;  %s8898_s13 = sld [smem:[#allocation44_spill]]  ;;  %v8899_v59 = vstv %s8884_s10 }
 0x1f4   : > { %v1520_v62 = vadd.f32 %v1519_v22, %v1516_v63  ;;  %v1022_v63 = vsel %vm947_vm3, %v1020_v47, 0.0  ;;  %v8900_v52 = vstv %s8885_s12  ;;  %v8901_v29 = vstv %s8886_s9  ;;  %s8906_s19 = sld [smem:[#allocation47_spill]]  ;;  %s8908_s8 = sld [smem:[#allocation51_spill]] }
 0x1f5   : > { %v1873_v56 = vadd.f32 %v1872_v37, %v1869_v12  ;;  %v6376_v37 = vmul.f32 %v8897_v17, %v974_v51  ;;  %v1023_v22 = vmul.f32 %v4306_v5, %v1022_v63  ;;  %v1384_v12 = vmul.f32 %v8899_v59, %v6364_v36  ;;  %s8913_s10 = sld [smem:[#allocation55_spill]]  ;;  %s8926_s12 = sld [smem:[#allocation45_spill]] }
 0x1f6   : > { %v1388_v4 = vmul.f32 %v8900_v52, %v6368_v33  ;;  %v1395_v23 = vmul.f32 %v8901_v29, %v6372_v18  ;;  %v8902_v57 = vstv %s8887_s25  ;;  %v8905_v10 = vstv %s8890_s18  ;;  %s8928_s9 = sld [smem:[#allocation69_spill]]  ;;  %s6437_s25 = sld [smem:[#allocation12 + $0xa1]] }
 0x1f7   : > { %v1173_v27 = vmul.f32 %v8902_v57, %v1054_v14  ;;  %v8903_v55 = vstv %s8888_s6  ;;  %v2233_v54 = vmul.f32 %v8905_v10, %v1054_v14  ;;  %v8907_v47 = vstv %s8892_s2  ;;  %s8922_s2 = sld [smem:[#allocation95_spill]]  ;;  %s6439_s6 = sld [smem:[#allocation12 + $0xa5]] }
 0x1f8   : > { %v1527_v39 = vmul.f32 %v8903_v55, %v1054_v14  ;;  %v8904_v51 = vstv %s8889_s28  ;;  %v1169_v5 = vmul.f32 %v8907_v47, %v1023_v22  ;;  %v8909_v63 = vstv %s8894_s17  ;;  %s6416_s17 = sld [smem:[#allocation12 + $0xf]]  ;;  %s8278_s28 = smov 64  }
 0x1f9   : > { %v1880_v17 = vmul.f32 %v8904_v51, %v1054_v14  ;;  %v1523_v59 = vmul.f32 %v8909_v63, %v1023_v22  ;;  %v8910_v1 = vstv %s8895_s26  ;;  %v8911_v52 = vstv %s8896_s1  ;;  %s8916_s26 = sld [smem:[#allocation48_spill]]  ;;  %s8924_s1 = sld [smem:[#allocation60_spill]] }
 0x1fa   : > { %v1876_v26 = vmul.f32 %v8910_v1, %v1023_v22  ;;  %v2229_v48 = vmul.f32 %v8911_v52, %v1023_v22  ;;  %v1385_v29 = vadd.f32 %v1384_v12, %v5799_v38  ;;  %v1390_v32 = vrot.slane %v1388_v4, 1  ;;  %s8933_s18 = sld [smem:[#allocation70_spill]]  ;;  %s6503_s3 = sld [smem:[#allocation12 + $0x84]] }
 0x1fb   : > { %v1397_v57 = vrot.slane %v1395_v23, 2  ;;  %v8912_v55 = vstv %s8898_s13  ;;  %v1170_v51 = vadd.f32 %v1169_v5, %v1166_v46  ;;  %v1524_v35 = vadd.f32 %v1523_v59, %v1520_v62  ;;  %s6414_s13 = sld [smem:[#allocation12 + $0xb]]  ;;  %s6519_s7 = sld [smem:[#allocation12 + $0x87]] }
 0x1fc   : > { %v1402_v53 = vmul.f32 %v8912_v55, %v6376_v37  ;;  %v1877_v10 = vadd.f32 %v1876_v26, %v1873_v56  ;;  %v2230_v14 = vadd.f32 %v2229_v48, %v2226_v7  ;;  %v1392_v34 = vadd.f32 %v1390_v32, %v1385_v29  ;;  %8931 = sst [smem:[#allocation128_spill]] %s6437_s25  ;;  %s6521_s22 = sld [smem:[#allocation12 + $0x95]] }
 0x1fd   : > { %v8914_v63 = vstv %s8906_s19  ;;  %v8915_v1 = vstv %s8908_s8  ;;  %v1174_v52 = vadd.f32 %v1173_v27, %v1170_v51  ;;  %v1528_v38 = vadd.f32 %v1527_v39, %v1524_v35  ;;  %s8920_s8 = sld [smem:[#allocation52_spill]]  ;;  %s8921_s19 = sld [smem:[#allocation56_spill]] }
 0x1fe   : > { %v1404_v47 = vrot.slane %v1402_v53, 3  ;;  %v1738_v13 = vmul.f32 %v8914_v63, %v6364_v36  ;;  %v1742_v22 = vmul.f32 %v8915_v1, %v6368_v33  ;;  %v1881_v23 = vadd.f32 %v1880_v17, %v1877_v10  ;;  %8918 = sst [smem:[#allocation126_spill]] %s6416_s17  ;;  %s6492_s17 = sld [smem:[#allocation12 + $0x83]] }
 0x1ff   : > { %v2234_v12 = vadd.f32 %v2233_v54, %v2230_v14  ;;  %v1399_v46 = vadd.f32 %v1397_v57, %v1392_v34  ;;  %v8919_v53 = vstv %s8913_s10  ;;  %v1178_v62 = vadd.f32 %v5663_v49, %v1174_v52  ;;  %8932 = sst [smem:[#allocation131_spill]] %s6439_s6  ;;  %s6448_s10 = sld [smem:[#allocation12 + $0xa9]] }
 0x200   : > { %v1739_v48 = vadd.f32 %v1738_v13, %v5853_v25  ;;  %v1744_v32 = vrot.slane %v1742_v22, 1  ;;  %v1749_v26 = vmul.f32 %v8919_v53, %v6372_v18  ;;  %v1532_v56 = vadd.f32 %v5669_v41, %v1528_v38  ;;  %8955 = sst [smem:[#allocation137_spill]] %s6503_s3  ;;  %s6527_s6 = sld [smem:[#allocation12 + $0x94]] }
 0x201   : > { %8917 = sst [smem:[#allocation90_spill]] %s6414_s13  ;;  %v1885_v35 = vadd.f32 %v5692_v3, %v1881_v23  ;;  %v2238_v7 = vadd.f32 %v5725_v19, %v2234_v12  ;;  %v1406_v4 = vadd.f32 %v1404_v47, %v1399_v46  ;;  %v8923_v25 = vstv %s8916_s26  ;;  %s6462_s26 = sld [smem:[#allocation12 + $0x91]] }
 0x202   : > { %v1746_v27 = vadd.f32 %v1744_v32, %v1739_v48  ;;  %v1751_v34 = vrot.slane %v1749_v26, 2  ;;  %v1756_v13 = vmul.f32 %v8923_v25, %v6376_v37  ;;  %v8925_v39 = vrot.slane %v5666_v9, 1  ;;  %s6501_s13 = sld [smem:[#allocation12 + $0xa0]]  ;;  %8960 = sst [smem:[#allocation102_spill]] %s6519_s7 }
 0x203   : > { %v8927_v41 = vrot.slane %v5672_v42, 1  ;;  %v8929_v17 = vrot.slane %v5695_v20, 1  ;;  %v8930_v54 = vrot.slane %v5698_v16, 1  ;;  %1412 = vrot.lane.b32.xlu0 %v1406_v4, %s8278_s28  ;;  %v8934_v42 = vstv %s8920_s8  ;;  %s6464_s8 = sld [smem:[#allocation12 + $0x92]]  ;;  %s6529_s25 = sld [smem:[#allocation12 + $0x96]] }
 0x204   : > { %v1185_v49 = vadd.f32 %v8925_v39, %v1178_v62  ;;  %v1753_v9 = vadd.f32 %v1751_v34, %v1746_v27  ;;  %v1758_v59 = vrot.slane %v1756_v13, 3  ;;  %v2091_v29 = vmul.f32 %v8934_v42, %v6364_v36  ;;  %8950 = sst [smem:[#allocation130_spill]] %s6492_s17  ;;  %s8961_s30 = smov 64  }
 0x205   : > { %v1539_v3 = vadd.f32 %v8927_v41, %v1532_v56  ;;  %v1892_v19 = vadd.f32 %v8929_v17, %v1885_v35  ;;  %v2245_v5 = vadd.f32 %v8930_v54, %v2238_v7  ;;  %v8935_v57 = vstv %s8921_s19  ;;  %8936 = sst [smem:[#allocation133_spill]] %s6448_s10  ;;  %s6539_s10 = sld [smem:[#allocation12 + $0xa4]] }
 0x206   : > { %v2095_v20 = vmul.f32 %v8935_v57, %v6368_v33  ;;  %v8937_v16 = vstv %s8922_s2  ;;  %v8938_v51 = vstv %s8924_s1  ;;  %v8939_v14 = vstv %s8926_s12  ;;  %s6470_s19 = sld [smem:[#allocation12 + $0xad]]  ;;  %s6475_s2 = sld [smem:[#allocation12 + $0x80]] }
 0x207   : > { %v2102_v55 = vmul.f32 %v8937_v16, %v6372_v18  ;;  %v2109_v10 = vmul.f32 %v8938_v51, %v6376_v37  ;;  %v2444_v47 = vmul.f32 %v8939_v14, %v6364_v36  ;;  %v8940_v63 = vstv %s8928_s9  ;;  %s8944_s1 = sld [smem:[#allocation49_spill]]  ;;  %s6477_s12 = sld [smem:[#allocation12 + $0x90]] }
 0x208   : > { %v2448_v1 = vmul.f32 %v8940_v63, %v6368_v33  ;;  %v1760_v22 = vadd.f32 %v1758_v59, %v1753_v9  ;;  %v2092_v52 = vadd.f32 %v2091_v29, %v5901_v28  ;;  %v2097_v38 = vrot.slane %v2095_v20, 1  ;;  %s6482_s9 = sld [smem:[#allocation12 + $0x81]]  ;;  %8954 = sst [smem:[#allocation135_spill]] %s6501_s13 }
 0x209   : > { %v8941_v23 = vstv %s8933_s18  ;;  %v2445_v46 = vadd.f32 %v2444_v47, %v5997_v58  ;;  %v2104_v28 = vrot.slane %v2102_v55, 2  ;;  %v2111_v53 = vrot.slane %v2109_v10, 3  ;;  %s6484_s18 = sld [smem:[#allocation12 + $0x93]]  ;;  %s6553_s16 = sld [smem:[#allocation12 + $0x99]] }
 0x20a   : > { %v2455_v12 = vmul.f32 %v8941_v23, %v6372_v18  ;;  %v2450_v48 = vrot.slane %v2448_v1, 1  ;;  %1766 = vrot.lane.b32.xlu0 %v1760_v22, %s8278_s28  ;;  %v2099_v33 = vadd.f32 %v2097_v38, %v2092_v52  ;;  %v8945_v26 = vrot.slane %v5869_v11, 2  ;;  %s6490_s28 = sld [smem:[#allocation12 + $0x82]]  ;;  %v8972_v52 = vld [vmem:[#allocation152_spill] sm:$0xff]  ;;  %s6605_s17 = sld [smem:[#allocation12 + $0xa8]] }
 0x20b   : > { %v8947_v56 = vrot.slane %v5923_v0, 2  ;;  %v8948_v7 = vrot.slane %v5955_v50, 2  ;;  %v8952_v25 = vrot.slane %v5879_v43, 3  ;;  %v8953_v39 = vrot.slane %v5988_v45, 2  ;;  %8965 = sst [smem:[#allocation140_spill]] %s6539_s10  ;;  %s6650_s7 = sld [smem:[#allocation12 + $0xa7]] }
 0x20c   : > { %8942 = sst [smem:[#allocation134_spill]] %s6470_s19  ;;  %v1192_v18 = vadd.f32 %v8945_v26, %v1185_v49  ;;  %v2452_v58 = vadd.f32 %v2450_v48, %v2445_v46  ;;  %v2457_v62 = vrot.slane %v2455_v12, 2  ;;  %v2106_v11 = vadd.f32 %v2104_v28, %v2099_v33  ;;  %v8974_v12 = vld [vmem:[#allocation153_spill] sm:$0xff]  ;;  %s6595_s19 = sld [smem:[#allocation12 + $0x8b]] }
 0x20d   : > { %8943 = sst [smem:[#allocation129_spill]] %s6475_s2  ;;  %v1546_v35 = vadd.f32 %v8947_v56, %v1539_v3  ;;  %v1899_v4 = vadd.f32 %v8948_v7, %v1892_v19  ;;  %v8951_v27 = vstv %s8944_s1  ;;  %v2252_v49 = vadd.f32 %v8953_v39, %v2245_v5  ;;  %s6511_s1 = sld [smem:[#allocation12 + $0x85]] }
 0x20e   : > { %8946 = sst [smem:[#allocation136_spill]] %s6482_s9  ;;  %v2462_v34 = vmul.f32 %v8951_v27, %v6376_v37  ;;  %v1199_v13 = vadd.f32 %v8952_v25, %v1192_v18  ;;  %v8956_v0 = vrot.slane %v5929_v31, 3  ;;  %v8957_v41 = vrot.slane %v5958_v8, 3  ;;  %s6614_s13 = sld [smem:[#allocation12 + $0x8c]]  ;;  %v8983_v25 = vld [vmem:[#allocation154_spill] sm:$0xff]  ;;  %v9016_v31 = vld [vmem:[#allocation171_spill] sm:$0xff] }
 0x20f   : > { %v6516_v43 = vmax.f32 %v6194_v61, 0.0  ;;  %v2113_v45 = vadd.f32 %v2111_v53, %v2106_v11  ;;  %v2459_v19 = vadd.f32 %v2457_v62, %v2452_v58  ;;  %v1246_v5 = vstv %s6462_s26  ;;  %s6537_s26 = sld [smem:[#allocation12 + $0x97]]  ;;  %s6682_s10 = sld [smem:[#allocation12 + $0xae]] }
 0x210   : > { %8949 = sst [smem:[#allocation138_spill]] %s6490_s28  ;;  %v1553_v50 = vadd.f32 %v8956_v0, %v1546_v35  ;;  %v1906_v3 = vadd.f32 %v8957_v41, %v1899_v4  ;;  %v1203_v54 = vadd.f32 %v5899_v44, %v1199_v13  ;;  %v1253_v9 = vstv %s6464_s8  ;;  %s6597_s28 = sld [smem:[#allocation12 + $0x9f]]  ;;  %v8979_v35 = vld [vmem:[#allocation182_spill] sm:$0xff]  ;;  %v8987_v41 = vld [vmem:[#allocation157_spill] sm:$0xff] }
 0x211   : > { %2119 = vrot.lane.b32.xlu0 %v2113_v45, %s8961_s30  ;;  %v2464_v44 = vrot.slane %v2462_v34, 3  ;;  %v8962_v61 = vrot.slane %v5884_v60, 1  ;;  %s8964_s8 = sld [smem:[#allocation39_spill]]  ;;  %v8966_v57 = vrot.slane %v5934_v40, 1  ;;  %v1226_v55 = vstv %s6475_s2  ;;  %8992 = sst [smem:[#allocation108_spill]] %s6650_s7 }
 0x212   : > { %v1557_v8 = vadd.f32 %v5947_v24, %v1553_v50  ;;  %v1910_v42 = vadd.f32 %v5985_v15, %v1906_v3  ;;  %v8963_v24 = vrot.slane %v6007_v2, 3  ;;  %v1242_v60 = vstv %s6477_s12  ;;  %s6571_s12 = sld [smem:[#allocation12 + $0x8a]]  ;;  %8977 = sst [smem:[#allocation103_spill]] %s6595_s19 }
 0x213   : > { %8958 = sst [smem:[#allocation139_spill]] %s6511_s1  ;;  %v1210_v59 = vadd.f32 %v8962_v61, %v1203_v54  ;;  %v2466_v15 = vadd.f32 %v2464_v44, %v2459_v19  ;;  %v8969_v2 = vrot.slane %v5889_v30, 2  ;;  %v1260_v10 = vstv %s6484_s18  ;;  %s6660_s2 = sld [smem:[#allocation12 + $0xaf]] }
 0x214   : > { %v2259_v29 = vadd.f32 %v8963_v24, %v2252_v49  ;;  %v1564_v20 = vadd.f32 %v8966_v57, %v1557_v8  ;;  %v8970_v14 = vstv %s6093_s24  ;;  %v1230_v47 = vstv %s6482_s9  ;;  %s6573_s18 = sld [smem:[#allocation12 + $0x9b]]  ;;  %s6583_s24 = sld [smem:[#allocation12 + $0x9d]]  ;;  %v8985_v49 = vld [vmem:[#allocation155_spill] sm:$0xff] }
 0x215   : > { %v1217_v51 = vadd.f32 %v8969_v2, %v1210_v59  ;;  %v2613_v40 = vmul.f32 %v8970_v14, %v6516_v43  ;;  %2472 = vrot.lane.b32.xlu0 %v2466_v15, %s8961_s30  ;;  %v8973_v38 = vrot.slane %v8972_v52, 3  ;;  %v8975_v46 = vrot.slane %v8974_v12, 2  ;;  %s6603_s9 = sld [smem:[#allocation12 + $0x98]]  ;;  %8978 = sst [smem:[#allocation98_spill]] %s6605_s17 }
 0x216   : > { %v8976_v33 = vrot.slane %v5963_v21, 1  ;;  %v2263_v53 = vadd.f32 %v6014_v6, %v2259_v29  ;;  %v1580_v21 = vstv %s6503_s3  ;;  %v1584_v6 = vstv %s6511_s1  ;;  %8981 = sst [smem:[#allocation141_spill]] %s6614_s13  ;;  %s6637_s1 = sld [smem:[#allocation12 + $0xac]] }
 0x217   : > { %v6563_v1 = vld [vmem:[%s8964_s8] sm:$0xf]  ;;  %v1224_v23 = vadd.f32 %v8973_v38, %v1217_v51  ;;  %v1571_v48 = vadd.f32 %v8975_v46, %v1564_v20  ;;  %s6585_s8 = sld [smem:[#allocation12 + $0x9e]]  ;;  %v1600_v56 = vstv %s6521_s22  ;;  %v6608_v7 = vadd.f32 %v2613_v40, %v8979_v35  ;;  %s6616_s3 = sld [smem:[#allocation12 + $0x8d]]  ;;  %v8997_v51 = vld [vmem:[#allocation158_spill] sm:$0xff] }
 0x218   : > { %v6566_v22 = vmul.f32 %v6563_v1, %v1246_v5  ;;  %v6569_v30 = vmul.f32 %v6563_v1, %v1253_v9  ;;  %8971 = sst [smem:[#allocation68_spill]] %s6571_s12  ;;  %v1917_v28 = vadd.f32 %v8976_v33, %v1910_v42  ;;  %v6589_v18 = vmul.f32 %v6563_v1, %v1242_v60  ;;  %s6625_s22 = sld [smem:[#allocation12 + $0x8e]]  ;;  %v8995_v60 = vld [vmem:[#allocation156_spill] sm:$0xff] }
 0x219   : > { %v6592_v58 = vmul.f32 %v6563_v1, %v1260_v10  ;;  %1408 = vrot.lane.b32.xlu1 %v1224_v23, %s8961_s30  ;;  %8980 = vst [vmem:[#allocation152_spill] sm:$0xff] %v6608_v7  ;;  %v1596_v27 = vstv %s6527_s6  ;;  %v1607_v34 = vstv %s6529_s25  ;;  %v8984_v13 = vrot.slane %v8983_v25, 3  ;;  %s6627_s25 = sld [smem:[#allocation12 + $0x9c]]  ;;  %s6635_s6 = sld [smem:[#allocation12 + $0x8f]]  ;;  %v9005_v25 = vld [vmem:[#allocation159_spill] sm:$0xff] }
 0x21a   : > { %v8986_v0 = vrot.slane %v8985_v49, 2  ;;  %v8988_v3 = vrot.slane %v8987_v41, 1  ;;  %v1614_v19 = vstv %s6537_s26  ;;  %v6633_v9 = vmul.f32 %v6563_v1, %v1600_v56  ;;  %s6648_s26 = sld [smem:[#allocation12 + $0xa3]]  ;;  %8994 = sst [smem:[#allocation142_spill]] %s6660_s2 }
 0x21b   : > { %v1578_v39 = vadd.f32 %v8984_v13, %v1571_v48  ;;  %v6641_v44 = vmul.f32 %v6563_v1, %v1596_v27  ;;  %v6644_v61 = vmul.f32 %v6563_v1, %v1607_v34  ;;  %v1953_v59 = vstv %s6553_s16  ;;  %s6670_s16 = sld [smem:[#allocation12 + $0xa6]]  ;;  %9000 = sst [smem:[#allocation107_spill]] %s6682_s10 }
 0x21c   : > { %v1924_v50 = vadd.f32 %v8986_v0, %v1917_v28  ;;  %v2270_v45 = vadd.f32 %v8988_v3, %v2263_v53  ;;  %v1960_v42 = vstv %s6555_s11  ;;  %v6653_v24 = vmul.f32 %v6563_v1, %v1614_v19  ;;  %s6668_s11 = sld [smem:[#allocation12 + $0xa2]]  ;;  %s6714_s12 = sld [smem:[#allocation12 + $0x31]] }
 0x21d   : > { %8982 = sst [smem:[#allocation99_spill]] %s6616_s3  ;;  %1762 = vrot.lane.b32.xlu1 %v1578_v39, %s8961_s30  ;;  %v1967_v20 = vstv %s6573_s18  ;;  %v8996_v15 = vrot.slane %v8995_v60, 3  ;;  %v8998_v10 = vrot.slane %v8997_v51, 2  ;;  %v2306_v40 = vstv %s6583_s24  ;;  %s6680_s18 = sld [smem:[#allocation12 + $0xaa]] }
 0x21e   : > { %8989 = sst [smem:[#allocation106_spill]] %s6625_s22  ;;  %v2313_v52 = vstv %s6585_s8  ;;  %v6674_v23 = vmul.f32 %v6563_v1, %v1953_v59  ;;  %v6677_v12 = vmul.f32 %v6563_v1, %v1960_v42  ;;  %v2320_v46 = vstv %s6597_s28  ;;  %s6691_s24 = sld [smem:[#allocation14]] }
 0x21f   : > { %8990 = sst [smem:[#allocation100_spill]] %s6635_s6  ;;  %v1931_v2 = vadd.f32 %v8996_v15, %v1924_v50  ;;  %v2277_v14 = vadd.f32 %v8998_v10, %v2270_v45  ;;  %v1949_v28 = vstv %s6603_s9  ;;  %v6689_v53 = vmul.f32 %v6563_v1, %v1967_v20  ;;  %s6693_s8 = sld [smem:[#allocation14 + $0x1]] }
 0x220   : > { %8991 = sst [smem:[#allocation101_spill]] %s6648_s26  ;;  %v6698_v27 = vmul.f32 %v6563_v1, %v2306_v40  ;;  %v6701_v34 = vmul.f32 %v6563_v1, %v2313_v52  ;;  %s6703_s28 = sld [smem:[#allocation14 + $0x2]]  ;;  %v9006_v13 = vrot.slane %v9005_v25, 3  ;;  %v2302_v0 = vstv %s6627_s25  ;;  %v9013_v40 = vld [vmem:[#allocation173_spill] sm:$0xff] }
 0x221   : > { %2115 = vrot.lane.b32.xlu1 %v1931_v2, %s8961_s30  ;;  %s6705_s9 = sld [smem:[#allocation14 + $0x3]]  ;;  %v6712_v50 = vmul.f32 %v6563_v1, %v2320_v46  ;;  %v6719_v41 = vmul.f32 %v6563_v1, %v1949_v28  ;;  %s6729_s25 = sld [smem:[#allocation12 + $0x20]]  ;;  %v6733_v2 = vmul.f32 %v6563_v1, %v2302_v0  ;;  %v9012_v25 = vstv %s6095_s5 }
 0x222   : > { %v2284_v39 = vadd.f32 %v9006_v13, %v2277_v14  ;;  %s6739_s17 = sld [smem:[#allocation12 + $0x33]]  ;;  %s6745_s6 = sld [smem:[#allocation12 + $0x21]]  ;;  %v1123_v46 = vstv %s6714_s12  ;;  %v1130_v52 = vstv %s6716_s23  ;;  %v9023_v59 = vstv %s6132_s4 }
 0x223   : > { %8999 = sst [smem:[#allocation116_spill]] %s6680_s18  ;;  %s9007_s22 = sld [smem:[#allocation53_spill]]  ;;  %v2849_v37 = vmul.f32 %v9023_v59, %v9016_v31  ;;  %v6814_v3 = vmul.f32 %v6563_v1, %v1123_v46  ;;  %v894_v38 = vpop.xlane.xlu1 %893 }
 0x224   : > { %9001 = sst [smem:[#allocation109_spill]] %s6691_s24  ;;  %s9008_s19 = sld [smem:[#allocation61_spill]] }
 0x225   : > { %9002 = sst [smem:[#allocation111_spill]] %s6693_s8  ;;  %2468 = vrot.lane.b32.xlu1 %v2284_v39, %s8961_s30  ;;  %s6737_s30 = sld [smem:[#allocation12 + $0x30]]  ;;  %v2493_v39 = vmul.f32 %v9012_v25, %v6516_v43  ;;  %v9020_v25 = vld [vmem:[#allocation185_spill] sm:$0xff] }
 0x226   : > { %9003 = sst [smem:[#allocation112_spill]] %s6703_s28  ;;  %s6751_s3 = sld [smem:[#allocation12 + $0x22]] }
 0x227   : > { %9004 = sst [smem:[#allocation113_spill]] %s6705_s9  ;;  %s9009_s13 = sld [smem:[#allocation57_spill]]  ;;  %v6784_v17 = vadd.f32 %v2493_v39, %v9020_v25 }
 0x228   : > { %s9010_s26 = sld [smem:[#allocation71_spill]]  ;;  %s9011_s7 = sld [smem:[#allocation78_spill]]  ;;  %v1137_v62 = vstv %s6739_s17 }
 0x229   : > { %s6761_s2 = sld [smem:[#allocation12 + $0x24]]  ;;  %s6763_s14 = sld [smem:[#allocation12 + $0x25]]  ;;  %v9014_v13 = vstv %s9007_s22  ;;  %9021 = vst [vmem:[#allocation153_spill] sm:$0xff] %v6784_v17 }
 0x22a   : > { %s9015_s18 = sld [smem:[#allocation79_spill]]  ;;  %v2725_v16 = vmul.f32 %v9014_v13, %v9013_v40  ;;  %s6773_s8 = sld [smem:[#allocation12 + $0x26]]  ;;  %v9017_v28 = vstv %s9008_s19 }
 0x22b   : > { %v2729_v0 = vmul.f32 %v9017_v28, %v9016_v31  ;;  %s9019_s9 = sld [smem:[#allocation62_spill]]  ;;  %s6781_s5 = sld [smem:[#allocation12 + $0x35]]  ;;  %v9025_v28 = vstv %s6142_s27 }
 0x22c   : > { %s6796_s23 = sld [smem:[#allocation12 + $0x36]]  ;;  %v2965_v39 = vmul.f32 %v9025_v28, %v9013_v40  ;;  %s6806_s4 = sld [smem:[#allocation12 + $0x34]] }
 0x22d   : > { %v9018_v14 = vstv %s9009_s13  ;;  %s6808_s13 = sld [smem:[#allocation12 + $0x37]]  ;;  %s9028_s27 = sld [smem:[#allocation63_spill]] }
 0x22e   : > { %v2733_v19 = vmul.f32 %v9018_v14, %v6516_v43  ;;  %v9022_v13 = vstv %s9010_s26  ;;  %v9024_v29 = vstv %s9011_s7  ;;  %v2730_v14 = vadd.f32 %v2729_v0, %v2725_v16  ;;  %s6819_s7 = sld [smem:[#allocation12 + $0x27]]  ;;  %s9031_s17 = sld [smem:[#allocation64_spill]] }
 0x22f   : > { %v2845_v10 = vmul.f32 %v9022_v13, %v9013_v40  ;;  %v2853_v51 = vmul.f32 %v9024_v29, %v6516_v43  ;;  %v1119_v13 = vstv %s6737_s30  ;;  %v6817_v16 = vmul.f32 %v6563_v1, %v1130_v52  ;;  %s6826_s19 = sld [smem:[#allocation12 + $0x28]]  ;;  %s6828_s12 = sld [smem:[#allocation12 + $0x39]] }
 0x230   : > { %v9026_v25 = vstv %s9015_s18  ;;  %v6821_v0 = vadd.f32 %v2733_v19, %v2730_v14  ;;  %v6833_v52 = vmul.f32 %v6563_v1, %v1119_v13  ;;  %s6838_s22 = sld [smem:[#allocation12 + $0x29]]  ;;  %s6840_s26 = sld [smem:[#allocation12 + $0x2a]] }
 0x231   : > { %v2969_v35 = vmul.f32 %v9026_v25, %v9016_v31  ;;  %v2850_v29 = vadd.f32 %v2849_v37, %v2845_v10  ;;  %v9027_v59 = vstv %s9019_s9  ;;  %9029 = vst [vmem:[#allocation182_spill] sm:$0xff] %v6817_v16  ;;  %s6849_s18 = sld [smem:[#allocation12 + $0x38]]  ;;  %s6851_s9 = sld [smem:[#allocation12 + $0x3a]]  ;;  %v9042_v37 = vstv %s6208_s15 }
 0x232   : > { %v2973_v45 = vmul.f32 %v9027_v59, %v6516_v43  ;;  %9030 = vst [vmem:[#allocation154_spill] sm:$0xff] %v6821_v0  ;;  %v6836_v59 = vmul.f32 %v6563_v1, %v1137_v62  ;;  %s9038_s30 = sld [smem:[#allocation81_spill]]  ;;  %s9039_s28 = sld [smem:[#allocation86_spill]]  ;;  %v9044_v25 = vstv %s6225_s21  ;;  %v1484_v10 = vstv %s6796_s23 }
 0x233   : > { %v2970_v28 = vadd.f32 %v2969_v35, %v2965_v39  ;;  %v6830_v46 = vadd.f32 %v2853_v51, %v2850_v29  ;;  %v9035_v19 = vstv %s9028_s27  ;;  %v9037_v29 = vstv %s6192_s0  ;;  %s9040_s27 = sld [smem:[#allocation87_spill]]  ;;  %s6862_s24 = sld [smem:[#allocation12 + $0x2b]] }
 0x234   : > { %9033 = vst [vmem:[#allocation157_spill] sm:$0xff] %v6836_v59  ;;  %v3085_v14 = vmul.f32 %v9035_v19, %v9013_v40  ;;  %v9036_v62 = vstv %s9031_s17  ;;  %s6864_s10 = sld [smem:[#allocation12 + $0x3b]]  ;;  %v1477_v39 = vstv %s6781_s5  ;;  %s6870_s0 = sld [smem:[#allocation12 + $0x3d]]  ;;  %v9043_v51 = vstv %s6210_s29 }
 0x235   : > { %9032 = vst [vmem:[#allocation155_spill] sm:$0xff] %v6830_v46  ;;  %v6842_v35 = vadd.f32 %v2973_v45, %v2970_v28  ;;  %v3089_v13 = vmul.f32 %v9036_v62, %v9016_v31  ;;  %v3093_v45 = vmul.f32 %v9037_v29, %v6516_v43  ;;  %v3205_v62 = vmul.f32 %v9042_v37, %v9013_v40  ;;  %s6879_s17 = sld [smem:[#allocation12 + $0x3e]]  ;;  %s6892_s29 = sld [smem:[#allocation12 + $0x2c]] }
 0x236   : > { %v3209_v28 = vmul.f32 %v9043_v51, %v9016_v31  ;;  %v3213_v19 = vmul.f32 %v9044_v25, %v6516_v43  ;;  %v1473_v51 = vstv %s6806_s4  ;;  %v1491_v11 = vstv %s6808_s13  ;;  %s6894_s15 = sld [smem:[#allocation12 + $0x2d]]  ;;  %s6903_s21 = sld [smem:[#allocation12 + $0x3c]] }
 0x237   : > { %9034 = vst [vmem:[#allocation156_spill] sm:$0xff] %v6842_v35  ;;  %v3090_v29 = vadd.f32 %v3089_v13, %v3085_v14  ;;  %v877_v13 = vpop.xlane.xlu0 %876  ;;  %s6913_s5 = sld [smem:[#allocation12 + $0x2f]]  ;;  %s6932_s4 = sld [smem:[#allocation15 + $0xb]] }
 0x238   : > { %v9045_v54 = vstv %s9038_s30  ;;  %v9046_v37 = vstv %s9039_s28  ;;  %v3210_v49 = vadd.f32 %v3209_v28, %v3205_v62  ;;  %v1830_v28 = vstv %s6828_s12  ;;  %s6911_s28 = sld [smem:[#allocation12 + $0x2e]]  ;;  %s6930_s23 = sld [smem:[#allocation12 + $0x3f]] }
 0x239   : > { %9041 = sst [smem:[#allocation115_spill]] %s6862_s24  ;;  %v3325_v56 = vmul.f32 %v9045_v54, %v9013_v40  ;;  %v3329_v15 = vmul.f32 %v9046_v37, %v9016_v31  ;;  %v9047_v60 = vstv %s9040_s27  ;;  %v6896_v25 = vadd.f32 %v3093_v45, %v3090_v29  ;;  %s6940_s13 = sld [smem:[#allocation15 + $0xc]] }
 0x23a   : > { %v3333_v14 = vmul.f32 %v9047_v60, %v6516_v43  ;;  %v6901_v43 = vmul.f32 %v6563_v1, %v1477_v39  ;;  %v6905_v40 = vmul.f32 0.00390625, %v877_v13  ;;  %v6908_v45 = vmul.f32 %v6563_v1, %v1484_v10  ;;  %s6942_s12 = sld [smem:[#allocation15 + $0xd]]  ;;  %s9063_s27 = sld [smem:[#allocation198_spill]] }
 0x23b   : > { %9049 = vst [vmem:[#allocation158_spill] sm:$0xff] %v6896_v25  ;;  %v3330_v60 = vadd.f32 %v3329_v15, %v3325_v56  ;;  %v6915_v62 = vadd.f32 %v3213_v19, %v3210_v49  ;;  %v6918_v39 = vmul.f32 %v6563_v1, %v1473_v51  ;;  %v6921_v29 = vmul.f32 %v6563_v1, %v1491_v11  ;;  %v939_v10 = vpop.permute.xlu0 %938  ;;  %v951_v49 = vpop.permute.xlu1 %950  ;;  %s9069_s30 = sld [smem:[#allocation65_spill]]  ;;  %s9085_s24 = sld [smem:[#allocation132_spill]] }
 0x23c   : > { %9048 = sst [smem:[#allocation117_spill]] %s6894_s15  ;;  %9050 = vst [vmem:[#allocation159_spill] sm:$0xff] %v6908_v45  ;;  %v1826_v54 = vstv %s6849_s18  ;;  %v1837_v31 = vstv %s6851_s9  ;;  %v6937_v11 = vmul.f32 %v6563_v1, %v1830_v28  ;;  %v896_v13 = vmul.f32 0.00390625, %v894_v38  ;;  %s6970_s18 = sld [smem:[#allocation15 + $0xf]] }
 0x23d   : > { %9052 = sst [smem:[#allocation120_spill]] %s6913_s5  ;;  %9053 = vst [vmem:[#allocation173_spill] sm:$0xff] %v6915_v62  ;;  %9054 = vst [vmem:[#allocation171_spill] sm:$0xff] %v6921_v29  ;;  %v6924_v15 = vadd.f32 %v3333_v14, %v3330_v60  ;;  %v1844_v14 = vstv %s6864_s10  ;;  %v897_v60 = vmul.f32 %v6905_v40, %v6905_v40  ;;  %v2183_v56 = vstv %s6870_s0  ;;  %s6968_s10 = sld [smem:[#allocation15 + $0xe]] }
 0x23e   : > { %9051 = sst [smem:[#allocation118_spill]] %s6911_s28  ;;  %v6950_v51 = vmul.f32 %v6563_v1, %v1826_v54  ;;  %v6953_v28 = vmul.f32 %v6563_v1, %v1837_v31  ;;  %v2190_v4 = vstv %s6879_s17  ;;  %v953_v32 = vsel %vm941_vm4, 0.0, %v951_v49  ;;  %s9074_s0 = sld [smem:[#allocation138_spill]] }
 0x23f   : > { %9055 = vst [vmem:[#allocation185_spill] sm:$0xff] %v6924_v15  ;;  %9056 = sst [smem:[#allocation121_spill]] %s6932_s4  ;;  %v993_v33 = vpop.permute.xlu0 %992  ;;  %v6958_v20 = vmul.f32 %v6563_v1, %v1844_v14  ;;  %v983_v19 = vpop.permute.xlu1 %982  ;;  %v2179_v36 = vstv %s6903_s21  ;;  %v6966_v31 = vmul.f32 %v6563_v1, %v2183_v56  ;;  %v898_v49 = vsub.f32 %v896_v13, %v897_v60  ;;  %s9075_s17 = sld [smem:[#allocation67_spill]] }
 0x240   : > { %9057 = sst [smem:[#allocation123_spill]] %s6940_s13  ;;  %9059 = vst [vmem:[#allocation192_spill] sm:$0xff] %v6953_v28  ;;  %v995_v42 = vsel %vm941_vm4, 0.0, %v993_v33  ;;  %v6975_v14 = vld [vmem:[%s9063_s27] sm:$0x1]  ;;  %v6980_v37 = vmul.f32 %v6563_v1, %v2190_v4  ;;  %v942_v56 = vsel %vm941_vm4, 0.0, %v939_v10  ;;  %v6993_v4 = vmul.f32 %v6563_v1, %v2179_v36 }
 0x241   : > { %9058 = sst [smem:[#allocation104_spill]] %s6942_s12  ;;  %9060 = vst [vmem:[#allocation193_spill] sm:$0xff] %v6958_v20  ;;  %9061 = vst [vmem:[#allocation194_spill] sm:$0xff] %v6966_v31  ;;  %v6984_v38 = vmul.f32 %v953_v32, %v6975_v14  ;;  %v6987_v13 = vmul.f32 %v995_v42, %v6975_v14  ;;  %v985_v60 = vsel %vm941_vm4, 0.0, %v983_v19  ;;  %v2197_v26 = vstv %s6930_s23  ;;  %s9070_s23 = sld [smem:[#allocation74_spill]] }
 0x242   : > { %9064 = vst [vmem:[#allocation195_spill] sm:$0xff] %v6980_v37  ;;  %v943_v19 = vmul.f32 %v942_v56, %v6975_v14  ;;  %v986_v8 = vmul.f32 %v985_v60, %v6975_v14  ;;  %v899_v33 = vmax.f32 %v898_v49, 0.0  ;;  %s9071_s27 = sld [smem:[#allocation75_spill]]  ;;  %s9072_s12 = sld [smem:[#allocation88_spill]]  ;;  %v7021_v48 = vmul.f32 %v6563_v1, %v2197_v26 }
 0x243   : > { %9062 = sst [smem:[#allocation110_spill]] %s6968_s10  ;;  %v1025_v5 = vpop.permute.xlu0 %1024  ;;  %v1015_v10 = vpop.permute.xlu1 %1014  ;;  %v1227_v32 = vmul.f32 %v1226_v55, %v6984_v38  ;;  %v1231_v57 = vmul.f32 %v1230_v47, %v6987_v13  ;;  %s9073_s13 = sld [smem:[#allocation77_spill]]  ;;  %v1585_v49 = vmul.f32 %v1584_v6, %v6987_v13  ;;  %v9078_v63 = vstv %s9069_s30 }
 0x244   : > { %v1027_v54 = vsel %vm941_vm4, 0.0, %v1025_v5  ;;  %v1017_v36 = vsel %vm941_vm4, 0.0, %v1015_v10  ;;  %v1581_v10 = vmul.f32 %v1580_v21, %v6984_v38  ;;  %s9076_s4 = sld [smem:[#allocation83_spill]]  ;;  %s9077_s5 = sld [smem:[#allocation89_spill]]  ;;  %v1072_v21 = vmul.f32 %v9078_v63, %v943_v19 }
 0x245   : > { %v7012_v60 = vmul.f32 %v1027_v54, %v6975_v14  ;;  %v1018_v55 = vmul.f32 %v1017_v36, %v6975_v14  ;;  %s9079_s21 = sld [smem:[#allocation82_spill]]  ;;  %s9083_s9 = sld [smem:[#allocation84_spill]]  ;;  %v900_v36 = vadd.f32 1e-05, %v899_v33  ;;  %v1232_v54 = vadd.f32 %v1231_v57, %v1227_v32 }
 0x246   : > { %s9084_s28 = sld [smem:[#allocation96_spill]]  ;;  %s7035_s15 = sld [smem:[#allocation15 + $0x3]]  ;;  %v9091_v46 = vstv %s9075_s17 }
 0x247   : > { %v1056_v5 = vpop.permute.xlu0 %1055  ;;  %v1046_v56 = vpop.permute.xlu1 %1045  ;;  %v9080_v15 = vstv %s9070_s23  ;;  %s9087_s10 = sld [smem:[#allocation85_spill]]  ;;  %s9088_s30 = sld [smem:[#allocation92_spill]]  ;;  %v1589_v0 = vmul.f32 %v9091_v46, %v7012_v60  ;;  %4287 = vrsqrt.f32 %v900_v36  ;;  %v9121_v36 = vld [vmem:[#allocation149_spill] sm:$0xff] }
 0x248   : > { %v1058_v47 = vsel %vm941_vm4, 0.0, %v1056_v5  ;;  %v1426_v62 = vmul.f32 %v9080_v15, %v943_v19  ;;  %v9081_v6 = vstv %s9071_s27  ;;  %v9082_v1 = vstv %s9072_s12  ;;  %s9089_s23 = sld [smem:[#allocation93_spill]]  ;;  %s9092_s12 = sld [smem:[#allocation130_spill]] }
 0x249   : > { %v1779_v25 = vmul.f32 %v9081_v6, %v943_v19  ;;  %v1076_v26 = vmul.f32 %v9082_v1, %v986_v8  ;;  %v9086_v5 = vstv %s9073_s13  ;;  %v1048_v42 = vsel %vm941_vm4, 0.0, %v1046_v56  ;;  %s9095_s13 = sld [smem:[#allocation102_spill]]  ;;  %s9099_s27 = sld [smem:[#allocation90_spill]] }
 0x24a   : > { %v1430_v35 = vmul.f32 %v9086_v5, %v986_v8  ;;  %v7041_v63 = vmul.f32 %v1058_v47, %v6975_v14  ;;  %v9090_v15 = vstv %s9074_s0  ;;  %v1586_v1 = vadd.f32 %v1585_v49, %v1581_v10  ;;  %s7070_s0 = sld [smem:[#allocation15 + $0x13]]  ;;  %s9110_s17 = sld [smem:[#allocation68_spill]] }
 0x24b   : > { %v1235_v6 = vmul.f32 %v9090_v15, %v7012_v60  ;;  %v9093_v33 = vstv %s9076_s4  ;;  %v9094_v5 = vstv %s9077_s5  ;;  %v9096_v56 = vstv %s9079_s21  ;;  %s9102_s4 = sld [smem:[#allocation76_spill]]  ;;  %s9105_s5 = sld [smem:[#allocation141_spill]] }
 0x24c   : > { %v1783_v17 = vmul.f32 %v9093_v33, %v986_v8  ;;  %v1080_v37 = vmul.f32 %v9094_v5, %v1018_v55  ;;  %v1434_v7 = vmul.f32 %v9096_v56, %v1018_v55  ;;  %v1049_v57 = vmul.f32 %v1048_v42, %v6975_v14  ;;  %s7082_s21 = sld [smem:[#allocation15 + $0x4]] }
 0x24d   : > { %v1077_v32 = vadd.f32 %v1076_v26, %v1072_v21  ;;  %v9097_v47 = vstv %s9083_s9  ;;  %v9098_v29 = vstv %s9084_s28  ;;  %v9100_v49 = vstv %s9085_s24  ;;  %s9108_s24 = sld [smem:[#allocation99_spill]]  ;;  %s7084_s9 = sld [smem:[#allocation15 + $0x5]] }
 0x24e   : > { %v2136_v20 = vmul.f32 %v9097_v47, %v986_v8  ;;  %v1934_v10 = vmul.f32 %v9098_v29, %v6984_v38  ;;  %v1938_v15 = vmul.f32 %v9100_v49, %v6987_v13  ;;  %v1431_v46 = vadd.f32 %v1430_v35, %v1426_v62  ;;  %s9109_s28 = sld [smem:[#allocation91_spill]] }
 0x24f   : > { %v9101_v59 = vstv %s9087_s10  ;;  %v9103_v31 = vstv %s9088_s30  ;;  %v9104_v28 = vstv %s9089_s23  ;;  %v1236_v8 = vadd.f32 %v1235_v6, %v1232_v54  ;;  %s7078_s10 = sld [smem:[#allocation15 + $0x1b]]  ;;  %s9114_s30 = sld [smem:[#allocation126_spill]] }
 0x250   : > { %v1787_v33 = vmul.f32 %v9101_v59, %v1018_v55  ;;  %v1084_v5 = vmul.f32 %v9103_v31, %v1049_v57  ;;  %v1438_v56 = vmul.f32 %v9104_v28, %v1049_v57  ;;  %v9106_v42 = vstv %s9092_s12  ;;  %s9118_s23 = sld [smem:[#allocation103_spill]]  ;;  %s7101_s12 = sld [smem:[#allocation15 + $0x6]] }
 0x251   : > { %v1239_v21 = vmul.f32 %v9106_v42, %v7041_v63  ;;  %v1590_v29 = vadd.f32 %v1589_v0, %v1586_v1  ;;  %v9107_v26 = vstv %s9095_s13  ;;  %v1784_v59 = vadd.f32 %v1783_v17, %v1779_v25  ;;  %s9122_s13 = sld [smem:[#allocation106_spill]] }
 0x252   : > { %v1593_v35 = vmul.f32 %v9107_v26, %v7041_v63  ;;  %v1081_v62 = vadd.f32 %v1080_v37, %v1077_v32  ;;  %v1435_v31 = vadd.f32 %v1434_v7, %v1431_v46  ;;  %v9111_v28 = vstv %s9099_s27  ;;  %s9123_s27 = sld [smem:[#allocation100_spill]] }
 0x253   : > { %v1791_v47 = vmul.f32 %v9111_v28, %v1049_v57  ;;  %v9112_v54 = vstv %s9102_s4  ;;  %v1939_v0 = vadd.f32 %v1938_v15, %v1934_v10  ;;  %v9113_v1 = vstv %s9105_s5  ;;  %s9134_s4 = sld [smem:[#allocation135_spill]]  ;;  %s9140_s5 = sld [smem:[#allocation73_spill]] }
 0x254   : > { %v2132_v6 = vmul.f32 %v9112_v54, %v943_v19  ;;  %v2287_v49 = vmul.f32 %v9113_v1, %v6984_v38  ;;  %v2496_v42 = vstv %s7035_s15  ;;  %v1788_v26 = vadd.f32 %v1787_v33, %v1784_v59  ;;  %s9261_s15 = sld [smem:[#allocation112_spill]] }
 0x255   : > { %v1085_v45 = vadd.f32 %v1084_v5, %v1081_v62  ;;  %v1439_v17 = vadd.f32 %v1438_v56, %v1435_v31  ;;  %v9115_v25 = vstv %s9108_s24  ;;  %v9116_v37 = vstv %s9109_s28  ;;  %s9143_s24 = sld [smem:[#allocation140_spill]]  ;;  %s9146_s28 = sld [smem:[#allocation128_spill]] }
 0x256   : > { %v2291_v7 = vmul.f32 %v9115_v25, %v6987_v13  ;;  %v2140_v32 = vmul.f32 %v9116_v37, %v1018_v55  ;;  %v1240_v46 = vadd.f32 %v1239_v21, %v1236_v8  ;;  %v1594_v28 = vadd.f32 %v1593_v35, %v1590_v29  ;;  %v9120_v21 = vld [vmem:[#allocation148_spill] sm:$0xff]  ;;  %v967_v35 = vpop.permute.xlu1 %966 }
 0x257   : > { %v9117_v16 = vstv %s9110_s17  ;;  %v2137_v10 = vadd.f32 %v2136_v20, %v2132_v6  ;;  %v1792_v15 = vadd.f32 %v1791_v47, %v1788_v26  ;;  %v2200_v54 = vrot.slane %v7021_v48, 3  ;;  %s9157_s17 = sld [smem:[#allocation98_spill]] }
 0x258   : > { %v1942_v19 = vmul.f32 %v9117_v16, %v7012_v60  ;;  %v9119_v33 = vstv %s9114_s30  ;;  %v1244_v55 = vadd.f32 %v6589_v18, %v1240_v46  ;;  %v1598_v56 = vadd.f32 %v6641_v44, %v1594_v28  ;;  %s9181_s30 = sld [smem:[#allocation108_spill]] }
 0x259   : > { %v2144_v5 = vmul.f32 %v9119_v33, %v1049_v57  ;;  %v1089_v16 = vadd.f32 %v9120_v21, %v1085_v45  ;;  %v1443_v20 = vadd.f32 %v9121_v36, %v1439_v17  ;;  %v2292_v29 = vadd.f32 %v2291_v7, %v2287_v49  ;;  %v1003_v45 = vpop.permute.xlu0 %1002  ;;  %v9135_v36 = vld [vmem:[#allocation165_spill] sm:$0xff] }
 0x25a   : > { %v1943_v8 = vadd.f32 %v1942_v19, %v1939_v0  ;;  %v2736_v59 = vstv %s7070_s0  ;;  %v2141_v62 = vadd.f32 %v2140_v32, %v2137_v10  ;;  %v9124_v31 = vrot.slane %v6566_v22, 1  ;;  %v9127_v0 = vld [vmem:[#allocation150_spill] sm:$0xff]  ;;  %s9265_s0 = sld [smem:[#allocation123_spill]] }
 0x25b   : > { %v9125_v47 = vrot.slane %v6633_v9, 1  ;;  %v9126_v6 = vstv %s9118_s23  ;;  %v1796_v1 = vadd.f32 %v9127_v0, %v1792_v15  ;;  %v2500_v26 = vstv %s7082_s21  ;;  %v9130_v9 = vld [vmem:[#allocation160_spill] sm:$0xff]  ;;  %v9131_v19 = vld [vmem:[#allocation162_spill] sm:$0xff]  ;;  %v4288_v0 = vpop.eup %4287  ;;  %s7229_s23 = sld [smem:[#allocation15 + $0x15]]  ;;  %s7746_s21 = sld [smem:[#allocation15 + $0x3e]] }
 0x25c   : > { %v1251_v57 = vadd.f32 %v9124_v31, %v1244_v55  ;;  %v1946_v44 = vmul.f32 %v9126_v6, %v7041_v63  ;;  %v2509_v17 = vstv %s7084_s9  ;;  %v2856_v25 = vstv %s7078_s10  ;;  %v9137_v6 = vld [vmem:[#allocation168_spill] sm:$0xff]  ;;  %s9271_s10 = sld [smem:[#allocation104_spill]] }
 0x25d   : > { %v1605_v18 = vadd.f32 %v9125_v47, %v1598_v56  ;;  %v2145_v49 = vadd.f32 %v2144_v5, %v2141_v62  ;;  %v9128_v7 = vrot.slane %v6569_v30, 2  ;;  %v9129_v22 = vstv %s9122_s13  ;;  %s7254_s13 = sld [smem:[#allocation15 + $0x16]] }
 0x25e   : > { %v1947_v32 = vadd.f32 %v1946_v44, %v1943_v8  ;;  %v2295_v46 = vmul.f32 %v9129_v22, %v7012_v60  ;;  %v1093_v28 = vadd.f32 %v9130_v9, %v1089_v16  ;;  %v1447_v10 = vadd.f32 %v9131_v19, %v1443_v20 }
 0x25f   : > { %v1258_v37 = vadd.f32 %v9128_v7, %v1251_v57  ;;  %v9132_v15 = vstv %s9123_s27  ;;  %v969_v55 = vsel %vm941_vm4, 0.0, %v967_v35  ;;  %v1005_v5 = vsel %vm941_vm4, 0.0, %v1003_v45  ;;  %v1034_v57 = vpop.permute.xlu1 %1033  ;;  %v9142_v45 = vld [vmem:[#allocation163_spill] sm:$0xff]  ;;  %s7256_s27 = sld [smem:[#allocation15 + $0x17]] }
 0x260   : > { %v2299_v33 = vmul.f32 %v9132_v15, %v7041_v63  ;;  %v9133_v30 = vrot.slane %v6644_v61, 2  ;;  %v1951_v8 = vadd.f32 %v6719_v41, %v1947_v32  ;;  %v2296_v21 = vadd.f32 %v2295_v46, %v2292_v29 }
 0x261   : > { %v1800_v62 = vadd.f32 %v9135_v36, %v1796_v1  ;;  %v9136_v16 = vrot.slane %v6592_v58, 3  ;;  %v970_v20 = vmul.f32 %v969_v55, %v6975_v14  ;;  %v8363_v47 = vstv %s7101_s12  ;;  %v9141_v1 = vld [vmem:[#allocation151_spill] sm:$0xff] }
 0x262   : > { %v1612_v56 = vadd.f32 %v9133_v30, %v1605_v18  ;;  %v2149_v35 = vadd.f32 %v9137_v6, %v2145_v49  ;;  %v9138_v44 = vrot.slane %v6674_v23, 1  ;;  %v2300_v18 = vadd.f32 %v2299_v33, %v2296_v21  ;;  %v9148_v33 = vld [vmem:[#allocation166_spill] sm:$0xff]  ;;  %v1065_v30 = vpop.permute.xlu0 %1064 }
 0x263   : > { %v1265_v31 = vadd.f32 %v9136_v16, %v1258_v37  ;;  %v9139_v41 = vstv %s6729_s25  ;;  %v1097_v58 = vadd.f32 %v9141_v1, %v1093_v28  ;;  %v1451_v7 = vadd.f32 %v9142_v45, %v1447_v10  ;;  %s9155_s25 = sld [smem:[#allocation131_spill]] }
 0x264   : > { %v1958_v61 = vadd.f32 %v9138_v44, %v1951_v8  ;;  %v1104_v29 = vmul.f32 %v9139_v41, %v6984_v38  ;;  %v1006_v37 = vmul.f32 %v1005_v5, %v6975_v14  ;;  %v9144_v32 = vstv %s9134_s4  ;;  %v9158_v44 = vld [vmem:[#allocation164_spill] sm:$0xff]  ;;  %s9198_s4 = sld [smem:[#allocation118_spill]] }
 0x265   : > { %v1268_v49 = vmul.f32 %v9144_v32, %v970_v20  ;;  %v9145_v23 = vrot.slane %v6653_v24, 3  ;;  %v9147_v46 = vrot.slane %v6677_v12, 2  ;;  %v2304_v19 = vadd.f32 %v6733_v2, %v2300_v18  ;;  %v9152_v12 = vld [vmem:[#allocation169_spill] sm:$0xff] }
 0x266   : > { %v1036_v15 = vsel %vm941_vm4, 0.0, %v1034_v57  ;;  %v1804_v28 = vadd.f32 %v9148_v33, %v1800_v62  ;;  %v9149_v10 = vstv %s6745_s6  ;;  %v9150_v8 = vstv %s6761_s2  ;;  %s9168_s2 = sld [smem:[#allocation133_spill]]  ;;  %s9170_s6 = sld [smem:[#allocation134_spill]] }
 0x267   : > { %v1619_v22 = vadd.f32 %v9145_v23, %v1612_v56  ;;  %v1965_v9 = vadd.f32 %v9147_v46, %v1958_v61  ;;  %v1269_v55 = vadd.f32 %v1268_v49, %v1265_v31  ;;  %v1108_v5 = vmul.f32 %v9149_v10, %v6987_v13  ;;  %v9156_v31 = vld [vmem:[#allocation161_spill] sm:$0xff]  ;;  %v9162_v23 = vld [vmem:[#allocation167_spill] sm:$0xff] }
 0x268   : > { %v1458_v24 = vmul.f32 %v9150_v8, %v6984_v38  ;;  %v9151_v21 = vstv %s9140_s5  ;;  %v2153_v36 = vadd.f32 %v9152_v12, %v2149_v35  ;;  %v9153_v2 = vrot.slane %v6698_v27, 1  ;;  %s7263_s5 = sld [smem:[#allocation15 + $0x1c]] }
 0x269   : > { %v7167_v56 = vmul.f32 %v4288_v0, %v9151_v21  ;;  %v9154_v57 = vstv %s9143_s24  ;;  %v1101_v6 = vadd.f32 %v9156_v31, %v1097_v58  ;;  %v1455_v61 = vadd.f32 %v9158_v44, %v1451_v7  ;;  %s7267_s24 = sld [smem:[#allocation15 + $0x2b]] }
 0x26a   : > { %v2311_v16 = vadd.f32 %v9153_v2, %v2304_v19  ;;  %v1622_v62 = vmul.f32 %v9154_v57, %v970_v20  ;;  %v9159_v18 = vstv %s9146_s28  ;;  %v1037_v1 = vmul.f32 %v1036_v15, %v6975_v14  ;;  %v9165_v15 = vld [vmem:[#allocation146_spill] sm:$0xff]  ;;  %s7278_s28 = sld [smem:[#allocation15 + $0x33]] }
 0x26b   : > { %v1272_v41 = vmul.f32 %v9159_v18, %v1006_v37  ;;  %v9160_v0 = vrot.slane %v6689_v53, 3  ;;  %v9161_v35 = vrot.slane %v6701_v34, 2  ;;  %v1067_v49 = vsel %vm941_vm4, 0.0, %v1065_v30 }
 0x26c   : > { %v1623_v32 = vadd.f32 %v1622_v62, %v1619_v22  ;;  %v1808_v46 = vadd.f32 %v9162_v23, %v1804_v28  ;;  %v9163_v7 = vstv %s6763_s14  ;;  %v9164_v33 = vstv %s6826_s19  ;;  %s9173_s14 = sld [smem:[#allocation101_spill]]  ;;  %s7221_s19 = sld [smem:[#allocation15 + $0x14]] }
 0x26d   : > { %v1972_v45 = vadd.f32 %v9160_v0, %v1965_v9  ;;  %v2318_v27 = vadd.f32 %v9161_v35, %v2311_v16  ;;  %v1273_v58 = vadd.f32 %v1272_v41, %v1269_v55  ;;  %v1462_v19 = vmul.f32 %v9163_v7, %v6987_v13  ;;  %v9166_v9 = vld [vmem:[#allocation170_spill] sm:$0xff] }
 0x26e   : > { %v1811_v10 = vmul.f32 %v9164_v33, %v6984_v38  ;;  %v911_v53 = vrot.slane %v7167_v56, %v9165_v15  ;;  %v2157_v34 = vadd.f32 %v9166_v9, %v2153_v36  ;;  %v9167_v8 = vstv %s9155_s25  ;;  %s9204_s25 = sld [smem:[#allocation142_spill]] }
 0x26f   : > { %v1626_v22 = vmul.f32 %v9167_v8, %v1006_v37  ;;  %v9169_v30 = vstv %s9157_s17  ;;  %v9171_v55 = vrot.slane %v6712_v50, 3  ;;  %v7201_v12 = vmul.f32 %v1067_v49, %v6975_v14  ;;  %s7288_s17 = sld [smem:[#allocation15 + $0x1f]] }
 0x270   : > { %v1975_v28 = vmul.f32 %v9169_v30, %v970_v20  ;;  %v9172_v2 = vstv %s6668_s11  ;;  %v1105_v57 = vadd.f32 %v1104_v29, %v1101_v6  ;;  %v914_v36 = vmul.f32 %v7167_v56, %v6905_v40  ;;  %s7219_s11 = sld [smem:[#allocation15 + $0x7]] }
 0x271   : > { %v2325_v21 = vadd.f32 %v9171_v55, %v2318_v27  ;;  %v1276_v16 = vmul.f32 %v9172_v2, %v1037_v1  ;;  %v1627_v31 = vadd.f32 %v1626_v22, %v1623_v32  ;;  %v1459_v44 = vadd.f32 %v1458_v24, %v1455_v61  ;;  %v9176_v27 = vld [vmem:[#allocation174_spill] sm:$0xff] }
 0x272   : > { %v1976_v62 = vadd.f32 %v1975_v28, %v1972_v45  ;;  %v9174_v18 = vstv %s6637_s1  ;;  %v1812_v50 = vadd.f32 %v1811_v10, %v1808_v46  ;;  %v9175_v35 = vstv %s6838_s22  ;;  %s9180_s1 = sld [smem:[#allocation80_spill]]  ;;  %s9183_s22 = sld [smem:[#allocation116_spill]] }
 0x273   : > { %v2328_v41 = vmul.f32 %v9174_v18, %v970_v20  ;;  %v1277_v0 = vadd.f32 %v1276_v16, %v1273_v58  ;;  %v1815_v14 = vmul.f32 %v9175_v35, %v6987_v13  ;;  %v2161_v49 = vadd.f32 %v9176_v27, %v2157_v34 }
 0x274   : > { %v9177_v23 = vstv %s9168_s2  ;;  %v9178_v6 = vstv %s9170_s6  ;;  %v9179_v40 = vstv %s6670_s16  ;;  %v9182_v24 = vstv %s9173_s14  ;;  %s9185_s16 = sld [smem:[#allocation107_spill]]  ;;  %s9206_s6 = sld [smem:[#allocation120_spill]] }
 0x275   : > { %v1979_v29 = vmul.f32 %v9177_v23, %v1006_v37  ;;  %v2332_v7 = vmul.f32 %v9178_v6, %v1006_v37  ;;  %v1630_v45 = vmul.f32 %v9179_v40, %v1037_v1  ;;  %v2329_v20 = vadd.f32 %v2328_v41, %v2325_v21  ;;  %s7290_s2 = sld [smem:[#allocation15 + $0x3b]]  ;;  %s7297_s14 = sld [smem:[#allocation15 + $0x24]] }
 0x276   : > { %v1280_v61 = vmul.f32 %v9182_v24, %v7201_v12  ;;  %v1109_v32 = vadd.f32 %v1108_v5, %v1105_v57  ;;  %v9184_v46 = vstv %s6751_s3  ;;  %v1463_v10 = vadd.f32 %v1462_v19, %v1459_v44  ;;  %s7240_s3 = sld [smem:[#allocation15 + $0x23]] }
 0x277   : > { %v1112_v58 = vmul.f32 %v9184_v46, %v7012_v60  ;;  %v1980_v37 = vadd.f32 %v1979_v29, %v1976_v62  ;;  %v1631_v33 = vadd.f32 %v1630_v45, %v1627_v31  ;;  %v9186_v9 = vstv %s6773_s8  ;;  %s9193_s8 = sld [smem:[#allocation115_spill]]  ;;  %v9199_v29 = vld [vmem:[#allocation188_spill] sm:$0xff] }
 0x278   : > { %v1466_v34 = vmul.f32 %v9186_v9, %v7012_v60  ;;  %v1281_v8 = vadd.f32 %v1280_v61, %v1277_v0  ;;  %v1816_v22 = vadd.f32 %v1815_v14, %v1812_v50  ;;  %v9187_v30 = vstv %s6840_s26  ;;  %s9194_s26 = sld [smem:[#allocation117_spill]] }
 0x279   : > { %v1819_v28 = vmul.f32 %v9187_v30, %v7012_v60  ;;  %v9188_v5 = vstv %s6892_s29  ;;  %v9189_v21 = vstv %s9180_s1  ;;  %v9190_v16 = vstv %s9181_s30  ;;  %s9197_s29 = sld [smem:[#allocation105_spill]]  ;;  %s7299_s1 = sld [smem:[#allocation15 + $0x25]] }
 0x27a   : > { %v2164_v55 = vmul.f32 %v9188_v5, %v6984_v38  ;;  %v7244_v2 = vsub.f32 %v9189_v21, %v914_v36  ;;  %v1634_v57 = vmul.f32 %v9190_v16, %v7201_v12  ;;  %v9191_v19 = vstv %s9183_s22  ;;  %v9209_v5 = vld [vmem:[#allocation172_spill] sm:$0xff]  ;;  %s7309_s30 = sld [smem:[#allocation15 + $0x26]]  ;;  %s7311_s22 = sld [smem:[#allocation15 + $0x27]] }
 0x27b   : > { %v1983_v62 = vmul.f32 %v9191_v19, %v1037_v1  ;;  %v9192_v31 = vstv %s6753_s20  ;;  %v2333_v38 = vadd.f32 %v2332_v7, %v2329_v20  ;;  %v9195_v18 = vstv %s9185_s16  ;;  %s7265_s20 = sld [smem:[#allocation15 + $0x1d]]  ;;  %s7318_s16 = sld [smem:[#allocation15 + $0x2c]] }
 0x27c   : > { %v1116_v44 = vmul.f32 %v9192_v31, %v7041_v63  ;;  %v2336_v41 = vmul.f32 %v9195_v18, %v1037_v1  ;;  %v9196_v36 = vstv %s6819_s7  ;;  %v2165_v50 = vadd.f32 %v2164_v55, %v2161_v49  ;;  %s7276_s7 = sld [smem:[#allocation15 + $0x1e]] }
 0x27d   : > { %v1470_v0 = vmul.f32 %v9196_v36, %v7041_v63  ;;  %v1635_v35 = vadd.f32 %v1634_v57, %v1631_v33  ;;  %v1984_v14 = vadd.f32 %v1983_v62, %v1980_v37  ;;  %v1113_v27 = vadd.f32 %v1112_v58, %v1109_v32  ;;  %v9205_v37 = vld [vmem:[#allocation72_spill] sm:$0xff] }
 0x27e   : > { %v1467_v23 = vadd.f32 %v1466_v34, %v1463_v10  ;;  %v1285_v1 = vadd.f32 %v9199_v29, %v1281_v8  ;;  %v1820_v6 = vadd.f32 %v1819_v28, %v1816_v22  ;;  %v9200_v7 = vstv %s9193_s8  ;;  %v9207_v34 = vld [vmem:[#allocation189_spill] sm:$0xff]  ;;  %s7320_s8 = sld [smem:[#allocation15 + $0x2d]] }
 0x27f   : > { %v1823_v40 = vmul.f32 %v9200_v7, %v7041_v63  ;;  %v9201_v49 = vstv %s9194_s26  ;;  %v9202_v20 = vstv %s9197_s29  ;;  %v9203_v61 = vstv %s9198_s4  ;;  %s7325_s26 = sld [smem:[#allocation15 + $0x2e]]  ;;  %s7327_s29 = sld [smem:[#allocation15 + $0x2f]] }
 0x280   : > { %v2168_v45 = vmul.f32 %v9201_v49, %v6987_v13  ;;  %v1987_v24 = vmul.f32 %v9202_v20, %v7201_v12  ;;  %v2172_v32 = vmul.f32 %v9203_v61, %v7012_v60  ;;  %v8355_v46 = vstv %s7219_s11  ;;  %9211 = sst [smem:[#allocation114_spill]] %s7311_s22  ;;  %s7338_s4 = sld [smem:[#allocation15 + $0x34]] }
 0x281   : > { %v2740_v58 = vstv %s7221_s19  ;;  %v913_v13 = vmul.f32 %v911_v53, %v9205_v37  ;;  %v2337_v33 = vadd.f32 %v2336_v41, %v2333_v38  ;;  %v2749_v9 = vstv %s7229_s23  ;;  %v9214_v41 = vld [vmem:[#allocation177_spill] sm:$0xff]  ;;  %v9221_v37 = vld [vmem:[#allocation178_spill] sm:$0xff]  ;;  %s7885_s19 = sld [smem:[#allocation17 + $0x1]]  ;;  %s7891_s23 = sld [smem:[#allocation17 + $0x2]] }
 0x282   : > { %v2169_v10 = vadd.f32 %v2168_v45, %v2165_v50  ;;  %v1988_v60 = vadd.f32 %v1987_v24, %v1984_v14  ;;  %v1639_v8 = vadd.f32 %v9207_v34, %v1635_v35  ;;  %v1117_v22 = vadd.f32 %v1116_v44, %v1113_v27 }
 0x283   : > { %v1471_v30 = vadd.f32 %v1470_v0, %v1467_v23  ;;  %v924_v56 = vrot.slane %v7244_v2, %v9165_v15  ;;  %v9208_v53 = vstv %s9204_s25  ;;  %v9210_v55 = vrot.slane %v9209_v5, 1  ;;  %v9216_v0 = vld [vmem:[#allocation190_spill] sm:$0xff]  ;;  %v9217_v23 = vld [vmem:[#allocation175_spill] sm:$0xff]  ;;  %s7340_s25 = sld [smem:[#allocation15 + $0x3c]] }
 0x284   : > { %v2340_v28 = vmul.f32 %v9208_v53, %v7201_v12  ;;  %v1824_v16 = vadd.f32 %v1823_v40, %v1820_v6  ;;  %v2173_v57 = vadd.f32 %v2172_v32, %v2169_v10  ;;  %v9212_v19 = vstv %s9206_s6  ;;  %v1413_v53 = vpop.permute.xlu0 %1412  ;;  %s9242_s6 = sld [smem:[#allocation111_spill]] }
 0x285   : > { %v1292_v21 = vadd.f32 %v9210_v55, %v1285_v1  ;;  %v2176_v62 = vmul.f32 %v9212_v19, %v7041_v63  ;;  %v8362_v31 = vstv %s7254_s13  ;;  %v2976_v44 = vstv %s7240_s3  ;;  %9213 = sst [smem:[#allocation119_spill]] %s7327_s29  ;;  %s7381_s29 = sld [smem:[#allocation15 + $0x36]] }
 0x286   : > { %v2341_v12 = vadd.f32 %v2340_v28, %v2337_v33  ;;  %v8361_v2 = vstv %s7256_s27  ;;  %v2860_v38 = vstv %s7263_s5  ;;  %v8365_v18 = vstv %s7265_s20  ;;  %v9223_v33 = vld [vmem:[#allocation180_spill] sm:$0xff]  ;;  %s9275_s3 = sld [smem:[#allocation113_spill]]  ;;  %s9305_s9 = sld [smem:[#allocation119_spill]] }
 0x287   : > { %v9215_v63 = vrot.slane %v9214_v41, 1  ;;  %v1992_v50 = vadd.f32 %v9216_v0, %v1988_v60  ;;  %v1121_v35 = vadd.f32 %v6833_v52, %v1117_v22  ;;  %v1475_v14 = vadd.f32 %v6918_v39, %v1471_v30  ;;  %v9220_v52 = vld [vmem:[#allocation191_spill] sm:$0xff]  ;;  %v9227_v28 = vld [vmem:[#allocation176_spill] sm:$0xff]  ;;  %s7908_s5 = sld [smem:[#allocation18 + $0x2]] }
 0x288   : > { %v926_v27 = vadd.f32 %v924_v56, %v913_v13  ;;  %v9218_v29 = vrot.slane %v9217_v23, 2  ;;  %v1828_v6 = vadd.f32 %v6950_v51, %v1824_v16  ;;  %v8357_v7 = vstv %s7276_s7  ;;  %v9231_v41 = vld [vmem:[#allocation184_spill] sm:$0xff] }
 0x289   : > { %v1646_v36 = vadd.f32 %v9215_v63, %v1639_v8  ;;  %9219 = sst [smem:[#allocation143_spill]] %s7340_s25  ;;  %v2177_v40 = vadd.f32 %v2176_v62, %v2173_v57  ;;  %v8359_v49 = vstv %s7288_s17  ;;  %v3096_v45 = vstv %s7267_s24  ;;  %s9230_s24 = sld [smem:[#allocation121_spill]] }
 0x28a   : > { %v1299_v1 = vadd.f32 %v9218_v29, %v1292_v21  ;;  %v3216_v20 = vstv %s7278_s28  ;;  %v2345_v39 = vadd.f32 %v9220_v52, %v2341_v12  ;;  %v2980_v24 = vstv %s7297_s14  ;;  %s9233_s28 = sld [smem:[#allocation109_spill]]  ;;  %v9238_v29 = vld [vmem:[#allocation182_spill] sm:$0xff]  ;;  %s9282_s25 = sld [smem:[#allocation114_spill]] }
 0x28b   : > { %v8364_v61 = vstv %s7299_s1  ;;  %v3336_v32 = vstv %s7290_s2  ;;  %v9222_v51 = vrot.slane %v9221_v37, 2  ;;  %v9224_v10 = vrot.slane %v9223_v33, 1  ;;  %s7379_s2 = sld [smem:[#allocation15 + $0x35]]  ;;  %s7918_s14 = sld [smem:[#allocation17]] }
 0x28c   : > { %v9225_v34 = vrot.slane %v6814_v3, 1  ;;  %v9226_v22 = vrot.slane %v6901_v43, 1  ;;  %v927_v56 = vmax.f32 %v926_v27, 0.0  ;;  %v9228_v5 = vrot.slane %v9227_v28, 3  ;;  %v9236_v27 = vld [vmem:[#allocation181_spill] sm:$0xff]  ;;  %v9247_v28 = vld [vmem:[#allocation194_spill] sm:$0xff] }
 0x28d   : > { %v1653_v13 = vadd.f32 %v9222_v51, %v1646_v36  ;;  %v1999_v60 = vadd.f32 %v9224_v10, %v1992_v50  ;;  %v9229_v21 = vrot.slane %v6937_v11, 1  ;;  %v8356_v57 = vstv %s7309_s30  ;;  %v9243_v51 = vld [vmem:[#allocation192_spill] sm:$0xff] }
 0x28e   : > { %v1128_v8 = vadd.f32 %v9225_v34, %v1121_v35  ;;  %v1482_v30 = vadd.f32 %v9226_v22, %v1475_v14  ;;  %v1306_v55 = vadd.f32 %v9228_v5, %v1299_v1  ;;  %v2181_v19 = vadd.f32 %v6993_v4, %v2177_v40  ;;  %v9234_v35 = vld [vmem:[#allocation179_spill] sm:$0xff] }
 0x28f   : > { %v1835_v16 = vadd.f32 %v9229_v21, %v1828_v6  ;;  %v8360_v62 = vstv %s7311_s22  ;;  %v3100_v12 = vstv %s7318_s16  ;;  %v8354_v3 = vstv %s7320_s8  ;;  %v9240_v40 = vld [vmem:[#allocation159_spill] sm:$0xff]  ;;  %s7388_s22 = sld [smem:[#allocation15 + $0x37]]  ;;  %s7934_s16 = sld [smem:[#allocation17 + $0x6]] }
 0x290   : > { %v1417_v43 = vsel %vm1415_vm5, %v1306_v55, %v1413_v53  ;;  %v9232_v63 = vrot.slane %v9231_v41, 1  ;;  %v8353_v0 = vstv %s7325_s26  ;;  %v9235_v11 = vrot.slane %v9234_v35, 3  ;;  %v9249_v41 = vld [vmem:[#allocation186_spill] sm:$0xff] }
 0x291   : > { %v9237_v4 = vrot.slane %v9236_v27, 2  ;;  %v9239_v1 = vrot.slane %v9238_v29, 2  ;;  %v9241_v52 = vrot.slane %v9240_v40, 2  ;;  %v9245_v10 = vstv %s9230_s24  ;;  %s9278_s24 = sld [smem:[#allocation110_spill]] }
 0x292   : > { %v2352_v36 = vadd.f32 %v9232_v63, %v2345_v39  ;;  %v1660_v14 = vadd.f32 %v9235_v11, %v1653_v13  ;;  %v1767_v39 = vpop.permute.xlu0 %1766  ;;  %v9244_v13 = vrot.slane %v9243_v51, 2  ;;  %v3220_v34 = vstv %s7338_s4  ;;  %s9316_s4 = sld [smem:[#allocation38_spill]] }
 0x293   : > { %v2006_v23 = vadd.f32 %v9237_v4, %v1999_v60  ;;  %v1135_v6 = vadd.f32 %v9239_v1, %v1128_v8  ;;  %v1489_v37 = vadd.f32 %v9241_v52, %v1482_v30  ;;  %v2617_v60 = vmul.f32 %v9245_v10, %v927_v56  ;;  %v9252_v1 = vld [vmem:[#allocation183_spill] sm:$0xff] }
 0x294   : > { %v1842_v33 = vadd.f32 %v9244_v13, %v1835_v16  ;;  %v9246_v22 = vstv %s9233_s28  ;;  %v1770_v30 = vsel %vm1415_vm5, %v1660_v14, %v1767_v39  ;;  %v9248_v5 = vrot.slane %v9247_v28, 1  ;;  %v9254_v14 = vld [vmem:[#allocation157_spill] sm:$0xff] }
 0x295   : > { %v1421_v53 = vadd.f32 %v9246_v22, %v1417_v43  ;;  %v2497_v21 = vmul.f32 %v2496_v42, %v927_v56  ;;  %v9250_v63 = vrot.slane %v9249_v41, 2  ;;  %v2737_v16 = vmul.f32 %v2736_v59, %v927_v56  ;;  %v9258_v13 = vld [vmem:[#allocation193_spill] sm:$0xff]  ;;  %v9260_v59 = vld [vmem:[#allocation152_spill] sm:$0xff] }
 0x296   : > { %v2188_v55 = vadd.f32 %v9248_v5, %v2181_v19  ;;  %v2857_v11 = vmul.f32 %v2856_v25, %v927_v56  ;;  %v2977_v27 = vmul.f32 %v2976_v44, %v927_v56  ;;  %v9251_v4 = vstv %s9242_s6  ;;  %v9256_v19 = vld [vmem:[#allocation171_spill] sm:$0xff]  ;;  %v9264_v5 = vld [vmem:[#allocation153_spill] sm:$0xff] }
 0x297   : > { %v2359_v35 = vadd.f32 %v9250_v63, %v2352_v36  ;;  %v1774_v29 = vadd.f32 %v9251_v4, %v1770_v30  ;;  %v9253_v43 = vrot.slane %v9252_v1, 3  ;;  %v9255_v52 = vrot.slane %v9254_v14, 3  ;;  %v9266_v63 = vld [vmem:[#allocation187_spill] sm:$0xff]  ;;  %v9268_v1 = vld [vmem:[#allocation154_spill] sm:$0xff] }
 0x298   : > { %v9257_v51 = vrot.slane %v9256_v19, 3  ;;  %v9259_v10 = vrot.slane %v9258_v13, 3  ;;  %v7419_v25 = vadd.f32 %v2617_v60, %v9260_v59  ;;  %v3097_v44 = vmul.f32 %v3096_v45, %v927_v56  ;;  %v9269_v45 = vld [vmem:[#allocation155_spill] sm:$0xff]  ;;  %v9274_v19 = vld [vmem:[#allocation173_spill] sm:$0xff] }
 0x299   : > { %v2013_v40 = vadd.f32 %v9253_v43, %v2006_v23  ;;  %v1142_v39 = vadd.f32 %v9255_v52, %v1135_v6  ;;  %v3217_v22 = vmul.f32 %v3216_v20, %v927_v56  ;;  %v7421_v30 = vmax.f32 %v1421_v53, 0.0  ;;  %v9262_v23 = vld [vmem:[#allocation195_spill] sm:$0xff]  ;;  %v9270_v53 = vld [vmem:[#allocation156_spill] sm:$0xff]  ;;  %v9273_v52 = vld [vmem:[#allocation158_spill] sm:$0xff] }
 0x29a   : > { %v1496_v42 = vadd.f32 %v9257_v51, %v1489_v37  ;;  %v7416_v36 = vadd.f32 %v9259_v10, %v1842_v33  ;;  %v9263_v28 = vrot.slane %v9262_v23, 2  ;;  %v7426_v37 = vadd.f32 %v2497_v21, %v9264_v5  ;;  %v2120_v33 = vpop.permute.xlu0 %2119  ;;  %v9277_v59 = vld [vmem:[#allocation185_spill] sm:$0xff] }
 0x29b   : > { %v3337_v41 = vmul.f32 %v3336_v32, %v927_v56  ;;  %v9267_v4 = vrot.slane %v9266_v63, 3  ;;  %v7431_v43 = vadd.f32 %v2737_v16, %v9268_v1  ;;  %v7434_v20 = vadd.f32 %v2857_v11, %v9269_v45 }
 0x29c   : > { %v2195_v6 = vadd.f32 %v9263_v28, %v2188_v55  ;;  %v7437_v14 = vadd.f32 %v2977_v27, %v9270_v53  ;;  %v7439_v55 = vmax.f32 %v1774_v29, 0.0  ;;  %v2123_v32 = vsel %vm1415_vm5, %v2013_v40, %v2120_v33 }
 0x29d   : > { %v2366_v60 = vadd.f32 %v9267_v4, %v2359_v35  ;;  %v8352_v56 = vstv %s7379_s2  ;;  %v8358_v21 = vstv %s7381_s29  ;;  %v9272_v35 = vstv %s9261_s15 }
 0x29e   : > { %v2127_v16 = vadd.f32 %v9272_v35, %v2123_v32  ;;  %v7447_v11 = vadd.f32 %v3097_v44, %v9273_v52  ;;  %v7450_v27 = vadd.f32 %v3217_v22, %v9274_v19  ;;  %v7455_v29 = vadd.f32 %v2200_v54, %v2195_v6  ;;  %v2473_v23 = vpop.permute.xlu0 %2472 }
 0x29f   : > { %v9276_v40 = vstv %s9265_s0  ;;  %v2502_v10 = vmul.f32 %v2500_v26, %v7421_v30  ;;  %v7464_v44 = vadd.f32 %v3337_v41, %v9277_v59  ;;  %v2742_v48 = vmul.f32 %v2740_v58, %v7421_v30 }
 0x2a0   : > { %v2622_v13 = vmul.f32 %v9276_v40, %v7421_v30  ;;  %v7466_v22 = vmax.f32 %v2127_v16, 0.0  ;;  %v2862_v54 = vmul.f32 %v2860_v38, %v7421_v30  ;;  %v2982_v28 = vmul.f32 %v2980_v24, %v7421_v30 }
 0x2a1   : > { %v2476_v6 = vsel %vm1415_vm5, %v2366_v60, %v2473_v23  ;;  %v9279_v5 = vstv %s9271_s10  ;;  %v7486_v33 = vmul.f32 %v3100_v12, %v7421_v30  ;;  %v7491_v63 = vmul.f32 %v3220_v34, %v7421_v30  ;;  %v1409_v60 = vpop.permute.xlu1 %1408 }
 0x2a2   : > { %v7481_v41 = vmul.f32 %v9279_v5, %v7439_v55  ;;  %v9280_v4 = vstv %s9275_s3  ;;  %v7498_v45 = vmul.f32 %v2509_v17, %v7439_v55  ;;  %v7503_v53 = vmul.f32 %v2749_v9, %v7439_v55 }
 0x2a3   : > { %v2480_v1 = vadd.f32 %v9280_v4, %v2476_v6  ;;  %v7508_v32 = vmul.f32 %v8365_v18, %v7439_v55  ;;  %v1416_v35 = vsel %vm1415_vm5, %v1142_v39, %v1409_v60  ;;  %v7514_v16 = vmul.f32 %v8364_v61, %v7439_v55 }
 0x2a4   : > { %v7519_v52 = vmul.f32 %v8354_v3, %v7439_v55  ;;  %v7524_v19 = vmul.f32 %v8352_v56, %v7439_v55  ;;  %v9281_v59 = vstv %s9233_s28  ;;  %v9283_v23 = vstv %s9278_s24  ;;  %s9317_s28 = sld [smem:[#allocation33_spill]] }
 0x2a5   : > { %v7526_v40 = vmax.f32 %v2480_v1, 0.0  ;;  %v1420_v39 = vadd.f32 %v9281_v59, %v1416_v35  ;;  %v7533_v6 = vmul.f32 %v9283_v23, %v7466_v22  ;;  %v7538_v5 = vmul.f32 %v8363_v47, %v7466_v22  ;;  %v1763_v23 = vpop.permute.xlu1 %1762 }
 0x2a6   : > { %v7543_v4 = vmul.f32 %v8362_v31, %v7466_v22  ;;  %v7548_v1 = vmul.f32 %v8357_v7, %v7466_v22  ;;  %v7553_v60 = vmul.f32 %v8356_v57, %v7466_v22  ;;  %v7558_v35 = vmul.f32 %v8353_v0, %v7466_v22 }
 0x2a7   : > { %v7560_v59 = vmax.f32 %v1420_v39, 0.0  ;;  %v9284_v8 = vstv %s6970_s18  ;;  %v7570_v56 = vmul.f32 %v8355_v46, %v7526_v40  ;;  %v7575_v50 = vmul.f32 %v8358_v21, %v7466_v22 }
 0x2a8   : > { %v7565_v51 = vmul.f32 %v9284_v8, %v7526_v40  ;;  %v1769_v0 = vsel %vm1415_vm5, %v1496_v42, %v1763_v23  ;;  %v7581_v39 = vmul.f32 %v8361_v2, %v7526_v40  ;;  %v7586_v3 = vmul.f32 %v8359_v49, %v7526_v40 }
 0x2a9   : > { %v7591_v8 = vmul.f32 %v8360_v62, %v7526_v40  ;;  %v9285_v46 = vstv %s9242_s6  ;;  %v9286_v7 = vstv %s9265_s0  ;;  %v2501_v42 = vmul.f32 %v2500_v26, %v7560_v59 }
 0x2aa   : > { %v1773_v57 = vadd.f32 %v9285_v46, %v1769_v0  ;;  %v2621_v21 = vmul.f32 %v9286_v7, %v7560_v59  ;;  %v2741_v23 = vmul.f32 %v2740_v58, %v7560_v59  ;;  %v2861_v49 = vmul.f32 %v2860_v38, %v7560_v59  ;;  %v2116_v58 = vpop.permute.xlu1 %2115 }
 0x2ab   : > { %v2981_v62 = vmul.f32 %v2980_v24, %v7560_v59  ;;  %v7613_v46 = vmul.f32 %v3100_v12, %v7560_v59  ;;  %v7618_v7 = vmul.f32 %v3220_v34, %v7560_v59  ;;  %v2505_v2 = vcombine.low %v2501_v42, %v2502_v10 }
 0x2ac   : > { %v7620_v26 = vmax.f32 %v1773_v57, 0.0  ;;  %v2625_v0 = vcombine.low %v2621_v21, %v2622_v13  ;;  %v2745_v31 = vcombine.low %v2741_v23, %v2742_v48  ;;  %v2122_v38 = vsel %vm1415_vm5, %v7416_v36, %v2116_v58 }
 0x2ad   : > { %v2865_v24 = vcombine.low %v2861_v49, %v2862_v54  ;;  %v2985_v47 = vcombine.low %v2981_v62, %v2982_v28  ;;  %v3105_v12 = vcombine.low %v7613_v46, %v7486_v33  ;;  %v9287_v61 = vstv %s9261_s15  ;;  %s9318_s15 = sld [smem:[#allocation36_spill]] }
 0x2ae   : > { %v2126_v18 = vadd.f32 %v9287_v61, %v2122_v38  ;;  %v2627_v34 = vadd.f32 %v2625_v0, %v7419_v25  ;;  %v9288_v57 = vstv %s9271_s10  ;;  %v2507_v13 = vadd.f32 %v2505_v2, %v7426_v37  ;;  %v2469_v10 = vpop.permute.xlu1 %2468 }
 0x2af   : > { %v2630_v21 = vmul.f32 %v9288_v57, %v7620_v26  ;;  %v2510_v36 = vmul.f32 %v2509_v17, %v7620_v26  ;;  %v2747_v49 = vadd.f32 %v2745_v31, %v7431_v43  ;;  %v2750_v62 = vmul.f32 %v2749_v9, %v7620_v26 }
 0x2b0   : > { %v2867_v61 = vadd.f32 %v2865_v24, %v7434_v20  ;;  %v7641_v25 = vmax.f32 %v2126_v18, 0.0  ;;  %v9289_v2 = vstv %s7265_s20  ;;  %v2987_v54 = vadd.f32 %v2985_v47, %v7437_v14  ;;  %s7911_s20 = sld [smem:[#allocation17 + $0x4]] }
 0x2b1   : > { %v2634_v48 = vcombine.low %v2630_v21, %v7481_v41  ;;  %v2870_v37 = vmul.f32 %v9289_v2, %v7620_v26  ;;  %v2475_v17 = vsel %vm1415_vm5, %v7455_v29, %v2469_v10  ;;  %v2514_v31 = vcombine.low %v2510_v36, %v7498_v45 }
 0x2b2   : > { %v2754_v9 = vcombine.low %v2750_v62, %v7503_v53  ;;  %v9290_v43 = vstv %s7299_s1  ;;  %v9291_v20 = vstv %s9275_s3  ;;  %v9292_v33 = vstv %s9278_s24  ;;  %s7924_s1 = sld [smem:[#allocation18 + $0x4]]  ;;  %s9319_s24 = sld [smem:[#allocation207_spill]] }
 0x2b3   : > { %v2990_v18 = vmul.f32 %v9290_v43, %v7620_v26  ;;  %v2479_v28 = vadd.f32 %v9291_v20, %v2475_v17  ;;  %v2636_v41 = vadd.f32 %v2634_v48, %v2627_v34  ;;  %v2639_v42 = vmul.f32 %v9292_v33, %v7641_v25  ;;  %p9320_p10 = scmp.ne.s32.totalorder %s9318_s15, 0 }
 0x2b4   : > { %v9293_v47 = vstv %s7101_s12  ;;  %v2516_v29 = vadd.f32 %v2514_v31, %v2507_v13  ;;  %v2756_v23 = vadd.f32 %v2754_v9, %v2747_v49  ;;  %v9294_v45 = vstv %s7254_s13  ;;  %s7793_s12 = sld [smem:[#allocation15 + $0x3f]]  ;;  %s7895_s13 = sld [smem:[#allocation17 + $0x3]] }
 0x2b5   : > { %v2519_v14 = vmul.f32 %v9293_v47, %v7641_v25  ;;  %v2759_v53 = vmul.f32 %v9294_v45, %v7641_v25  ;;  %v2874_v46 = vcombine.low %v2870_v37, %v7508_v32  ;;  %v7667_v58 = vmax.f32 %v2479_v28, 0.0  ;;  %v9304_v45 = vld [vmem:[#allocation41_spill] sm:$0xff] }
 0x2b6   : > { %v2643_v0 = vcombine.low %v2639_v42, %v7533_v6  ;;  %v9295_v24 = vstv %s7276_s7  ;;  %v2994_v13 = vcombine.low %v2990_v18, %v7514_v16  ;;  %v9296_v36 = vstv %s7309_s30  ;;  %s7913_s7 = sld [smem:[#allocation18 + $0x3]]  ;;  %s7926_s30 = sld [smem:[#allocation18]] }
 0x2b7   : > { %v2523_v38 = vcombine.low %v2519_v14, %v7538_v5  ;;  %v2879_v34 = vmul.f32 %v9295_v24, %v7641_v25  ;;  %v2763_v57 = vcombine.low %v2759_v53, %v7543_v4  ;;  %v2876_v21 = vadd.f32 %v2874_v46, %v2867_v61 }
 0x2b8   : > { %v2999_v49 = vmul.f32 %v9296_v36, %v7641_v25  ;;  %v2645_v32 = vadd.f32 %v2643_v0, %v2636_v41  ;;  %v9297_v62 = vstv %s6970_s18  ;;  %v9298_v6 = vstv %s7219_s11  ;;  %s7700_s18 = sld [smem:[#allocation15 + $0x3d]]  ;;  %s9313_s11 = sld [smem:[#allocation143_spill]] }
 0x2b9   : > { %v2648_v10 = vmul.f32 %v9297_v62, %v7667_v58  ;;  %v2525_v48 = vadd.f32 %v2523_v38, %v2516_v29  ;;  %v2528_v5 = vmul.f32 %v9298_v6, %v7667_v58  ;;  %v2765_v2 = vadd.f32 %v2763_v57, %v2756_v23  ;;  %v9303_v29 = vld [vmem:[#allocation40_spill] sm:$0xff] }
 0x2ba   : > { %v9299_v37 = vstv %s7256_s27  ;;  %v2883_v4 = vcombine.low %v2879_v34, %v7548_v1  ;;  %v9300_v16 = vstv %s7288_s17  ;;  %v2996_v43 = vadd.f32 %v2994_v13, %v2987_v54  ;;  %s7903_s27 = sld [smem:[#allocation18 + $0x1]]  ;;  %s7916_s17 = sld [smem:[#allocation17 + $0x5]] }
 0x2bb   : > { %v2768_v17 = vmul.f32 %v9299_v37, %v7667_v58  ;;  %v2888_v61 = vmul.f32 %v9300_v16, %v7667_v58  ;;  %v2652_v31 = vcombine.low %v2648_v10, %v7565_v51  ;;  %v2532_v9 = vcombine.low %v2528_v5, %v7570_v56 }
 0x2bc   : > { %v3003_v18 = vcombine.low %v2999_v49, %v7553_v60  ;;  %v2885_v28 = vadd.f32 %v2883_v4, %v2876_v21  ;;  %v9301_v33 = vstv %s9282_s25  ;;  %v3107_v56 = vadd.f32 %v3105_v12, %v7447_v11  ;;  %s3767_s25 = sshll.u32 %s9316_s4, 4 }
 0x2bd   : > { %v2772_v20 = vcombine.low %v2768_v17, %v7581_v39  ;;  %v2892_v41 = vcombine.low %v2888_v61, %v7586_v3  ;;  %v3008_v42 = vmul.f32 %v9301_v33, %v7667_v58  ;;  %v7702_v1 = vadd.f32 %v2652_v31, %v2645_v32  ;;  %s541_s6 = scalar_lea.vmem [#allocation20], %s3767_s25 }
 0x2be   : > { %v7704_v47 = vadd.f32 %v2532_v9, %v2525_v48  ;;  %v3005_v51 = vadd.f32 %v3003_v18, %v2996_v43  ;;  %v9302_v3 = vstv %s7320_s8  ;;  %v3349_v17 = vstv %s7700_s18  ;;  %s7942_s8 = sld [smem:[#allocation18 + $0x6]]  ;;  %s3568_s0 = sshll.u32 %s541_s6, 4  ;;  %s8012_s0 = int_to_ptr.vmem [resolvable:$true] %s3568_s0 }
 0x2bf   : > { %v7707_v54 = vadd.f32 %v2772_v20, %v2765_v2  ;;  %v7709_v60 = vadd.f32 %v2892_v41, %v2885_v28  ;;  %v3012_v39 = vcombine.low %v3008_v42, %v7591_v8  ;;  %v3110_v14 = vmul.f32 %v9302_v3, %v7620_v26 }
 0x2c0   : > { %v2661_v23 = vrot.slane %v7702_v1, %v9303_v29  ;;  %v2665_v53 = vrot.slane %v7702_v1, %v9304_v45  ;;  %v2541_v46 = vrot.slane %v7704_v47, %v9303_v29  ;;  %v2545_v11 = vrot.slane %v7704_v47, %v9304_v45 }
 0x2c1   : > { %v2781_v12 = vrot.slane %v7707_v54, %v9303_v29  ;;  %v2785_v8 = vrot.slane %v7707_v54, %v9304_v45  ;;  %v2901_v0 = vrot.slane %v7709_v60, %v9303_v29  ;;  %v2905_v38 = vrot.slane %v7709_v60, %v9304_v45 }
 0x2c2   : > { %v2668_v24 = vsel %vm584_vm0, %v2661_v23, 0.0  ;;  %v2669_v34 = vsel %vm584_vm0, %v2665_v53, 0.0  ;;  %v2548_v57 = vsel %vm584_vm0, %v2541_v46, 0.0  ;;  %v2549_v21 = vsel %vm584_vm0, %v2545_v11, 0.0 }
 0x2c3   : > { %v2670_v13 = vadd.f32 %v2669_v34, %v2668_v24  ;;  %v2550_v36 = vadd.f32 %v2549_v21, %v2548_v57  ;;  %v2788_v49 = vsel %vm584_vm0, %v2781_v12, 0.0  ;;  %v2789_v32 = vsel %vm584_vm0, %v2785_v8, 0.0 }
 0x2c4   : > { %v2790_v62 = vadd.f32 %v2789_v32, %v2788_v49  ;;  %v2908_v10 = vsel %vm584_vm0, %v2901_v0, 0.0  ;;  %v2909_v48 = vsel %vm584_vm0, %v2905_v38, 0.0  ;;  %v2673_v6 = vmul.f32 %v7702_v1, %v7702_v1 }
 0x2c5   : > { %2671 = vadd.xlane.f32.xlu0 %v2670_v13  ;;  %2551 = vadd.xlane.f32.xlu1 %v2550_v36  ;;  %v2910_v5 = vadd.f32 %v2909_v48, %v2908_v10  ;;  %v7741_v2 = vadd.f32 %v3012_v39, %v3005_v51  ;;  %v2793_v37 = vmul.f32 %v7707_v54, %v7707_v54  ;;  %v9306_v31 = vstv %s7325_s26  ;;  %s7956_s26 = sld [smem:[#allocation17 + $0x7]] }
 0x2c6   : > { %v2678_v4 = vrot.slane %v2673_v6, %v9303_v29  ;;  %v2682_v16 = vrot.slane %v2673_v6, %v9304_v45  ;;  %v3114_v61 = vcombine.low %v3110_v14, %v7519_v52  ;;  %v3119_v9 = vmul.f32 %v9306_v31, %v7641_v25 }
 0x2c7   : > { %v3021_v43 = vrot.slane %v7741_v2, %v9303_v29  ;;  %v3025_v18 = vrot.slane %v7741_v2, %v9304_v45  ;;  %v2798_v20 = vrot.slane %v2793_v37, %v9303_v29  ;;  %v2802_v28 = vrot.slane %v2793_v37, %v9304_v45 }
 0x2c8   : > { %v2685_v41 = vsel %vm584_vm0, %v2678_v4, 0.0  ;;  %v2686_v33 = vsel %vm584_vm0, %v2682_v16, 0.0  ;;  %v3116_v52 = vadd.f32 %v3114_v61, %v3107_v56  ;;  %v3123_v42 = vcombine.low %v3119_v9, %v7558_v35 }
 0x2c9   : > { %2791 = vadd.xlane.f32.xlu0 %v2790_v62  ;;  %2911 = vadd.xlane.f32.xlu1 %v2910_v5  ;;  %v2687_v51 = vadd.f32 %v2686_v33, %v2685_v41  ;;  %v3028_v39 = vsel %vm584_vm0, %v3021_v43, 0.0  ;;  %v3029_v3 = vsel %vm584_vm0, %v3025_v18, 0.0  ;;  %v9307_v14 = vstv %s9305_s9  ;;  %s4488_s9 = scalar_lea.vmem %s8012_s0, 256 }
 0x2ca   : > { %v3129_v23 = vmul.f32 %v9307_v14, %v7526_v40  ;;  %v3030_v53 = vadd.f32 %v3029_v3, %v3028_v39  ;;  %v2805_v46 = vsel %vm584_vm0, %v2798_v20, 0.0  ;;  %v3125_v56 = vadd.f32 %v3123_v42, %v3116_v52  ;;  %p4489_p9 = scmp.ne.s32.totalorder %s8012_s0, %s4488_s9 }
 0x2cb   : > { %v9308_v35 = vmov %v9307_v14  ;;  %v2806_v12 = vsel %vm584_vm0, %v2802_v28, 0.0  ;;  %v2913_v8 = vmul.f32 %v7709_v60, %v7709_v60  ;;  %v3225_v0 = vcombine.low %v7618_v7, %v7491_v63 }
 0x2cc   : > { %v3128_v11 = vmul.f32 %v9308_v35, %v7667_v58  ;;  %v9309_v38 = vstv %s7379_s2  ;;  %v9310_v57 = vstv %s7381_s29  ;;  %v9311_v13 = vstv %s7388_s22  ;;  %s7929_s22 = sld [smem:[#allocation18 + $0x5]]  ;;  %s7962_s29 = sld [smem:[#allocation18 + $0x7]] }
 0x2cd   : > { %v3230_v24 = vmul.f32 %v9309_v38, %v7620_v26  ;;  %v3239_v21 = vmul.f32 %v9310_v57, %v7641_v25  ;;  %v3248_v36 = vmul.f32 %v9311_v13, %v7667_v58  ;;  %v9312_v49 = vmov %v9311_v13  ;;  %2688 = vadd.xlane.f32.xlu0 %v2687_v51  ;;  %s4142_s2 = sshll.u32 %s9317_s28, 8  ;;  %p4490_p3 = pnand %p4489_p9, %p9320_p10 }
 0x2ce   : > { %v3132_v34 = vcombine.low %v3128_v11, %v3129_v23  ;;  %v3249_v32 = vmul.f32 %v9312_v49, %v7526_v40  ;;  %3031 = vadd.xlane.f32.xlu1 %v3030_v53  ;;  %v2918_v62 = vrot.slane %v2913_v8, %v9303_v29  ;;  %v2922_v10 = vrot.slane %v2913_v8, %v9304_v45  ;;  %s8010_s18 = scalar_lea.hbm %s9319_s24, %s4142_s2 }
 0x2cf   : > { %v3227_v63 = vadd.f32 %v3225_v0, %v7450_v27  ;;  %v3358_v7 = vstv %s7746_s21  ;;  %v2807_v48 = vadd.f32 %v2806_v12, %v2805_v46  ;;  %v3234_v5 = vcombine.low %v3230_v24, %v7524_v19  ;;  %s3554_s21 = scalar_lea.sflag [#allocation4], %s9316_s4  ;;  %p4491_p6 = pneg %p4490_p3 }
 0x2d0   : > { %v7795_v6 = vadd.f32 %v3132_v34, %v3125_v56  ;;  %v3243_v37 = vcombine.low %v3239_v21, %v7575_v50  ;;  %v2925_v4 = vsel %vm584_vm0, %v2918_v62, 0.0  ;;  %v2926_v16 = vsel %vm584_vm0, %v2922_v10, 0.0 }
 0x2d1   : > { %v3252_v61 = vcombine.low %v3248_v36, %v3249_v32  ;;  %v3033_v27 = vmul.f32 %v7741_v2, %v7741_v2  ;;  %v3236_v43 = vadd.f32 %v3234_v5, %v3227_v63  ;;  %v2553_v19 = vmul.f32 %v7704_v47, %v7704_v47  ;;  %2808 = vadd.xlane.f32.xlu0 %v2807_v48 }
 0x2d2   : > { %v3141_v31 = vrot.slane %v7795_v6, %v9303_v29  ;;  %v3145_v9 = vrot.slane %v7795_v6, %v9304_v45  ;;  %v9314_v20 = vstv %s9313_s11  ;;  %v3351_v41 = vmul.f32 %v3349_v17, %v7439_v55 }
 0x2d3   : > { %v3038_v50 = vrot.slane %v3033_v27, %v9303_v29  ;;  %v3042_v18 = vrot.slane %v3033_v27, %v9304_v45  ;;  %v3342_v28 = vmul.f32 %v9314_v20, %v7421_v30  ;;  %v3245_v42 = vadd.f32 %v3243_v37, %v3236_v43 }
 0x2d4   : > { %v3148_v33 = vsel %vm584_vm0, %v3141_v31, 0.0  ;;  %v3149_v52 = vsel %vm584_vm0, %v3145_v9, 0.0  ;;  %v3153_v51 = vmul.f32 %v7795_v6, %v7795_v6  ;;  %v2927_v3 = vadd.f32 %v2926_v16, %v2925_v4 }
 0x2d5   : > { %v3150_v39 = vadd.f32 %v3149_v52, %v3148_v33  ;;  %v3045_v14 = vsel %vm584_vm0, %v3038_v50, 0.0  ;;  %v3046_v30 = vsel %vm584_vm0, %v3042_v18, 0.0  ;;  %v7823_v23 = vadd.f32 %v3252_v61, %v3245_v42 }
 0x2d6   : > { %v2558_v55 = vrot.slane %v2553_v19, %v9303_v29  ;;  %v3158_v53 = vrot.slane %v3153_v51, %v9303_v29  ;;  %v3360_v46 = vmul.f32 %v3358_v7, %v7466_v22  ;;  %2928 = vadd.xlane.f32.xlu0 %v2927_v3  ;;  %v2562_v56 = vrot.slane %v2553_v19, %v9304_v45 }
 0x2d7   : > { %3151 = vadd.xlane.f32.xlu1 %v3150_v39  ;;  %v3162_v35 = vrot.slane %v3153_v51, %v9304_v45  ;;  %v9315_v11 = vmov %v9314_v20  ;;  %v3367_v8 = vstv %s7793_s12  ;;  %v3261_v0 = vrot.slane %v7823_v23, %v9303_v29  ;;  %s4596_s12 = smov [#allocation20]  }
 0x2d8   : > { %v3341_v12 = vmul.f32 %v9315_v11, %v7560_v59  ;;  %v3265_v38 = vrot.slane %v7823_v23, %v9304_v45  ;;  %v3047_v24 = vadd.f32 %v3046_v30, %v3045_v14  ;;  %v3350_v22 = vmul.f32 %v3349_v17, %v7620_v26  ;;  %s4492_s11 = sshll.u32 %s4596_s12, 4  ;;  %s4493_s11 = int_to_ptr.vmem [resolvable:$false] %s4492_s11 }
 0x2d9   : > { %v3165_v34 = vsel %vm584_vm0, %v3158_v53, 0.0  ;;  %v3359_v21 = vmul.f32 %v3358_v7, %v7641_v25  ;;  %v3368_v13 = vmul.f32 %v3367_v8, %v7667_v58  ;;  %v3268_v59 = vsel %vm584_vm0, %v3261_v0, 0.0  ;;  %p4495_p0 = scmp.lt.s32.totalorder %s8012_s0, %s4493_s11 }
 0x2da   : > { %v3345_v57 = vcombine.low %v3341_v12, %v3342_v28  ;;  %v3269_v36 = vsel %vm584_vm0, %v3265_v38, 0.0  ;;  %v3166_v49 = vsel %vm584_vm0, %v3162_v35, 0.0  ;;  %v3354_v32 = vcombine.low %v3350_v22, %v3351_v41  ;;  %3048 = vadd.xlane.f32.xlu0 %v3047_v24 }
 0x2db   : > { %v3270_v62 = vadd.f32 %v3269_v36, %v3268_v59  ;;  %v3363_v63 = vcombine.low %v3359_v21, %v3360_v46  ;;  %v3369_v26 = vmul.f32 %v3367_v8, %v7526_v40  ;;  %v2565_v17 = vsel %vm584_vm0, %v2558_v55, 0.0 }
 0x2dc   : > { %v3347_v10 = vadd.f32 %v3345_v57, %v7464_v44  ;;  %v2566_v25 = vsel %vm584_vm0, %v2562_v56, 0.0  ;;  %v3273_v58 = vmul.f32 %v7823_v23, %v7823_v23  ;;  %v3167_v7 = vadd.f32 %v3166_v49, %v3165_v34 }
 0x2dd   : > { %3271 = vadd.xlane.f32.xlu1 %v3270_v62  ;;  %v3372_v5 = vcombine.low %v3368_v13, %v3369_v26  ;;  %v2567_v16 = vadd.f32 %v2566_v25, %v2565_v17 }
 0x2de   : > { %v3356_v48 = vadd.f32 %v3354_v32, %v3347_v10  ;;  %v3278_v37 = vrot.slane %v3273_v58, %v9303_v29  ;;  %v3282_v4 = vrot.slane %v3273_v58, %v9304_v45  ;;  %3168 = vadd.xlane.f32.xlu0 %v3167_v7 }
 0x2e0   : > { %v3365_v44 = vadd.f32 %v3363_v63, %v3356_v48  ;;  %v3285_v40 = vsel %vm584_vm0, %v3278_v37, 0.0  ;;  %v3286_v61 = vsel %vm584_vm0, %v3282_v4, 0.0 }
 0x2e1   : > { %2568 = vadd.xlane.f32.xlu1 %v2567_v16  ;;  %v3287_v31 = vadd.f32 %v3286_v61, %v3285_v40 }
 0x2e2   : > { %v7857_v27 = vadd.f32 %v3372_v5, %v3365_v44 }
 0x2e3   : > { %3288 = vadd.xlane.f32.xlu0 %v3287_v31 }
 0x2e4   : > { %v3381_v9 = vrot.slane %v7857_v27, %v9303_v29  ;;  %v3385_v43 = vrot.slane %v7857_v27, %v9304_v45  ;;  %v3393_v19 = vmul.f32 %v7857_v27, %v7857_v27 }
 0x2e6   : > { %v3388_v50 = vsel %vm584_vm0, %v3381_v9, 0.0  ;;  %v3389_v18 = vsel %vm584_vm0, %v3385_v43, 0.0  ;;  %v3398_v20 = vrot.slane %v3393_v19, %v9303_v29  ;;  %v3402_v28 = vrot.slane %v3393_v19, %v9304_v45 }
 0x2e7   : > { %v3390_v41 = vadd.f32 %v3389_v18, %v3388_v50  ;;  %v2697_v18 = vstv %s7885_s19  ;;  %s4494_s19 = scalar_lea.vmem %s4493_s11, 512 }
 0x2e8   : > { %v3405_v33 = vsel %vm584_vm0, %v3398_v20, 0.0  ;;  %v3406_v52 = vsel %vm584_vm0, %v3402_v28, 0.0  ;;  %p4496_p8 = scmp.lt.s32.totalorder %s4494_s19, %s4488_s9 }
 0x2e9   : > { %3391 = vadd.xlane.f32.xlu1 %v3390_v41  ;;  %v3407_v42 = vadd.f32 %v3406_v52, %v3405_v33 }
 0x2ea   : > { %p4497_p11 = por %p4496_p8, %p4495_p0 }
 0x2ec   : > { %p4498_p2 = pnand %p4497_p11, %p4491_p6 }
 0x2ed   : > { %3408 = vadd.xlane.f32.xlu1 %v3407_v42  ;;  %v2817_v42 = vstv %s7891_s23 }
 0x352   : > { %v2672_v51 = vpop.xlane.xlu0 %2671  ;;  %v2552_v39 = vpop.xlane.xlu1 %2551 }
 0x353   : > { %v7871_v30 = vmul.f32 0.00390625, %v2672_v51  ;;  %v7893_v7 = vmul.f32 0.00390625, %v2552_v39 }
 0x355   : > { %v2692_v53 = vmul.f32 %v7871_v30, %v7871_v30  ;;  %v2572_v31 = vmul.f32 %v7893_v7, %v7893_v7 }
 0x356   : > { %v2792_v3 = vpop.xlane.xlu0 %2791  ;;  %v2912_v14 = vpop.xlane.xlu1 %2911 }
 0x357   : > { %v7875_v46 = vmul.f32 0.00390625, %v2792_v3  ;;  %v7879_v0 = vmul.f32 0.00390625, %v2912_v14 }
 0x359   : > { %v2812_v8 = vmul.f32 %v7875_v46, %v7875_v46  ;;  %v2932_v59 = vmul.f32 %v7879_v0, %v7879_v0 }
 0x35a   : > { %v2689_v55 = vpop.xlane.xlu0 %2688 }
 0x35b   : > { %v2691_v56 = vmul.f32 0.00390625, %v2689_v55  ;;  %v3032_v35 = vpop.xlane.xlu1 %3031 }
 0x35c   : > { %v7881_v57 = vmul.f32 0.00390625, %v3032_v35 }
 0x35d   : > { %v2693_v11 = vsub.f32 %v2691_v56, %v2692_v53  ;;  %v2937_v53 = vstv %s7895_s13 }
 0x35e   : > { %v2809_v12 = vpop.xlane.xlu0 %2808  ;;  %v3052_v10 = vmul.f32 %v7881_v57, %v7881_v57 }
 0x35f   : > { %v2694_v38 = vmax.f32 %v2693_v11, 0.0  ;;  %v2811_v24 = vmul.f32 0.00390625, %v2809_v12 }
 0x361   : > { %v2695_v22 = vadd.f32 1e-05, %v2694_v38  ;;  %v2813_v34 = vsub.f32 %v2811_v24, %v2812_v8 }
 0x363   : > { %v2929_v13 = vpop.xlane.xlu0 %2928  ;;  %v2814_v36 = vmax.f32 %v2813_v34, 0.0  ;;  %4289 = vrsqrt.f32 %v2695_v22  ;;  %v2710_v34 = vstv %s7903_s27 }
 0x364   : > { %v3152_v21 = vpop.xlane.xlu1 %3151  ;;  %v2931_v49 = vmul.f32 0.00390625, %v2929_v13 }
 0x365   : > { %v2815_v32 = vadd.f32 1e-05, %v2814_v36  ;;  %v7889_v26 = vmul.f32 0.00390625, %v3152_v21 }
 0x366   : > { %v2933_v62 = vsub.f32 %v2931_v49, %v2932_v59  ;;  %v3057_v49 = vstv %s7911_s20 }
 0x367   : > { %v3049_v63 = vpop.xlane.xlu0 %3048  ;;  %4291 = vrsqrt.f32 %v2815_v32  ;;  %v3172_v16 = vmul.f32 %v7889_v26, %v7889_v26 }
 0x368   : > { %v2934_v17 = vmax.f32 %v2933_v62, 0.0  ;;  %v3051_v25 = vmul.f32 0.00390625, %v3049_v63 }
 0x36a   : > { %v3272_v58 = vpop.xlane.xlu1 %3271  ;;  %v2935_v48 = vadd.f32 1e-05, %v2934_v17  ;;  %v3053_v5 = vsub.f32 %v3051_v25, %v3052_v10  ;;  %v2950_v10 = vstv %s7913_s7 }
 0x36b   : > { %v7897_v37 = vmul.f32 0.00390625, %v3272_v58  ;;  %v3169_v4 = vpop.xlane.xlu0 %3168 }
 0x36c   : > { %4293 = vrsqrt.f32 %v2935_v48  ;;  %v3054_v44 = vmax.f32 %v3053_v5, 0.0  ;;  %v3171_v40 = vmul.f32 0.00390625, %v3169_v4  ;;  %v2577_v4 = vstv %s7918_s14 }
 0x36d   : > { %v4290_v50 = vpop.eup %4289  ;;  %v3292_v20 = vmul.f32 %v7897_v37, %v7897_v37 }
 0x36e   : > { %v2569_v61 = vpop.xlane.xlu1 %2568  ;;  %v3055_v9 = vadd.f32 1e-05, %v3054_v44  ;;  %v3173_v19 = vsub.f32 %v3171_v40, %v3172_v16  ;;  %v2698_v39 = vmul.f32 %v4290_v50, %v2697_v18 }
 0x36f   : > { %v2571_v43 = vmul.f32 0.00390625, %v2569_v61 }
 0x370   : > { %v3289_v28 = vpop.xlane.xlu0 %3288  ;;  %4295 = vrsqrt.f32 %v3055_v9  ;;  %v3174_v33 = vmax.f32 %v3173_v19, 0.0  ;;  %v2709_v38 = vmul.f32 %v2698_v39, %v7871_v30  ;;  %v2830_v30 = vstv %s7908_s5 }
 0x371   : > { %v2573_v41 = vsub.f32 %v2571_v43, %v2572_v31  ;;  %v3291_v52 = vmul.f32 0.00390625, %v3289_v28  ;;  %v4292_v51 = vpop.eup %4291  ;;  %v2706_v25 = vrot.slane %v2698_v39, %v9165_v15  ;;  %v3070_v43 = vstv %s7924_s1 }
 0x372   : > { %v3175_v14 = vadd.f32 1e-05, %v3174_v33  ;;  %v2818_v56 = vmul.f32 %v4292_v51, %v2817_v42  ;;  %v2711_v62 = vsub.f32 %v2710_v34, %v2709_v38  ;;  %v2590_v19 = vstv %s7926_s30 }
 0x373   : > { %v2574_v3 = vmax.f32 %v2573_v41, 0.0  ;;  %v3293_v55 = vsub.f32 %v3291_v52, %v3292_v20  ;;  %v2708_v20 = vmul.f32 %v2706_v25, %v7702_v1  ;;  %v3190_v41 = vstv %s7929_s22 }
 0x374   : > { %4297 = vrsqrt.f32 %v3175_v14  ;;  %v2829_v13 = vmul.f32 %v2818_v56, %v7875_v46  ;;  %v3177_v46 = vstv %s7916_s17  ;;  %v2719_v44 = vrot.slane %v2711_v62, %v9165_v15 }
 0x375   : > { %v2575_v35 = vadd.f32 1e-05, %v2574_v3  ;;  %v3294_v12 = vmax.f32 %v3293_v55, 0.0  ;;  %v2826_v40 = vrot.slane %v2818_v56, %v9165_v15  ;;  %v3297_v39 = vstv %s7934_s16 }
 0x376   : > { %v3392_v11 = vpop.xlane.xlu1 %3391  ;;  %v4294_v8 = vpop.eup %4293  ;;  %v2831_v58 = vsub.f32 %v2830_v30, %v2829_v13  ;;  %v2721_v3 = vadd.f32 %v2719_v44, %v2708_v20 }
 0x377   : > { %4299 = vrsqrt.f32 %v2575_v35  ;;  %v7921_v24 = vmul.f32 0.00390625, %v3392_v11  ;;  %v3295_v22 = vadd.f32 1e-05, %v3294_v12  ;;  %v2938_v21 = vmul.f32 %v4294_v8, %v2937_v53 }
 0x378   : > { %v2839_v28 = vrot.slane %v2831_v58, %v9165_v15  ;;  %v2828_v14 = vmul.f32 %v2826_v40, %v7707_v54  ;;  %v2722_v13 = vmax.f32 %v2721_v3, 0.0 }
 0x379   : > { %4301 = vrsqrt.f32 %v3295_v22  ;;  %v2949_v36 = vmul.f32 %v2938_v21, %v7879_v0  ;;  %v3412_v63 = vmul.f32 %v7921_v24, %v7921_v24  ;;  %v2946_v9 = vrot.slane %v2938_v21, %v9165_v15 }
 0x37a   : > { %v3409_v59 = vpop.xlane.xlu1 %3408  ;;  %v4296_v32 = vpop.eup %4295  ;;  %v3310_v22 = vstv %s7942_s8 }
 0x37b   : > { %v3411_v17 = vmul.f32 0.00390625, %v3409_v59  ;;  %v3058_v48 = vmul.f32 %v4296_v32, %v3057_v49  ;;  %v2951_v0 = vsub.f32 %v2950_v10, %v2949_v36  ;;  %v2948_v1 = vmul.f32 %v2946_v9, %v7709_v60 }
 0x37d   : > { %v3413_v5 = vsub.f32 %v3411_v17, %v3412_v63  ;;  %v3069_v61 = vmul.f32 %v3058_v48, %v7881_v57  ;;  %v2959_v52 = vrot.slane %v2951_v0, %v9165_v15  ;;  %v3066_v11 = vrot.slane %v3058_v48, %v9165_v15 }
 0x37e   : > { %v4298_v16 = vpop.eup %4297  ;;  %v3417_v17 = vstv %s7956_s26  ;;  %v3458_v0 = vrot.slane %v2722_v13, %v9303_v29 }
 0x37f   : > { %v3414_v31 = vmax.f32 %v3413_v5, 0.0  ;;  %v3178_v50 = vmul.f32 %v4298_v16, %v3177_v46  ;;  %v3071_v55 = vsub.f32 %v3070_v43, %v3069_v61  ;;  %v2961_v38 = vadd.f32 %v2959_v52, %v2948_v1 }
 0x380   : > { %v3068_v49 = vmul.f32 %v3066_v11, %v7741_v2  ;;  %v3430_v5 = vstv %s7962_s29  ;;  %v3462_v2 = vrot.slane %v2722_v13, %v9304_v45 }
 0x381   : > { %v4300_v18 = vpop.eup %4299  ;;  %v3415_v33 = vadd.f32 1e-05, %v3414_v31  ;;  %v3189_v51 = vmul.f32 %v3178_v50, %v7889_v26  ;;  %v2841_v26 = vadd.f32 %v2839_v28, %v2828_v14  ;;  %v3186_v12 = vrot.slane %v3178_v50, %v9165_v15 }
 0x382   : > { %v2578_v42 = vmul.f32 %v4300_v18, %v2577_v4  ;;  %v3079_v34 = vrot.slane %v3071_v55, %v9165_v15  ;;  %v2962_v10 = vmax.f32 %v2961_v38, 0.0 }
 0x383   : > { %v4302_v57 = vpop.eup %4301  ;;  %4303 = vrsqrt.f32 %v3415_v33  ;;  %v3191_v35 = vsub.f32 %v3190_v41, %v3189_v51  ;;  %v2842_v36 = vmax.f32 %v2841_v26, 0.0  ;;  %v3188_v32 = vmul.f32 %v3186_v12, %v7795_v6 }
 0x384   : > { %v2586_v53 = vrot.slane %v2578_v42, %v9165_v15  ;;  %v2589_v56 = vmul.f32 %v2578_v42, %v7893_v7  ;;  %v3298_v8 = vmul.f32 %v4302_v57, %v3297_v39  ;;  %v3081_v46 = vadd.f32 %v3079_v34, %v3068_v49 }
 0x385   : > { %v3199_v7 = vrot.slane %v3191_v35, %v9165_v15  ;;  %v3469_v4 = vrot.slane %v2842_v36, %v9303_v29  ;;  %v3473_v40 = vrot.slane %v2842_v36, %v9304_v45  ;;  %v3480_v9 = vrot.slane %v2962_v10, %v9303_v29 }
 0x386   : > { %v2591_v54 = vsub.f32 %v2590_v19, %v2589_v56  ;;  %v3306_v60 = vrot.slane %v3298_v8, %v9165_v15  ;;  %v3309_v21 = vmul.f32 %v3298_v8, %v7897_v37  ;;  %v2588_v59 = vmul.f32 %v2586_v53, %v7704_v47 }
 0x387   : > { %v3201_v25 = vadd.f32 %v3199_v7, %v3188_v32  ;;  %v3082_v61 = vmax.f32 %v3081_v46, 0.0  ;;  %v3484_v43 = vrot.slane %v2962_v10, %v9304_v45 }
 0x388   : > { %v2599_v30 = vrot.slane %v2591_v54, %v9165_v15  ;;  %v3311_v62 = vsub.f32 %v3310_v22, %v3309_v21  ;;  %v3308_v37 = vmul.f32 %v3306_v60, %v7823_v23 }
 0x389   : > { %v3202_v31 = vmax.f32 %v3201_v25, 0.0  ;;  %v3491_v39 = vrot.slane %v3082_v61, %v9303_v29 }
 0x38a   : > { %v2601_v63 = vadd.f32 %v2599_v30, %v2588_v59  ;;  %v3319_v58 = vrot.slane %v3311_v62, %v9165_v15 }
 0x38b   : > { %v3502_v14 = vrot.slane %v3202_v31, %v9303_v29  ;;  %v3506_v55 = vrot.slane %v3202_v31, %v9304_v45 }
 0x38c   : > { %v2602_v48 = vmax.f32 %v2601_v63, 0.0  ;;  %v3321_v6 = vadd.f32 %v3319_v58, %v3308_v37 }
 0x38d   : > { %v4304_v47 = vpop.eup %4303 }
 0x38e   : > { %v3447_v16 = vrot.slane %v2602_v48, %v9303_v29  ;;  %v3451_v44 = vrot.slane %v2602_v48, %v9304_v45  ;;  %v3418_v23 = vmul.f32 %v4304_v47, %v3417_v17  ;;  %v3322_v28 = vmax.f32 %v3321_v6, 0.0 }
 0x390   : > { %v3426_v19 = vrot.slane %v3418_v23, %v9165_v15  ;;  %v3429_v50 = vmul.f32 %v3418_v23, %v7921_v24  ;;  %v3531_v18 = vsel %vm584_vm0, %v3447_v16, %v3458_v0  ;;  %v3532_v20 = vsel %vm584_vm0, %v3451_v44, %v3462_v2 }
 0x391   : > { %v3534_v41 = vsel %vm3533_vm6, %v3531_v18, %v3469_v4  ;;  %v3535_v33 = vsel %vm3533_vm6, %v3532_v20, %v3473_v40  ;;  %v3495_v24 = vrot.slane %v3082_v61, %v9304_v45  ;;  %v3513_v1 = vrot.slane %v3322_v28, %v9303_v29 }
 0x392   : > { %v3431_v52 = vsub.f32 %v3430_v5, %v3429_v50  ;;  %v3537_v42 = vsel %vm3536_vm7, %v3534_v41, %v3480_v9  ;;  %v3538_v51 = vsel %vm3536_vm7, %v3535_v33, %v3484_v43  ;;  %v3428_v57 = vmul.f32 %v3426_v19, %v7857_v27 }
 0x393   : > { %v3517_v53 = vrot.slane %v3322_v28, %v9304_v45  ;;  %v3540_v56 = vsel %vm3539_vm8, %v3537_v42, %v3491_v39  ;;  %v3541_v35 = vsel %vm3539_vm8, %v3538_v51, %v3495_v24 }
 0x394   : > { %v3439_v3 = vrot.slane %v3431_v52, %v9165_v15  ;;  %v3543_v12 = vsel %vm3542_vm9, %v3540_v56, %v3502_v14  ;;  %v3544_v8 = vsel %vm3542_vm9, %v3541_v35, %v3506_v55 }
 0x395   : > { %v3546_v15 = vsel %vm3545_vm10, %v3543_v12, %v3513_v1  ;;  %v3547_v27 = vsel %vm3545_vm10, %v3544_v8, %v3517_v53 }
 0x396   : > { %v3441_v26 = vadd.f32 %v3439_v3, %v3428_v57 }
 0x398   : > { %v3442_v11 = vmax.f32 %v3441_v26, 0.0 }
 0x39a   : > { %v3524_v38 = vrot.slane %v3442_v11, %v9303_v29  ;;  %v3528_v54 = vrot.slane %v3442_v11, %v9304_v45 }
 0x39c   : > { %v3549_v22 = vsel %vm3548_vm11, %v3546_v15, %v3524_v38  ;;  %v3550_v34 = vsel %vm3548_vm11, %v3547_v27, %v3528_v54 }
 0x39d   : > { %3551 = vst [vmem:[%s541_s6] sm:$0xff] %v3549_v22  ;;  %3552 = vst [vmem:[%s541_s6 + $0x8] sm:$0xff] %v3550_v34 }
 0x39e   : > { %4501 = shalt.err (!%p4498_p2)
}
 0x39f   : > { %s4502_s23 = scalar_lea.hbm %s8010_s18, 256  ;;  %s4506_s5 = scalar_lea.hbm %s9319_s24, 512 }
 0x3a0   : > { %p4503_p1 = scmp.ne.s32.totalorder %s8010_s18, %s4502_s23  ;;  %p4507_p7 = scmp.lt.u32.totalorder %s8010_s18, %s9319_s24 }
 0x3a1   : > { %p4508_p12 = scmp.lt.u32.totalorder %s4506_s5, %s4502_s23  ;;  %p4510_p9 = scmp.lt.u32.totalorder %s4502_s23, %s8010_s18 }
 0x3a2   : > { %p4504_p4 = pnand %p4503_p1, %p9320_p10 }
 0x3a3   : > { %p4509_p13 = por %p4508_p12, %p4507_p7 }
 0x3a4   : > { %p4505_p5 = pneg %p4504_p4 }
 0x3a5   : > { %p4511_p3 = por %p4510_p9, %p4509_p13 }
 0x3a7   : > { %p4512_p6 = pnand %p4511_p3, %p4505_p5 }
 0x3a9   : > { %4515 = shalt.err (!%p4512_p6)
}
 0x3aa   : > { %4179 = dma.vmem_to_hbm [thread:$0]  (%p9320_p10), %s8012_s0, 256, %s8010_s18, %s3554_s21  }
 0x3ab PF: > { %s9321_s17 = sld [smem:[#allocation29_spill]]  ;;  %s9322_s14 = sld [smem:[#allocation37_spill]] }
 0x3ac   : > { %s9323_s1 = sld [smem:[#allocation32_spill]] }
 0x3b1   : > { %s3580_s30 = sand.u32 1, %s9321_s17   ;;  %p9324_p0 = scmp.ne.s32.totalorder %s9322_s14, 0 }
 0x3b2   : > { %p9325_p8 = scmp.ge.s32.totalorder %s9323_s1, 2  ;;  %s3581_s22 = scalar_lea.sflag [#allocation4], %s3580_s30 }
 0x3b4   : > { %p4214_p11 = pnand %p9325_p8, %p9324_p0 }
 0x3b6   : > { %4561 = dma.done.wait (!%p4214_p11), %s3581_s22, 256  }
 0x3b7   : > { %4563 = vsyncadd (!%p4214_p11), %s3581_s22, 4294967040  ;;  %s9326_s20 = sld [smem:[#allocation34_spill]]  ;;  %s9327_s17 = sld [smem:[#allocation30_spill]] }
 0x3b8   : > { %s9328_s18 = sld [smem:[#allocation31_spill]]  ;;  %s9329_s19 = sld [smem:[#allocation35_spill]] }
 0x3bd   : > { %p32_p2 = scmp.ge.s32.totalorder %s9326_s20, 4  }
 0x3bf   :  { %34 = sbr.rel (!%p32_p2) target bundleno = 25 (0x19), region = 155 }
 0x3c6   :  { %3586 = vsyncpa [#allocation3], 1 }
 0x3c7   :  { %3588 = vsyncpa [#allocation3 + $0x1], 1 }
 0x3c8   :  { %3589 = vsyncpa [#allocation7], 1 }
 0x3c9   :  { %3591 = vsyncpa [#allocation7 + $0x1], 1 }
 0x3ca   :  { %3592 = vsyncpa [#allocation4], 1 }
 0x3cb   :  { %3594 = vsyncpa [#allocation4 + $0x1], 1 }
 0x3cc   :  { %3595 = vsyncpa [#allocation5], 1 }
 0x3cd   :  { %3597 = vsyncpa [#allocation5 + $0x1], 1 }
 0x3ce   :  { %3598 = vsyncpa [#allocation10], 1 }
 0x3cf   :  { %3599 = vsyncpa [#allocation13], 1 }
 0x3d0   :  { %3600 = vsyncpa [#allocation16], 1 }
 0x3d1   :  { %3601 = vsyncpa [#allocation19], 1 }

</bundles_post_ra>
